<compile_context>
chip_gen: v7x
topology: tpu7x:2x2x1
jax: 0.10.0
libtpu: 0.0.40
codegen_flags: <defaults>
</compile_context>

<pallas_src>
import jax
import jax.numpy as jnp
from jax import lax
from jax.experimental import pallas as pl
from jax.experimental.pallas import tpu as pltpu


# ------------------------------ helpers ------------------------------------

def _lstm_gates(g, H):
    """Split pre-activations (B, 4H), gate column order [i, f, o, g].

    One sigmoid over the contiguous [i|f|o] block, one tanh over g.
    """
    s = jax.nn.sigmoid(g[:, 0:3 * H])
    i = s[:, 0 * H:1 * H]
    f = s[:, 1 * H:2 * H]
    o = s[:, 2 * H:3 * H]
    c_bar = jnp.tanh(g[:, 3 * H:4 * H])
    return i, f, c_bar, o


# ------------------------------ Pallas kernel -------------------------------

def autoencoder_kernel(x_ref, len_ref,
                       ewih1_ref, ewhh1_ref, eb1_ref,
                       ewih2_ref, ewhh2_ref, eb2_ref,
                       dwih1_ref, dwhh1_ref, db1_ref,
                       dwih2_ref, dwhh2_ref, db2_ref,
                       dwout_ref, dbout_ref,
                       latent_ref, recon_ref,
                       xg_ref, dh2_all_ref):
    TB, _ = x_ref.shape                      # x is pre-flattened (T*B, F)
    B, E = latent_ref.shape
    T = TB // B
    H1, H2 = 2 * E, E                        # encoder hidden sizes
    D1, D2 = E, 2 * E                        # decoder hidden sizes

    lens = len_ref[...]                      # (B, 1) int32

    # ----------------------------- Encoder ---------------------------------
    # Input projection for ALL timesteps in one matmul (off the recurrent
    # chain), staged into VMEM scratch so it is never live in vregs.
    xg_ref[...] = (jnp.dot(x_ref[...], ewih1_ref[...],
                           preferred_element_type=jnp.float32)
                   + eb1_ref[...])

    h1 = jnp.zeros((B, H1), jnp.float32)
    c1 = jnp.zeros((B, H1), jnp.float32)
    h2 = jnp.zeros((B, H2), jnp.float32)
    c2 = jnp.zeros((B, H2), jnp.float32)

    for t in range(T):                       # fully unrolled, static t (T small)
        mask = lens > t                      # (B, 1) valid-step mask
        m1 = jnp.broadcast_to(mask, (B, H1))
        m2 = jnp.broadcast_to(mask, (B, H2))

        # layer 1 (rnn1): only the hidden matmul is on the chain; the input
        # projection is streamed from scratch (B x 4H1 row block, static slice).
        g1 = xg_ref[pl.ds(t * B, B), :] + jnp.dot(
            h1, ewhh1_ref[...], preferred_element_type=jnp.float32)
        i1, f1, gb1, o1 = _lstm_gates(g1, H1)
        c1n = f1 * c1 + i1 * gb1
        h1n = o1 * jnp.tanh(c1n)
        c1 = jnp.where(m1, c1n, c1)
        h1 = jnp.where(m1, h1n, h1)

        # layer 2 (rnn2): two separate dots (no lane-concat on the chain);
        # the h2 @ Whh2 term only depends on the previous step and overlaps.
        g2 = (jnp.dot(h1, ewih2_ref[...], preferred_element_type=jnp.float32)
              + jnp.dot(h2, ewhh2_ref[...], preferred_element_type=jnp.float32)
              + eb2_ref[...])
        i2, f2, gb2, o2 = _lstm_gates(g2, H2)
        c2n = f2 * c2 + i2 * gb2
        h2n = o2 * jnp.tanh(c2n)
        c2 = jnp.where(m2, c2n, c2)
        h2 = jnp.where(m2, h2n, h2)

    z = h2                                   # hidden_n[-1] of encoder rnn2
    latent_ref[...] = z

    # ----------------------------- Decoder ---------------------------------
    # TODO(synk): a zero-length sequence yields the zero latent here instead of
    # raising like torch pack_padded_sequence would.
    # Decoder rnn1 input is the constant latent z: its input projection is
    # loop-invariant -> compute once (tiny: (B, 4*D1) = one vreg live).
    pre1 = (jnp.dot(z, dwih1_ref[...], preferred_element_type=jnp.float32)
            + db1_ref[...])

    dh1 = jnp.zeros((B, D1), jnp.float32)
    dc1 = jnp.zeros((B, D1), jnp.float32)
    dh2 = jnp.zeros((B, D2), jnp.float32)
    dc2 = jnp.zeros((B, D2), jnp.float32)

    for t in range(T):                       # no masking in decoder
        g1 = pre1 + jnp.dot(dh1, dwhh1_ref[...],
                            preferred_element_type=jnp.float32)
        i1, f1, gb1, o1 = _lstm_gates(g1, D1)
        dc1 = f1 * dc1 + i1 * gb1
        dh1 = o1 * jnp.tanh(dc1)

        g2 = (jnp.dot(dh1, dwih2_ref[...], preferred_element_type=jnp.float32)
              + jnp.dot(dh2, dwhh2_ref[...], preferred_element_type=jnp.float32)
              + db2_ref[...])
        i2, f2, gb2, o2 = _lstm_gates(g2, D2)
        dc2 = f2 * dc2 + i2 * gb2
        dh2 = o2 * jnp.tanh(dc2)

        # stage hidden state; output projection is batched after the loop
        dh2_all_ref[pl.ds(t * B, B), :] = dh2

    # One batched output projection + one store for all timesteps.
    recon_ref[...] = (jnp.dot(dh2_all_ref[...], dwout_ref[...],
                              preferred_element_type=jnp.float32)
                      + dbout_ref[...])


# ------------------------------ wrapper --------------------------------------

def autoencoder_forward(x_btf, lengths, packed):
    """x_btf: (B, T, F) f32; lengths: (B,) int -> (latent (B,E), recon (B,T,F))."""
    B, T, F = x_btf.shape
    E = packed["dwih1"].shape[0]          # decoder rnn1 input dim = embedding dim
    n_features = packed["dwout"].shape[1]
    H1 = 2 * E                            # encoder rnn1 hidden
    D2 = 2 * E                            # decoder rnn2 hidden

    # time-major + flattened (T*B, F) so the hoisted input projection and the
    # batched output projection need no in-kernel reshapes.
    x_flat = jnp.transpose(x_btf, (1, 0, 2)).reshape(T * B, F)
    len_col = lengths.astype(jnp.int32).reshape(B, 1)

    vmem = lambda: pl.BlockSpec(memory_space=pltpu.MemorySpace.VMEM)

    latent, recon_flat = pl.pallas_call(
        autoencoder_kernel,
        out_shape=(jax.ShapeDtypeStruct((B, E), jnp.float32),
                   jax.ShapeDtypeStruct((T * B, n_features), jnp.float32)),
        in_specs=[vmem() for _ in range(16)],
        out_specs=(vmem(), vmem()),
        scratch_shapes=[pltpu.VMEM((T * B, 4 * H1), jnp.float32),   # xg
                        pltpu.VMEM((T * B, D2), jnp.float32)],      # dh2 stage
    )(x_flat, len_col,
      packed["ewih1"], packed["ewhh1"], packed["eb1"],
      packed["ewih2"], packed["ewhh2"], packed["eb2"],
      packed["dwih1"], packed["dwhh1"], packed["db1"],
      packed["dwih2"], packed["dwhh2"], packed["db2"],
      packed["dwout"], packed["dbout"])

    recon = recon_flat.reshape(T, B, n_features).transpose(1, 0, 2)
    return latent, recon                                   # batch-first output


# ------------------------ parameter init & packing ---------------------------

def init_params(key, n_features, embedding_dim):
    """Raw PyTorch-shaped LSTM / Linear parameters (gate order i, f, g, o)."""
    E = embedding_dim
    H1, H2 = 2 * E, E
    D1, D2 = E, 2 * E
    keys = jax.random.split(key, 18)
    it = iter(range(18))

    def u(shape, hidden):
        bound = 1.0 / float(hidden) ** 0.5
        return jax.random.uniform(keys[next(it)], shape, jnp.float32,
                                  -bound, bound)

    return dict(
        # encoder rnn1: LSTM(n_features -> 2E)
        e_wih1=u((4 * H1, n_features), H1), e_whh1=u((4 * H1, H1), H1),
        e_bih1=u((4 * H1,), H1), e_bhh1=u((4 * H1,), H1),
        # encoder rnn2: LSTM(2E -> E)
        e_wih2=u((4 * H2, H1), H2), e_whh2=u((4 * H2, H2), H2),
        e_bih2=u((4 * H2,), H2), e_bhh2=u((4 * H2,), H2),
        # decoder rnn1: LSTM(E -> E)
        d_wih1=u((4 * D1, E), D1), d_whh1=u((4 * D1, D1), D1),
        d_bih1=u((4 * D1,), D1), d_bhh1=u((4 * D1,), D1),
        # decoder rnn2: LSTM(E -> 2E)
        d_wih2=u((4 * D2, D1), D2), d_whh2=u((4 * D2, D2), D2),
        d_bih2=u((4 * D2,), D2), d_bhh2=u((4 * D2,), D2),
        # decoder output layer: Linear(2E -> n_features)
        d_wout=u((n_features, D2), D2), d_bout=u((n_features,), D2),
    )


def _prep_lstm(w_ih, w_hh, b_ih, b_hh, H):
    """Transpose to right-multiply layout and reorder gate columns
    from PyTorch [i, f, g, o] to the kernel's [i, f, o, g] (unpadded 4H)."""
    def reorder(w_t):            # w_t: (R, 4H)
        return jnp.concatenate([w_t[:, 0 * H:1 * H], w_t[:, 1 * H:2 * H],
                                w_t[:, 3 * H:4 * H], w_t[:, 2 * H:3 * H]],
                               axis=1)
    wih = reorder(w_ih.T)                                  # (in, 4H)
    whh = reorder(w_hh.T)                                  # (H, 4H)
    b = reorder((b_ih + b_hh).reshape(1, 4 * H))           # (1, 4H)
    return wih, whh, b


def pack_params(raw, embedding_dim):
    E = embedding_dim
    H1, H2 = 2 * E, E
    D1, D2 = E, 2 * E
    ewih1, ewhh1, eb1 = _prep_lstm(raw["e_wih1"], raw["e_whh1"],
                                   raw["e_bih1"], raw["e_bhh1"], H1)
    ewih2, ewhh2, eb2 = _prep_lstm(raw["e_wih2"], raw["e_whh2"],
                                   raw["e_bih2"], raw["e_bhh2"], H2)
    dwih1, dwhh1, db1 = _prep_lstm(raw["d_wih1"], raw["d_whh1"],
                                   raw["d_bih1"], raw["d_bhh1"], D1)
    dwih2, dwhh2, db2 = _prep_lstm(raw["d_wih2"], raw["d_whh2"],
                                   raw["d_bih2"], raw["d_bhh2"], D2)
    return dict(ewih1=ewih1, ewhh1=ewhh1, eb1=eb1,
                ewih2=ewih2, ewhh2=ewhh2, eb2=eb2,
                dwih1=dwih1, dwhh1=dwhh1, db1=db1,
                dwih2=dwih2, dwhh2=dwhh2, db2=db2,
                dwout=raw["d_wout"].T, dbout=raw["d_bout"].reshape(1, -1))


# ------------------------------ JAX reference --------------------------------

def _mm(a, b):
    return jnp.dot(a, b, precision=lax.Precision.HIGHEST)


def _lstm_cell_ref(x, h, c, w_ih, w_hh, b_ih, b_hh):
    g = _mm(x, w_ih.T) + _mm(h, w_hh.T) + b_ih + b_hh
    H = h.shape[-1]
    i = jax.nn.sigmoid(g[:, 0 * H:1 * H])
    f = jax.nn.sigmoid(g[:, 1 * H:2 * H])
    gg = jnp.tanh(g[:, 2 * H:3 * H])
    o = jax.nn.sigmoid(g[:, 3 * H:4 * H])
    c_new = f * c + i * gg
    h_new = o * jnp.tanh(c_new)
    return h_new, c_new


def autoencoder_ref(x_btf, lengths, raw, *, embedding_dim):
    B, T, _ = x_btf.shape
    E = embedding_dim
    H1, H2 = 2 * E, E
    D1, D2 = E, 2 * E

    h1 = jnp.zeros((B, H1), jnp.float32); c1 = jnp.zeros((B, H1), jnp.float32)
    h2 = jnp.zeros((B, H2), jnp.float32); c2 = jnp.zeros((B, H2), jnp.float32)
    for t in range(T):
        m = lengths[:, None] > t
        h1n, c1n = _lstm_cell_ref(x_btf[:, t, :], h1, c1, raw["e_wih1"],
                                  raw["e_whh1"], raw["e_bih1"], raw["e_bhh1"])
        h1 = jnp.where(m, h1n, h1); c1 = jnp.where(m, c1n, c1)
        h2n, c2n = _lstm_cell_ref(h1, h2, c2, raw["e_wih2"],
                                  raw["e_whh2"], raw["e_bih2"], raw["e_bhh2"])
        h2 = jnp.where(m, h2n, h2); c2 = jnp.where(m, c2n, c2)
    z = h2

    dh1 = jnp.zeros((B, D1), jnp.float32); dc1 = jnp.zeros((B, D1), jnp.float32)
    dh2 = jnp.zeros((B, D2), jnp.float32); dc2 = jnp.zeros((B, D2), jnp.float32)
    ys = []
    for t in range(T):
        dh1, dc1 = _lstm_cell_ref(z, dh1, dc1, raw["d_wih1"], raw["d_whh1"],
                                  raw["d_bih1"], raw["d_bhh1"])
        dh2, dc2 = _lstm_cell_ref(dh1, dh2, dc2, raw["d_wih2"], raw["d_whh2"],
                                  raw["d_bih2"], raw["d_bhh2"])
        ys.append(_mm(dh2, raw["d_wout"].T) + raw["d_bout"])
    return z, jnp.stack(ys, axis=1)           # (B, E), (B, T, n_features)


# ----------------------------------- main ------------------------------------

if __name__ == "__main__":
    B, T = 8, 12              # small demo shapes; B can be raised toward the
    n_features = 2            # MXU row width (128/256) at ~no extra step cost
    embedding_dim = 32

    key = jax.random.PRNGKey(0)
    k_x, k_p = jax.random.split(key)

    x = jax.random.normal(k_x, (B, T, n_features), jnp.float32)
    lengths = jnp.array([12, 7, 3, 12, 9, 5, 1, 10], dtype=jnp.int32)

    raw = init_params(k_p, n_features, embedding_dim)
    packed = pack_params(raw, embedding_dim)

    latent, recon = autoencoder_forward(x, lengths, packed)
    latent, recon = jax.block_until_ready((latent, recon))

    lat_ref, rec_ref = autoencoder_ref(x, lengths, raw,
                                       embedding_dim=embedding_dim)
    assert latent.shape == (B, embedding_dim)
    assert recon.shape == (B, T, n_features)
    assert jnp.allclose(latent, lat_ref, atol=2e-4, rtol=2e-4), \
        "latent mismatch vs JAX reference"
    assert jnp.allclose(recon, rec_ref, atol=2e-4, rtol=2e-4), \
        "reconstruction mismatch vs JAX reference"

    print("KERNEL_OK")
</pallas_src>

<mosaic_0001>
module attributes {stable_mosaic.version = 11 : i64} {
  func.func @autoencoder_kernel(%arg0: memref<96x2xf32, #tpu.memory_space<vmem>>, %arg1: memref<8x1xi32, #tpu.memory_space<vmem>>, %arg2: memref<2x256xf32, #tpu.memory_space<vmem>>, %arg3: memref<64x256xf32, #tpu.memory_space<vmem>>, %arg4: memref<1x256xf32, #tpu.memory_space<vmem>>, %arg5: memref<64x128xf32, #tpu.memory_space<vmem>>, %arg6: memref<32x128xf32, #tpu.memory_space<vmem>>, %arg7: memref<1x128xf32, #tpu.memory_space<vmem>>, %arg8: memref<32x128xf32, #tpu.memory_space<vmem>>, %arg9: memref<32x128xf32, #tpu.memory_space<vmem>>, %arg10: memref<1x128xf32, #tpu.memory_space<vmem>>, %arg11: memref<32x256xf32, #tpu.memory_space<vmem>>, %arg12: memref<64x256xf32, #tpu.memory_space<vmem>>, %arg13: memref<1x256xf32, #tpu.memory_space<vmem>>, %arg14: memref<64x2xf32, #tpu.memory_space<vmem>>, %arg15: memref<1x2xf32, #tpu.memory_space<vmem>>, %arg16: memref<8x32xf32, #tpu.memory_space<vmem>>, %arg17: memref<96x2xf32, #tpu.memory_space<vmem>>, %arg18: memref<96x256xf32, #tpu.memory_space<vmem>>, %arg19: memref<96x64xf32, #tpu.memory_space<vmem>>) attributes {dimension_semantics = [], scalar_prefetch = 0 : i64, scratch_operands = 2 : i64, tpu.core_type = #tpu.core_type<tc>} {
    %c0 = arith.constant 0 : index
    %c0_0 = arith.constant 0 : index
    %0 = vector.load %arg1[%c0, %c0_0] : memref<8x1xi32, #tpu.memory_space<vmem>>, vector<8x1xi32>
    %c0_1 = arith.constant 0 : index
    %c0_2 = arith.constant 0 : index
    %1 = vector.load %arg0[%c0_1, %c0_2] : memref<96x2xf32, #tpu.memory_space<vmem>>, vector<96x2xf32>
    %c0_3 = arith.constant 0 : index
    %c0_4 = arith.constant 0 : index
    %2 = vector.load %arg2[%c0_3, %c0_4] : memref<2x256xf32, #tpu.memory_space<vmem>>, vector<2x256xf32>
    %cst = arith.constant dense<0.000000e+00> : vector<96x256xf32>
    %3 = tpu.matmul %1, %2, %cst {dimension_numbers = #tpu.dot_dimension_numbers<[1], [0], [0], [1], [0, 0, 1, 1], [], []>} : vector<96x2xf32>, vector<2x256xf32>, vector<96x256xf32> -> vector<96x256xf32>
    %c0_5 = arith.constant 0 : index
    %c0_6 = arith.constant 0 : index
    %4 = vector.load %arg4[%c0_5, %c0_6] : memref<1x256xf32, #tpu.memory_space<vmem>>, vector<1x256xf32>
    %5 = vector.broadcast %4 : vector<1x256xf32> to vector<96x256xf32>
    %6 = arith.addf %3, %5 : vector<96x256xf32>
    %c0_7 = arith.constant 0 : index
    %c0_8 = arith.constant 0 : index
    %7 = vector.load %arg18[%c0_7, %c0_8] : memref<96x256xf32, #tpu.memory_space<vmem>>, vector<96x256xf32>
    tpu.vector_store %arg18[%c0_7, %c0_8], %6 {strides = array<i32>} : memref<96x256xf32, #tpu.memory_space<vmem>>, vector<96x256xf32>,
    %cst_9 = arith.constant 0.000000e+00 : f32
    %8 = vector.broadcast %cst_9 : f32 to vector<8x64xf32>
    %cst_10 = arith.constant 0.000000e+00 : f32
    %9 = vector.broadcast %cst_10 : f32 to vector<8x64xf32>
    %cst_11 = arith.constant 0.000000e+00 : f32
    %10 = vector.broadcast %cst_11 : f32 to vector<8x32xf32>
    %cst_12 = arith.constant 0.000000e+00 : f32
    %11 = vector.broadcast %cst_12 : f32 to vector<8x32xf32>
    %c0_i32 = arith.constant 0 : i32
    %12 = vector.broadcast %c0_i32 : i32 to vector<8x1xi32>
    %13 = arith.cmpi sgt, %0, %12 : vector<8x1xi32>
    %14 = vector.shape_cast %13 : vector<8x1xi1> to vector<8x1xi1>
    %15 = vector.broadcast %14 : vector<8x1xi1> to vector<8x64xi1>
    %16 = vector.shape_cast %13 : vector<8x1xi1> to vector<8x1xi1>
    %17 = vector.broadcast %16 : vector<8x1xi1> to vector<8x32xi1>
    %c0_13 = arith.constant 0 : index
    %c0_14 = arith.constant 0 : index
    %18 = vector.load %arg18[%c0_13, %c0_14] : memref<96x256xf32, #tpu.memory_space<vmem>>, vector<8x256xf32>
    %c0_15 = arith.constant 0 : index
    %c0_16 = arith.constant 0 : index
    %19 = vector.load %arg3[%c0_15, %c0_16] : memref<64x256xf32, #tpu.memory_space<vmem>>, vector<64x256xf32>
    %cst_17 = arith.constant dense<0.000000e+00> : vector<8x256xf32>
    %20 = tpu.matmul %8, %19, %cst_17 {dimension_numbers = #tpu.dot_dimension_numbers<[1], [0], [0], [1], [0, 0, 1, 1], [], []>} : vector<8x64xf32>, vector<64x256xf32>, vector<8x256xf32> -> vector<8x256xf32>
    %21 = arith.addf %18, %20 : vector<8x256xf32>
    %22 = vector.extract_strided_slice %21 {offsets = [0, 0], sizes = [8, 192], strides = [1, 1]} : vector<8x256xf32> to vector<8x192xf32>
    %23 = arith.negf %22 : vector<8x192xf32>
    %24 = math.exp %23 : vector<8x192xf32>
    %cst_18 = arith.constant 1.000000e+00 : f32
    %25 = vector.broadcast %cst_18 : f32 to vector<8x192xf32>
    %26 = arith.addf %25, %24 : vector<8x192xf32>
    %27 = arith.divf %25, %26 : vector<8x192xf32>
    %28 = vector.extract_strided_slice %27 {offsets = [0, 0], sizes = [8, 64], strides = [1, 1]} : vector<8x192xf32> to vector<8x64xf32>
    %29 = vector.extract_strided_slice %27 {offsets = [0, 64], sizes = [8, 64], strides = [1, 1]} : vector<8x192xf32> to vector<8x64xf32>
    %30 = vector.extract_strided_slice %27 {offsets = [0, 128], sizes = [8, 64], strides = [1, 1]} : vector<8x192xf32> to vector<8x64xf32>
    %31 = vector.extract_strided_slice %21 {offsets = [0, 192], sizes = [8, 64], strides = [1, 1]} : vector<8x256xf32> to vector<8x64xf32>
    %32 = math.tanh %31 : vector<8x64xf32>
    %33 = arith.mulf %29, %9 : vector<8x64xf32>
    %34 = arith.mulf %28, %32 : vector<8x64xf32>
    %35 = arith.addf %33, %34 : vector<8x64xf32>
    %36 = math.tanh %35 : vector<8x64xf32>
    %37 = arith.mulf %30, %36 : vector<8x64xf32>
    %38 = arith.select %15, %35, %9 : vector<8x64xi1>, vector<8x64xf32>
    %39 = arith.select %15, %37, %8 : vector<8x64xi1>, vector<8x64xf32>
    %c0_19 = arith.constant 0 : index
    %c0_20 = arith.constant 0 : index
    %40 = vector.load %arg5[%c0_19, %c0_20] : memref<64x128xf32, #tpu.memory_space<vmem>>, vector<64x128xf32>
    %cst_21 = arith.constant dense<0.000000e+00> : vector<8x128xf32>
    %41 = tpu.matmul %39, %40, %cst_21 {dimension_numbers = #tpu.dot_dimension_numbers<[1], [0], [0], [1], [0, 0, 1, 1], [], []>} : vector<8x64xf32>, vector<64x128xf32>, vector<8x128xf32> -> vector<8x128xf32>
    %c0_22 = arith.constant 0 : index
    %c0_23 = arith.constant 0 : index
    %42 = vector.load %arg6[%c0_22, %c0_23] : memref<32x128xf32, #tpu.memory_space<vmem>>, vector<32x128xf32>
    %cst_24 = arith.constant dense<0.000000e+00> : vector<8x128xf32>
    %43 = tpu.matmul %10, %42, %cst_24 {dimension_numbers = #tpu.dot_dimension_numbers<[1], [0], [0], [1], [0, 0, 1, 1], [], []>} : vector<8x32xf32>, vector<32x128xf32>, vector<8x128xf32> -> vector<8x128xf32>
    %44 = arith.addf %41, %43 : vector<8x128xf32>
    %c0_25 = arith.constant 0 : index
    %c0_26 = arith.constant 0 : index
    %45 = vector.load %arg7[%c0_25, %c0_26] : memref<1x128xf32, #tpu.memory_space<vmem>>, vector<1x128xf32>
    %46 = vector.broadcast %45 : vector<1x128xf32> to vector<8x128xf32>
    %47 = arith.addf %44, %46 : vector<8x128xf32>
    %48 = vector.extract_strided_slice %47 {offsets = [0, 0], sizes = [8, 96], strides = [1, 1]} : vector<8x128xf32> to vector<8x96xf32>
    %49 = arith.negf %48 : vector<8x96xf32>
    %50 = math.exp %49 : vector<8x96xf32>
    %cst_27 = arith.constant 1.000000e+00 : f32
    %51 = vector.broadcast %cst_27 : f32 to vector<8x96xf32>
    %52 = arith.addf %51, %50 : vector<8x96xf32>
    %53 = arith.divf %51, %52 : vector<8x96xf32>
    %54 = vector.extract_strided_slice %53 {offsets = [0, 0], sizes = [8, 32], strides = [1, 1]} : vector<8x96xf32> to vector<8x32xf32>
    %55 = vector.extract_strided_slice %53 {offsets = [0, 32], sizes = [8, 32], strides = [1, 1]} : vector<8x96xf32> to vector<8x32xf32>
    %56 = vector.extract_strided_slice %53 {offsets = [0, 64], sizes = [8, 32], strides = [1, 1]} : vector<8x96xf32> to vector<8x32xf32>
    %57 = vector.extract_strided_slice %47 {offsets = [0, 96], sizes = [8, 32], strides = [1, 1]} : vector<8x128xf32> to vector<8x32xf32>
    %58 = math.tanh %57 : vector<8x32xf32>
    %59 = arith.mulf %55, %11 : vector<8x32xf32>
    %60 = arith.mulf %54, %58 : vector<8x32xf32>
    %61 = arith.addf %59, %60 : vector<8x32xf32>
    %62 = math.tanh %61 : vector<8x32xf32>
    %63 = arith.mulf %56, %62 : vector<8x32xf32>
    %64 = arith.select %17, %61, %11 : vector<8x32xi1>, vector<8x32xf32>
    %65 = arith.select %17, %63, %10 : vector<8x32xi1>, vector<8x32xf32>
    %c1_i32 = arith.constant 1 : i32
    %66 = vector.broadcast %c1_i32 : i32 to vector<8x1xi32>
    %67 = arith.cmpi sgt, %0, %66 : vector<8x1xi32>
    %68 = vector.shape_cast %67 : vector<8x1xi1> to vector<8x1xi1>
    %69 = vector.broadcast %68 : vector<8x1xi1> to vector<8x64xi1>
    %70 = vector.shape_cast %67 : vector<8x1xi1> to vector<8x1xi1>
    %71 = vector.broadcast %70 : vector<8x1xi1> to vector<8x32xi1>
    %c8 = arith.constant 8 : index
    %c0_28 = arith.constant 0 : index
    %72 = vector.load %arg18[%c8, %c0_28] : memref<96x256xf32, #tpu.memory_space<vmem>>, vector<8x256xf32>
    %c0_29 = arith.constant 0 : index
    %c0_30 = arith.constant 0 : index
    %73 = vector.load %arg3[%c0_29, %c0_30] : memref<64x256xf32, #tpu.memory_space<vmem>>, vector<64x256xf32>
    %cst_31 = arith.constant dense<0.000000e+00> : vector<8x256xf32>
    %74 = tpu.matmul %39, %73, %cst_31 {dimension_numbers = #tpu.dot_dimension_numbers<[1], [0], [0], [1], [0, 0, 1, 1], [], []>} : vector<8x64xf32>, vector<64x256xf32>, vector<8x256xf32> -> vector<8x256xf32>
    %75 = arith.addf %72, %74 : vector<8x256xf32>
    %76 = vector.extract_strided_slice %75 {offsets = [0, 0], sizes = [8, 192], strides = [1, 1]} : vector<8x256xf32> to vector<8x192xf32>
    %77 = arith.negf %76 : vector<8x192xf32>
    %78 = math.exp %77 : vector<8x192xf32>
    %cst_32 = arith.constant 1.000000e+00 : f32
    %79 = vector.broadcast %cst_32 : f32 to vector<8x192xf32>
    %80 = arith.addf %79, %78 : vector<8x192xf32>
    %81 = arith.divf %79, %80 : vector<8x192xf32>
    %82 = vector.extract_strided_slice %81 {offsets = [0, 0], sizes = [8, 64], strides = [1, 1]} : vector<8x192xf32> to vector<8x64xf32>
    %83 = vector.extract_strided_slice %81 {offsets = [0, 64], sizes = [8, 64], strides = [1, 1]} : vector<8x192xf32> to vector<8x64xf32>
    %84 = vector.extract_strided_slice %81 {offsets = [0, 128], sizes = [8, 64], strides = [1, 1]} : vector<8x192xf32> to vector<8x64xf32>
    %85 = vector.extract_strided_slice %75 {offsets = [0, 192], sizes = [8, 64], strides = [1, 1]} : vector<8x256xf32> to vector<8x64xf32>
    %86 = math.tanh %85 : vector<8x64xf32>
    %87 = arith.mulf %83, %38 : vector<8x64xf32>
    %88 = arith.mulf %82, %86 : vector<8x64xf32>
    %89 = arith.addf %87, %88 : vector<8x64xf32>
    %90 = math.tanh %89 : vector<8x64xf32>
    %91 = arith.mulf %84, %90 : vector<8x64xf32>
    %92 = arith.select %69, %89, %38 : vector<8x64xi1>, vector<8x64xf32>
    %93 = arith.select %69, %91, %39 : vector<8x64xi1>, vector<8x64xf32>
    %c0_33 = arith.constant 0 : index
    %c0_34 = arith.constant 0 : index
    %94 = vector.load %arg5[%c0_33, %c0_34] : memref<64x128xf32, #tpu.memory_space<vmem>>, vector<64x128xf32>
    %cst_35 = arith.constant dense<0.000000e+00> : vector<8x128xf32>
    %95 = tpu.matmul %93, %94, %cst_35 {dimension_numbers = #tpu.dot_dimension_numbers<[1], [0], [0], [1], [0, 0, 1, 1], [], []>} : vector<8x64xf32>, vector<64x128xf32>, vector<8x128xf32> -> vector<8x128xf32>
    %c0_36 = arith.constant 0 : index
    %c0_37 = arith.constant 0 : index
    %96 = vector.load %arg6[%c0_36, %c0_37] : memref<32x128xf32, #tpu.memory_space<vmem>>, vector<32x128xf32>
    %cst_38 = arith.constant dense<0.000000e+00> : vector<8x128xf32>
    %97 = tpu.matmul %65, %96, %cst_38 {dimension_numbers = #tpu.dot_dimension_numbers<[1], [0], [0], [1], [0, 0, 1, 1], [], []>} : vector<8x32xf32>, vector<32x128xf32>, vector<8x128xf32> -> vector<8x128xf32>
    %98 = arith.addf %95, %97 : vector<8x128xf32>
    %c0_39 = arith.constant 0 : index
    %c0_40 = arith.constant 0 : index
    %99 = vector.load %arg7[%c0_39, %c0_40] : memref<1x128xf32, #tpu.memory_space<vmem>>, vector<1x128xf32>
    %100 = vector.broadcast %99 : vector<1x128xf32> to vector<8x128xf32>
    %101 = arith.addf %98, %100 : vector<8x128xf32>
    %102 = vector.extract_strided_slice %101 {offsets = [0, 0], sizes = [8, 96], strides = [1, 1]} : vector<8x128xf32> to vector<8x96xf32>
    %103 = arith.negf %102 : vector<8x96xf32>
    %104 = math.exp %103 : vector<8x96xf32>
    %cst_41 = arith.constant 1.000000e+00 : f32
    %105 = vector.broadcast %cst_41 : f32 to vector<8x96xf32>
    %106 = arith.addf %105, %104 : vector<8x96xf32>
    %107 = arith.divf %105, %106 : vector<8x96xf32>
    %108 = vector.extract_strided_slice %107 {offsets = [0, 0], sizes = [8, 32], strides = [1, 1]} : vector<8x96xf32> to vector<8x32xf32>
    %109 = vector.extract_strided_slice %107 {offsets = [0, 32], sizes = [8, 32], strides = [1, 1]} : vector<8x96xf32> to vector<8x32xf32>
    %110 = vector.extract_strided_slice %107 {offsets = [0, 64], sizes = [8, 32], strides = [1, 1]} : vector<8x96xf32> to vector<8x32xf32>
    %111 = vector.extract_strided_slice %101 {offsets = [0, 96], sizes = [8, 32], strides = [1, 1]} : vector<8x128xf32> to vector<8x32xf32>
    %112 = math.tanh %111 : vector<8x32xf32>
    %113 = arith.mulf %109, %64 : vector<8x32xf32>
    %114 = arith.mulf %108, %112 : vector<8x32xf32>
    %115 = arith.addf %113, %114 : vector<8x32xf32>
    %116 = math.tanh %115 : vector<8x32xf32>
    %117 = arith.mulf %110, %116 : vector<8x32xf32>
    %118 = arith.select %71, %115, %64 : vector<8x32xi1>, vector<8x32xf32>
    %119 = arith.select %71, %117, %65 : vector<8x32xi1>, vector<8x32xf32>
    %c2_i32 = arith.constant 2 : i32
    %120 = vector.broadcast %c2_i32 : i32 to vector<8x1xi32>
    %121 = arith.cmpi sgt, %0, %120 : vector<8x1xi32>
    %122 = vector.shape_cast %121 : vector<8x1xi1> to vector<8x1xi1>
    %123 = vector.broadcast %122 : vector<8x1xi1> to vector<8x64xi1>
    %124 = vector.shape_cast %121 : vector<8x1xi1> to vector<8x1xi1>
    %125 = vector.broadcast %124 : vector<8x1xi1> to vector<8x32xi1>
    %c16 = arith.constant 16 : index
    %c0_42 = arith.constant 0 : index
    %126 = vector.load %arg18[%c16, %c0_42] : memref<96x256xf32, #tpu.memory_space<vmem>>, vector<8x256xf32>
    %c0_43 = arith.constant 0 : index
    %c0_44 = arith.constant 0 : index
    %127 = vector.load %arg3[%c0_43, %c0_44] : memref<64x256xf32, #tpu.memory_space<vmem>>, vector<64x256xf32>
    %cst_45 = arith.constant dense<0.000000e+00> : vector<8x256xf32>
    %128 = tpu.matmul %93, %127, %cst_45 {dimension_numbers = #tpu.dot_dimension_numbers<[1], [0], [0], [1], [0, 0, 1, 1], [], []>} : vector<8x64xf32>, vector<64x256xf32>, vector<8x256xf32> -> vector<8x256xf32>
    %129 = arith.addf %126, %128 : vector<8x256xf32>
    %130 = vector.extract_strided_slice %129 {offsets = [0, 0], sizes = [8, 192], strides = [1, 1]} : vector<8x256xf32> to vector<8x192xf32>
    %131 = arith.negf %130 : vector<8x192xf32>
    %132 = math.exp %131 : vector<8x192xf32>
    %cst_46 = arith.constant 1.000000e+00 : f32
    %133 = vector.broadcast %cst_46 : f32 to vector<8x192xf32>
    %134 = arith.addf %133, %132 : vector<8x192xf32>
    %135 = arith.divf %133, %134 : vector<8x192xf32>
    %136 = vector.extract_strided_slice %135 {offsets = [0, 0], sizes = [8, 64], strides = [1, 1]} : vector<8x192xf32> to vector<8x64xf32>
    %137 = vector.extract_strided_slice %135 {offsets = [0, 64], sizes = [8, 64], strides = [1, 1]} : vector<8x192xf32> to vector<8x64xf32>
    %138 = vector.extract_strided_slice %135 {offsets = [0, 128], sizes = [8, 64], strides = [1, 1]} : vector<8x192xf32> to vector<8x64xf32>
    %139 = vector.extract_strided_slice %129 {offsets = [0, 192], sizes = [8, 64], strides = [1, 1]} : vector<8x256xf32> to vector<8x64xf32>
    %140 = math.tanh %139 : vector<8x64xf32>
    %141 = arith.mulf %137, %92 : vector<8x64xf32>
    %142 = arith.mulf %136, %140 : vector<8x64xf32>
    %143 = arith.addf %141, %142 : vector<8x64xf32>
    %144 = math.tanh %143 : vector<8x64xf32>
    %145 = arith.mulf %138, %144 : vector<8x64xf32>
    %146 = arith.select %123, %143, %92 : vector<8x64xi1>, vector<8x64xf32>
    %147 = arith.select %123, %145, %93 : vector<8x64xi1>, vector<8x64xf32>
    %c0_47 = arith.constant 0 : index
    %c0_48 = arith.constant 0 : index
    %148 = vector.load %arg5[%c0_47, %c0_48] : memref<64x128xf32, #tpu.memory_space<vmem>>, vector<64x128xf32>
    %cst_49 = arith.constant dense<0.000000e+00> : vector<8x128xf32>
    %149 = tpu.matmul %147, %148, %cst_49 {dimension_numbers = #tpu.dot_dimension_numbers<[1], [0], [0], [1], [0, 0, 1, 1], [], []>} : vector<8x64xf32>, vector<64x128xf32>, vector<8x128xf32> -> vector<8x128xf32>
    %c0_50 = arith.constant 0 : index
    %c0_51 = arith.constant 0 : index
    %150 = vector.load %arg6[%c0_50, %c0_51] : memref<32x128xf32, #tpu.memory_space<vmem>>, vector<32x128xf32>
    %cst_52 = arith.constant dense<0.000000e+00> : vector<8x128xf32>
    %151 = tpu.matmul %119, %150, %cst_52 {dimension_numbers = #tpu.dot_dimension_numbers<[1], [0], [0], [1], [0, 0, 1, 1], [], []>} : vector<8x32xf32>, vector<32x128xf32>, vector<8x128xf32> -> vector<8x128xf32>
    %152 = arith.addf %149, %151 : vector<8x128xf32>
    %c0_53 = arith.constant 0 : index
    %c0_54 = arith.constant 0 : index
    %153 = vector.load %arg7[%c0_53, %c0_54] : memref<1x128xf32, #tpu.memory_space<vmem>>, vector<1x128xf32>
    %154 = vector.broadcast %153 : vector<1x128xf32> to vector<8x128xf32>
    %155 = arith.addf %152, %154 : vector<8x128xf32>
    %156 = vector.extract_strided_slice %155 {offsets = [0, 0], sizes = [8, 96], strides = [1, 1]} : vector<8x128xf32> to vector<8x96xf32>
    %157 = arith.negf %156 : vector<8x96xf32>
    %158 = math.exp %157 : vector<8x96xf32>
    %cst_55 = arith.constant 1.000000e+00 : f32
    %159 = vector.broadcast %cst_55 : f32 to vector<8x96xf32>
    %160 = arith.addf %159, %158 : vector<8x96xf32>
    %161 = arith.divf %159, %160 : vector<8x96xf32>
    %162 = vector.extract_strided_slice %161 {offsets = [0, 0], sizes = [8, 32], strides = [1, 1]} : vector<8x96xf32> to vector<8x32xf32>
    %163 = vector.extract_strided_slice %161 {offsets = [0, 32], sizes = [8, 32], strides = [1, 1]} : vector<8x96xf32> to vector<8x32xf32>
    %164 = vector.extract_strided_slice %161 {offsets = [0, 64], sizes = [8, 32], strides = [1, 1]} : vector<8x96xf32> to vector<8x32xf32>
    %165 = vector.extract_strided_slice %155 {offsets = [0, 96], sizes = [8, 32], strides = [1, 1]} : vector<8x128xf32> to vector<8x32xf32>
    %166 = math.tanh %165 : vector<8x32xf32>
    %167 = arith.mulf %163, %118 : vector<8x32xf32>
    %168 = arith.mulf %162, %166 : vector<8x32xf32>
    %169 = arith.addf %167, %168 : vector<8x32xf32>
    %170 = math.tanh %169 : vector<8x32xf32>
    %171 = arith.mulf %164, %170 : vector<8x32xf32>
    %172 = arith.select %125, %169, %118 : vector<8x32xi1>, vector<8x32xf32>
    %173 = arith.select %125, %171, %119 : vector<8x32xi1>, vector<8x32xf32>
    %c3_i32 = arith.constant 3 : i32
    %174 = vector.broadcast %c3_i32 : i32 to vector<8x1xi32>
    %175 = arith.cmpi sgt, %0, %174 : vector<8x1xi32>
    %176 = vector.shape_cast %175 : vector<8x1xi1> to vector<8x1xi1>
    %177 = vector.broadcast %176 : vector<8x1xi1> to vector<8x64xi1>
    %178 = vector.shape_cast %175 : vector<8x1xi1> to vector<8x1xi1>
    %179 = vector.broadcast %178 : vector<8x1xi1> to vector<8x32xi1>
    %c24 = arith.constant 24 : index
    %c0_56 = arith.constant 0 : index
    %180 = vector.load %arg18[%c24, %c0_56] : memref<96x256xf32, #tpu.memory_space<vmem>>, vector<8x256xf32>
    %c0_57 = arith.constant 0 : index
    %c0_58 = arith.constant 0 : index
    %181 = vector.load %arg3[%c0_57, %c0_58] : memref<64x256xf32, #tpu.memory_space<vmem>>, vector<64x256xf32>
    %cst_59 = arith.constant dense<0.000000e+00> : vector<8x256xf32>
    %182 = tpu.matmul %147, %181, %cst_59 {dimension_numbers = #tpu.dot_dimension_numbers<[1], [0], [0], [1], [0, 0, 1, 1], [], []>} : vector<8x64xf32>, vector<64x256xf32>, vector<8x256xf32> -> vector<8x256xf32>
    %183 = arith.addf %180, %182 : vector<8x256xf32>
    %184 = vector.extract_strided_slice %183 {offsets = [0, 0], sizes = [8, 192], strides = [1, 1]} : vector<8x256xf32> to vector<8x192xf32>
    %185 = arith.negf %184 : vector<8x192xf32>
    %186 = math.exp %185 : vector<8x192xf32>
    %cst_60 = arith.constant 1.000000e+00 : f32
    %187 = vector.broadcast %cst_60 : f32 to vector<8x192xf32>
    %188 = arith.addf %187, %186 : vector<8x192xf32>
    %189 = arith.divf %187, %188 : vector<8x192xf32>
    %190 = vector.extract_strided_slice %189 {offsets = [0, 0], sizes = [8, 64], strides = [1, 1]} : vector<8x192xf32> to vector<8x64xf32>
    %191 = vector.extract_strided_slice %189 {offsets = [0, 64], sizes = [8, 64], strides = [1, 1]} : vector<8x192xf32> to vector<8x64xf32>
    %192 = vector.extract_strided_slice %189 {offsets = [0, 128], sizes = [8, 64], strides = [1, 1]} : vector<8x192xf32> to vector<8x64xf32>
    %193 = vector.extract_strided_slice %183 {offsets = [0, 192], sizes = [8, 64], strides = [1, 1]} : vector<8x256xf32> to vector<8x64xf32>
    %194 = math.tanh %193 : vector<8x64xf32>
    %195 = arith.mulf %191, %146 : vector<8x64xf32>
    %196 = arith.mulf %190, %194 : vector<8x64xf32>
    %197 = arith.addf %195, %196 : vector<8x64xf32>
    %198 = math.tanh %197 : vector<8x64xf32>
    %199 = arith.mulf %192, %198 : vector<8x64xf32>
    %200 = arith.select %177, %197, %146 : vector<8x64xi1>, vector<8x64xf32>
    %201 = arith.select %177, %199, %147 : vector<8x64xi1>, vector<8x64xf32>
    %c0_61 = arith.constant 0 : index
    %c0_62 = arith.constant 0 : index
    %202 = vector.load %arg5[%c0_61, %c0_62] : memref<64x128xf32, #tpu.memory_space<vmem>>, vector<64x128xf32>
    %cst_63 = arith.constant dense<0.000000e+00> : vector<8x128xf32>
    %203 = tpu.matmul %201, %202, %cst_63 {dimension_numbers = #tpu.dot_dimension_numbers<[1], [0], [0], [1], [0, 0, 1, 1], [], []>} : vector<8x64xf32>, vector<64x128xf32>, vector<8x128xf32> -> vector<8x128xf32>
    %c0_64 = arith.constant 0 : index
    %c0_65 = arith.constant 0 : index
    %204 = vector.load %arg6[%c0_64, %c0_65] : memref<32x128xf32, #tpu.memory_space<vmem>>, vector<32x128xf32>
    %cst_66 = arith.constant dense<0.000000e+00> : vector<8x128xf32>
    %205 = tpu.matmul %173, %204, %cst_66 {dimension_numbers = #tpu.dot_dimension_numbers<[1], [0], [0], [1], [0, 0, 1, 1], [], []>} : vector<8x32xf32>, vector<32x128xf32>, vector<8x128xf32> -> vector<8x128xf32>
    %206 = arith.addf %203, %205 : vector<8x128xf32>
    %c0_67 = arith.constant 0 : index
    %c0_68 = arith.constant 0 : index
    %207 = vector.load %arg7[%c0_67, %c0_68] : memref<1x128xf32, #tpu.memory_space<vmem>>, vector<1x128xf32>
    %208 = vector.broadcast %207 : vector<1x128xf32> to vector<8x128xf32>
    %209 = arith.addf %206, %208 : vector<8x128xf32>
    %210 = vector.extract_strided_slice %209 {offsets = [0, 0], sizes = [8, 96], strides = [1, 1]} : vector<8x128xf32> to vector<8x96xf32>
    %211 = arith.negf %210 : vector<8x96xf32>
    %212 = math.exp %211 : vector<8x96xf32>
    %cst_69 = arith.constant 1.000000e+00 : f32
    %213 = vector.broadcast %cst_69 : f32 to vector<8x96xf32>
    %214 = arith.addf %213, %212 : vector<8x96xf32>
    %215 = arith.divf %213, %214 : vector<8x96xf32>
    %216 = vector.extract_strided_slice %215 {offsets = [0, 0], sizes = [8, 32], strides = [1, 1]} : vector<8x96xf32> to vector<8x32xf32>
    %217 = vector.extract_strided_slice %215 {offsets = [0, 32], sizes = [8, 32], strides = [1, 1]} : vector<8x96xf32> to vector<8x32xf32>
    %218 = vector.extract_strided_slice %215 {offsets = [0, 64], sizes = [8, 32], strides = [1, 1]} : vector<8x96xf32> to vector<8x32xf32>
    %219 = vector.extract_strided_slice %209 {offsets = [0, 96], sizes = [8, 32], strides = [1, 1]} : vector<8x128xf32> to vector<8x32xf32>
    %220 = math.tanh %219 : vector<8x32xf32>
    %221 = arith.mulf %217, %172 : vector<8x32xf32>
    %222 = arith.mulf %216, %220 : vector<8x32xf32>
    %223 = arith.addf %221, %222 : vector<8x32xf32>
    %224 = math.tanh %223 : vector<8x32xf32>
    %225 = arith.mulf %218, %224 : vector<8x32xf32>
    %226 = arith.select %179, %223, %172 : vector<8x32xi1>, vector<8x32xf32>
    %227 = arith.select %179, %225, %173 : vector<8x32xi1>, vector<8x32xf32>
    %c4_i32 = arith.constant 4 : i32
    %228 = vector.broadcast %c4_i32 : i32 to vector<8x1xi32>
    %229 = arith.cmpi sgt, %0, %228 : vector<8x1xi32>
    %230 = vector.shape_cast %229 : vector<8x1xi1> to vector<8x1xi1>
    %231 = vector.broadcast %230 : vector<8x1xi1> to vector<8x64xi1>
    %232 = vector.shape_cast %229 : vector<8x1xi1> to vector<8x1xi1>
    %233 = vector.broadcast %232 : vector<8x1xi1> to vector<8x32xi1>
    %c32 = arith.constant 32 : index
    %c0_70 = arith.constant 0 : index
    %234 = vector.load %arg18[%c32, %c0_70] : memref<96x256xf32, #tpu.memory_space<vmem>>, vector<8x256xf32>
    %c0_71 = arith.constant 0 : index
    %c0_72 = arith.constant 0 : index
    %235 = vector.load %arg3[%c0_71, %c0_72] : memref<64x256xf32, #tpu.memory_space<vmem>>, vector<64x256xf32>
    %cst_73 = arith.constant dense<0.000000e+00> : vector<8x256xf32>
    %236 = tpu.matmul %201, %235, %cst_73 {dimension_numbers = #tpu.dot_dimension_numbers<[1], [0], [0], [1], [0, 0, 1, 1], [], []>} : vector<8x64xf32>, vector<64x256xf32>, vector<8x256xf32> -> vector<8x256xf32>
    %237 = arith.addf %234, %236 : vector<8x256xf32>
    %238 = vector.extract_strided_slice %237 {offsets = [0, 0], sizes = [8, 192], strides = [1, 1]} : vector<8x256xf32> to vector<8x192xf32>
    %239 = arith.negf %238 : vector<8x192xf32>
    %240 = math.exp %239 : vector<8x192xf32>
    %cst_74 = arith.constant 1.000000e+00 : f32
    %241 = vector.broadcast %cst_74 : f32 to vector<8x192xf32>
    %242 = arith.addf %241, %240 : vector<8x192xf32>
    %243 = arith.divf %241, %242 : vector<8x192xf32>
    %244 = vector.extract_strided_slice %243 {offsets = [0, 0], sizes = [8, 64], strides = [1, 1]} : vector<8x192xf32> to vector<8x64xf32>
    %245 = vector.extract_strided_slice %243 {offsets = [0, 64], sizes = [8, 64], strides = [1, 1]} : vector<8x192xf32> to vector<8x64xf32>
    %246 = vector.extract_strided_slice %243 {offsets = [0, 128], sizes = [8, 64], strides = [1, 1]} : vector<8x192xf32> to vector<8x64xf32>
    %247 = vector.extract_strided_slice %237 {offsets = [0, 192], sizes = [8, 64], strides = [1, 1]} : vector<8x256xf32> to vector<8x64xf32>
    %248 = math.tanh %247 : vector<8x64xf32>
    %249 = arith.mulf %245, %200 : vector<8x64xf32>
    %250 = arith.mulf %244, %248 : vector<8x64xf32>
    %251 = arith.addf %249, %250 : vector<8x64xf32>
    %252 = math.tanh %251 : vector<8x64xf32>
    %253 = arith.mulf %246, %252 : vector<8x64xf32>
    %254 = arith.select %231, %251, %200 : vector<8x64xi1>, vector<8x64xf32>
    %255 = arith.select %231, %253, %201 : vector<8x64xi1>, vector<8x64xf32>
    %c0_75 = arith.constant 0 : index
    %c0_76 = arith.constant 0 : index
    %256 = vector.load %arg5[%c0_75, %c0_76] : memref<64x128xf32, #tpu.memory_space<vmem>>, vector<64x128xf32>
    %cst_77 = arith.constant dense<0.000000e+00> : vector<8x128xf32>
    %257 = tpu.matmul %255, %256, %cst_77 {dimension_numbers = #tpu.dot_dimension_numbers<[1], [0], [0], [1], [0, 0, 1, 1], [], []>} : vector<8x64xf32>, vector<64x128xf32>, vector<8x128xf32> -> vector<8x128xf32>
    %c0_78 = arith.constant 0 : index
    %c0_79 = arith.constant 0 : index
    %258 = vector.load %arg6[%c0_78, %c0_79] : memref<32x128xf32, #tpu.memory_space<vmem>>, vector<32x128xf32>
    %cst_80 = arith.constant dense<0.000000e+00> : vector<8x128xf32>
    %259 = tpu.matmul %227, %258, %cst_80 {dimension_numbers = #tpu.dot_dimension_numbers<[1], [0], [0], [1], [0, 0, 1, 1], [], []>} : vector<8x32xf32>, vector<32x128xf32>, vector<8x128xf32> -> vector<8x128xf32>
    %260 = arith.addf %257, %259 : vector<8x128xf32>
    %c0_81 = arith.constant 0 : index
    %c0_82 = arith.constant 0 : index
    %261 = vector.load %arg7[%c0_81, %c0_82] : memref<1x128xf32, #tpu.memory_space<vmem>>, vector<1x128xf32>
    %262 = vector.broadcast %261 : vector<1x128xf32> to vector<8x128xf32>
    %263 = arith.addf %260, %262 : vector<8x128xf32>
    %264 = vector.extract_strided_slice %263 {offsets = [0, 0], sizes = [8, 96], strides = [1, 1]} : vector<8x128xf32> to vector<8x96xf32>
    %265 = arith.negf %264 : vector<8x96xf32>
    %266 = math.exp %265 : vector<8x96xf32>
    %cst_83 = arith.constant 1.000000e+00 : f32
    %267 = vector.broadcast %cst_83 : f32 to vector<8x96xf32>
    %268 = arith.addf %267, %266 : vector<8x96xf32>
    %269 = arith.divf %267, %268 : vector<8x96xf32>
    %270 = vector.extract_strided_slice %269 {offsets = [0, 0], sizes = [8, 32], strides = [1, 1]} : vector<8x96xf32> to vector<8x32xf32>
    %271 = vector.extract_strided_slice %269 {offsets = [0, 32], sizes = [8, 32], strides = [1, 1]} : vector<8x96xf32> to vector<8x32xf32>
    %272 = vector.extract_strided_slice %269 {offsets = [0, 64], sizes = [8, 32], strides = [1, 1]} : vector<8x96xf32> to vector<8x32xf32>
    %273 = vector.extract_strided_slice %263 {offsets = [0, 96], sizes = [8, 32], strides = [1, 1]} : vector<8x128xf32> to vector<8x32xf32>
    %274 = math.tanh %273 : vector<8x32xf32>
    %275 = arith.mulf %271, %226 : vector<8x32xf32>
    %276 = arith.mulf %270, %274 : vector<8x32xf32>
    %277 = arith.addf %275, %276 : vector<8x32xf32>
    %278 = math.tanh %277 : vector<8x32xf32>
    %279 = arith.mulf %272, %278 : vector<8x32xf32>
    %280 = arith.select %233, %277, %226 : vector<8x32xi1>, vector<8x32xf32>
    %281 = arith.select %233, %279, %227 : vector<8x32xi1>, vector<8x32xf32>
    %c5_i32 = arith.constant 5 : i32
    %282 = vector.broadcast %c5_i32 : i32 to vector<8x1xi32>
    %283 = arith.cmpi sgt, %0, %282 : vector<8x1xi32>
    %284 = vector.shape_cast %283 : vector<8x1xi1> to vector<8x1xi1>
    %285 = vector.broadcast %284 : vector<8x1xi1> to vector<8x64xi1>
    %286 = vector.shape_cast %283 : vector<8x1xi1> to vector<8x1xi1>
    %287 = vector.broadcast %286 : vector<8x1xi1> to vector<8x32xi1>
    %c40 = arith.constant 40 : index
    %c0_84 = arith.constant 0 : index
    %288 = vector.load %arg18[%c40, %c0_84] : memref<96x256xf32, #tpu.memory_space<vmem>>, vector<8x256xf32>
    %c0_85 = arith.constant 0 : index
    %c0_86 = arith.constant 0 : index
    %289 = vector.load %arg3[%c0_85, %c0_86] : memref<64x256xf32, #tpu.memory_space<vmem>>, vector<64x256xf32>
    %cst_87 = arith.constant dense<0.000000e+00> : vector<8x256xf32>
    %290 = tpu.matmul %255, %289, %cst_87 {dimension_numbers = #tpu.dot_dimension_numbers<[1], [0], [0], [1], [0, 0, 1, 1], [], []>} : vector<8x64xf32>, vector<64x256xf32>, vector<8x256xf32> -> vector<8x256xf32>
    %291 = arith.addf %288, %290 : vector<8x256xf32>
    %292 = vector.extract_strided_slice %291 {offsets = [0, 0], sizes = [8, 192], strides = [1, 1]} : vector<8x256xf32> to vector<8x192xf32>
    %293 = arith.negf %292 : vector<8x192xf32>
    %294 = math.exp %293 : vector<8x192xf32>
    %cst_88 = arith.constant 1.000000e+00 : f32
    %295 = vector.broadcast %cst_88 : f32 to vector<8x192xf32>
    %296 = arith.addf %295, %294 : vector<8x192xf32>
    %297 = arith.divf %295, %296 : vector<8x192xf32>
    %298 = vector.extract_strided_slice %297 {offsets = [0, 0], sizes = [8, 64], strides = [1, 1]} : vector<8x192xf32> to vector<8x64xf32>
    %299 = vector.extract_strided_slice %297 {offsets = [0, 64], sizes = [8, 64], strides = [1, 1]} : vector<8x192xf32> to vector<8x64xf32>
    %300 = vector.extract_strided_slice %297 {offsets = [0, 128], sizes = [8, 64], strides = [1, 1]} : vector<8x192xf32> to vector<8x64xf32>
    %301 = vector.extract_strided_slice %291 {offsets = [0, 192], sizes = [8, 64], strides = [1, 1]} : vector<8x256xf32> to vector<8x64xf32>
    %302 = math.tanh %301 : vector<8x64xf32>
    %303 = arith.mulf %299, %254 : vector<8x64xf32>
    %304 = arith.mulf %298, %302 : vector<8x64xf32>
    %305 = arith.addf %303, %304 : vector<8x64xf32>
    %306 = math.tanh %305 : vector<8x64xf32>
    %307 = arith.mulf %300, %306 : vector<8x64xf32>
    %308 = arith.select %285, %305, %254 : vector<8x64xi1>, vector<8x64xf32>
    %309 = arith.select %285, %307, %255 : vector<8x64xi1>, vector<8x64xf32>
    %c0_89 = arith.constant 0 : index
    %c0_90 = arith.constant 0 : index
    %310 = vector.load %arg5[%c0_89, %c0_90] : memref<64x128xf32, #tpu.memory_space<vmem>>, vector<64x128xf32>
    %cst_91 = arith.constant dense<0.000000e+00> : vector<8x128xf32>
    %311 = tpu.matmul %309, %310, %cst_91 {dimension_numbers = #tpu.dot_dimension_numbers<[1], [0], [0], [1], [0, 0, 1, 1], [], []>} : vector<8x64xf32>, vector<64x128xf32>, vector<8x128xf32> -> vector<8x128xf32>
    %c0_92 = arith.constant 0 : index
    %c0_93 = arith.constant 0 : index
    %312 = vector.load %arg6[%c0_92, %c0_93] : memref<32x128xf32, #tpu.memory_space<vmem>>, vector<32x128xf32>
    %cst_94 = arith.constant dense<0.000000e+00> : vector<8x128xf32>
    %313 = tpu.matmul %281, %312, %cst_94 {dimension_numbers = #tpu.dot_dimension_numbers<[1], [0], [0], [1], [0, 0, 1, 1], [], []>} : vector<8x32xf32>, vector<32x128xf32>, vector<8x128xf32> -> vector<8x128xf32>
    %314 = arith.addf %311, %313 : vector<8x128xf32>
    %c0_95 = arith.constant 0 : index
    %c0_96 = arith.constant 0 : index
    %315 = vector.load %arg7[%c0_95, %c0_96] : memref<1x128xf32, #tpu.memory_space<vmem>>, vector<1x128xf32>
    %316 = vector.broadcast %315 : vector<1x128xf32> to vector<8x128xf32>
    %317 = arith.addf %314, %316 : vector<8x128xf32>
    %318 = vector.extract_strided_slice %317 {offsets = [0, 0], sizes = [8, 96], strides = [1, 1]} : vector<8x128xf32> to vector<8x96xf32>
    %319 = arith.negf %318 : vector<8x96xf32>
    %320 = math.exp %319 : vector<8x96xf32>
    %cst_97 = arith.constant 1.000000e+00 : f32
    %321 = vector.broadcast %cst_97 : f32 to vector<8x96xf32>
    %322 = arith.addf %321, %320 : vector<8x96xf32>
    %323 = arith.divf %321, %322 : vector<8x96xf32>
    %324 = vector.extract_strided_slice %323 {offsets = [0, 0], sizes = [8, 32], strides = [1, 1]} : vector<8x96xf32> to vector<8x32xf32>
    %325 = vector.extract_strided_slice %323 {offsets = [0, 32], sizes = [8, 32], strides = [1, 1]} : vector<8x96xf32> to vector<8x32xf32>
    %326 = vector.extract_strided_slice %323 {offsets = [0, 64], sizes = [8, 32], strides = [1, 1]} : vector<8x96xf32> to vector<8x32xf32>
    %327 = vector.extract_strided_slice %317 {offsets = [0, 96], sizes = [8, 32], strides = [1, 1]} : vector<8x128xf32> to vector<8x32xf32>
    %328 = math.tanh %327 : vector<8x32xf32>
    %329 = arith.mulf %325, %280 : vector<8x32xf32>
    %330 = arith.mulf %324, %328 : vector<8x32xf32>
    %331 = arith.addf %329, %330 : vector<8x32xf32>
    %332 = math.tanh %331 : vector<8x32xf32>
    %333 = arith.mulf %326, %332 : vector<8x32xf32>
    %334 = arith.select %287, %331, %280 : vector<8x32xi1>, vector<8x32xf32>
    %335 = arith.select %287, %333, %281 : vector<8x32xi1>, vector<8x32xf32>
    %c6_i32 = arith.constant 6 : i32
    %336 = vector.broadcast %c6_i32 : i32 to vector<8x1xi32>
    %337 = arith.cmpi sgt, %0, %336 : vector<8x1xi32>
    %338 = vector.shape_cast %337 : vector<8x1xi1> to vector<8x1xi1>
    %339 = vector.broadcast %338 : vector<8x1xi1> to vector<8x64xi1>
    %340 = vector.shape_cast %337 : vector<8x1xi1> to vector<8x1xi1>
    %341 = vector.broadcast %340 : vector<8x1xi1> to vector<8x32xi1>
    %c48 = arith.constant 48 : index
    %c0_98 = arith.constant 0 : index
    %342 = vector.load %arg18[%c48, %c0_98] : memref<96x256xf32, #tpu.memory_space<vmem>>, vector<8x256xf32>
    %c0_99 = arith.constant 0 : index
    %c0_100 = arith.constant 0 : index
    %343 = vector.load %arg3[%c0_99, %c0_100] : memref<64x256xf32, #tpu.memory_space<vmem>>, vector<64x256xf32>
    %cst_101 = arith.constant dense<0.000000e+00> : vector<8x256xf32>
    %344 = tpu.matmul %309, %343, %cst_101 {dimension_numbers = #tpu.dot_dimension_numbers<[1], [0], [0], [1], [0, 0, 1, 1], [], []>} : vector<8x64xf32>, vector<64x256xf32>, vector<8x256xf32> -> vector<8x256xf32>
    %345 = arith.addf %342, %344 : vector<8x256xf32>
    %346 = vector.extract_strided_slice %345 {offsets = [0, 0], sizes = [8, 192], strides = [1, 1]} : vector<8x256xf32> to vector<8x192xf32>
    %347 = arith.negf %346 : vector<8x192xf32>
    %348 = math.exp %347 : vector<8x192xf32>
    %cst_102 = arith.constant 1.000000e+00 : f32
    %349 = vector.broadcast %cst_102 : f32 to vector<8x192xf32>
    %350 = arith.addf %349, %348 : vector<8x192xf32>
    %351 = arith.divf %349, %350 : vector<8x192xf32>
    %352 = vector.extract_strided_slice %351 {offsets = [0, 0], sizes = [8, 64], strides = [1, 1]} : vector<8x192xf32> to vector<8x64xf32>
    %353 = vector.extract_strided_slice %351 {offsets = [0, 64], sizes = [8, 64], strides = [1, 1]} : vector<8x192xf32> to vector<8x64xf32>
    %354 = vector.extract_strided_slice %351 {offsets = [0, 128], sizes = [8, 64], strides = [1, 1]} : vector<8x192xf32> to vector<8x64xf32>
    %355 = vector.extract_strided_slice %345 {offsets = [0, 192], sizes = [8, 64], strides = [1, 1]} : vector<8x256xf32> to vector<8x64xf32>
    %356 = math.tanh %355 : vector<8x64xf32>
    %357 = arith.mulf %353, %308 : vector<8x64xf32>
    %358 = arith.mulf %352, %356 : vector<8x64xf32>
    %359 = arith.addf %357, %358 : vector<8x64xf32>
    %360 = math.tanh %359 : vector<8x64xf32>
    %361 = arith.mulf %354, %360 : vector<8x64xf32>
    %362 = arith.select %339, %359, %308 : vector<8x64xi1>, vector<8x64xf32>
    %363 = arith.select %339, %361, %309 : vector<8x64xi1>, vector<8x64xf32>
    %c0_103 = arith.constant 0 : index
    %c0_104 = arith.constant 0 : index
    %364 = vector.load %arg5[%c0_103, %c0_104] : memref<64x128xf32, #tpu.memory_space<vmem>>, vector<64x128xf32>
    %cst_105 = arith.constant dense<0.000000e+00> : vector<8x128xf32>
    %365 = tpu.matmul %363, %364, %cst_105 {dimension_numbers = #tpu.dot_dimension_numbers<[1], [0], [0], [1], [0, 0, 1, 1], [], []>} : vector<8x64xf32>, vector<64x128xf32>, vector<8x128xf32> -> vector<8x128xf32>
    %c0_106 = arith.constant 0 : index
    %c0_107 = arith.constant 0 : index
    %366 = vector.load %arg6[%c0_106, %c0_107] : memref<32x128xf32, #tpu.memory_space<vmem>>, vector<32x128xf32>
    %cst_108 = arith.constant dense<0.000000e+00> : vector<8x128xf32>
    %367 = tpu.matmul %335, %366, %cst_108 {dimension_numbers = #tpu.dot_dimension_numbers<[1], [0], [0], [1], [0, 0, 1, 1], [], []>} : vector<8x32xf32>, vector<32x128xf32>, vector<8x128xf32> -> vector<8x128xf32>
    %368 = arith.addf %365, %367 : vector<8x128xf32>
    %c0_109 = arith.constant 0 : index
    %c0_110 = arith.constant 0 : index
    %369 = vector.load %arg7[%c0_109, %c0_110] : memref<1x128xf32, #tpu.memory_space<vmem>>, vector<1x128xf32>
    %370 = vector.broadcast %369 : vector<1x128xf32> to vector<8x128xf32>
    %371 = arith.addf %368, %370 : vector<8x128xf32>
    %372 = vector.extract_strided_slice %371 {offsets = [0, 0], sizes = [8, 96], strides = [1, 1]} : vector<8x128xf32> to vector<8x96xf32>
    %373 = arith.negf %372 : vector<8x96xf32>
    %374 = math.exp %373 : vector<8x96xf32>
    %cst_111 = arith.constant 1.000000e+00 : f32
    %375 = vector.broadcast %cst_111 : f32 to vector<8x96xf32>
    %376 = arith.addf %375, %374 : vector<8x96xf32>
    %377 = arith.divf %375, %376 : vector<8x96xf32>
    %378 = vector.extract_strided_slice %377 {offsets = [0, 0], sizes = [8, 32], strides = [1, 1]} : vector<8x96xf32> to vector<8x32xf32>
    %379 = vector.extract_strided_slice %377 {offsets = [0, 32], sizes = [8, 32], strides = [1, 1]} : vector<8x96xf32> to vector<8x32xf32>
    %380 = vector.extract_strided_slice %377 {offsets = [0, 64], sizes = [8, 32], strides = [1, 1]} : vector<8x96xf32> to vector<8x32xf32>
    %381 = vector.extract_strided_slice %371 {offsets = [0, 96], sizes = [8, 32], strides = [1, 1]} : vector<8x128xf32> to vector<8x32xf32>
    %382 = math.tanh %381 : vector<8x32xf32>
    %383 = arith.mulf %379, %334 : vector<8x32xf32>
    %384 = arith.mulf %378, %382 : vector<8x32xf32>
    %385 = arith.addf %383, %384 : vector<8x32xf32>
    %386 = math.tanh %385 : vector<8x32xf32>
    %387 = arith.mulf %380, %386 : vector<8x32xf32>
    %388 = arith.select %341, %385, %334 : vector<8x32xi1>, vector<8x32xf32>
    %389 = arith.select %341, %387, %335 : vector<8x32xi1>, vector<8x32xf32>
    %c7_i32 = arith.constant 7 : i32
    %390 = vector.broadcast %c7_i32 : i32 to vector<8x1xi32>
    %391 = arith.cmpi sgt, %0, %390 : vector<8x1xi32>
    %392 = vector.shape_cast %391 : vector<8x1xi1> to vector<8x1xi1>
    %393 = vector.broadcast %392 : vector<8x1xi1> to vector<8x64xi1>
    %394 = vector.shape_cast %391 : vector<8x1xi1> to vector<8x1xi1>
    %395 = vector.broadcast %394 : vector<8x1xi1> to vector<8x32xi1>
    %c56 = arith.constant 56 : index
    %c0_112 = arith.constant 0 : index
    %396 = vector.load %arg18[%c56, %c0_112] : memref<96x256xf32, #tpu.memory_space<vmem>>, vector<8x256xf32>
    %c0_113 = arith.constant 0 : index
    %c0_114 = arith.constant 0 : index
    %397 = vector.load %arg3[%c0_113, %c0_114] : memref<64x256xf32, #tpu.memory_space<vmem>>, vector<64x256xf32>
    %cst_115 = arith.constant dense<0.000000e+00> : vector<8x256xf32>
    %398 = tpu.matmul %363, %397, %cst_115 {dimension_numbers = #tpu.dot_dimension_numbers<[1], [0], [0], [1], [0, 0, 1, 1], [], []>} : vector<8x64xf32>, vector<64x256xf32>, vector<8x256xf32> -> vector<8x256xf32>
    %399 = arith.addf %396, %398 : vector<8x256xf32>
    %400 = vector.extract_strided_slice %399 {offsets = [0, 0], sizes = [8, 192], strides = [1, 1]} : vector<8x256xf32> to vector<8x192xf32>
    %401 = arith.negf %400 : vector<8x192xf32>
    %402 = math.exp %401 : vector<8x192xf32>
    %cst_116 = arith.constant 1.000000e+00 : f32
    %403 = vector.broadcast %cst_116 : f32 to vector<8x192xf32>
    %404 = arith.addf %403, %402 : vector<8x192xf32>
    %405 = arith.divf %403, %404 : vector<8x192xf32>
    %406 = vector.extract_strided_slice %405 {offsets = [0, 0], sizes = [8, 64], strides = [1, 1]} : vector<8x192xf32> to vector<8x64xf32>
    %407 = vector.extract_strided_slice %405 {offsets = [0, 64], sizes = [8, 64], strides = [1, 1]} : vector<8x192xf32> to vector<8x64xf32>
    %408 = vector.extract_strided_slice %405 {offsets = [0, 128], sizes = [8, 64], strides = [1, 1]} : vector<8x192xf32> to vector<8x64xf32>
    %409 = vector.extract_strided_slice %399 {offsets = [0, 192], sizes = [8, 64], strides = [1, 1]} : vector<8x256xf32> to vector<8x64xf32>
    %410 = math.tanh %409 : vector<8x64xf32>
    %411 = arith.mulf %407, %362 : vector<8x64xf32>
    %412 = arith.mulf %406, %410 : vector<8x64xf32>
    %413 = arith.addf %411, %412 : vector<8x64xf32>
    %414 = math.tanh %413 : vector<8x64xf32>
    %415 = arith.mulf %408, %414 : vector<8x64xf32>
    %416 = arith.select %393, %413, %362 : vector<8x64xi1>, vector<8x64xf32>
    %417 = arith.select %393, %415, %363 : vector<8x64xi1>, vector<8x64xf32>
    %c0_117 = arith.constant 0 : index
    %c0_118 = arith.constant 0 : index
    %418 = vector.load %arg5[%c0_117, %c0_118] : memref<64x128xf32, #tpu.memory_space<vmem>>, vector<64x128xf32>
    %cst_119 = arith.constant dense<0.000000e+00> : vector<8x128xf32>
    %419 = tpu.matmul %417, %418, %cst_119 {dimension_numbers = #tpu.dot_dimension_numbers<[1], [0], [0], [1], [0, 0, 1, 1], [], []>} : vector<8x64xf32>, vector<64x128xf32>, vector<8x128xf32> -> vector<8x128xf32>
    %c0_120 = arith.constant 0 : index
    %c0_121 = arith.constant 0 : index
    %420 = vector.load %arg6[%c0_120, %c0_121] : memref<32x128xf32, #tpu.memory_space<vmem>>, vector<32x128xf32>
    %cst_122 = arith.constant dense<0.000000e+00> : vector<8x128xf32>
    %421 = tpu.matmul %389, %420, %cst_122 {dimension_numbers = #tpu.dot_dimension_numbers<[1], [0], [0], [1], [0, 0, 1, 1], [], []>} : vector<8x32xf32>, vector<32x128xf32>, vector<8x128xf32> -> vector<8x128xf32>
    %422 = arith.addf %419, %421 : vector<8x128xf32>
    %c0_123 = arith.constant 0 : index
    %c0_124 = arith.constant 0 : index
    %423 = vector.load %arg7[%c0_123, %c0_124] : memref<1x128xf32, #tpu.memory_space<vmem>>, vector<1x128xf32>
    %424 = vector.broadcast %423 : vector<1x128xf32> to vector<8x128xf32>
    %425 = arith.addf %422, %424 : vector<8x128xf32>
    %426 = vector.extract_strided_slice %425 {offsets = [0, 0], sizes = [8, 96], strides = [1, 1]} : vector<8x128xf32> to vector<8x96xf32>
    %427 = arith.negf %426 : vector<8x96xf32>
    %428 = math.exp %427 : vector<8x96xf32>
    %cst_125 = arith.constant 1.000000e+00 : f32
    %429 = vector.broadcast %cst_125 : f32 to vector<8x96xf32>
    %430 = arith.addf %429, %428 : vector<8x96xf32>
    %431 = arith.divf %429, %430 : vector<8x96xf32>
    %432 = vector.extract_strided_slice %431 {offsets = [0, 0], sizes = [8, 32], strides = [1, 1]} : vector<8x96xf32> to vector<8x32xf32>
    %433 = vector.extract_strided_slice %431 {offsets = [0, 32], sizes = [8, 32], strides = [1, 1]} : vector<8x96xf32> to vector<8x32xf32>
    %434 = vector.extract_strided_slice %431 {offsets = [0, 64], sizes = [8, 32], strides = [1, 1]} : vector<8x96xf32> to vector<8x32xf32>
    %435 = vector.extract_strided_slice %425 {offsets = [0, 96], sizes = [8, 32], strides = [1, 1]} : vector<8x128xf32> to vector<8x32xf32>
    %436 = math.tanh %435 : vector<8x32xf32>
    %437 = arith.mulf %433, %388 : vector<8x32xf32>
    %438 = arith.mulf %432, %436 : vector<8x32xf32>
    %439 = arith.addf %437, %438 : vector<8x32xf32>
    %440 = math.tanh %439 : vector<8x32xf32>
    %441 = arith.mulf %434, %440 : vector<8x32xf32>
    %442 = arith.select %395, %439, %388 : vector<8x32xi1>, vector<8x32xf32>
    %443 = arith.select %395, %441, %389 : vector<8x32xi1>, vector<8x32xf32>
    %c8_i32 = arith.constant 8 : i32
    %444 = vector.broadcast %c8_i32 : i32 to vector<8x1xi32>
    %445 = arith.cmpi sgt, %0, %444 : vector<8x1xi32>
    %446 = vector.shape_cast %445 : vector<8x1xi1> to vector<8x1xi1>
    %447 = vector.broadcast %446 : vector<8x1xi1> to vector<8x64xi1>
    %448 = vector.shape_cast %445 : vector<8x1xi1> to vector<8x1xi1>
    %449 = vector.broadcast %448 : vector<8x1xi1> to vector<8x32xi1>
    %c64 = arith.constant 64 : index
    %c0_126 = arith.constant 0 : index
    %450 = vector.load %arg18[%c64, %c0_126] : memref<96x256xf32, #tpu.memory_space<vmem>>, vector<8x256xf32>
    %c0_127 = arith.constant 0 : index
    %c0_128 = arith.constant 0 : index
    %451 = vector.load %arg3[%c0_127, %c0_128] : memref<64x256xf32, #tpu.memory_space<vmem>>, vector<64x256xf32>
    %cst_129 = arith.constant dense<0.000000e+00> : vector<8x256xf32>
    %452 = tpu.matmul %417, %451, %cst_129 {dimension_numbers = #tpu.dot_dimension_numbers<[1], [0], [0], [1], [0, 0, 1, 1], [], []>} : vector<8x64xf32>, vector<64x256xf32>, vector<8x256xf32> -> vector<8x256xf32>
    %453 = arith.addf %450, %452 : vector<8x256xf32>
    %454 = vector.extract_strided_slice %453 {offsets = [0, 0], sizes = [8, 192], strides = [1, 1]} : vector<8x256xf32> to vector<8x192xf32>
    %455 = arith.negf %454 : vector<8x192xf32>
    %456 = math.exp %455 : vector<8x192xf32>
    %cst_130 = arith.constant 1.000000e+00 : f32
    %457 = vector.broadcast %cst_130 : f32 to vector<8x192xf32>
    %458 = arith.addf %457, %456 : vector<8x192xf32>
    %459 = arith.divf %457, %458 : vector<8x192xf32>
    %460 = vector.extract_strided_slice %459 {offsets = [0, 0], sizes = [8, 64], strides = [1, 1]} : vector<8x192xf32> to vector<8x64xf32>
    %461 = vector.extract_strided_slice %459 {offsets = [0, 64], sizes = [8, 64], strides = [1, 1]} : vector<8x192xf32> to vector<8x64xf32>
    %462 = vector.extract_strided_slice %459 {offsets = [0, 128], sizes = [8, 64], strides = [1, 1]} : vector<8x192xf32> to vector<8x64xf32>
    %463 = vector.extract_strided_slice %453 {offsets = [0, 192], sizes = [8, 64], strides = [1, 1]} : vector<8x256xf32> to vector<8x64xf32>
    %464 = math.tanh %463 : vector<8x64xf32>
    %465 = arith.mulf %461, %416 : vector<8x64xf32>
    %466 = arith.mulf %460, %464 : vector<8x64xf32>
    %467 = arith.addf %465, %466 : vector<8x64xf32>
    %468 = math.tanh %467 : vector<8x64xf32>
    %469 = arith.mulf %462, %468 : vector<8x64xf32>
    %470 = arith.select %447, %467, %416 : vector<8x64xi1>, vector<8x64xf32>
    %471 = arith.select %447, %469, %417 : vector<8x64xi1>, vector<8x64xf32>
    %c0_131 = arith.constant 0 : index
    %c0_132 = arith.constant 0 : index
    %472 = vector.load %arg5[%c0_131, %c0_132] : memref<64x128xf32, #tpu.memory_space<vmem>>, vector<64x128xf32>
    %cst_133 = arith.constant dense<0.000000e+00> : vector<8x128xf32>
    %473 = tpu.matmul %471, %472, %cst_133 {dimension_numbers = #tpu.dot_dimension_numbers<[1], [0], [0], [1], [0, 0, 1, 1], [], []>} : vector<8x64xf32>, vector<64x128xf32>, vector<8x128xf32> -> vector<8x128xf32>
    %c0_134 = arith.constant 0 : index
    %c0_135 = arith.constant 0 : index
    %474 = vector.load %arg6[%c0_134, %c0_135] : memref<32x128xf32, #tpu.memory_space<vmem>>, vector<32x128xf32>
    %cst_136 = arith.constant dense<0.000000e+00> : vector<8x128xf32>
    %475 = tpu.matmul %443, %474, %cst_136 {dimension_numbers = #tpu.dot_dimension_numbers<[1], [0], [0], [1], [0, 0, 1, 1], [], []>} : vector<8x32xf32>, vector<32x128xf32>, vector<8x128xf32> -> vector<8x128xf32>
    %476 = arith.addf %473, %475 : vector<8x128xf32>
    %c0_137 = arith.constant 0 : index
    %c0_138 = arith.constant 0 : index
    %477 = vector.load %arg7[%c0_137, %c0_138] : memref<1x128xf32, #tpu.memory_space<vmem>>, vector<1x128xf32>
    %478 = vector.broadcast %477 : vector<1x128xf32> to vector<8x128xf32>
    %479 = arith.addf %476, %478 : vector<8x128xf32>
    %480 = vector.extract_strided_slice %479 {offsets = [0, 0], sizes = [8, 96], strides = [1, 1]} : vector<8x128xf32> to vector<8x96xf32>
    %481 = arith.negf %480 : vector<8x96xf32>
    %482 = math.exp %481 : vector<8x96xf32>
    %cst_139 = arith.constant 1.000000e+00 : f32
    %483 = vector.broadcast %cst_139 : f32 to vector<8x96xf32>
    %484 = arith.addf %483, %482 : vector<8x96xf32>
    %485 = arith.divf %483, %484 : vector<8x96xf32>
    %486 = vector.extract_strided_slice %485 {offsets = [0, 0], sizes = [8, 32], strides = [1, 1]} : vector<8x96xf32> to vector<8x32xf32>
    %487 = vector.extract_strided_slice %485 {offsets = [0, 32], sizes = [8, 32], strides = [1, 1]} : vector<8x96xf32> to vector<8x32xf32>
    %488 = vector.extract_strided_slice %485 {offsets = [0, 64], sizes = [8, 32], strides = [1, 1]} : vector<8x96xf32> to vector<8x32xf32>
    %489 = vector.extract_strided_slice %479 {offsets = [0, 96], sizes = [8, 32], strides = [1, 1]} : vector<8x128xf32> to vector<8x32xf32>
    %490 = math.tanh %489 : vector<8x32xf32>
    %491 = arith.mulf %487, %442 : vector<8x32xf32>
    %492 = arith.mulf %486, %490 : vector<8x32xf32>
    %493 = arith.addf %491, %492 : vector<8x32xf32>
    %494 = math.tanh %493 : vector<8x32xf32>
    %495 = arith.mulf %488, %494 : vector<8x32xf32>
    %496 = arith.select %449, %493, %442 : vector<8x32xi1>, vector<8x32xf32>
    %497 = arith.select %449, %495, %443 : vector<8x32xi1>, vector<8x32xf32>
    %c9_i32 = arith.constant 9 : i32
    %498 = vector.broadcast %c9_i32 : i32 to vector<8x1xi32>
    %499 = arith.cmpi sgt, %0, %498 : vector<8x1xi32>
    %500 = vector.shape_cast %499 : vector<8x1xi1> to vector<8x1xi1>
    %501 = vector.broadcast %500 : vector<8x1xi1> to vector<8x64xi1>
    %502 = vector.shape_cast %499 : vector<8x1xi1> to vector<8x1xi1>
    %503 = vector.broadcast %502 : vector<8x1xi1> to vector<8x32xi1>
    %c72 = arith.constant 72 : index
    %c0_140 = arith.constant 0 : index
    %504 = vector.load %arg18[%c72, %c0_140] : memref<96x256xf32, #tpu.memory_space<vmem>>, vector<8x256xf32>
    %c0_141 = arith.constant 0 : index
    %c0_142 = arith.constant 0 : index
    %505 = vector.load %arg3[%c0_141, %c0_142] : memref<64x256xf32, #tpu.memory_space<vmem>>, vector<64x256xf32>
    %cst_143 = arith.constant dense<0.000000e+00> : vector<8x256xf32>
    %506 = tpu.matmul %471, %505, %cst_143 {dimension_numbers = #tpu.dot_dimension_numbers<[1], [0], [0], [1], [0, 0, 1, 1], [], []>} : vector<8x64xf32>, vector<64x256xf32>, vector<8x256xf32> -> vector<8x256xf32>
    %507 = arith.addf %504, %506 : vector<8x256xf32>
    %508 = vector.extract_strided_slice %507 {offsets = [0, 0], sizes = [8, 192], strides = [1, 1]} : vector<8x256xf32> to vector<8x192xf32>
    %509 = arith.negf %508 : vector<8x192xf32>
    %510 = math.exp %509 : vector<8x192xf32>
    %cst_144 = arith.constant 1.000000e+00 : f32
    %511 = vector.broadcast %cst_144 : f32 to vector<8x192xf32>
    %512 = arith.addf %511, %510 : vector<8x192xf32>
    %513 = arith.divf %511, %512 : vector<8x192xf32>
    %514 = vector.extract_strided_slice %513 {offsets = [0, 0], sizes = [8, 64], strides = [1, 1]} : vector<8x192xf32> to vector<8x64xf32>
    %515 = vector.extract_strided_slice %513 {offsets = [0, 64], sizes = [8, 64], strides = [1, 1]} : vector<8x192xf32> to vector<8x64xf32>
    %516 = vector.extract_strided_slice %513 {offsets = [0, 128], sizes = [8, 64], strides = [1, 1]} : vector<8x192xf32> to vector<8x64xf32>
    %517 = vector.extract_strided_slice %507 {offsets = [0, 192], sizes = [8, 64], strides = [1, 1]} : vector<8x256xf32> to vector<8x64xf32>
    %518 = math.tanh %517 : vector<8x64xf32>
    %519 = arith.mulf %515, %470 : vector<8x64xf32>
    %520 = arith.mulf %514, %518 : vector<8x64xf32>
    %521 = arith.addf %519, %520 : vector<8x64xf32>
    %522 = math.tanh %521 : vector<8x64xf32>
    %523 = arith.mulf %516, %522 : vector<8x64xf32>
    %524 = arith.select %501, %521, %470 : vector<8x64xi1>, vector<8x64xf32>
    %525 = arith.select %501, %523, %471 : vector<8x64xi1>, vector<8x64xf32>
    %c0_145 = arith.constant 0 : index
    %c0_146 = arith.constant 0 : index
    %526 = vector.load %arg5[%c0_145, %c0_146] : memref<64x128xf32, #tpu.memory_space<vmem>>, vector<64x128xf32>
    %cst_147 = arith.constant dense<0.000000e+00> : vector<8x128xf32>
    %527 = tpu.matmul %525, %526, %cst_147 {dimension_numbers = #tpu.dot_dimension_numbers<[1], [0], [0], [1], [0, 0, 1, 1], [], []>} : vector<8x64xf32>, vector<64x128xf32>, vector<8x128xf32> -> vector<8x128xf32>
    %c0_148 = arith.constant 0 : index
    %c0_149 = arith.constant 0 : index
    %528 = vector.load %arg6[%c0_148, %c0_149] : memref<32x128xf32, #tpu.memory_space<vmem>>, vector<32x128xf32>
    %cst_150 = arith.constant dense<0.000000e+00> : vector<8x128xf32>
    %529 = tpu.matmul %497, %528, %cst_150 {dimension_numbers = #tpu.dot_dimension_numbers<[1], [0], [0], [1], [0, 0, 1, 1], [], []>} : vector<8x32xf32>, vector<32x128xf32>, vector<8x128xf32> -> vector<8x128xf32>
    %530 = arith.addf %527, %529 : vector<8x128xf32>
    %c0_151 = arith.constant 0 : index
    %c0_152 = arith.constant 0 : index
    %531 = vector.load %arg7[%c0_151, %c0_152] : memref<1x128xf32, #tpu.memory_space<vmem>>, vector<1x128xf32>
    %532 = vector.broadcast %531 : vector<1x128xf32> to vector<8x128xf32>
    %533 = arith.addf %530, %532 : vector<8x128xf32>
    %534 = vector.extract_strided_slice %533 {offsets = [0, 0], sizes = [8, 96], strides = [1, 1]} : vector<8x128xf32> to vector<8x96xf32>
    %535 = arith.negf %534 : vector<8x96xf32>
    %536 = math.exp %535 : vector<8x96xf32>
    %cst_153 = arith.constant 1.000000e+00 : f32
    %537 = vector.broadcast %cst_153 : f32 to vector<8x96xf32>
    %538 = arith.addf %537, %536 : vector<8x96xf32>
    %539 = arith.divf %537, %538 : vector<8x96xf32>
    %540 = vector.extract_strided_slice %539 {offsets = [0, 0], sizes = [8, 32], strides = [1, 1]} : vector<8x96xf32> to vector<8x32xf32>
    %541 = vector.extract_strided_slice %539 {offsets = [0, 32], sizes = [8, 32], strides = [1, 1]} : vector<8x96xf32> to vector<8x32xf32>
    %542 = vector.extract_strided_slice %539 {offsets = [0, 64], sizes = [8, 32], strides = [1, 1]} : vector<8x96xf32> to vector<8x32xf32>
    %543 = vector.extract_strided_slice %533 {offsets = [0, 96], sizes = [8, 32], strides = [1, 1]} : vector<8x128xf32> to vector<8x32xf32>
    %544 = math.tanh %543 : vector<8x32xf32>
    %545 = arith.mulf %541, %496 : vector<8x32xf32>
    %546 = arith.mulf %540, %544 : vector<8x32xf32>
    %547 = arith.addf %545, %546 : vector<8x32xf32>
    %548 = math.tanh %547 : vector<8x32xf32>
    %549 = arith.mulf %542, %548 : vector<8x32xf32>
    %550 = arith.select %503, %547, %496 : vector<8x32xi1>, vector<8x32xf32>
    %551 = arith.select %503, %549, %497 : vector<8x32xi1>, vector<8x32xf32>
    %c10_i32 = arith.constant 10 : i32
    %552 = vector.broadcast %c10_i32 : i32 to vector<8x1xi32>
    %553 = arith.cmpi sgt, %0, %552 : vector<8x1xi32>
    %554 = vector.shape_cast %553 : vector<8x1xi1> to vector<8x1xi1>
    %555 = vector.broadcast %554 : vector<8x1xi1> to vector<8x64xi1>
    %556 = vector.shape_cast %553 : vector<8x1xi1> to vector<8x1xi1>
    %557 = vector.broadcast %556 : vector<8x1xi1> to vector<8x32xi1>
    %c80 = arith.constant 80 : index
    %c0_154 = arith.constant 0 : index
    %558 = vector.load %arg18[%c80, %c0_154] : memref<96x256xf32, #tpu.memory_space<vmem>>, vector<8x256xf32>
    %c0_155 = arith.constant 0 : index
    %c0_156 = arith.constant 0 : index
    %559 = vector.load %arg3[%c0_155, %c0_156] : memref<64x256xf32, #tpu.memory_space<vmem>>, vector<64x256xf32>
    %cst_157 = arith.constant dense<0.000000e+00> : vector<8x256xf32>
    %560 = tpu.matmul %525, %559, %cst_157 {dimension_numbers = #tpu.dot_dimension_numbers<[1], [0], [0], [1], [0, 0, 1, 1], [], []>} : vector<8x64xf32>, vector<64x256xf32>, vector<8x256xf32> -> vector<8x256xf32>
    %561 = arith.addf %558, %560 : vector<8x256xf32>
    %562 = vector.extract_strided_slice %561 {offsets = [0, 0], sizes = [8, 192], strides = [1, 1]} : vector<8x256xf32> to vector<8x192xf32>
    %563 = arith.negf %562 : vector<8x192xf32>
    %564 = math.exp %563 : vector<8x192xf32>
    %cst_158 = arith.constant 1.000000e+00 : f32
    %565 = vector.broadcast %cst_158 : f32 to vector<8x192xf32>
    %566 = arith.addf %565, %564 : vector<8x192xf32>
    %567 = arith.divf %565, %566 : vector<8x192xf32>
    %568 = vector.extract_strided_slice %567 {offsets = [0, 0], sizes = [8, 64], strides = [1, 1]} : vector<8x192xf32> to vector<8x64xf32>
    %569 = vector.extract_strided_slice %567 {offsets = [0, 64], sizes = [8, 64], strides = [1, 1]} : vector<8x192xf32> to vector<8x64xf32>
    %570 = vector.extract_strided_slice %567 {offsets = [0, 128], sizes = [8, 64], strides = [1, 1]} : vector<8x192xf32> to vector<8x64xf32>
    %571 = vector.extract_strided_slice %561 {offsets = [0, 192], sizes = [8, 64], strides = [1, 1]} : vector<8x256xf32> to vector<8x64xf32>
    %572 = math.tanh %571 : vector<8x64xf32>
    %573 = arith.mulf %569, %524 : vector<8x64xf32>
    %574 = arith.mulf %568, %572 : vector<8x64xf32>
    %575 = arith.addf %573, %574 : vector<8x64xf32>
    %576 = math.tanh %575 : vector<8x64xf32>
    %577 = arith.mulf %570, %576 : vector<8x64xf32>
    %578 = arith.select %555, %575, %524 : vector<8x64xi1>, vector<8x64xf32>
    %579 = arith.select %555, %577, %525 : vector<8x64xi1>, vector<8x64xf32>
    %c0_159 = arith.constant 0 : index
    %c0_160 = arith.constant 0 : index
    %580 = vector.load %arg5[%c0_159, %c0_160] : memref<64x128xf32, #tpu.memory_space<vmem>>, vector<64x128xf32>
    %cst_161 = arith.constant dense<0.000000e+00> : vector<8x128xf32>
    %581 = tpu.matmul %579, %580, %cst_161 {dimension_numbers = #tpu.dot_dimension_numbers<[1], [0], [0], [1], [0, 0, 1, 1], [], []>} : vector<8x64xf32>, vector<64x128xf32>, vector<8x128xf32> -> vector<8x128xf32>
    %c0_162 = arith.constant 0 : index
    %c0_163 = arith.constant 0 : index
    %582 = vector.load %arg6[%c0_162, %c0_163] : memref<32x128xf32, #tpu.memory_space<vmem>>, vector<32x128xf32>
    %cst_164 = arith.constant dense<0.000000e+00> : vector<8x128xf32>
    %583 = tpu.matmul %551, %582, %cst_164 {dimension_numbers = #tpu.dot_dimension_numbers<[1], [0], [0], [1], [0, 0, 1, 1], [], []>} : vector<8x32xf32>, vector<32x128xf32>, vector<8x128xf32> -> vector<8x128xf32>
    %584 = arith.addf %581, %583 : vector<8x128xf32>
    %c0_165 = arith.constant 0 : index
    %c0_166 = arith.constant 0 : index
    %585 = vector.load %arg7[%c0_165, %c0_166] : memref<1x128xf32, #tpu.memory_space<vmem>>, vector<1x128xf32>
    %586 = vector.broadcast %585 : vector<1x128xf32> to vector<8x128xf32>
    %587 = arith.addf %584, %586 : vector<8x128xf32>
    %588 = vector.extract_strided_slice %587 {offsets = [0, 0], sizes = [8, 96], strides = [1, 1]} : vector<8x128xf32> to vector<8x96xf32>
    %589 = arith.negf %588 : vector<8x96xf32>
    %590 = math.exp %589 : vector<8x96xf32>
    %cst_167 = arith.constant 1.000000e+00 : f32
    %591 = vector.broadcast %cst_167 : f32 to vector<8x96xf32>
    %592 = arith.addf %591, %590 : vector<8x96xf32>
    %593 = arith.divf %591, %592 : vector<8x96xf32>
    %594 = vector.extract_strided_slice %593 {offsets = [0, 0], sizes = [8, 32], strides = [1, 1]} : vector<8x96xf32> to vector<8x32xf32>
    %595 = vector.extract_strided_slice %593 {offsets = [0, 32], sizes = [8, 32], strides = [1, 1]} : vector<8x96xf32> to vector<8x32xf32>
    %596 = vector.extract_strided_slice %593 {offsets = [0, 64], sizes = [8, 32], strides = [1, 1]} : vector<8x96xf32> to vector<8x32xf32>
    %597 = vector.extract_strided_slice %587 {offsets = [0, 96], sizes = [8, 32], strides = [1, 1]} : vector<8x128xf32> to vector<8x32xf32>
    %598 = math.tanh %597 : vector<8x32xf32>
    %599 = arith.mulf %595, %550 : vector<8x32xf32>
    %600 = arith.mulf %594, %598 : vector<8x32xf32>
    %601 = arith.addf %599, %600 : vector<8x32xf32>
    %602 = math.tanh %601 : vector<8x32xf32>
    %603 = arith.mulf %596, %602 : vector<8x32xf32>
    %604 = arith.select %557, %601, %550 : vector<8x32xi1>, vector<8x32xf32>
    %605 = arith.select %557, %603, %551 : vector<8x32xi1>, vector<8x32xf32>
    %c11_i32 = arith.constant 11 : i32
    %606 = vector.broadcast %c11_i32 : i32 to vector<8x1xi32>
    %607 = arith.cmpi sgt, %0, %606 : vector<8x1xi32>
    %608 = vector.shape_cast %607 : vector<8x1xi1> to vector<8x1xi1>
    %609 = vector.broadcast %608 : vector<8x1xi1> to vector<8x64xi1>
    %610 = vector.shape_cast %607 : vector<8x1xi1> to vector<8x1xi1>
    %611 = vector.broadcast %610 : vector<8x1xi1> to vector<8x32xi1>
    %c88 = arith.constant 88 : index
    %c0_168 = arith.constant 0 : index
    %612 = vector.load %arg18[%c88, %c0_168] : memref<96x256xf32, #tpu.memory_space<vmem>>, vector<8x256xf32>
    %c0_169 = arith.constant 0 : index
    %c0_170 = arith.constant 0 : index
    %613 = vector.load %arg3[%c0_169, %c0_170] : memref<64x256xf32, #tpu.memory_space<vmem>>, vector<64x256xf32>
    %cst_171 = arith.constant dense<0.000000e+00> : vector<8x256xf32>
    %614 = tpu.matmul %579, %613, %cst_171 {dimension_numbers = #tpu.dot_dimension_numbers<[1], [0], [0], [1], [0, 0, 1, 1], [], []>} : vector<8x64xf32>, vector<64x256xf32>, vector<8x256xf32> -> vector<8x256xf32>
    %615 = arith.addf %612, %614 : vector<8x256xf32>
    %616 = vector.extract_strided_slice %615 {offsets = [0, 0], sizes = [8, 192], strides = [1, 1]} : vector<8x256xf32> to vector<8x192xf32>
    %617 = arith.negf %616 : vector<8x192xf32>
    %618 = math.exp %617 : vector<8x192xf32>
    %cst_172 = arith.constant 1.000000e+00 : f32
    %619 = vector.broadcast %cst_172 : f32 to vector<8x192xf32>
    %620 = arith.addf %619, %618 : vector<8x192xf32>
    %621 = arith.divf %619, %620 : vector<8x192xf32>
    %622 = vector.extract_strided_slice %621 {offsets = [0, 0], sizes = [8, 64], strides = [1, 1]} : vector<8x192xf32> to vector<8x64xf32>
    %623 = vector.extract_strided_slice %621 {offsets = [0, 64], sizes = [8, 64], strides = [1, 1]} : vector<8x192xf32> to vector<8x64xf32>
    %624 = vector.extract_strided_slice %621 {offsets = [0, 128], sizes = [8, 64], strides = [1, 1]} : vector<8x192xf32> to vector<8x64xf32>
    %625 = vector.extract_strided_slice %615 {offsets = [0, 192], sizes = [8, 64], strides = [1, 1]} : vector<8x256xf32> to vector<8x64xf32>
    %626 = math.tanh %625 : vector<8x64xf32>
    %627 = arith.mulf %623, %578 : vector<8x64xf32>
    %628 = arith.mulf %622, %626 : vector<8x64xf32>
    %629 = arith.addf %627, %628 : vector<8x64xf32>
    %630 = math.tanh %629 : vector<8x64xf32>
    %631 = arith.mulf %624, %630 : vector<8x64xf32>
    %632 = arith.select %609, %631, %579 : vector<8x64xi1>, vector<8x64xf32>
    %c0_173 = arith.constant 0 : index
    %c0_174 = arith.constant 0 : index
    %633 = vector.load %arg5[%c0_173, %c0_174] : memref<64x128xf32, #tpu.memory_space<vmem>>, vector<64x128xf32>
    %cst_175 = arith.constant dense<0.000000e+00> : vector<8x128xf32>
    %634 = tpu.matmul %632, %633, %cst_175 {dimension_numbers = #tpu.dot_dimension_numbers<[1], [0], [0], [1], [0, 0, 1, 1], [], []>} : vector<8x64xf32>, vector<64x128xf32>, vector<8x128xf32> -> vector<8x128xf32>
    %c0_176 = arith.constant 0 : index
    %c0_177 = arith.constant 0 : index
    %635 = vector.load %arg6[%c0_176, %c0_177] : memref<32x128xf32, #tpu.memory_space<vmem>>, vector<32x128xf32>
    %cst_178 = arith.constant dense<0.000000e+00> : vector<8x128xf32>
    %636 = tpu.matmul %605, %635, %cst_178 {dimension_numbers = #tpu.dot_dimension_numbers<[1], [0], [0], [1], [0, 0, 1, 1], [], []>} : vector<8x32xf32>, vector<32x128xf32>, vector<8x128xf32> -> vector<8x128xf32>
    %637 = arith.addf %634, %636 : vector<8x128xf32>
    %c0_179 = arith.constant 0 : index
    %c0_180 = arith.constant 0 : index
    %638 = vector.load %arg7[%c0_179, %c0_180] : memref<1x128xf32, #tpu.memory_space<vmem>>, vector<1x128xf32>
    %639 = vector.broadcast %638 : vector<1x128xf32> to vector<8x128xf32>
    %640 = arith.addf %637, %639 : vector<8x128xf32>
    %641 = vector.extract_strided_slice %640 {offsets = [0, 0], sizes = [8, 96], strides = [1, 1]} : vector<8x128xf32> to vector<8x96xf32>
    %642 = arith.negf %641 : vector<8x96xf32>
    %643 = math.exp %642 : vector<8x96xf32>
    %cst_181 = arith.constant 1.000000e+00 : f32
    %644 = vector.broadcast %cst_181 : f32 to vector<8x96xf32>
    %645 = arith.addf %644, %643 : vector<8x96xf32>
    %646 = arith.divf %644, %645 : vector<8x96xf32>
    %647 = vector.extract_strided_slice %646 {offsets = [0, 0], sizes = [8, 32], strides = [1, 1]} : vector<8x96xf32> to vector<8x32xf32>
    %648 = vector.extract_strided_slice %646 {offsets = [0, 32], sizes = [8, 32], strides = [1, 1]} : vector<8x96xf32> to vector<8x32xf32>
    %649 = vector.extract_strided_slice %646 {offsets = [0, 64], sizes = [8, 32], strides = [1, 1]} : vector<8x96xf32> to vector<8x32xf32>
    %650 = vector.extract_strided_slice %640 {offsets = [0, 96], sizes = [8, 32], strides = [1, 1]} : vector<8x128xf32> to vector<8x32xf32>
    %651 = math.tanh %650 : vector<8x32xf32>
    %652 = arith.mulf %648, %604 : vector<8x32xf32>
    %653 = arith.mulf %647, %651 : vector<8x32xf32>
    %654 = arith.addf %652, %653 : vector<8x32xf32>
    %655 = math.tanh %654 : vector<8x32xf32>
    %656 = arith.mulf %649, %655 : vector<8x32xf32>
    %657 = arith.select %611, %656, %605 : vector<8x32xi1>, vector<8x32xf32>
    %c0_182 = arith.constant 0 : index
    %c0_183 = arith.constant 0 : index
    %658 = vector.load %arg16[%c0_182, %c0_183] : memref<8x32xf32, #tpu.memory_space<vmem>>, vector<8x32xf32>
    tpu.vector_store %arg16[%c0_182, %c0_183], %657 {strides = array<i32>} : memref<8x32xf32, #tpu.memory_space<vmem>>, vector<8x32xf32>,
    %c0_184 = arith.constant 0 : index
    %c0_185 = arith.constant 0 : index
    %659 = vector.load %arg8[%c0_184, %c0_185] : memref<32x128xf32, #tpu.memory_space<vmem>>, vector<32x128xf32>
    %cst_186 = arith.constant dense<0.000000e+00> : vector<8x128xf32>
    %660 = tpu.matmul %657, %659, %cst_186 {dimension_numbers = #tpu.dot_dimension_numbers<[1], [0], [0], [1], [0, 0, 1, 1], [], []>} : vector<8x32xf32>, vector<32x128xf32>, vector<8x128xf32> -> vector<8x128xf32>
    %c0_187 = arith.constant 0 : index
    %c0_188 = arith.constant 0 : index
    %661 = vector.load %arg10[%c0_187, %c0_188] : memref<1x128xf32, #tpu.memory_space<vmem>>, vector<1x128xf32>
    %662 = vector.broadcast %661 : vector<1x128xf32> to vector<8x128xf32>
    %663 = arith.addf %660, %662 : vector<8x128xf32>
    %cst_189 = arith.constant 0.000000e+00 : f32
    %664 = vector.broadcast %cst_189 : f32 to vector<8x32xf32>
    %cst_190 = arith.constant 0.000000e+00 : f32
    %665 = vector.broadcast %cst_190 : f32 to vector<8x32xf32>
    %cst_191 = arith.constant 0.000000e+00 : f32
    %666 = vector.broadcast %cst_191 : f32 to vector<8x64xf32>
    %cst_192 = arith.constant 0.000000e+00 : f32
    %667 = vector.broadcast %cst_192 : f32 to vector<8x64xf32>
    %c0_193 = arith.constant 0 : index
    %c0_194 = arith.constant 0 : index
    %668 = vector.load %arg9[%c0_193, %c0_194] : memref<32x128xf32, #tpu.memory_space<vmem>>, vector<32x128xf32>
    %cst_195 = arith.constant dense<0.000000e+00> : vector<8x128xf32>
    %669 = tpu.matmul %664, %668, %cst_195 {dimension_numbers = #tpu.dot_dimension_numbers<[1], [0], [0], [1], [0, 0, 1, 1], [], []>} : vector<8x32xf32>, vector<32x128xf32>, vector<8x128xf32> -> vector<8x128xf32>
    %670 = arith.addf %663, %669 : vector<8x128xf32>
    %671 = vector.extract_strided_slice %670 {offsets = [0, 0], sizes = [8, 96], strides = [1, 1]} : vector<8x128xf32> to vector<8x96xf32>
    %672 = arith.negf %671 : vector<8x96xf32>
    %673 = math.exp %672 : vector<8x96xf32>
    %cst_196 = arith.constant 1.000000e+00 : f32
    %674 = vector.broadcast %cst_196 : f32 to vector<8x96xf32>
    %675 = arith.addf %674, %673 : vector<8x96xf32>
    %676 = arith.divf %674, %675 : vector<8x96xf32>
    %677 = vector.extract_strided_slice %676 {offsets = [0, 0], sizes = [8, 32], strides = [1, 1]} : vector<8x96xf32> to vector<8x32xf32>
    %678 = vector.extract_strided_slice %676 {offsets = [0, 32], sizes = [8, 32], strides = [1, 1]} : vector<8x96xf32> to vector<8x32xf32>
    %679 = vector.extract_strided_slice %676 {offsets = [0, 64], sizes = [8, 32], strides = [1, 1]} : vector<8x96xf32> to vector<8x32xf32>
    %680 = vector.extract_strided_slice %670 {offsets = [0, 96], sizes = [8, 32], strides = [1, 1]} : vector<8x128xf32> to vector<8x32xf32>
    %681 = math.tanh %680 : vector<8x32xf32>
    %682 = arith.mulf %678, %665 : vector<8x32xf32>
    %683 = arith.mulf %677, %681 : vector<8x32xf32>
    %684 = arith.addf %682, %683 : vector<8x32xf32>
    %685 = math.tanh %684 : vector<8x32xf32>
    %686 = arith.mulf %679, %685 : vector<8x32xf32>
    %c0_197 = arith.constant 0 : index
    %c0_198 = arith.constant 0 : index
    %687 = vector.load %arg11[%c0_197, %c0_198] : memref<32x256xf32, #tpu.memory_space<vmem>>, vector<32x256xf32>
    %cst_199 = arith.constant dense<0.000000e+00> : vector<8x256xf32>
    %688 = tpu.matmul %686, %687, %cst_199 {dimension_numbers = #tpu.dot_dimension_numbers<[1], [0], [0], [1], [0, 0, 1, 1], [], []>} : vector<8x32xf32>, vector<32x256xf32>, vector<8x256xf32> -> vector<8x256xf32>
    %c0_200 = arith.constant 0 : index
    %c0_201 = arith.constant 0 : index
    %689 = vector.load %arg12[%c0_200, %c0_201] : memref<64x256xf32, #tpu.memory_space<vmem>>, vector<64x256xf32>
    %cst_202 = arith.constant dense<0.000000e+00> : vector<8x256xf32>
    %690 = tpu.matmul %666, %689, %cst_202 {dimension_numbers = #tpu.dot_dimension_numbers<[1], [0], [0], [1], [0, 0, 1, 1], [], []>} : vector<8x64xf32>, vector<64x256xf32>, vector<8x256xf32> -> vector<8x256xf32>
    %691 = arith.addf %688, %690 : vector<8x256xf32>
    %c0_203 = arith.constant 0 : index
    %c0_204 = arith.constant 0 : index
    %692 = vector.load %arg13[%c0_203, %c0_204] : memref<1x256xf32, #tpu.memory_space<vmem>>, vector<1x256xf32>
    %693 = vector.broadcast %692 : vector<1x256xf32> to vector<8x256xf32>
    %694 = arith.addf %691, %693 : vector<8x256xf32>
    %695 = vector.extract_strided_slice %694 {offsets = [0, 0], sizes = [8, 192], strides = [1, 1]} : vector<8x256xf32> to vector<8x192xf32>
    %696 = arith.negf %695 : vector<8x192xf32>
    %697 = math.exp %696 : vector<8x192xf32>
    %cst_205 = arith.constant 1.000000e+00 : f32
    %698 = vector.broadcast %cst_205 : f32 to vector<8x192xf32>
    %699 = arith.addf %698, %697 : vector<8x192xf32>
    %700 = arith.divf %698, %699 : vector<8x192xf32>
    %701 = vector.extract_strided_slice %700 {offsets = [0, 0], sizes = [8, 64], strides = [1, 1]} : vector<8x192xf32> to vector<8x64xf32>
    %702 = vector.extract_strided_slice %700 {offsets = [0, 64], sizes = [8, 64], strides = [1, 1]} : vector<8x192xf32> to vector<8x64xf32>
    %703 = vector.extract_strided_slice %700 {offsets = [0, 128], sizes = [8, 64], strides = [1, 1]} : vector<8x192xf32> to vector<8x64xf32>
    %704 = vector.extract_strided_slice %694 {offsets = [0, 192], sizes = [8, 64], strides = [1, 1]} : vector<8x256xf32> to vector<8x64xf32>
    %705 = math.tanh %704 : vector<8x64xf32>
    %706 = arith.mulf %702, %667 : vector<8x64xf32>
    %707 = arith.mulf %701, %705 : vector<8x64xf32>
    %708 = arith.addf %706, %707 : vector<8x64xf32>
    %709 = math.tanh %708 : vector<8x64xf32>
    %710 = arith.mulf %703, %709 : vector<8x64xf32>
    %c0_206 = arith.constant 0 : index
    %c0_207 = arith.constant 0 : index
    %711 = vector.load %arg19[%c0_206, %c0_207] : memref<96x64xf32, #tpu.memory_space<vmem>>, vector<8x64xf32>
    tpu.vector_store %arg19[%c0_206, %c0_207], %710 {strides = array<i32>} : memref<96x64xf32, #tpu.memory_space<vmem>>, vector<8x64xf32>,
    %c0_208 = arith.constant 0 : index
    %c0_209 = arith.constant 0 : index
    %712 = vector.load %arg9[%c0_208, %c0_209] : memref<32x128xf32, #tpu.memory_space<vmem>>, vector<32x128xf32>
    %cst_210 = arith.constant dense<0.000000e+00> : vector<8x128xf32>
    %713 = tpu.matmul %686, %712, %cst_210 {dimension_numbers = #tpu.dot_dimension_numbers<[1], [0], [0], [1], [0, 0, 1, 1], [], []>} : vector<8x32xf32>, vector<32x128xf32>, vector<8x128xf32> -> vector<8x128xf32>
    %714 = arith.addf %663, %713 : vector<8x128xf32>
    %715 = vector.extract_strided_slice %714 {offsets = [0, 0], sizes = [8, 96], strides = [1, 1]} : vector<8x128xf32> to vector<8x96xf32>
    %716 = arith.negf %715 : vector<8x96xf32>
    %717 = math.exp %716 : vector<8x96xf32>
    %cst_211 = arith.constant 1.000000e+00 : f32
    %718 = vector.broadcast %cst_211 : f32 to vector<8x96xf32>
    %719 = arith.addf %718, %717 : vector<8x96xf32>
    %720 = arith.divf %718, %719 : vector<8x96xf32>
    %721 = vector.extract_strided_slice %720 {offsets = [0, 0], sizes = [8, 32], strides = [1, 1]} : vector<8x96xf32> to vector<8x32xf32>
    %722 = vector.extract_strided_slice %720 {offsets = [0, 32], sizes = [8, 32], strides = [1, 1]} : vector<8x96xf32> to vector<8x32xf32>
    %723 = vector.extract_strided_slice %720 {offsets = [0, 64], sizes = [8, 32], strides = [1, 1]} : vector<8x96xf32> to vector<8x32xf32>
    %724 = vector.extract_strided_slice %714 {offsets = [0, 96], sizes = [8, 32], strides = [1, 1]} : vector<8x128xf32> to vector<8x32xf32>
    %725 = math.tanh %724 : vector<8x32xf32>
    %726 = arith.mulf %722, %684 : vector<8x32xf32>
    %727 = arith.mulf %721, %725 : vector<8x32xf32>
    %728 = arith.addf %726, %727 : vector<8x32xf32>
    %729 = math.tanh %728 : vector<8x32xf32>
    %730 = arith.mulf %723, %729 : vector<8x32xf32>
    %c0_212 = arith.constant 0 : index
    %c0_213 = arith.constant 0 : index
    %731 = vector.load %arg11[%c0_212, %c0_213] : memref<32x256xf32, #tpu.memory_space<vmem>>, vector<32x256xf32>
    %cst_214 = arith.constant dense<0.000000e+00> : vector<8x256xf32>
    %732 = tpu.matmul %730, %731, %cst_214 {dimension_numbers = #tpu.dot_dimension_numbers<[1], [0], [0], [1], [0, 0, 1, 1], [], []>} : vector<8x32xf32>, vector<32x256xf32>, vector<8x256xf32> -> vector<8x256xf32>
    %c0_215 = arith.constant 0 : index
    %c0_216 = arith.constant 0 : index
    %733 = vector.load %arg12[%c0_215, %c0_216] : memref<64x256xf32, #tpu.memory_space<vmem>>, vector<64x256xf32>
    %cst_217 = arith.constant dense<0.000000e+00> : vector<8x256xf32>
    %734 = tpu.matmul %710, %733, %cst_217 {dimension_numbers = #tpu.dot_dimension_numbers<[1], [0], [0], [1], [0, 0, 1, 1], [], []>} : vector<8x64xf32>, vector<64x256xf32>, vector<8x256xf32> -> vector<8x256xf32>
    %735 = arith.addf %732, %734 : vector<8x256xf32>
    %c0_218 = arith.constant 0 : index
    %c0_219 = arith.constant 0 : index
    %736 = vector.load %arg13[%c0_218, %c0_219] : memref<1x256xf32, #tpu.memory_space<vmem>>, vector<1x256xf32>
    %737 = vector.broadcast %736 : vector<1x256xf32> to vector<8x256xf32>
    %738 = arith.addf %735, %737 : vector<8x256xf32>
    %739 = vector.extract_strided_slice %738 {offsets = [0, 0], sizes = [8, 192], strides = [1, 1]} : vector<8x256xf32> to vector<8x192xf32>
    %740 = arith.negf %739 : vector<8x192xf32>
    %741 = math.exp %740 : vector<8x192xf32>
    %cst_220 = arith.constant 1.000000e+00 : f32
    %742 = vector.broadcast %cst_220 : f32 to vector<8x192xf32>
    %743 = arith.addf %742, %741 : vector<8x192xf32>
    %744 = arith.divf %742, %743 : vector<8x192xf32>
    %745 = vector.extract_strided_slice %744 {offsets = [0, 0], sizes = [8, 64], strides = [1, 1]} : vector<8x192xf32> to vector<8x64xf32>
    %746 = vector.extract_strided_slice %744 {offsets = [0, 64], sizes = [8, 64], strides = [1, 1]} : vector<8x192xf32> to vector<8x64xf32>
    %747 = vector.extract_strided_slice %744 {offsets = [0, 128], sizes = [8, 64], strides = [1, 1]} : vector<8x192xf32> to vector<8x64xf32>
    %748 = vector.extract_strided_slice %738 {offsets = [0, 192], sizes = [8, 64], strides = [1, 1]} : vector<8x256xf32> to vector<8x64xf32>
    %749 = math.tanh %748 : vector<8x64xf32>
    %750 = arith.mulf %746, %708 : vector<8x64xf32>
    %751 = arith.mulf %745, %749 : vector<8x64xf32>
    %752 = arith.addf %750, %751 : vector<8x64xf32>
    %753 = math.tanh %752 : vector<8x64xf32>
    %754 = arith.mulf %747, %753 : vector<8x64xf32>
    %c8_221 = arith.constant 8 : index
    %c0_222 = arith.constant 0 : index
    %755 = vector.load %arg19[%c8_221, %c0_222] : memref<96x64xf32, #tpu.memory_space<vmem>>, vector<8x64xf32>
    tpu.vector_store %arg19[%c8_221, %c0_222], %754 {strides = array<i32>} : memref<96x64xf32, #tpu.memory_space<vmem>>, vector<8x64xf32>,
    %c0_223 = arith.constant 0 : index
    %c0_224 = arith.constant 0 : index
    %756 = vector.load %arg9[%c0_223, %c0_224] : memref<32x128xf32, #tpu.memory_space<vmem>>, vector<32x128xf32>
    %cst_225 = arith.constant dense<0.000000e+00> : vector<8x128xf32>
    %757 = tpu.matmul %730, %756, %cst_225 {dimension_numbers = #tpu.dot_dimension_numbers<[1], [0], [0], [1], [0, 0, 1, 1], [], []>} : vector<8x32xf32>, vector<32x128xf32>, vector<8x128xf32> -> vector<8x128xf32>
    %758 = arith.addf %663, %757 : vector<8x128xf32>
    %759 = vector.extract_strided_slice %758 {offsets = [0, 0], sizes = [8, 96], strides = [1, 1]} : vector<8x128xf32> to vector<8x96xf32>
    %760 = arith.negf %759 : vector<8x96xf32>
    %761 = math.exp %760 : vector<8x96xf32>
    %cst_226 = arith.constant 1.000000e+00 : f32
    %762 = vector.broadcast %cst_226 : f32 to vector<8x96xf32>
    %763 = arith.addf %762, %761 : vector<8x96xf32>
    %764 = arith.divf %762, %763 : vector<8x96xf32>
    %765 = vector.extract_strided_slice %764 {offsets = [0, 0], sizes = [8, 32], strides = [1, 1]} : vector<8x96xf32> to vector<8x32xf32>
    %766 = vector.extract_strided_slice %764 {offsets = [0, 32], sizes = [8, 32], strides = [1, 1]} : vector<8x96xf32> to vector<8x32xf32>
    %767 = vector.extract_strided_slice %764 {offsets = [0, 64], sizes = [8, 32], strides = [1, 1]} : vector<8x96xf32> to vector<8x32xf32>
    %768 = vector.extract_strided_slice %758 {offsets = [0, 96], sizes = [8, 32], strides = [1, 1]} : vector<8x128xf32> to vector<8x32xf32>
    %769 = math.tanh %768 : vector<8x32xf32>
    %770 = arith.mulf %766, %728 : vector<8x32xf32>
    %771 = arith.mulf %765, %769 : vector<8x32xf32>
    %772 = arith.addf %770, %771 : vector<8x32xf32>
    %773 = math.tanh %772 : vector<8x32xf32>
    %774 = arith.mulf %767, %773 : vector<8x32xf32>
    %c0_227 = arith.constant 0 : index
    %c0_228 = arith.constant 0 : index
    %775 = vector.load %arg11[%c0_227, %c0_228] : memref<32x256xf32, #tpu.memory_space<vmem>>, vector<32x256xf32>
    %cst_229 = arith.constant dense<0.000000e+00> : vector<8x256xf32>
    %776 = tpu.matmul %774, %775, %cst_229 {dimension_numbers = #tpu.dot_dimension_numbers<[1], [0], [0], [1], [0, 0, 1, 1], [], []>} : vector<8x32xf32>, vector<32x256xf32>, vector<8x256xf32> -> vector<8x256xf32>
    %c0_230 = arith.constant 0 : index
    %c0_231 = arith.constant 0 : index
    %777 = vector.load %arg12[%c0_230, %c0_231] : memref<64x256xf32, #tpu.memory_space<vmem>>, vector<64x256xf32>
    %cst_232 = arith.constant dense<0.000000e+00> : vector<8x256xf32>
    %778 = tpu.matmul %754, %777, %cst_232 {dimension_numbers = #tpu.dot_dimension_numbers<[1], [0], [0], [1], [0, 0, 1, 1], [], []>} : vector<8x64xf32>, vector<64x256xf32>, vector<8x256xf32> -> vector<8x256xf32>
    %779 = arith.addf %776, %778 : vector<8x256xf32>
    %c0_233 = arith.constant 0 : index
    %c0_234 = arith.constant 0 : index
    %780 = vector.load %arg13[%c0_233, %c0_234] : memref<1x256xf32, #tpu.memory_space<vmem>>, vector<1x256xf32>
    %781 = vector.broadcast %780 : vector<1x256xf32> to vector<8x256xf32>
    %782 = arith.addf %779, %781 : vector<8x256xf32>
    %783 = vector.extract_strided_slice %782 {offsets = [0, 0], sizes = [8, 192], strides = [1, 1]} : vector<8x256xf32> to vector<8x192xf32>
    %784 = arith.negf %783 : vector<8x192xf32>
    %785 = math.exp %784 : vector<8x192xf32>
    %cst_235 = arith.constant 1.000000e+00 : f32
    %786 = vector.broadcast %cst_235 : f32 to vector<8x192xf32>
    %787 = arith.addf %786, %785 : vector<8x192xf32>
    %788 = arith.divf %786, %787 : vector<8x192xf32>
    %789 = vector.extract_strided_slice %788 {offsets = [0, 0], sizes = [8, 64], strides = [1, 1]} : vector<8x192xf32> to vector<8x64xf32>
    %790 = vector.extract_strided_slice %788 {offsets = [0, 64], sizes = [8, 64], strides = [1, 1]} : vector<8x192xf32> to vector<8x64xf32>
    %791 = vector.extract_strided_slice %788 {offsets = [0, 128], sizes = [8, 64], strides = [1, 1]} : vector<8x192xf32> to vector<8x64xf32>
    %792 = vector.extract_strided_slice %782 {offsets = [0, 192], sizes = [8, 64], strides = [1, 1]} : vector<8x256xf32> to vector<8x64xf32>
    %793 = math.tanh %792 : vector<8x64xf32>
    %794 = arith.mulf %790, %752 : vector<8x64xf32>
    %795 = arith.mulf %789, %793 : vector<8x64xf32>
    %796 = arith.addf %794, %795 : vector<8x64xf32>
    %797 = math.tanh %796 : vector<8x64xf32>
    %798 = arith.mulf %791, %797 : vector<8x64xf32>
    %c16_236 = arith.constant 16 : index
    %c0_237 = arith.constant 0 : index
    %799 = vector.load %arg19[%c16_236, %c0_237] : memref<96x64xf32, #tpu.memory_space<vmem>>, vector<8x64xf32>
    tpu.vector_store %arg19[%c16_236, %c0_237], %798 {strides = array<i32>} : memref<96x64xf32, #tpu.memory_space<vmem>>, vector<8x64xf32>,
    %c0_238 = arith.constant 0 : index
    %c0_239 = arith.constant 0 : index
    %800 = vector.load %arg9[%c0_238, %c0_239] : memref<32x128xf32, #tpu.memory_space<vmem>>, vector<32x128xf32>
    %cst_240 = arith.constant dense<0.000000e+00> : vector<8x128xf32>
    %801 = tpu.matmul %774, %800, %cst_240 {dimension_numbers = #tpu.dot_dimension_numbers<[1], [0], [0], [1], [0, 0, 1, 1], [], []>} : vector<8x32xf32>, vector<32x128xf32>, vector<8x128xf32> -> vector<8x128xf32>
    %802 = arith.addf %663, %801 : vector<8x128xf32>
    %803 = vector.extract_strided_slice %802 {offsets = [0, 0], sizes = [8, 96], strides = [1, 1]} : vector<8x128xf32> to vector<8x96xf32>
    %804 = arith.negf %803 : vector<8x96xf32>
    %805 = math.exp %804 : vector<8x96xf32>
    %cst_241 = arith.constant 1.000000e+00 : f32
    %806 = vector.broadcast %cst_241 : f32 to vector<8x96xf32>
    %807 = arith.addf %806, %805 : vector<8x96xf32>
    %808 = arith.divf %806, %807 : vector<8x96xf32>
    %809 = vector.extract_strided_slice %808 {offsets = [0, 0], sizes = [8, 32], strides = [1, 1]} : vector<8x96xf32> to vector<8x32xf32>
    %810 = vector.extract_strided_slice %808 {offsets = [0, 32], sizes = [8, 32], strides = [1, 1]} : vector<8x96xf32> to vector<8x32xf32>
    %811 = vector.extract_strided_slice %808 {offsets = [0, 64], sizes = [8, 32], strides = [1, 1]} : vector<8x96xf32> to vector<8x32xf32>
    %812 = vector.extract_strided_slice %802 {offsets = [0, 96], sizes = [8, 32], strides = [1, 1]} : vector<8x128xf32> to vector<8x32xf32>
    %813 = math.tanh %812 : vector<8x32xf32>
    %814 = arith.mulf %810, %772 : vector<8x32xf32>
    %815 = arith.mulf %809, %813 : vector<8x32xf32>
    %816 = arith.addf %814, %815 : vector<8x32xf32>
    %817 = math.tanh %816 : vector<8x32xf32>
    %818 = arith.mulf %811, %817 : vector<8x32xf32>
    %c0_242 = arith.constant 0 : index
    %c0_243 = arith.constant 0 : index
    %819 = vector.load %arg11[%c0_242, %c0_243] : memref<32x256xf32, #tpu.memory_space<vmem>>, vector<32x256xf32>
    %cst_244 = arith.constant dense<0.000000e+00> : vector<8x256xf32>
    %820 = tpu.matmul %818, %819, %cst_244 {dimension_numbers = #tpu.dot_dimension_numbers<[1], [0], [0], [1], [0, 0, 1, 1], [], []>} : vector<8x32xf32>, vector<32x256xf32>, vector<8x256xf32> -> vector<8x256xf32>
    %c0_245 = arith.constant 0 : index
    %c0_246 = arith.constant 0 : index
    %821 = vector.load %arg12[%c0_245, %c0_246] : memref<64x256xf32, #tpu.memory_space<vmem>>, vector<64x256xf32>
    %cst_247 = arith.constant dense<0.000000e+00> : vector<8x256xf32>
    %822 = tpu.matmul %798, %821, %cst_247 {dimension_numbers = #tpu.dot_dimension_numbers<[1], [0], [0], [1], [0, 0, 1, 1], [], []>} : vector<8x64xf32>, vector<64x256xf32>, vector<8x256xf32> -> vector<8x256xf32>
    %823 = arith.addf %820, %822 : vector<8x256xf32>
    %c0_248 = arith.constant 0 : index
    %c0_249 = arith.constant 0 : index
    %824 = vector.load %arg13[%c0_248, %c0_249] : memref<1x256xf32, #tpu.memory_space<vmem>>, vector<1x256xf32>
    %825 = vector.broadcast %824 : vector<1x256xf32> to vector<8x256xf32>
    %826 = arith.addf %823, %825 : vector<8x256xf32>
    %827 = vector.extract_strided_slice %826 {offsets = [0, 0], sizes = [8, 192], strides = [1, 1]} : vector<8x256xf32> to vector<8x192xf32>
    %828 = arith.negf %827 : vector<8x192xf32>
    %829 = math.exp %828 : vector<8x192xf32>
    %cst_250 = arith.constant 1.000000e+00 : f32
    %830 = vector.broadcast %cst_250 : f32 to vector<8x192xf32>
    %831 = arith.addf %830, %829 : vector<8x192xf32>
    %832 = arith.divf %830, %831 : vector<8x192xf32>
    %833 = vector.extract_strided_slice %832 {offsets = [0, 0], sizes = [8, 64], strides = [1, 1]} : vector<8x192xf32> to vector<8x64xf32>
    %834 = vector.extract_strided_slice %832 {offsets = [0, 64], sizes = [8, 64], strides = [1, 1]} : vector<8x192xf32> to vector<8x64xf32>
    %835 = vector.extract_strided_slice %832 {offsets = [0, 128], sizes = [8, 64], strides = [1, 1]} : vector<8x192xf32> to vector<8x64xf32>
    %836 = vector.extract_strided_slice %826 {offsets = [0, 192], sizes = [8, 64], strides = [1, 1]} : vector<8x256xf32> to vector<8x64xf32>
    %837 = math.tanh %836 : vector<8x64xf32>
    %838 = arith.mulf %834, %796 : vector<8x64xf32>
    %839 = arith.mulf %833, %837 : vector<8x64xf32>
    %840 = arith.addf %838, %839 : vector<8x64xf32>
    %841 = math.tanh %840 : vector<8x64xf32>
    %842 = arith.mulf %835, %841 : vector<8x64xf32>
    %c24_251 = arith.constant 24 : index
    %c0_252 = arith.constant 0 : index
    %843 = vector.load %arg19[%c24_251, %c0_252] : memref<96x64xf32, #tpu.memory_space<vmem>>, vector<8x64xf32>
    tpu.vector_store %arg19[%c24_251, %c0_252], %842 {strides = array<i32>} : memref<96x64xf32, #tpu.memory_space<vmem>>, vector<8x64xf32>,
    %c0_253 = arith.constant 0 : index
    %c0_254 = arith.constant 0 : index
    %844 = vector.load %arg9[%c0_253, %c0_254] : memref<32x128xf32, #tpu.memory_space<vmem>>, vector<32x128xf32>
    %cst_255 = arith.constant dense<0.000000e+00> : vector<8x128xf32>
    %845 = tpu.matmul %818, %844, %cst_255 {dimension_numbers = #tpu.dot_dimension_numbers<[1], [0], [0], [1], [0, 0, 1, 1], [], []>} : vector<8x32xf32>, vector<32x128xf32>, vector<8x128xf32> -> vector<8x128xf32>
    %846 = arith.addf %663, %845 : vector<8x128xf32>
    %847 = vector.extract_strided_slice %846 {offsets = [0, 0], sizes = [8, 96], strides = [1, 1]} : vector<8x128xf32> to vector<8x96xf32>
    %848 = arith.negf %847 : vector<8x96xf32>
    %849 = math.exp %848 : vector<8x96xf32>
    %cst_256 = arith.constant 1.000000e+00 : f32
    %850 = vector.broadcast %cst_256 : f32 to vector<8x96xf32>
    %851 = arith.addf %850, %849 : vector<8x96xf32>
    %852 = arith.divf %850, %851 : vector<8x96xf32>
    %853 = vector.extract_strided_slice %852 {offsets = [0, 0], sizes = [8, 32], strides = [1, 1]} : vector<8x96xf32> to vector<8x32xf32>
    %854 = vector.extract_strided_slice %852 {offsets = [0, 32], sizes = [8, 32], strides = [1, 1]} : vector<8x96xf32> to vector<8x32xf32>
    %855 = vector.extract_strided_slice %852 {offsets = [0, 64], sizes = [8, 32], strides = [1, 1]} : vector<8x96xf32> to vector<8x32xf32>
    %856 = vector.extract_strided_slice %846 {offsets = [0, 96], sizes = [8, 32], strides = [1, 1]} : vector<8x128xf32> to vector<8x32xf32>
    %857 = math.tanh %856 : vector<8x32xf32>
    %858 = arith.mulf %854, %816 : vector<8x32xf32>
    %859 = arith.mulf %853, %857 : vector<8x32xf32>
    %860 = arith.addf %858, %859 : vector<8x32xf32>
    %861 = math.tanh %860 : vector<8x32xf32>
    %862 = arith.mulf %855, %861 : vector<8x32xf32>
    %c0_257 = arith.constant 0 : index
    %c0_258 = arith.constant 0 : index
    %863 = vector.load %arg11[%c0_257, %c0_258] : memref<32x256xf32, #tpu.memory_space<vmem>>, vector<32x256xf32>
    %cst_259 = arith.constant dense<0.000000e+00> : vector<8x256xf32>
    %864 = tpu.matmul %862, %863, %cst_259 {dimension_numbers = #tpu.dot_dimension_numbers<[1], [0], [0], [1], [0, 0, 1, 1], [], []>} : vector<8x32xf32>, vector<32x256xf32>, vector<8x256xf32> -> vector<8x256xf32>
    %c0_260 = arith.constant 0 : index
    %c0_261 = arith.constant 0 : index
    %865 = vector.load %arg12[%c0_260, %c0_261] : memref<64x256xf32, #tpu.memory_space<vmem>>, vector<64x256xf32>
    %cst_262 = arith.constant dense<0.000000e+00> : vector<8x256xf32>
    %866 = tpu.matmul %842, %865, %cst_262 {dimension_numbers = #tpu.dot_dimension_numbers<[1], [0], [0], [1], [0, 0, 1, 1], [], []>} : vector<8x64xf32>, vector<64x256xf32>, vector<8x256xf32> -> vector<8x256xf32>
    %867 = arith.addf %864, %866 : vector<8x256xf32>
    %c0_263 = arith.constant 0 : index
    %c0_264 = arith.constant 0 : index
    %868 = vector.load %arg13[%c0_263, %c0_264] : memref<1x256xf32, #tpu.memory_space<vmem>>, vector<1x256xf32>
    %869 = vector.broadcast %868 : vector<1x256xf32> to vector<8x256xf32>
    %870 = arith.addf %867, %869 : vector<8x256xf32>
    %871 = vector.extract_strided_slice %870 {offsets = [0, 0], sizes = [8, 192], strides = [1, 1]} : vector<8x256xf32> to vector<8x192xf32>
    %872 = arith.negf %871 : vector<8x192xf32>
    %873 = math.exp %872 : vector<8x192xf32>
    %cst_265 = arith.constant 1.000000e+00 : f32
    %874 = vector.broadcast %cst_265 : f32 to vector<8x192xf32>
    %875 = arith.addf %874, %873 : vector<8x192xf32>
    %876 = arith.divf %874, %875 : vector<8x192xf32>
    %877 = vector.extract_strided_slice %876 {offsets = [0, 0], sizes = [8, 64], strides = [1, 1]} : vector<8x192xf32> to vector<8x64xf32>
    %878 = vector.extract_strided_slice %876 {offsets = [0, 64], sizes = [8, 64], strides = [1, 1]} : vector<8x192xf32> to vector<8x64xf32>
    %879 = vector.extract_strided_slice %876 {offsets = [0, 128], sizes = [8, 64], strides = [1, 1]} : vector<8x192xf32> to vector<8x64xf32>
    %880 = vector.extract_strided_slice %870 {offsets = [0, 192], sizes = [8, 64], strides = [1, 1]} : vector<8x256xf32> to vector<8x64xf32>
    %881 = math.tanh %880 : vector<8x64xf32>
    %882 = arith.mulf %878, %840 : vector<8x64xf32>
    %883 = arith.mulf %877, %881 : vector<8x64xf32>
    %884 = arith.addf %882, %883 : vector<8x64xf32>
    %885 = math.tanh %884 : vector<8x64xf32>
    %886 = arith.mulf %879, %885 : vector<8x64xf32>
    %c32_266 = arith.constant 32 : index
    %c0_267 = arith.constant 0 : index
    %887 = vector.load %arg19[%c32_266, %c0_267] : memref<96x64xf32, #tpu.memory_space<vmem>>, vector<8x64xf32>
    tpu.vector_store %arg19[%c32_266, %c0_267], %886 {strides = array<i32>} : memref<96x64xf32, #tpu.memory_space<vmem>>, vector<8x64xf32>,
    %c0_268 = arith.constant 0 : index
    %c0_269 = arith.constant 0 : index
    %888 = vector.load %arg9[%c0_268, %c0_269] : memref<32x128xf32, #tpu.memory_space<vmem>>, vector<32x128xf32>
    %cst_270 = arith.constant dense<0.000000e+00> : vector<8x128xf32>
    %889 = tpu.matmul %862, %888, %cst_270 {dimension_numbers = #tpu.dot_dimension_numbers<[1], [0], [0], [1], [0, 0, 1, 1], [], []>} : vector<8x32xf32>, vector<32x128xf32>, vector<8x128xf32> -> vector<8x128xf32>
    %890 = arith.addf %663, %889 : vector<8x128xf32>
    %891 = vector.extract_strided_slice %890 {offsets = [0, 0], sizes = [8, 96], strides = [1, 1]} : vector<8x128xf32> to vector<8x96xf32>
    %892 = arith.negf %891 : vector<8x96xf32>
    %893 = math.exp %892 : vector<8x96xf32>
    %cst_271 = arith.constant 1.000000e+00 : f32
    %894 = vector.broadcast %cst_271 : f32 to vector<8x96xf32>
    %895 = arith.addf %894, %893 : vector<8x96xf32>
    %896 = arith.divf %894, %895 : vector<8x96xf32>
    %897 = vector.extract_strided_slice %896 {offsets = [0, 0], sizes = [8, 32], strides = [1, 1]} : vector<8x96xf32> to vector<8x32xf32>
    %898 = vector.extract_strided_slice %896 {offsets = [0, 32], sizes = [8, 32], strides = [1, 1]} : vector<8x96xf32> to vector<8x32xf32>
    %899 = vector.extract_strided_slice %896 {offsets = [0, 64], sizes = [8, 32], strides = [1, 1]} : vector<8x96xf32> to vector<8x32xf32>
    %900 = vector.extract_strided_slice %890 {offsets = [0, 96], sizes = [8, 32], strides = [1, 1]} : vector<8x128xf32> to vector<8x32xf32>
    %901 = math.tanh %900 : vector<8x32xf32>
    %902 = arith.mulf %898, %860 : vector<8x32xf32>
    %903 = arith.mulf %897, %901 : vector<8x32xf32>
    %904 = arith.addf %902, %903 : vector<8x32xf32>
    %905 = math.tanh %904 : vector<8x32xf32>
    %906 = arith.mulf %899, %905 : vector<8x32xf32>
    %c0_272 = arith.constant 0 : index
    %c0_273 = arith.constant 0 : index
    %907 = vector.load %arg11[%c0_272, %c0_273] : memref<32x256xf32, #tpu.memory_space<vmem>>, vector<32x256xf32>
    %cst_274 = arith.constant dense<0.000000e+00> : vector<8x256xf32>
    %908 = tpu.matmul %906, %907, %cst_274 {dimension_numbers = #tpu.dot_dimension_numbers<[1], [0], [0], [1], [0, 0, 1, 1], [], []>} : vector<8x32xf32>, vector<32x256xf32>, vector<8x256xf32> -> vector<8x256xf32>
    %c0_275 = arith.constant 0 : index
    %c0_276 = arith.constant 0 : index
    %909 = vector.load %arg12[%c0_275, %c0_276] : memref<64x256xf32, #tpu.memory_space<vmem>>, vector<64x256xf32>
    %cst_277 = arith.constant dense<0.000000e+00> : vector<8x256xf32>
    %910 = tpu.matmul %886, %909, %cst_277 {dimension_numbers = #tpu.dot_dimension_numbers<[1], [0], [0], [1], [0, 0, 1, 1], [], []>} : vector<8x64xf32>, vector<64x256xf32>, vector<8x256xf32> -> vector<8x256xf32>
    %911 = arith.addf %908, %910 : vector<8x256xf32>
    %c0_278 = arith.constant 0 : index
    %c0_279 = arith.constant 0 : index
    %912 = vector.load %arg13[%c0_278, %c0_279] : memref<1x256xf32, #tpu.memory_space<vmem>>, vector<1x256xf32>
    %913 = vector.broadcast %912 : vector<1x256xf32> to vector<8x256xf32>
    %914 = arith.addf %911, %913 : vector<8x256xf32>
    %915 = vector.extract_strided_slice %914 {offsets = [0, 0], sizes = [8, 192], strides = [1, 1]} : vector<8x256xf32> to vector<8x192xf32>
    %916 = arith.negf %915 : vector<8x192xf32>
    %917 = math.exp %916 : vector<8x192xf32>
    %cst_280 = arith.constant 1.000000e+00 : f32
    %918 = vector.broadcast %cst_280 : f32 to vector<8x192xf32>
    %919 = arith.addf %918, %917 : vector<8x192xf32>
    %920 = arith.divf %918, %919 : vector<8x192xf32>
    %921 = vector.extract_strided_slice %920 {offsets = [0, 0], sizes = [8, 64], strides = [1, 1]} : vector<8x192xf32> to vector<8x64xf32>
    %922 = vector.extract_strided_slice %920 {offsets = [0, 64], sizes = [8, 64], strides = [1, 1]} : vector<8x192xf32> to vector<8x64xf32>
    %923 = vector.extract_strided_slice %920 {offsets = [0, 128], sizes = [8, 64], strides = [1, 1]} : vector<8x192xf32> to vector<8x64xf32>
    %924 = vector.extract_strided_slice %914 {offsets = [0, 192], sizes = [8, 64], strides = [1, 1]} : vector<8x256xf32> to vector<8x64xf32>
    %925 = math.tanh %924 : vector<8x64xf32>
    %926 = arith.mulf %922, %884 : vector<8x64xf32>
    %927 = arith.mulf %921, %925 : vector<8x64xf32>
    %928 = arith.addf %926, %927 : vector<8x64xf32>
    %929 = math.tanh %928 : vector<8x64xf32>
    %930 = arith.mulf %923, %929 : vector<8x64xf32>
    %c40_281 = arith.constant 40 : index
    %c0_282 = arith.constant 0 : index
    %931 = vector.load %arg19[%c40_281, %c0_282] : memref<96x64xf32, #tpu.memory_space<vmem>>, vector<8x64xf32>
    tpu.vector_store %arg19[%c40_281, %c0_282], %930 {strides = array<i32>} : memref<96x64xf32, #tpu.memory_space<vmem>>, vector<8x64xf32>,
    %c0_283 = arith.constant 0 : index
    %c0_284 = arith.constant 0 : index
    %932 = vector.load %arg9[%c0_283, %c0_284] : memref<32x128xf32, #tpu.memory_space<vmem>>, vector<32x128xf32>
    %cst_285 = arith.constant dense<0.000000e+00> : vector<8x128xf32>
    %933 = tpu.matmul %906, %932, %cst_285 {dimension_numbers = #tpu.dot_dimension_numbers<[1], [0], [0], [1], [0, 0, 1, 1], [], []>} : vector<8x32xf32>, vector<32x128xf32>, vector<8x128xf32> -> vector<8x128xf32>
    %934 = arith.addf %663, %933 : vector<8x128xf32>
    %935 = vector.extract_strided_slice %934 {offsets = [0, 0], sizes = [8, 96], strides = [1, 1]} : vector<8x128xf32> to vector<8x96xf32>
    %936 = arith.negf %935 : vector<8x96xf32>
    %937 = math.exp %936 : vector<8x96xf32>
    %cst_286 = arith.constant 1.000000e+00 : f32
    %938 = vector.broadcast %cst_286 : f32 to vector<8x96xf32>
    %939 = arith.addf %938, %937 : vector<8x96xf32>
    %940 = arith.divf %938, %939 : vector<8x96xf32>
    %941 = vector.extract_strided_slice %940 {offsets = [0, 0], sizes = [8, 32], strides = [1, 1]} : vector<8x96xf32> to vector<8x32xf32>
    %942 = vector.extract_strided_slice %940 {offsets = [0, 32], sizes = [8, 32], strides = [1, 1]} : vector<8x96xf32> to vector<8x32xf32>
    %943 = vector.extract_strided_slice %940 {offsets = [0, 64], sizes = [8, 32], strides = [1, 1]} : vector<8x96xf32> to vector<8x32xf32>
    %944 = vector.extract_strided_slice %934 {offsets = [0, 96], sizes = [8, 32], strides = [1, 1]} : vector<8x128xf32> to vector<8x32xf32>
    %945 = math.tanh %944 : vector<8x32xf32>
    %946 = arith.mulf %942, %904 : vector<8x32xf32>
    %947 = arith.mulf %941, %945 : vector<8x32xf32>
    %948 = arith.addf %946, %947 : vector<8x32xf32>
    %949 = math.tanh %948 : vector<8x32xf32>
    %950 = arith.mulf %943, %949 : vector<8x32xf32>
    %c0_287 = arith.constant 0 : index
    %c0_288 = arith.constant 0 : index
    %951 = vector.load %arg11[%c0_287, %c0_288] : memref<32x256xf32, #tpu.memory_space<vmem>>, vector<32x256xf32>
    %cst_289 = arith.constant dense<0.000000e+00> : vector<8x256xf32>
    %952 = tpu.matmul %950, %951, %cst_289 {dimension_numbers = #tpu.dot_dimension_numbers<[1], [0], [0], [1], [0, 0, 1, 1], [], []>} : vector<8x32xf32>, vector<32x256xf32>, vector<8x256xf32> -> vector<8x256xf32>
    %c0_290 = arith.constant 0 : index
    %c0_291 = arith.constant 0 : index
    %953 = vector.load %arg12[%c0_290, %c0_291] : memref<64x256xf32, #tpu.memory_space<vmem>>, vector<64x256xf32>
    %cst_292 = arith.constant dense<0.000000e+00> : vector<8x256xf32>
    %954 = tpu.matmul %930, %953, %cst_292 {dimension_numbers = #tpu.dot_dimension_numbers<[1], [0], [0], [1], [0, 0, 1, 1], [], []>} : vector<8x64xf32>, vector<64x256xf32>, vector<8x256xf32> -> vector<8x256xf32>
    %955 = arith.addf %952, %954 : vector<8x256xf32>
    %c0_293 = arith.constant 0 : index
    %c0_294 = arith.constant 0 : index
    %956 = vector.load %arg13[%c0_293, %c0_294] : memref<1x256xf32, #tpu.memory_space<vmem>>, vector<1x256xf32>
    %957 = vector.broadcast %956 : vector<1x256xf32> to vector<8x256xf32>
    %958 = arith.addf %955, %957 : vector<8x256xf32>
    %959 = vector.extract_strided_slice %958 {offsets = [0, 0], sizes = [8, 192], strides = [1, 1]} : vector<8x256xf32> to vector<8x192xf32>
    %960 = arith.negf %959 : vector<8x192xf32>
    %961 = math.exp %960 : vector<8x192xf32>
    %cst_295 = arith.constant 1.000000e+00 : f32
    %962 = vector.broadcast %cst_295 : f32 to vector<8x192xf32>
    %963 = arith.addf %962, %961 : vector<8x192xf32>
    %964 = arith.divf %962, %963 : vector<8x192xf32>
    %965 = vector.extract_strided_slice %964 {offsets = [0, 0], sizes = [8, 64], strides = [1, 1]} : vector<8x192xf32> to vector<8x64xf32>
    %966 = vector.extract_strided_slice %964 {offsets = [0, 64], sizes = [8, 64], strides = [1, 1]} : vector<8x192xf32> to vector<8x64xf32>
    %967 = vector.extract_strided_slice %964 {offsets = [0, 128], sizes = [8, 64], strides = [1, 1]} : vector<8x192xf32> to vector<8x64xf32>
    %968 = vector.extract_strided_slice %958 {offsets = [0, 192], sizes = [8, 64], strides = [1, 1]} : vector<8x256xf32> to vector<8x64xf32>
    %969 = math.tanh %968 : vector<8x64xf32>
    %970 = arith.mulf %966, %928 : vector<8x64xf32>
    %971 = arith.mulf %965, %969 : vector<8x64xf32>
    %972 = arith.addf %970, %971 : vector<8x64xf32>
    %973 = math.tanh %972 : vector<8x64xf32>
    %974 = arith.mulf %967, %973 : vector<8x64xf32>
    %c48_296 = arith.constant 48 : index
    %c0_297 = arith.constant 0 : index
    %975 = vector.load %arg19[%c48_296, %c0_297] : memref<96x64xf32, #tpu.memory_space<vmem>>, vector<8x64xf32>
    tpu.vector_store %arg19[%c48_296, %c0_297], %974 {strides = array<i32>} : memref<96x64xf32, #tpu.memory_space<vmem>>, vector<8x64xf32>,
    %c0_298 = arith.constant 0 : index
    %c0_299 = arith.constant 0 : index
    %976 = vector.load %arg9[%c0_298, %c0_299] : memref<32x128xf32, #tpu.memory_space<vmem>>, vector<32x128xf32>
    %cst_300 = arith.constant dense<0.000000e+00> : vector<8x128xf32>
    %977 = tpu.matmul %950, %976, %cst_300 {dimension_numbers = #tpu.dot_dimension_numbers<[1], [0], [0], [1], [0, 0, 1, 1], [], []>} : vector<8x32xf32>, vector<32x128xf32>, vector<8x128xf32> -> vector<8x128xf32>
    %978 = arith.addf %663, %977 : vector<8x128xf32>
    %979 = vector.extract_strided_slice %978 {offsets = [0, 0], sizes = [8, 96], strides = [1, 1]} : vector<8x128xf32> to vector<8x96xf32>
    %980 = arith.negf %979 : vector<8x96xf32>
    %981 = math.exp %980 : vector<8x96xf32>
    %cst_301 = arith.constant 1.000000e+00 : f32
    %982 = vector.broadcast %cst_301 : f32 to vector<8x96xf32>
    %983 = arith.addf %982, %981 : vector<8x96xf32>
    %984 = arith.divf %982, %983 : vector<8x96xf32>
    %985 = vector.extract_strided_slice %984 {offsets = [0, 0], sizes = [8, 32], strides = [1, 1]} : vector<8x96xf32> to vector<8x32xf32>
    %986 = vector.extract_strided_slice %984 {offsets = [0, 32], sizes = [8, 32], strides = [1, 1]} : vector<8x96xf32> to vector<8x32xf32>
    %987 = vector.extract_strided_slice %984 {offsets = [0, 64], sizes = [8, 32], strides = [1, 1]} : vector<8x96xf32> to vector<8x32xf32>
    %988 = vector.extract_strided_slice %978 {offsets = [0, 96], sizes = [8, 32], strides = [1, 1]} : vector<8x128xf32> to vector<8x32xf32>
    %989 = math.tanh %988 : vector<8x32xf32>
    %990 = arith.mulf %986, %948 : vector<8x32xf32>
    %991 = arith.mulf %985, %989 : vector<8x32xf32>
    %992 = arith.addf %990, %991 : vector<8x32xf32>
    %993 = math.tanh %992 : vector<8x32xf32>
    %994 = arith.mulf %987, %993 : vector<8x32xf32>
    %c0_302 = arith.constant 0 : index
    %c0_303 = arith.constant 0 : index
    %995 = vector.load %arg11[%c0_302, %c0_303] : memref<32x256xf32, #tpu.memory_space<vmem>>, vector<32x256xf32>
    %cst_304 = arith.constant dense<0.000000e+00> : vector<8x256xf32>
    %996 = tpu.matmul %994, %995, %cst_304 {dimension_numbers = #tpu.dot_dimension_numbers<[1], [0], [0], [1], [0, 0, 1, 1], [], []>} : vector<8x32xf32>, vector<32x256xf32>, vector<8x256xf32> -> vector<8x256xf32>
    %c0_305 = arith.constant 0 : index
    %c0_306 = arith.constant 0 : index
    %997 = vector.load %arg12[%c0_305, %c0_306] : memref<64x256xf32, #tpu.memory_space<vmem>>, vector<64x256xf32>
    %cst_307 = arith.constant dense<0.000000e+00> : vector<8x256xf32>
    %998 = tpu.matmul %974, %997, %cst_307 {dimension_numbers = #tpu.dot_dimension_numbers<[1], [0], [0], [1], [0, 0, 1, 1], [], []>} : vector<8x64xf32>, vector<64x256xf32>, vector<8x256xf32> -> vector<8x256xf32>
    %999 = arith.addf %996, %998 : vector<8x256xf32>
    %c0_308 = arith.constant 0 : index
    %c0_309 = arith.constant 0 : index
    %1000 = vector.load %arg13[%c0_308, %c0_309] : memref<1x256xf32, #tpu.memory_space<vmem>>, vector<1x256xf32>
    %1001 = vector.broadcast %1000 : vector<1x256xf32> to vector<8x256xf32>
    %1002 = arith.addf %999, %1001 : vector<8x256xf32>
    %1003 = vector.extract_strided_slice %1002 {offsets = [0, 0], sizes = [8, 192], strides = [1, 1]} : vector<8x256xf32> to vector<8x192xf32>
    %1004 = arith.negf %1003 : vector<8x192xf32>
    %1005 = math.exp %1004 : vector<8x192xf32>
    %cst_310 = arith.constant 1.000000e+00 : f32
    %1006 = vector.broadcast %cst_310 : f32 to vector<8x192xf32>
    %1007 = arith.addf %1006, %1005 : vector<8x192xf32>
    %1008 = arith.divf %1006, %1007 : vector<8x192xf32>
    %1009 = vector.extract_strided_slice %1008 {offsets = [0, 0], sizes = [8, 64], strides = [1, 1]} : vector<8x192xf32> to vector<8x64xf32>
    %1010 = vector.extract_strided_slice %1008 {offsets = [0, 64], sizes = [8, 64], strides = [1, 1]} : vector<8x192xf32> to vector<8x64xf32>
    %1011 = vector.extract_strided_slice %1008 {offsets = [0, 128], sizes = [8, 64], strides = [1, 1]} : vector<8x192xf32> to vector<8x64xf32>
    %1012 = vector.extract_strided_slice %1002 {offsets = [0, 192], sizes = [8, 64], strides = [1, 1]} : vector<8x256xf32> to vector<8x64xf32>
    %1013 = math.tanh %1012 : vector<8x64xf32>
    %1014 = arith.mulf %1010, %972 : vector<8x64xf32>
    %1015 = arith.mulf %1009, %1013 : vector<8x64xf32>
    %1016 = arith.addf %1014, %1015 : vector<8x64xf32>
    %1017 = math.tanh %1016 : vector<8x64xf32>
    %1018 = arith.mulf %1011, %1017 : vector<8x64xf32>
    %c56_311 = arith.constant 56 : index
    %c0_312 = arith.constant 0 : index
    %1019 = vector.load %arg19[%c56_311, %c0_312] : memref<96x64xf32, #tpu.memory_space<vmem>>, vector<8x64xf32>
    tpu.vector_store %arg19[%c56_311, %c0_312], %1018 {strides = array<i32>} : memref<96x64xf32, #tpu.memory_space<vmem>>, vector<8x64xf32>,
    %c0_313 = arith.constant 0 : index
    %c0_314 = arith.constant 0 : index
    %1020 = vector.load %arg9[%c0_313, %c0_314] : memref<32x128xf32, #tpu.memory_space<vmem>>, vector<32x128xf32>
    %cst_315 = arith.constant dense<0.000000e+00> : vector<8x128xf32>
    %1021 = tpu.matmul %994, %1020, %cst_315 {dimension_numbers = #tpu.dot_dimension_numbers<[1], [0], [0], [1], [0, 0, 1, 1], [], []>} : vector<8x32xf32>, vector<32x128xf32>, vector<8x128xf32> -> vector<8x128xf32>
    %1022 = arith.addf %663, %1021 : vector<8x128xf32>
    %1023 = vector.extract_strided_slice %1022 {offsets = [0, 0], sizes = [8, 96], strides = [1, 1]} : vector<8x128xf32> to vector<8x96xf32>
    %1024 = arith.negf %1023 : vector<8x96xf32>
    %1025 = math.exp %1024 : vector<8x96xf32>
    %cst_316 = arith.constant 1.000000e+00 : f32
    %1026 = vector.broadcast %cst_316 : f32 to vector<8x96xf32>
    %1027 = arith.addf %1026, %1025 : vector<8x96xf32>
    %1028 = arith.divf %1026, %1027 : vector<8x96xf32>
    %1029 = vector.extract_strided_slice %1028 {offsets = [0, 0], sizes = [8, 32], strides = [1, 1]} : vector<8x96xf32> to vector<8x32xf32>
    %1030 = vector.extract_strided_slice %1028 {offsets = [0, 32], sizes = [8, 32], strides = [1, 1]} : vector<8x96xf32> to vector<8x32xf32>
    %1031 = vector.extract_strided_slice %1028 {offsets = [0, 64], sizes = [8, 32], strides = [1, 1]} : vector<8x96xf32> to vector<8x32xf32>
    %1032 = vector.extract_strided_slice %1022 {offsets = [0, 96], sizes = [8, 32], strides = [1, 1]} : vector<8x128xf32> to vector<8x32xf32>
    %1033 = math.tanh %1032 : vector<8x32xf32>
    %1034 = arith.mulf %1030, %992 : vector<8x32xf32>
    %1035 = arith.mulf %1029, %1033 : vector<8x32xf32>
    %1036 = arith.addf %1034, %1035 : vector<8x32xf32>
    %1037 = math.tanh %1036 : vector<8x32xf32>
    %1038 = arith.mulf %1031, %1037 : vector<8x32xf32>
    %c0_317 = arith.constant 0 : index
    %c0_318 = arith.constant 0 : index
    %1039 = vector.load %arg11[%c0_317, %c0_318] : memref<32x256xf32, #tpu.memory_space<vmem>>, vector<32x256xf32>
    %cst_319 = arith.constant dense<0.000000e+00> : vector<8x256xf32>
    %1040 = tpu.matmul %1038, %1039, %cst_319 {dimension_numbers = #tpu.dot_dimension_numbers<[1], [0], [0], [1], [0, 0, 1, 1], [], []>} : vector<8x32xf32>, vector<32x256xf32>, vector<8x256xf32> -> vector<8x256xf32>
    %c0_320 = arith.constant 0 : index
    %c0_321 = arith.constant 0 : index
    %1041 = vector.load %arg12[%c0_320, %c0_321] : memref<64x256xf32, #tpu.memory_space<vmem>>, vector<64x256xf32>
    %cst_322 = arith.constant dense<0.000000e+00> : vector<8x256xf32>
    %1042 = tpu.matmul %1018, %1041, %cst_322 {dimension_numbers = #tpu.dot_dimension_numbers<[1], [0], [0], [1], [0, 0, 1, 1], [], []>} : vector<8x64xf32>, vector<64x256xf32>, vector<8x256xf32> -> vector<8x256xf32>
    %1043 = arith.addf %1040, %1042 : vector<8x256xf32>
    %c0_323 = arith.constant 0 : index
    %c0_324 = arith.constant 0 : index
    %1044 = vector.load %arg13[%c0_323, %c0_324] : memref<1x256xf32, #tpu.memory_space<vmem>>, vector<1x256xf32>
    %1045 = vector.broadcast %1044 : vector<1x256xf32> to vector<8x256xf32>
    %1046 = arith.addf %1043, %1045 : vector<8x256xf32>
    %1047 = vector.extract_strided_slice %1046 {offsets = [0, 0], sizes = [8, 192], strides = [1, 1]} : vector<8x256xf32> to vector<8x192xf32>
    %1048 = arith.negf %1047 : vector<8x192xf32>
    %1049 = math.exp %1048 : vector<8x192xf32>
    %cst_325 = arith.constant 1.000000e+00 : f32
    %1050 = vector.broadcast %cst_325 : f32 to vector<8x192xf32>
    %1051 = arith.addf %1050, %1049 : vector<8x192xf32>
    %1052 = arith.divf %1050, %1051 : vector<8x192xf32>
    %1053 = vector.extract_strided_slice %1052 {offsets = [0, 0], sizes = [8, 64], strides = [1, 1]} : vector<8x192xf32> to vector<8x64xf32>
    %1054 = vector.extract_strided_slice %1052 {offsets = [0, 64], sizes = [8, 64], strides = [1, 1]} : vector<8x192xf32> to vector<8x64xf32>
    %1055 = vector.extract_strided_slice %1052 {offsets = [0, 128], sizes = [8, 64], strides = [1, 1]} : vector<8x192xf32> to vector<8x64xf32>
    %1056 = vector.extract_strided_slice %1046 {offsets = [0, 192], sizes = [8, 64], strides = [1, 1]} : vector<8x256xf32> to vector<8x64xf32>
    %1057 = math.tanh %1056 : vector<8x64xf32>
    %1058 = arith.mulf %1054, %1016 : vector<8x64xf32>
    %1059 = arith.mulf %1053, %1057 : vector<8x64xf32>
    %1060 = arith.addf %1058, %1059 : vector<8x64xf32>
    %1061 = math.tanh %1060 : vector<8x64xf32>
    %1062 = arith.mulf %1055, %1061 : vector<8x64xf32>
    %c64_326 = arith.constant 64 : index
    %c0_327 = arith.constant 0 : index
    %1063 = vector.load %arg19[%c64_326, %c0_327] : memref<96x64xf32, #tpu.memory_space<vmem>>, vector<8x64xf32>
    tpu.vector_store %arg19[%c64_326, %c0_327], %1062 {strides = array<i32>} : memref<96x64xf32, #tpu.memory_space<vmem>>, vector<8x64xf32>,
    %c0_328 = arith.constant 0 : index
    %c0_329 = arith.constant 0 : index
    %1064 = vector.load %arg9[%c0_328, %c0_329] : memref<32x128xf32, #tpu.memory_space<vmem>>, vector<32x128xf32>
    %cst_330 = arith.constant dense<0.000000e+00> : vector<8x128xf32>
    %1065 = tpu.matmul %1038, %1064, %cst_330 {dimension_numbers = #tpu.dot_dimension_numbers<[1], [0], [0], [1], [0, 0, 1, 1], [], []>} : vector<8x32xf32>, vector<32x128xf32>, vector<8x128xf32> -> vector<8x128xf32>
    %1066 = arith.addf %663, %1065 : vector<8x128xf32>
    %1067 = vector.extract_strided_slice %1066 {offsets = [0, 0], sizes = [8, 96], strides = [1, 1]} : vector<8x128xf32> to vector<8x96xf32>
    %1068 = arith.negf %1067 : vector<8x96xf32>
    %1069 = math.exp %1068 : vector<8x96xf32>
    %cst_331 = arith.constant 1.000000e+00 : f32
    %1070 = vector.broadcast %cst_331 : f32 to vector<8x96xf32>
    %1071 = arith.addf %1070, %1069 : vector<8x96xf32>
    %1072 = arith.divf %1070, %1071 : vector<8x96xf32>
    %1073 = vector.extract_strided_slice %1072 {offsets = [0, 0], sizes = [8, 32], strides = [1, 1]} : vector<8x96xf32> to vector<8x32xf32>
    %1074 = vector.extract_strided_slice %1072 {offsets = [0, 32], sizes = [8, 32], strides = [1, 1]} : vector<8x96xf32> to vector<8x32xf32>
    %1075 = vector.extract_strided_slice %1072 {offsets = [0, 64], sizes = [8, 32], strides = [1, 1]} : vector<8x96xf32> to vector<8x32xf32>
    %1076 = vector.extract_strided_slice %1066 {offsets = [0, 96], sizes = [8, 32], strides = [1, 1]} : vector<8x128xf32> to vector<8x32xf32>
    %1077 = math.tanh %1076 : vector<8x32xf32>
    %1078 = arith.mulf %1074, %1036 : vector<8x32xf32>
    %1079 = arith.mulf %1073, %1077 : vector<8x32xf32>
    %1080 = arith.addf %1078, %1079 : vector<8x32xf32>
    %1081 = math.tanh %1080 : vector<8x32xf32>
    %1082 = arith.mulf %1075, %1081 : vector<8x32xf32>
    %c0_332 = arith.constant 0 : index
    %c0_333 = arith.constant 0 : index
    %1083 = vector.load %arg11[%c0_332, %c0_333] : memref<32x256xf32, #tpu.memory_space<vmem>>, vector<32x256xf32>
    %cst_334 = arith.constant dense<0.000000e+00> : vector<8x256xf32>
    %1084 = tpu.matmul %1082, %1083, %cst_334 {dimension_numbers = #tpu.dot_dimension_numbers<[1], [0], [0], [1], [0, 0, 1, 1], [], []>} : vector<8x32xf32>, vector<32x256xf32>, vector<8x256xf32> -> vector<8x256xf32>
    %c0_335 = arith.constant 0 : index
    %c0_336 = arith.constant 0 : index
    %1085 = vector.load %arg12[%c0_335, %c0_336] : memref<64x256xf32, #tpu.memory_space<vmem>>, vector<64x256xf32>
    %cst_337 = arith.constant dense<0.000000e+00> : vector<8x256xf32>
    %1086 = tpu.matmul %1062, %1085, %cst_337 {dimension_numbers = #tpu.dot_dimension_numbers<[1], [0], [0], [1], [0, 0, 1, 1], [], []>} : vector<8x64xf32>, vector<64x256xf32>, vector<8x256xf32> -> vector<8x256xf32>
    %1087 = arith.addf %1084, %1086 : vector<8x256xf32>
    %c0_338 = arith.constant 0 : index
    %c0_339 = arith.constant 0 : index
    %1088 = vector.load %arg13[%c0_338, %c0_339] : memref<1x256xf32, #tpu.memory_space<vmem>>, vector<1x256xf32>
    %1089 = vector.broadcast %1088 : vector<1x256xf32> to vector<8x256xf32>
    %1090 = arith.addf %1087, %1089 : vector<8x256xf32>
    %1091 = vector.extract_strided_slice %1090 {offsets = [0, 0], sizes = [8, 192], strides = [1, 1]} : vector<8x256xf32> to vector<8x192xf32>
    %1092 = arith.negf %1091 : vector<8x192xf32>
    %1093 = math.exp %1092 : vector<8x192xf32>
    %cst_340 = arith.constant 1.000000e+00 : f32
    %1094 = vector.broadcast %cst_340 : f32 to vector<8x192xf32>
    %1095 = arith.addf %1094, %1093 : vector<8x192xf32>
    %1096 = arith.divf %1094, %1095 : vector<8x192xf32>
    %1097 = vector.extract_strided_slice %1096 {offsets = [0, 0], sizes = [8, 64], strides = [1, 1]} : vector<8x192xf32> to vector<8x64xf32>
    %1098 = vector.extract_strided_slice %1096 {offsets = [0, 64], sizes = [8, 64], strides = [1, 1]} : vector<8x192xf32> to vector<8x64xf32>
    %1099 = vector.extract_strided_slice %1096 {offsets = [0, 128], sizes = [8, 64], strides = [1, 1]} : vector<8x192xf32> to vector<8x64xf32>
    %1100 = vector.extract_strided_slice %1090 {offsets = [0, 192], sizes = [8, 64], strides = [1, 1]} : vector<8x256xf32> to vector<8x64xf32>
    %1101 = math.tanh %1100 : vector<8x64xf32>
    %1102 = arith.mulf %1098, %1060 : vector<8x64xf32>
    %1103 = arith.mulf %1097, %1101 : vector<8x64xf32>
    %1104 = arith.addf %1102, %1103 : vector<8x64xf32>
    %1105 = math.tanh %1104 : vector<8x64xf32>
    %1106 = arith.mulf %1099, %1105 : vector<8x64xf32>
    %c72_341 = arith.constant 72 : index
    %c0_342 = arith.constant 0 : index
    %1107 = vector.load %arg19[%c72_341, %c0_342] : memref<96x64xf32, #tpu.memory_space<vmem>>, vector<8x64xf32>
    tpu.vector_store %arg19[%c72_341, %c0_342], %1106 {strides = array<i32>} : memref<96x64xf32, #tpu.memory_space<vmem>>, vector<8x64xf32>,
    %c0_343 = arith.constant 0 : index
    %c0_344 = arith.constant 0 : index
    %1108 = vector.load %arg9[%c0_343, %c0_344] : memref<32x128xf32, #tpu.memory_space<vmem>>, vector<32x128xf32>
    %cst_345 = arith.constant dense<0.000000e+00> : vector<8x128xf32>
    %1109 = tpu.matmul %1082, %1108, %cst_345 {dimension_numbers = #tpu.dot_dimension_numbers<[1], [0], [0], [1], [0, 0, 1, 1], [], []>} : vector<8x32xf32>, vector<32x128xf32>, vector<8x128xf32> -> vector<8x128xf32>
    %1110 = arith.addf %663, %1109 : vector<8x128xf32>
    %1111 = vector.extract_strided_slice %1110 {offsets = [0, 0], sizes = [8, 96], strides = [1, 1]} : vector<8x128xf32> to vector<8x96xf32>
    %1112 = arith.negf %1111 : vector<8x96xf32>
    %1113 = math.exp %1112 : vector<8x96xf32>
    %cst_346 = arith.constant 1.000000e+00 : f32
    %1114 = vector.broadcast %cst_346 : f32 to vector<8x96xf32>
    %1115 = arith.addf %1114, %1113 : vector<8x96xf32>
    %1116 = arith.divf %1114, %1115 : vector<8x96xf32>
    %1117 = vector.extract_strided_slice %1116 {offsets = [0, 0], sizes = [8, 32], strides = [1, 1]} : vector<8x96xf32> to vector<8x32xf32>
    %1118 = vector.extract_strided_slice %1116 {offsets = [0, 32], sizes = [8, 32], strides = [1, 1]} : vector<8x96xf32> to vector<8x32xf32>
    %1119 = vector.extract_strided_slice %1116 {offsets = [0, 64], sizes = [8, 32], strides = [1, 1]} : vector<8x96xf32> to vector<8x32xf32>
    %1120 = vector.extract_strided_slice %1110 {offsets = [0, 96], sizes = [8, 32], strides = [1, 1]} : vector<8x128xf32> to vector<8x32xf32>
    %1121 = math.tanh %1120 : vector<8x32xf32>
    %1122 = arith.mulf %1118, %1080 : vector<8x32xf32>
    %1123 = arith.mulf %1117, %1121 : vector<8x32xf32>
    %1124 = arith.addf %1122, %1123 : vector<8x32xf32>
    %1125 = math.tanh %1124 : vector<8x32xf32>
    %1126 = arith.mulf %1119, %1125 : vector<8x32xf32>
    %c0_347 = arith.constant 0 : index
    %c0_348 = arith.constant 0 : index
    %1127 = vector.load %arg11[%c0_347, %c0_348] : memref<32x256xf32, #tpu.memory_space<vmem>>, vector<32x256xf32>
    %cst_349 = arith.constant dense<0.000000e+00> : vector<8x256xf32>
    %1128 = tpu.matmul %1126, %1127, %cst_349 {dimension_numbers = #tpu.dot_dimension_numbers<[1], [0], [0], [1], [0, 0, 1, 1], [], []>} : vector<8x32xf32>, vector<32x256xf32>, vector<8x256xf32> -> vector<8x256xf32>
    %c0_350 = arith.constant 0 : index
    %c0_351 = arith.constant 0 : index
    %1129 = vector.load %arg12[%c0_350, %c0_351] : memref<64x256xf32, #tpu.memory_space<vmem>>, vector<64x256xf32>
    %cst_352 = arith.constant dense<0.000000e+00> : vector<8x256xf32>
    %1130 = tpu.matmul %1106, %1129, %cst_352 {dimension_numbers = #tpu.dot_dimension_numbers<[1], [0], [0], [1], [0, 0, 1, 1], [], []>} : vector<8x64xf32>, vector<64x256xf32>, vector<8x256xf32> -> vector<8x256xf32>
    %1131 = arith.addf %1128, %1130 : vector<8x256xf32>
    %c0_353 = arith.constant 0 : index
    %c0_354 = arith.constant 0 : index
    %1132 = vector.load %arg13[%c0_353, %c0_354] : memref<1x256xf32, #tpu.memory_space<vmem>>, vector<1x256xf32>
    %1133 = vector.broadcast %1132 : vector<1x256xf32> to vector<8x256xf32>
    %1134 = arith.addf %1131, %1133 : vector<8x256xf32>
    %1135 = vector.extract_strided_slice %1134 {offsets = [0, 0], sizes = [8, 192], strides = [1, 1]} : vector<8x256xf32> to vector<8x192xf32>
    %1136 = arith.negf %1135 : vector<8x192xf32>
    %1137 = math.exp %1136 : vector<8x192xf32>
    %cst_355 = arith.constant 1.000000e+00 : f32
    %1138 = vector.broadcast %cst_355 : f32 to vector<8x192xf32>
    %1139 = arith.addf %1138, %1137 : vector<8x192xf32>
    %1140 = arith.divf %1138, %1139 : vector<8x192xf32>
    %1141 = vector.extract_strided_slice %1140 {offsets = [0, 0], sizes = [8, 64], strides = [1, 1]} : vector<8x192xf32> to vector<8x64xf32>
    %1142 = vector.extract_strided_slice %1140 {offsets = [0, 64], sizes = [8, 64], strides = [1, 1]} : vector<8x192xf32> to vector<8x64xf32>
    %1143 = vector.extract_strided_slice %1140 {offsets = [0, 128], sizes = [8, 64], strides = [1, 1]} : vector<8x192xf32> to vector<8x64xf32>
    %1144 = vector.extract_strided_slice %1134 {offsets = [0, 192], sizes = [8, 64], strides = [1, 1]} : vector<8x256xf32> to vector<8x64xf32>
    %1145 = math.tanh %1144 : vector<8x64xf32>
    %1146 = arith.mulf %1142, %1104 : vector<8x64xf32>
    %1147 = arith.mulf %1141, %1145 : vector<8x64xf32>
    %1148 = arith.addf %1146, %1147 : vector<8x64xf32>
    %1149 = math.tanh %1148 : vector<8x64xf32>
    %1150 = arith.mulf %1143, %1149 : vector<8x64xf32>
    %c80_356 = arith.constant 80 : index
    %c0_357 = arith.constant 0 : index
    %1151 = vector.load %arg19[%c80_356, %c0_357] : memref<96x64xf32, #tpu.memory_space<vmem>>, vector<8x64xf32>
    tpu.vector_store %arg19[%c80_356, %c0_357], %1150 {strides = array<i32>} : memref<96x64xf32, #tpu.memory_space<vmem>>, vector<8x64xf32>,
    %c0_358 = arith.constant 0 : index
    %c0_359 = arith.constant 0 : index
    %1152 = vector.load %arg9[%c0_358, %c0_359] : memref<32x128xf32, #tpu.memory_space<vmem>>, vector<32x128xf32>
    %cst_360 = arith.constant dense<0.000000e+00> : vector<8x128xf32>
    %1153 = tpu.matmul %1126, %1152, %cst_360 {dimension_numbers = #tpu.dot_dimension_numbers<[1], [0], [0], [1], [0, 0, 1, 1], [], []>} : vector<8x32xf32>, vector<32x128xf32>, vector<8x128xf32> -> vector<8x128xf32>
    %1154 = arith.addf %663, %1153 : vector<8x128xf32>
    %1155 = vector.extract_strided_slice %1154 {offsets = [0, 0], sizes = [8, 96], strides = [1, 1]} : vector<8x128xf32> to vector<8x96xf32>
    %1156 = arith.negf %1155 : vector<8x96xf32>
    %1157 = math.exp %1156 : vector<8x96xf32>
    %cst_361 = arith.constant 1.000000e+00 : f32
    %1158 = vector.broadcast %cst_361 : f32 to vector<8x96xf32>
    %1159 = arith.addf %1158, %1157 : vector<8x96xf32>
    %1160 = arith.divf %1158, %1159 : vector<8x96xf32>
    %1161 = vector.extract_strided_slice %1160 {offsets = [0, 0], sizes = [8, 32], strides = [1, 1]} : vector<8x96xf32> to vector<8x32xf32>
    %1162 = vector.extract_strided_slice %1160 {offsets = [0, 32], sizes = [8, 32], strides = [1, 1]} : vector<8x96xf32> to vector<8x32xf32>
    %1163 = vector.extract_strided_slice %1160 {offsets = [0, 64], sizes = [8, 32], strides = [1, 1]} : vector<8x96xf32> to vector<8x32xf32>
    %1164 = vector.extract_strided_slice %1154 {offsets = [0, 96], sizes = [8, 32], strides = [1, 1]} : vector<8x128xf32> to vector<8x32xf32>
    %1165 = math.tanh %1164 : vector<8x32xf32>
    %1166 = arith.mulf %1162, %1124 : vector<8x32xf32>
    %1167 = arith.mulf %1161, %1165 : vector<8x32xf32>
    %1168 = arith.addf %1166, %1167 : vector<8x32xf32>
    %1169 = math.tanh %1168 : vector<8x32xf32>
    %1170 = arith.mulf %1163, %1169 : vector<8x32xf32>
    %c0_362 = arith.constant 0 : index
    %c0_363 = arith.constant 0 : index
    %1171 = vector.load %arg11[%c0_362, %c0_363] : memref<32x256xf32, #tpu.memory_space<vmem>>, vector<32x256xf32>
    %cst_364 = arith.constant dense<0.000000e+00> : vector<8x256xf32>
    %1172 = tpu.matmul %1170, %1171, %cst_364 {dimension_numbers = #tpu.dot_dimension_numbers<[1], [0], [0], [1], [0, 0, 1, 1], [], []>} : vector<8x32xf32>, vector<32x256xf32>, vector<8x256xf32> -> vector<8x256xf32>
    %c0_365 = arith.constant 0 : index
    %c0_366 = arith.constant 0 : index
    %1173 = vector.load %arg12[%c0_365, %c0_366] : memref<64x256xf32, #tpu.memory_space<vmem>>, vector<64x256xf32>
    %cst_367 = arith.constant dense<0.000000e+00> : vector<8x256xf32>
    %1174 = tpu.matmul %1150, %1173, %cst_367 {dimension_numbers = #tpu.dot_dimension_numbers<[1], [0], [0], [1], [0, 0, 1, 1], [], []>} : vector<8x64xf32>, vector<64x256xf32>, vector<8x256xf32> -> vector<8x256xf32>
    %1175 = arith.addf %1172, %1174 : vector<8x256xf32>
    %c0_368 = arith.constant 0 : index
    %c0_369 = arith.constant 0 : index
    %1176 = vector.load %arg13[%c0_368, %c0_369] : memref<1x256xf32, #tpu.memory_space<vmem>>, vector<1x256xf32>
    %1177 = vector.broadcast %1176 : vector<1x256xf32> to vector<8x256xf32>
    %1178 = arith.addf %1175, %1177 : vector<8x256xf32>
    %1179 = vector.extract_strided_slice %1178 {offsets = [0, 0], sizes = [8, 192], strides = [1, 1]} : vector<8x256xf32> to vector<8x192xf32>
    %1180 = arith.negf %1179 : vector<8x192xf32>
    %1181 = math.exp %1180 : vector<8x192xf32>
    %cst_370 = arith.constant 1.000000e+00 : f32
    %1182 = vector.broadcast %cst_370 : f32 to vector<8x192xf32>
    %1183 = arith.addf %1182, %1181 : vector<8x192xf32>
    %1184 = arith.divf %1182, %1183 : vector<8x192xf32>
    %1185 = vector.extract_strided_slice %1184 {offsets = [0, 0], sizes = [8, 64], strides = [1, 1]} : vector<8x192xf32> to vector<8x64xf32>
    %1186 = vector.extract_strided_slice %1184 {offsets = [0, 64], sizes = [8, 64], strides = [1, 1]} : vector<8x192xf32> to vector<8x64xf32>
    %1187 = vector.extract_strided_slice %1184 {offsets = [0, 128], sizes = [8, 64], strides = [1, 1]} : vector<8x192xf32> to vector<8x64xf32>
    %1188 = vector.extract_strided_slice %1178 {offsets = [0, 192], sizes = [8, 64], strides = [1, 1]} : vector<8x256xf32> to vector<8x64xf32>
    %1189 = math.tanh %1188 : vector<8x64xf32>
    %1190 = arith.mulf %1186, %1148 : vector<8x64xf32>
    %1191 = arith.mulf %1185, %1189 : vector<8x64xf32>
    %1192 = arith.addf %1190, %1191 : vector<8x64xf32>
    %1193 = math.tanh %1192 : vector<8x64xf32>
    %1194 = arith.mulf %1187, %1193 : vector<8x64xf32>
    %c88_371 = arith.constant 88 : index
    %c0_372 = arith.constant 0 : index
    %1195 = vector.load %arg19[%c88_371, %c0_372] : memref<96x64xf32, #tpu.memory_space<vmem>>, vector<8x64xf32>
    tpu.vector_store %arg19[%c88_371, %c0_372], %1194 {strides = array<i32>} : memref<96x64xf32, #tpu.memory_space<vmem>>, vector<8x64xf32>,
    %c0_373 = arith.constant 0 : index
    %c0_374 = arith.constant 0 : index
    %1196 = vector.load %arg19[%c0_373, %c0_374] : memref<96x64xf32, #tpu.memory_space<vmem>>, vector<96x64xf32>
    %c0_375 = arith.constant 0 : index
    %c0_376 = arith.constant 0 : index
    %1197 = vector.load %arg14[%c0_375, %c0_376] : memref<64x2xf32, #tpu.memory_space<vmem>>, vector<64x2xf32>
    %cst_377 = arith.constant dense<0.000000e+00> : vector<96x2xf32>
    %1198 = tpu.matmul %1196, %1197, %cst_377 {dimension_numbers = #tpu.dot_dimension_numbers<[1], [0], [0], [1], [0, 0, 1, 1], [], []>} : vector<96x64xf32>, vector<64x2xf32>, vector<96x2xf32> -> vector<96x2xf32>
    %c0_378 = arith.constant 0 : index
    %c0_379 = arith.constant 0 : index
    %1199 = vector.load %arg15[%c0_378, %c0_379] : memref<1x2xf32, #tpu.memory_space<vmem>>, vector<1x2xf32>
    %1200 = vector.broadcast %1199 : vector<1x2xf32> to vector<96x2xf32>
    %1201 = arith.addf %1198, %1200 : vector<96x2xf32>
    %c0_380 = arith.constant 0 : index
    %c0_381 = arith.constant 0 : index
    %1202 = vector.load %arg17[%c0_380, %c0_381] : memref<96x2xf32, #tpu.memory_space<vmem>>, vector<96x2xf32>
    tpu.vector_store %arg17[%c0_380, %c0_381], %1201 {strides = array<i32>} : memref<96x2xf32, #tpu.memory_space<vmem>>, vector<96x2xf32>,
    return
  }
}

</mosaic_0001>

<bundles_post_ra>
// kernel: tpu_custom_call.1
= control target key start
LH: loop header
LB: loop body
LE: loop exit
PB: predicated region body
PF: predicated region fallthrough
CT: control target
= control target key end

     0   :  { %s12527_s0 = inlined_call_operand.vmem [shape: f32[96,2], index: 0, kind: input, shape index: {}]   ;;  %s12528_s1 = inlined_call_operand.vmem [shape: s32[8,1], index: 1, kind: input, shape index: {}]   ;;  %s12529_s2 = inlined_call_operand.hbm [shape: f32[2,256], index: 2, kind: input, shape index: {}]   ;;  %s12530_s3 = inlined_call_operand.vmem [shape: f32[64,256], index: 3, kind: input, shape index: {}]   ;;  %s12531_s4 = inlined_call_operand.vmem [shape: f32[1,256], index: 4, kind: input, shape index: {}]   ;;  %s12532_s5 = inlined_call_operand.hbm [shape: f32[64,128], index: 5, kind: input, shape index: {}]   ;;  %s12533_s6 = inlined_call_operand.hbm [shape: f32[32,128], index: 6, kind: input, shape index: {}]   ;;  %s12534_s7 = inlined_call_operand.vmem [shape: f32[1,128], index: 7, kind: input, shape index: {}]   ;;  %s12535_s8 = inlined_call_operand.hbm [shape: f32[32,128], index: 8, kind: input, shape index: {}]   ;;  %s12536_s9 = inlined_call_operand.hbm [shape: f32[32,128], index: 9, kind: input, shape index: {}]   ;;  %s12537_s10 = inlined_call_operand.vmem [shape: f32[1,128], index: 10, kind: input, shape index: {}]   ;;  %s12538_s11 = inlined_call_operand.vmem [shape: f32[32,256], index: 11, kind: input, shape index: {}]   ;;  %s12539_s12 = inlined_call_operand.hbm [shape: f32[64,256], index: 12, kind: input, shape index: {}]   ;;  %s12540_s13 = inlined_call_operand.vmem [shape: f32[1,256], index: 13, kind: input, shape index: {}]   ;;  %s12541_s14 = inlined_call_operand.vmem [shape: f32[64,2], index: 14, kind: input, shape index: {}]   ;;  %s12542_s15 = inlined_call_operand.vmem [shape: f32[1,2], index: 15, kind: input, shape index: {}]   ;;  %s12543_s16 = inlined_call_operand.hbm [shape: f32[8,32], index: 16, kind: output, shape index: {0}]   ;;  %s12544_s17 = inlined_call_operand.vmem [shape: f32[96,2], index: 17, kind: output, shape index: {1}]  }
   0x1   :  { %12548 = sst [smem:[#allocation21_spill]] %s12527_s0 }
   0x2   :  { %12549 = sst [smem:[#allocation22_spill]] %s12528_s1 }
   0x3   :  { %12550 = sst [smem:[#allocation23_spill]] %s12543_s16 }
   0x4   :  { %23 = vsyncpa [#allocation5], 0 }
   0x5   :  { %24 = vsyncpa [#allocation8], 0 }
   0x6   :  { %25 = vsyncpa [#allocation11], 0 }
   0x7   :  { %26 = vsyncpa [#allocation14], 0 }
   0x8   :  { %27 = vsyncpa [#allocation6], 0  ;;  %s10477_s24 = smov [#allocation7]   ;;  %s10313_s28 = scalar_lea.hbm %s12532_s5, 1024 }
   0x9   :  { %s51_s25 = sshll.u32 %s10477_s24, 4  ;;  %p10314_p0 = scmp.ne.s32.totalorder %s12532_s5, %s10313_s28  ;;  %s52_s25 = int_to_ptr.vmem [resolvable:$true] %s51_s25 }
   0xa   :  { %p10317_p1 = scmp.lt.u32.totalorder %s10313_s28, %s12532_s5 }
   0xc   :  { %p10319_p2 = pnand %p10317_p1, %p10314_p0 }
   0xe   :  { %10322 = shalt.err (!%p10319_p2)
}
   0xf   :  { %s10323_s19 = scalar_lea.vmem %s52_s25, 1024  ;;  %p10328_p4 = scmp.lt.s32.totalorder %s52_s25, %s52_s25 }
  0x10   :  { %p10324_p3 = scmp.ne.s32.totalorder %s52_s25, %s10323_s19  ;;  %p10329_p5 = scmp.lt.s32.totalorder %s10323_s19, %s10323_s19 }
  0x12   :  { %p10330_p6 = por %p10329_p5, %p10328_p4 }
  0x14   :  { %p10331_p7 = pnand %p10330_p6, %p10324_p3 }
  0x16   :  { %10334 = shalt.err (!%p10331_p7)
}
  0x17   :  { %s10478_s1 = smov 128   ;;  %s10479_s20 = smov 8  }
  0x18   :  { %57 = dma.hbm_to_vmem [thread:$0]  %s12532_s5, 1024, %s52_s25, [#allocation8], %s10478_s1, %s10478_s1, %s10479_s20  }
  0x19   :  { %s10480_s23 = smov [#allocation10]   ;;  %s10481_s26 = smov [#allocation4]  }
  0x1a   :  { %s77_s24 = sshll.u32 %s10480_s23, 4  ;;  %s38_s27 = sshll.u32 %s10481_s26, 4  ;;  %s78_s24 = int_to_ptr.vmem [resolvable:$true] %s77_s24  ;;  %s39_s27 = int_to_ptr.vmem [resolvable:$true] %s38_s27 }
  0x1b   :  { %s10335_s0 = scalar_lea.hbm %s12535_s8, 512 }
  0x1c   :  { %p10336_p8 = scmp.ne.s32.totalorder %s12535_s8, %s10335_s0  ;;  %p10339_p9 = scmp.lt.u32.totalorder %s10335_s0, %s12535_s8 }
  0x1e   :  { %p10341_p10 = pnand %p10339_p9, %p10336_p8 }
  0x20   :  { %10344 = shalt.err (!%p10341_p10)
}
  0x21   :  { %s10345_s5 = scalar_lea.vmem %s78_s24, 512  ;;  %p10350_p12 = scmp.lt.s32.totalorder %s78_s24, %s78_s24 }
  0x22   :  { %p10346_p11 = scmp.ne.s32.totalorder %s78_s24, %s10345_s5  ;;  %p10351_p13 = scmp.lt.s32.totalorder %s10345_s5, %s10345_s5 }
  0x24   :  { %p10352_p0 = por %p10351_p13, %p10350_p12 }
  0x26   :  { %p10353_p1 = pnand %p10352_p0, %p10346_p11 }
  0x28   :  { %10356 = shalt.err (!%p10353_p1)
}
  0x29   :  { %83 = dma.hbm_to_vmem [thread:$0]  %s12535_s8, 512, %s78_s24, [#allocation11], %s10478_s1, %s10478_s1, %s10479_s20  }
  0x2a   :  { %s10357_s23 = scalar_lea.hbm %s12529_s2, 64 }
  0x2b   :  { %p10358_p2 = scmp.ne.s32.totalorder %s12529_s2, %s10357_s23  ;;  %p10361_p3 = scmp.lt.u32.totalorder %s10357_s23, %s12529_s2 }
  0x2d   :  { %p10363_p4 = pnand %p10361_p3, %p10358_p2 }
  0x2f   :  { %10366 = shalt.err (!%p10363_p4)
}
  0x30   :  { %s10367_s30 = scalar_lea.vmem %s39_s27, 64  ;;  %p10372_p6 = scmp.lt.s32.totalorder %s39_s27, %s39_s27 }
  0x31   :  { %p10368_p5 = scmp.ne.s32.totalorder %s39_s27, %s10367_s30  ;;  %p10373_p7 = scmp.lt.s32.totalorder %s10367_s30, %s10367_s30 }
  0x33   :  { %p10374_p8 = por %p10373_p7, %p10372_p6 }
  0x35   :  { %p10375_p9 = pnand %p10374_p8, %p10368_p5 }
  0x37   :  { %10378 = shalt.err (!%p10375_p9)
}
  0x38   :  { %41 = dma.hbm_to_vmem [thread:$0]  %s12529_s2, 64, %s39_s27, [#allocation5]  }
  0x39   :  { %s10482_s18 = smov [#allocation9]   ;;  %s10483_s5 = smov [#allocation12]  }
  0x3a   :  { %s63_s19 = sshll.u32 %s10482_s18, 4  ;;  %s89_s25 = sshll.u32 %s10483_s5, 4  ;;  %s64_s19 = int_to_ptr.vmem [resolvable:$true] %s63_s19  ;;  %s90_s25 = int_to_ptr.vmem [resolvable:$true] %s89_s25 }
  0x3b   :  { %s10379_s16 = scalar_lea.hbm %s12533_s6, 512 }
  0x3c   :  { %p10380_p10 = scmp.ne.s32.totalorder %s12533_s6, %s10379_s16  ;;  %p10383_p11 = scmp.lt.u32.totalorder %s10379_s16, %s12533_s6 }
  0x3e   :  { %p10385_p12 = pnand %p10383_p11, %p10380_p10 }
  0x40   :  { %10388 = shalt.err (!%p10385_p12)
}
  0x41   :  { %s10389_s2 = scalar_lea.vmem %s64_s19, 512  ;;  %p10394_p0 = scmp.lt.s32.totalorder %s64_s19, %s64_s19 }
  0x42   :  { %p10390_p13 = scmp.ne.s32.totalorder %s64_s19, %s10389_s2  ;;  %p10395_p1 = scmp.lt.s32.totalorder %s10389_s2, %s10389_s2 }
  0x44   :  { %p10396_p2 = por %p10395_p1, %p10394_p0 }
  0x46   :  { %p10397_p3 = pnand %p10396_p2, %p10390_p13 }
  0x48   :  { %10400 = shalt.err (!%p10397_p3)
}
  0x49   :  { %69 = dma.hbm_to_vmem [thread:$0]  %s12533_s6, 512, %s64_s19, [#allocation8], %s10478_s1, %s10478_s1, %s10479_s20  }
  0x4a   :  { %s10401_s24 = scalar_lea.hbm %s12536_s9, 512 }
  0x4b   :  { %p10402_p4 = scmp.ne.s32.totalorder %s12536_s9, %s10401_s24  ;;  %p10405_p5 = scmp.lt.u32.totalorder %s10401_s24, %s12536_s9 }
  0x4d   :  { %p10407_p6 = pnand %p10405_p5, %p10402_p4 }
  0x4f   :  { %10410 = shalt.err (!%p10407_p6)
}
  0x50   :  { %s10411_s16 = scalar_lea.vmem %s90_s25, 512  ;;  %p10416_p8 = scmp.lt.s32.totalorder %s90_s25, %s90_s25 }
  0x51   :  { %p10412_p7 = scmp.ne.s32.totalorder %s90_s25, %s10411_s16  ;;  %p10417_p9 = scmp.lt.s32.totalorder %s10411_s16, %s10411_s16 }
  0x53   :  { %p10418_p10 = por %p10417_p9, %p10416_p8 }
  0x55   :  { %p10419_p11 = pnand %p10418_p10, %p10412_p7 }
  0x57   :  { %10422 = shalt.err (!%p10419_p11)
}
  0x58   :  { %95 = dma.hbm_to_vmem [thread:$0]  %s12536_s9, 512, %s90_s25, [#allocation11], %s10478_s1, %s10478_s1, %s10479_s20  }
  0x59   :  { %s10484_s23 = smov [#allocation13]   ;;  %s10423_s2 = scalar_lea.hbm %s12539_s12, 2048 }
  0x5a   :  { %s105_s26 = sshll.u32 %s10484_s23, 4  ;;  %p10424_p12 = scmp.ne.s32.totalorder %s12539_s12, %s10423_s2  ;;  %s106_s26 = int_to_ptr.vmem [resolvable:$true] %s105_s26 }
  0x5b   :  { %p10427_p13 = scmp.lt.u32.totalorder %s10423_s2, %s12539_s12 }
  0x5d   :  { %p10429_p0 = pnand %p10427_p13, %p10424_p12 }
  0x5f   :  { %10432 = shalt.err (!%p10429_p0)
}
  0x60   :  { %s10433_s24 = scalar_lea.vmem %s106_s26, 2048  ;;  %p10438_p2 = scmp.lt.s32.totalorder %s106_s26, %s106_s26 }
  0x61   :  { %p10434_p1 = scmp.ne.s32.totalorder %s106_s26, %s10433_s24  ;;  %p10439_p3 = scmp.lt.s32.totalorder %s10433_s24, %s10433_s24 }
  0x63   :  { %p10440_p4 = por %p10439_p3, %p10438_p2 }
  0x65   :  { %p10441_p5 = pnand %p10440_p4, %p10434_p1 }
  0x67   :  { %10444 = shalt.err (!%p10441_p5)
}
  0x68   :  { %s10485_s9 = smov 256   ;;  %s10486_s1 = smov 16  }
  0x69   :  { %111 = dma.hbm_to_vmem [thread:$0]  %s12539_s12, 2048, %s106_s26, [#allocation14], %s10485_s9, %s10485_s9, %s10486_s1  }
  0x6a   :  { %10467 = dma.done.wait [#allocation5], 64  }
  0x6b   :  { %10468 = vsyncadd [#allocation5], 4294967232 }
  0x6c   :  { %10469 = dma.done.wait [#allocation8], 1536  }
  0x6d   :  { %10470 = vsyncadd [#allocation8], 4294965760 }
  0x6e   :  { %10471 = dma.done.wait [#allocation11], 1024  }
  0x6f   :  { %10472 = vsyncadd [#allocation11], 4294966272 }
  0x70   :  { %10473 = dma.done.wait [#allocation14], 2048  }
  0x71   :  { %10474 = vsyncadd [#allocation14], 4294965248  ;;  %v10487_v0 = vmov 0.0   ;;  %vm208_vm0 = vcmask 1041408   ;;  %v383_v2 = vld [vmem:[%s12530_s3 + $0x8] sm:$0xff]  ;;  %v385_v4 = vld [vmem:[%s12530_s3 + $0x18] sm:$0xff]  ;;  %v152_v42 = vlaneseq }
  0x72   :  { %277 = vmatprep.mubr.f32.mxu0 %v10487_v0  ;;  %v7988_v1 = vld.sshfl [vmem:[#allocation4] sm:$0x33 pattern:$0x76325410]  ;;  %v384_v6 = vld [vmem:[%s12530_s3 + $0x10] sm:$0xff]  ;;  %s12551_s28 = sld [smem:[#allocation21_spill]]  ;;  %v10684_v8 = vpack.c.bf16 %v385_v4, %v383_v2 }
  0x73   :  { %v170_v3 = vcombine.high %v7988_v1, %v7988_v1  ;;  %v382_v5 = vld [vmem:[%s12530_s3] sm:$0xff]  ;;  %vm171_vm1 = vcmask 15360   ;;  %v387_v10 = vld [vmem:[%s12530_s3 + $0x28] sm:$0xff]  ;;  %v389_v11 = vld [vmem:[%s12530_s3 + $0x38] sm:$0xff]  ;;  %s12552_s8 = sld [smem:[#allocation22_spill]]  ;;  %v10488_v40 = vmov 0  }
  0x74   :  { %v10686_v9 = vpack.c.bf16 %v384_v6, %v382_v5  ;;  %v386_v12 = vld [vmem:[%s12530_s3 + $0x20] sm:$0xff]  ;;  %v10697_v13 = vpack.c.bf16 %v389_v11, %v387_v10  ;;  %v388_v14 = vld [vmem:[%s12530_s3 + $0x30] sm:$0xff]  ;;  %v391_v15 = vld [vmem:[%s12530_s3 + $0x48] sm:$0xff]  ;;  %9828 = vset.pattern.permute.xlu1 %v10488_v40  ;;  %9829 = vset.pattern.permute.xlu0 %v10488_v40  ;;  %v153_v43 = vshrl.u32 %v152_v42, 7  ;;  %s10489_s9 = smov 64   ;;  %v10490_v63 = vmov 0.0|0.0  }
  0x75   :  { %7989 = vmatprep.subr.msk.mxu0 %vm208_vm0, %v170_v3  ;;  %v393_v16 = vld [vmem:[%s12530_s3 + $0x58] sm:$0xff]  ;;  %v10715_v18 = vpack.c.bf16 %v388_v14, %v386_v12  ;;  %v390_v20 = vld [vmem:[%s12530_s3 + $0x40] sm:$0xff]  ;;  %v392_v21 = vld [vmem:[%s12530_s3 + $0x50] sm:$0xff]  ;;  %8965 = vmatprep.subr.bf16.mxu1 %v10490_v63  ;;  %vm10491_vm3 = vmmov 0   ;;  %vm398_vm4 = vcmask 523264   ;;  %s10492_s20 = smov 32  }
  0x76   :  { %7990 = vmatpush1.msk.msra.mxu0 %vm208_vm0, %v7988_v1  ;;  %v10718_v19 = vpack.c.bf16 %v393_v16, %v391_v15  ;;  %v395_v22 = vld [vmem:[%s12530_s3 + $0x68] sm:$0xff]  ;;  %v397_v23 = vld [vmem:[%s12530_s3 + $0x78] sm:$0xff]  ;;  %v10738_v25 = vpack.c.bf16 %v392_v21, %v390_v20  ;;  %v394_v27 = vld [vmem:[%s12530_s3 + $0x60] sm:$0xff]  ;;  %v10811_v44 = vsub.s32 1, %v153_v43  ;;  %v10824_v51 = vsub.s32 0, %v153_v43  ;;  %8420 = vmatprep.mubr.msk.f32.mxu1 %vm10491_vm3, %v10487_v0 }
  0x77   :  { %8950 = vmatprep.subr.bf16.mxu0 %v10684_v8  ;;  %v10741_v26 = vpack.c.bf16 %v397_v23, %v395_v22  ;;  %v396_v28 = vld [vmem:[%s12530_s3 + $0x70] sm:$0xff]  ;;  %v150_v45 = vld [vmem:[%s12531_s4] sm:$0x3]  ;;  %v507_v60 = vld [vmem:[#allocation7] sm:$0xff]  ;;  %vm519_vm7 = vcmask 261120  }
  0x78   :  { %v137_v7 = vld [vmem:[%s12551_s28] sm:$0xff]  ;;  %v138_v17 = vld [vmem:[%s12551_s28 + $0x8] sm:$0xff]  ;;  %v139_v24 = vld [vmem:[%s12551_s28 + $0x10] sm:$0xff]  ;;  %v10755_v30 = vpack.c.bf16 %v396_v28, %v394_v27  ;;  %v10817_v46 = vrot.slane %v150_v45, %v10811_v44  ;;  %v10827_v52 = vrot.slane %v150_v45, %v10824_v51 }
  0x79   :  { %7991 = vmatmul.mubr.msk.f32.vlgmr.msra.gmra.mrb[0].mxu0 %vm171_vm1, %v137_v7  ;;  %v140_v29 = vld [vmem:[%s12551_s28 + $0x18] sm:$0xff]  ;;  %v141_v31 = vld [vmem:[%s12551_s28 + $0x20] sm:$0xff]  ;;  %v142_v32 = vld [vmem:[%s12551_s28 + $0x28] sm:$0xff] }
  0x7a   :  { %8952 = vmatpush1.bf16.msra.mxu0 %v10686_v9  ;;  %283 = vmatprep.mubr.f32.mxu0 %v10487_v0  ;;  %v143_v33 = vld [vmem:[%s12551_s28 + $0x30] sm:$0xff]  ;;  %v144_v34 = vld [vmem:[%s12551_s28 + $0x38] sm:$0xff]  ;;  %v145_v35 = vld [vmem:[%s12551_s28 + $0x40] sm:$0xff] }
  0x7b   :  { %8954 = vmatprep.subr.bf16.mxu0 %v10697_v13  ;;  %v146_v36 = vld [vmem:[%s12551_s28 + $0x48] sm:$0xff]  ;;  %v147_v37 = vld [vmem:[%s12551_s28 + $0x50] sm:$0xff]  ;;  %v148_v38 = vld [vmem:[%s12551_s28 + $0x58] sm:$0xff] }
  0x7c   :  { %v10805_v39 = vld [vmem:[%s12552_s8] sm:$0xff]  ;;  %v508_v61 = vld [vmem:[#allocation7 + $0x8] sm:$0xff]  ;;  %v509_v62 = vld [vmem:[#allocation7 + $0x10] sm:$0xff] }
  0x7d   :  { %7992 = vmatmul.mubr.msk.f32.gmra.mrb[2].mxu0 %vm171_vm1, %v138_v17  ;;  %vm374_vm2 = vcmp.gt.s32.totalorder %v10805_v39, 0  ;;  %v10832_v1 = vpack.c.bf16 %v508_v61, %v507_v60  ;;  %v510_v2 = vld [vmem:[#allocation7 + $0x18] sm:$0xff]  ;;  %v515_v3 = vld [vmem:[#allocation9] sm:$0xff]  ;;  %v516_v4 = vld [vmem:[#allocation9 + $0x8] sm:$0xff]  ;;  %vm699_vm6 = vcmp.gt.s32.totalorder %v10805_v39, 1  ;;  %vm987_vm9 = vcmp.gt.s32.totalorder %v10805_v39, 2 }
  0x7e   :  { %289 = vmatprep.mubr.f32.mxu0 %v10487_v0  ;;  %8956 = vmatpush1.bf16.msra.mxu0 %v10715_v18  ;;  %v375_v41 = vsel %vm374_vm2, 1, %v10488_v40  ;;  %v10836_v5 = vpack.c.bf16 %v510_v2, %v509_v62  ;;  %v10838_v6 = vpack.c.bf16 %v516_v4, %v515_v3  ;;  %v511_v7 = vld [vmem:[#allocation7 + $0x20] sm:$0xff]  ;;  %v512_v10 = vld [vmem:[#allocation7 + $0x28] sm:$0xff]  ;;  %v513_v12 = vld [vmem:[#allocation7 + $0x30] sm:$0xff]  ;;  %vm1275_vm11 = vcmp.gt.s32.totalorder %v10805_v39, 3 }
  0x7f   :  { %8958 = vmatprep.subr.bf16.mxu0 %v10718_v19  ;;  %377 = vperm.xlu1 %9828, %v375_v41   ;;  %v10844_v11 = vpack.c.bf16 %v512_v10, %v511_v7  ;;  %v514_v14 = vld [vmem:[#allocation7 + $0x38] sm:$0xff]  ;;  %v517_v16 = vld [vmem:[#allocation9 + $0x10] sm:$0xff]  ;;  %v700_v10 = vsel %vm699_vm6, 1, %v10488_v40  ;;  %vm1563_vm13 = vcmp.gt.s32.totalorder %v10805_v39, 4 }
  0x80   :  { %8967 = vmatpush3.bf16.msra.mxu1 %v10838_v6  ;;  %v10848_v15 = vpack.c.bf16 %v514_v14, %v513_v12  ;;  %v518_v17 = vld [vmem:[#allocation9 + $0x18] sm:$0xff] }
  0x81   :  { %7993 = vmatmul.mubr.msk.f32.gmra.mrb[4].mxu0 %vm171_vm1, %v139_v24  ;;  %8968 = vmatprep.subr.bf16.mxu1 %v10490_v63  ;;  %v10853_v20 = vpack.c.bf16 %v518_v17, %v517_v16  ;;  %v10905_v41 = vld [vmem:[%s12534_s7] ss:$0 sm:$0xff] }
  0x82   :  { %295 = vmatprep.mubr.f32.mxu0 %v10487_v0  ;;  %8960 = vmatpush1.bf16.msra.mxu0 %v10738_v25 }
  0x83   :  { %8962 = vmatprep.subr.bf16.mxu0 %v10741_v26 }
  0x84   :  { %8970 = vmatpush3.bf16.msra.mxu1 %v10853_v20 }
  0x85   :  { %7994 = vmatmul.mubr.msk.f32.gmra.mrb[6].mxu0 %vm171_vm1, %v140_v29  ;;  %8999 = vmatprep.subr.bf16.mxu1 %v10490_v63 }
  0x86   :  { %301 = vmatprep.mubr.f32.mxu0 %v10487_v0  ;;  %8964 = vmatpush1.bf16.msra.mxu0 %v10755_v30 }
  0x87   :  { %8971 = vmatprep.subr.bf16.mxu0 %v10490_v63  ;;  %8421 = vmatmul.mubr.f32.vlgmr.msra.gmra.mrb[0].mxu1 %v10487_v0 }
  0x88   :  { %9001 = vmatpush3.bf16.msra.mxu1 %v10838_v6  ;;  %8450 = vmatprep.mubr.msk.f32.mxu1 %vm10491_vm3, %v10487_v0 }
  0x89   :  { %7995 = vmatmul.mubr.msk.f32.gmra.mrb[8].mxu0 %vm171_vm1, %v141_v31  ;;  %9002 = vmatprep.subr.bf16.mxu1 %v10490_v63 }
  0x8a   :  { %307 = vmatprep.mubr.f32.mxu0 %v10487_v0 }
  0x8c   :  { %9004 = vmatpush3.bf16.msra.mxu1 %v10853_v20 }
  0x8d   :  { %7996 = vmatmul.mubr.msk.f32.gmra.mrb[10].mxu0 %vm171_vm1, %v142_v32  ;;  %9005 = vmatprep.subr.bf16.mxu1 %v10490_v63 }
  0x8e   :  { %313 = vmatprep.mubr.f32.mxu0 %v10487_v0 }
  0x91   :  { %7997 = vmatmul.mubr.msk.f32.gmra.mrb[12].mxu0 %vm171_vm1, %v143_v33 }
  0x92   :  { %319 = vmatprep.mubr.f32.mxu0 %v10487_v0 }
  0x95   :  { %7998 = vmatmul.mubr.msk.f32.gmra.mrb[14].mxu0 %vm171_vm1, %v144_v34 }
  0x96   :  { %325 = vmatprep.mubr.f32.mxu0 %v10487_v0 }
  0x99   :  { %7999 = vmatmul.mubr.msk.f32.gmra.mrb[16].mxu0 %vm171_vm1, %v145_v35 }
  0x9a   :  { %331 = vmatprep.mubr.f32.mxu0 %v10487_v0 }
  0x9d   :  { %8000 = vmatmul.mubr.msk.f32.gmra.mrb[18].mxu0 %vm171_vm1, %v146_v36 }
  0x9e   :  { %337 = vmatprep.mubr.f32.mxu0 %v10487_v0 }
  0xa1   :  { %8001 = vmatmul.mubr.msk.f32.gmra.mrb[20].mxu0 %vm171_vm1, %v147_v37 }
  0xa2   :  { %343 = vmatprep.mubr.f32.mxu0 %v10487_v0 }
  0xa5   :  { %8002 = vmatmul.mubr.msk.f32.gmra.mrb[22].mxu0 %vm171_vm1, %v148_v38 }
  0xa6   :  { %466 = vmatprep.mubr.f32.mxu0 %v10487_v0 }
  0xa9   :  { %467 = vmatmul.mubr.f32.vlgmr.msra.gmra.mrb[0].mxu0 %v10487_v0 }
  0xaa   :  { %8973 = vmatpush3.bf16.msra.mxu0 %v10832_v1  ;;  %8439 = vmatprep.mubr.msk.f32.mxu0 %vm10491_vm3, %v10487_v0 }
  0xab   :  { %8974 = vmatprep.subr.bf16.mxu0 %v10490_v63 }
  0xae   :  { %8976 = vmatpush3.bf16.msra.mxu0 %v10836_v5 }
  0xaf   :  { %8977 = vmatprep.subr.bf16.mxu0 %v10490_v63 }
  0xb2   :  { %8979 = vmatpush3.bf16.msra.mxu0 %v10844_v11 }
  0xb3   :  { %8980 = vmatprep.subr.bf16.mxu0 %v10490_v63 }
  0xb6   :  { %8982 = vmatpush3.bf16.msra.mxu0 %v10848_v15 }
  0xb7   :  { %8984 = vmatprep.subr.bf16.mxu0 %v10684_v8 }
  0xfe   :  { %v10873_v31 = vpop.permute.xlu1 %377 }
  0xff   :  { %vm379_vm5 = vcmp.eq.s32.totalorder %v10873_v31, 1 }
 0x15a   :  { %v588_v36 = vpop.f32.mrb[0].mxu1 }
 0x15b   :  { %v8422_v37 = vpop.f32.mrb[1].mxu1 }
 0x17c   :  { %v468_v47 = vpop.f32.mrb[0].mxu0 }
 0x17d   :  { %v470_v48 = vpop.f32.mrb[1].mxu0  ;;  %v9739_v53 = vadd.f32 %v468_v47, %v10827_v52 }
 0x17e   :  { %v10820_v49 = vadd.f32 %v470_v48, %v10817_v46 }
 0x17f   :  { %v8003_v54 = vmul.f32 -1.442695, %v9739_v53 }
 0x180   :  { %9830 = vtanh.f32 %v10820_v49  ;;  %v8004_v27 = vmul.f32 -1.442695, %v10820_v49 }
 0x181   :  { %9832 = vpow2.f32 %v8003_v54 }
 0x18a   :  { %v9831_v50 = vpop.eup %9830 }
 0x18b   :  { %490 = vrot.lane.b32.xlu0 %v9831_v50, %s10489_s9  ;;  %v9833_v55 = vpop.eup %9832 }
 0x18c   :  { %v481_v56 = vadd.f32 1.0, %v9833_v55 }
 0x18e   :  { %9834 = vrcp.f32 %v481_v56 }
 0x198   :  { %v9835_v57 = vpop.eup %9834 }
 0x199   :  { %v488_v21 = vmul.f32 0.0, %v9835_v57 }
 0x1fd   :  { %v491_v58 = vpop.permute.xlu0 %490 }
 0x1fe   :  { %v493_v59 = vmul.f32 %v9835_v57, %v491_v58 }
 0x200   :  { %495 = vrot.lane.b32.xlu0 %v493_v59, %s10489_s9 }
 0x272   :  { %v496_v22 = vpop.permute.xlu0 %495 }
 0x273   :  { %v10856_v23 = vadd.f32 %v496_v22, %v488_v21 }
 0x275   :  { %9836 = vtanh.f32 %v10856_v23  ;;  %v10923_v21 = vsel %vm379_vm5, %v10856_v23, 0.0 }
 0x276   :  { %9838 = vpow2.f32 %v8004_v27 }
 0x27f   :  { %v9837_v24 = vpop.eup %9836 }
 0x280   :  { %501 = vrot.lane.b32.xlu1 %v9837_v24, %s10489_s9  ;;  %v9839_v28 = vpop.eup %9838 }
 0x281   :  { %v482_v29 = vadd.f32 1.0, %v9839_v28 }
 0x283   :  { %9840 = vrcp.f32 %v482_v29 }
 0x28d   :  { %v9841_v32 = vpop.eup %9840 }
 0x2f2   :  { %v502_v33 = vpop.permute.xlu1 %501 }
 0x2f3   :  { %v504_v34 = vmul.f32 %v9841_v32, %v502_v33 }
 0x2f5   :  { %v10878_v35 = vsel %vm379_vm5, %v504_v34, 0.0 }
 0x2f6   :  { %8440 = vmatmul.mubr.msk.f32.vlgmr.msra.gmra.mrb[24].mxu0 %vm398_vm4, %v10878_v35 }
 0x2f7   :  { %8986 = vmatpush1.bf16.msra.mxu0 %v10686_v9  ;;  %771 = vmatprep.mubr.f32.mxu0 %v10487_v0 }
 0x2f8   :  { %8988 = vmatprep.subr.bf16.mxu0 %v10697_v13 }
 0x2fb   :  { %8990 = vmatpush1.bf16.msra.mxu0 %v10715_v18 }
 0x2fc   :  { %8992 = vmatprep.subr.bf16.mxu0 %v10718_v19 }
 0x2ff   :  { %8994 = vmatpush1.bf16.msra.mxu0 %v10738_v25 }
 0x300   :  { %8996 = vmatprep.subr.bf16.mxu0 %v10741_v26 }
 0x303   :  { %8998 = vmatpush1.bf16.msra.mxu0 %v10755_v30 }
 0x304   :  { %9018 = vmatprep.subr.bf16.mxu0 %v10684_v8 }
 0x306   :  { %8008 = vmatmul.mubr.msk.f32.vlgmr.msra.gmra.mrb[2].mxu0 %vm398_vm4, %v10878_v35 }
 0x307   :  { %9020 = vmatpush1.bf16.msra.mxu0 %v10686_v9  ;;  %1059 = vmatprep.mubr.f32.mxu0 %v10487_v0 }
 0x308   :  { %9022 = vmatprep.subr.bf16.mxu0 %v10697_v13 }
 0x30b   :  { %9024 = vmatpush1.bf16.msra.mxu0 %v10715_v18 }
 0x30c   :  { %9026 = vmatprep.subr.bf16.mxu0 %v10718_v19 }
 0x30f   :  { %9028 = vmatpush1.bf16.msra.mxu0 %v10738_v25 }
 0x310   :  { %9030 = vmatprep.subr.bf16.mxu0 %v10741_v26 }
 0x313   :  { %9032 = vmatpush1.bf16.msra.mxu0 %v10755_v30 }
 0x314   :  { %9052 = vmatprep.subr.bf16.mxu0 %v10684_v8 }
 0x3c9   :  { %v661_v38 = vpop.f32.mrb[24].mxu0 }
 0x3ca   :  { %v662_v42 = vadd.f32 %v661_v38, %v588_v36  ;;  %v8441_v43 = vpop.f32.mrb[25].mxu0 }
 0x3cc   :  { %v672_v45 = vadd.f32 %v10905_v41, %v662_v42 }
 0x3ce   :  { %9842 = vtanh.f32 %v672_v45  ;;  %v8007_v54 = vmul.f32 -1.442695, %v672_v45 }
 0x3d8   :  { %v9843_v47 = vpop.eup %9842 }
 0x3d9   :  { %v773_v48 = vpop.f32.mrb[2].mxu0  ;;  %682 = vrot.lane.b32.xlu0 %v9843_v47, %s10492_s20 }
 0x3da   :  { %v775_v49 = vpop.f32.mrb[3].mxu0  ;;  %v9741_v56 = vadd.f32 %v773_v48, %v10827_v52 }
 0x3db   :  { %v9742_v50 = vadd.f32 %v775_v49, %v10817_v46 }
 0x3dc   :  { %v8009_v58 = vmul.f32 -1.442695, %v9741_v56 }
 0x3dd   :  { %9844 = vtanh.f32 %v9742_v50  ;;  %v8010_v23 = vmul.f32 -1.442695, %v9742_v50 }
 0x3de   :  { %9846 = vpow2.f32 %v8007_v54 }
 0x3e7   :  { %v9845_v53 = vpop.eup %9844 }
 0x3e8   :  { %795 = vrot.lane.b32.xlu0 %v9845_v53, %s10489_s9  ;;  %v9847_v55 = vpop.eup %9846 }
 0x3e9   :  { %v676_v57 = vadd.f32 1.0, %v9847_v55 }
 0x3eb   :  { %9848 = vrcp.f32 %v676_v57 }
 0x3ec   :  { %9850 = vpow2.f32 %v8009_v58 }
 0x3f5   :  { %v9849_v59 = vpop.eup %9848 }
 0x3f6   :  { %v9851_v61 = vpop.eup %9850  ;;  %v680_v12 = vmul.f32 0.0, %v9849_v59 }
 0x3f7   :  { %v786_v2 = vadd.f32 1.0, %v9851_v61 }
 0x3f9   :  { %9852 = vrcp.f32 %v786_v2 }
 0x403   :  { %v9853_v3 = vpop.eup %9852 }
 0x404   :  { %v793_v24 = vmul.f32 %v9853_v3, %v10923_v21 }
 0x44b   :  { %v683_v60 = vpop.permute.xlu0 %682 }
 0x44c   :  { %v685_v62 = vmul.f32 %v9849_v59, %v683_v60 }
 0x44e   :  { %687 = vrot.lane.b32.xlu1 %v685_v62, %s10492_s20 }
 0x45a   :  { %v796_v4 = vpop.permute.xlu0 %795 }
 0x45b   :  { %v798_v7 = vmul.f32 %v9853_v3, %v796_v4 }
 0x45d   :  { %800 = vrot.lane.b32.xlu0 %v798_v7, %s10489_s9 }
 0x461   :  { %702 = vperm.xlu0 %9829, %v700_v10  }
 0x4c0   :  { %v688_v14 = vpop.permute.xlu1 %687 }
 0x4c1   :  { %v10916_v16 = vadd.f32 %v688_v14, %v680_v12 }
 0x4c3   :  { %9854 = vtanh.f32 %v10916_v16 }
 0x4cd   :  { %v9855_v17 = vpop.eup %9854 }
 0x4ce   :  { %693 = vrot.lane.b32.xlu1 %v9855_v17, %s10492_s20 }
 0x4cf   :  { %v801_v22 = vpop.permute.xlu0 %800 }
 0x4d0   :  { %v10926_v27 = vadd.f32 %v801_v22, %v793_v24 }
 0x4d2   :  { %9856 = vtanh.f32 %v10926_v27 }
 0x4d3   :  { %9858 = vpow2.f32 %v8010_v23 }
 0x4dc   :  { %v9857_v33 = vpop.eup %9856 }
 0x4dd   :  { %v9859_v34 = vpop.eup %9858 }
 0x4de   :  { %v787_v36 = vadd.f32 1.0, %v9859_v34 }
 0x4e0   :  { %9860 = vrcp.f32 %v787_v36  ;;  %v10940_v38 = vpop.permute.xlu0 %702 }
 0x4e1   :  { %vm704_vm8 = vcmp.eq.s32.totalorder %v10940_v38, 1 }
 0x4ea   :  { %v9861_v42 = vpop.eup %9860 }
 0x540   :  { %v694_v28 = vpop.permute.xlu1 %693 }
 0x541   :  { %v696_v29 = vmul.f32 %v9849_v59, %v694_v28  ;;  %v988_v28 = vsel %vm987_vm9, 1, %v10488_v40 }
 0x543   :  { %v10931_v32 = vsel %vm379_vm5, %v696_v29, 0.0  ;;  %v10986_v29 = vsel %vm379_vm5, %v10916_v16, 0.0 }
 0x544   :  { %813 = vrot.lane.b32.xlu1 %v10931_v32, %s10489_s9 }
 0x548   :  { %806 = vrot.lane.b32.xlu1 %v9857_v33, %s10489_s9 }
 0x5b6   :  { %v814_v37 = vpop.permute.xlu1 %813 }
 0x5b7   :  { %8451 = vmatmul.mubr.msk.f32.vlgmr.msra.gmra.mrb[2].mxu1 %vm519_vm7, %v814_v37  ;;  %v10997_v37 = vsel %vm704_vm8, %v10926_v27, %v10923_v21 }
 0x5b8   :  { %9007 = vmatpush3.bf16.msra.mxu1 %v10832_v1  ;;  %8469 = vmatprep.mubr.msk.f32.mxu1 %vm10491_vm3, %v10487_v0 }
 0x5b9   :  { %9008 = vmatprep.subr.bf16.mxu1 %v10490_v63 }
 0x5ba   :  { %v807_v43 = vpop.permute.xlu1 %806 }
 0x5bb   :  { %v809_v45 = vmul.f32 %v9861_v42, %v807_v43 }
 0x5bc   :  { %9010 = vmatpush3.bf16.msra.mxu1 %v10836_v5 }
 0x5bd   :  { %9011 = vmatprep.subr.bf16.mxu1 %v10490_v63  ;;  %v10949_v47 = vsel %vm704_vm8, %v809_v45, %v10878_v35 }
 0x5be   :  { %8014 = vmatmul.mubr.msk.f32.vlgmr.msra.gmra.mrb[4].mxu0 %vm398_vm4, %v10949_v47 }
 0x5bf   :  { %9054 = vmatpush1.bf16.msra.mxu0 %v10686_v9  ;;  %1347 = vmatprep.mubr.f32.mxu0 %v10487_v0 }
 0x5c0   :  { %9013 = vmatpush3.bf16.msra.mxu1 %v10844_v11  ;;  %9056 = vmatprep.subr.bf16.mxu0 %v10697_v13 }
 0x5c1   :  { %9014 = vmatprep.subr.bf16.mxu1 %v10490_v63 }
 0x5c3   :  { %9058 = vmatpush1.bf16.msra.mxu0 %v10715_v18 }
 0x5c4   :  { %9016 = vmatpush3.bf16.msra.mxu1 %v10848_v15  ;;  %9060 = vmatprep.subr.bf16.mxu0 %v10718_v19 }
 0x5c5   :  { %9033 = vmatprep.subr.bf16.mxu1 %v10490_v63 }
 0x5c7   :  { %8470 = vmatmul.mubr.msk.f32.vlgmr.msra.gmra.mrb[4].mxu1 %vm398_vm4, %v10949_v47  ;;  %9062 = vmatpush1.bf16.msra.mxu0 %v10738_v25 }
 0x5c8   :  { %9035 = vmatpush3.bf16.msra.mxu1 %v10838_v6  ;;  %8480 = vmatprep.mubr.msk.f32.mxu1 %vm10491_vm3, %v10487_v0 }
 0x5c9   :  { %9036 = vmatprep.subr.bf16.mxu1 %v10490_v63  ;;  %9064 = vmatprep.subr.bf16.mxu0 %v10741_v26 }
 0x5cb   :  { %9066 = vmatpush1.bf16.msra.mxu0 %v10755_v30 }
 0x5cc   :  { %9038 = vmatpush3.bf16.msra.mxu1 %v10853_v20  ;;  %9086 = vmatprep.subr.bf16.mxu0 %v10684_v8 }
 0x5cd   :  { %9039 = vmatprep.subr.bf16.mxu1 %v10490_v63 }
 0x68a   :  { %v883_v35 = vpop.f32.mrb[2].mxu1 }
 0x68b   :  { %v8452_v48 = vpop.f32.mrb[3].mxu1 }
 0x691   :  { %v1061_v49 = vpop.f32.mrb[4].mxu0 }
 0x692   :  { %v1063_v50 = vpop.f32.mrb[5].mxu0  ;;  %v9743_v60 = vadd.f32 %v1061_v49, %v10827_v52 }
 0x693   :  { %v9744_v57 = vadd.f32 %v1063_v50, %v10817_v46 }
 0x694   :  { %v8015_v62 = vmul.f32 -1.442695, %v9743_v60 }
 0x695   :  { %v8016_v21 = vmul.f32 -1.442695, %v9744_v57 }
 0x69a   :  { %v956_v53 = vpop.f32.mrb[4].mxu1 }
 0x69b   :  { %v957_v54 = vadd.f32 %v956_v53, %v883_v35  ;;  %v8471_v55 = vpop.f32.mrb[5].mxu1 }
 0x69d   :  { %v960_v56 = vadd.f32 %v10905_v41, %v957_v54 }
 0x69f   :  { %9862 = vtanh.f32 %v960_v56  ;;  %v8013_v61 = vmul.f32 -1.442695, %v960_v56 }
 0x6a0   :  { %9864 = vtanh.f32 %v9744_v57 }
 0x6a1   :  { %9866 = vpow2.f32 %v8013_v61 }
 0x6a2   :  { %9868 = vpow2.f32 %v8015_v62 }
 0x6a9   :  { %v9863_v58 = vpop.eup %9862 }
 0x6aa   :  { %970 = vrot.lane.b32.xlu1 %v9863_v58, %s10492_s20  ;;  %v9865_v59 = vpop.eup %9864 }
 0x6ab   :  { %v9867_v2 = vpop.eup %9866 }
 0x6ac   :  { %v964_v3 = vadd.f32 1.0, %v9867_v2  ;;  %v9869_v4 = vpop.eup %9868 }
 0x6ad   :  { %v1074_v7 = vadd.f32 1.0, %v9869_v4 }
 0x6ae   :  { %1083 = vrot.lane.b32.xlu1 %v9865_v59, %s10489_s9  ;;  %9870 = vrcp.f32 %v964_v3 }
 0x6af   :  { %9872 = vrcp.f32 %v1074_v7 }
 0x6b8   :  { %v9871_v10 = vpop.eup %9870 }
 0x6b9   :  { %v9873_v17 = vpop.eup %9872  ;;  %v968_v33 = vmul.f32 %v9871_v10, %v10986_v29 }
 0x6ba   :  { %v1081_v31 = vmul.f32 %v9873_v17, %v10997_v37 }
 0x71c   :  { %v971_v12 = vpop.permute.xlu1 %970 }
 0x71d   :  { %v973_v14 = vmul.f32 %v9871_v10, %v971_v12 }
 0x71f   :  { %975 = vrot.lane.b32.xlu0 %v973_v14, %s10492_s20 }
 0x720   :  { %v1084_v22 = vpop.permute.xlu1 %1083 }
 0x721   :  { %v1086_v24 = vmul.f32 %v9873_v17, %v1084_v22 }
 0x723   :  { %1088 = vrot.lane.b32.xlu1 %v1086_v24, %s10489_s9 }
 0x727   :  { %990 = vperm.xlu1 %9828, %v988_v28  }
 0x791   :  { %v976_v23 = vpop.permute.xlu0 %975 }
 0x792   :  { %v10989_v34 = vadd.f32 %v976_v23, %v968_v33 }
 0x794   :  { %9874 = vtanh.f32 %v10989_v34 }
 0x795   :  { %v1089_v42 = vpop.permute.xlu1 %1088 }
 0x796   :  { %v11000_v16 = vadd.f32 %v1089_v42, %v1081_v31 }
 0x798   :  { %9876 = vtanh.f32 %v11000_v16 }
 0x799   :  { %9878 = vpow2.f32 %v8016_v21 }
 0x79e   :  { %v9875_v36 = vpop.eup %9874 }
 0x79f   :  { %981 = vrot.lane.b32.xlu0 %v9875_v36, %s10492_s20 }
 0x7a2   :  { %v9877_v48 = vpop.eup %9876 }
 0x7a3   :  { %v9879_v27 = vpop.eup %9878 }
 0x7a4   :  { %v1075_v49 = vadd.f32 1.0, %v9879_v27 }
 0x7a6   :  { %9880 = vrcp.f32 %v1075_v49 }
 0x7b0   :  { %v9881_v53 = vpop.eup %9880 }
 0x811   :  { %v982_v43 = vpop.permute.xlu0 %981 }
 0x812   :  { %v984_v45 = vmul.f32 %v9871_v10, %v982_v43 }
 0x814   :  { %v11006_v35 = vsel %vm704_vm8, %v984_v45, %v10931_v32  ;;  %v11015_v32 = vpop.permute.xlu1 %990  ;;  %v1276_v45 = vsel %vm1275_vm11, 1, %v10488_v40 }
 0x815   :  { %1101 = vrot.lane.b32.xlu0 %v11006_v35, %s10489_s9  ;;  %vm992_vm10 = vcmp.eq.s32.totalorder %v11015_v32, 1 }
 0x819   :  { %1094 = vrot.lane.b32.xlu0 %v9877_v48, %s10489_s9  ;;  %v11062_v48 = vsel %vm704_vm8, %v10989_v34, %v10986_v29 }
 0x887   :  { %v1102_v50 = vpop.permute.xlu0 %1101 }
 0x888   :  { %8481 = vmatmul.mubr.msk.f32.vlgmr.msra.gmra.mrb[6].mxu1 %vm519_vm7, %v1102_v50 }
 0x889   :  { %9041 = vmatpush3.bf16.msra.mxu1 %v10832_v1  ;;  %8499 = vmatprep.mubr.msk.f32.mxu1 %vm10491_vm3, %v10487_v0 }
 0x88a   :  { %9042 = vmatprep.subr.bf16.mxu1 %v10490_v63 }
 0x88b   :  { %v1095_v54 = vpop.permute.xlu0 %1094 }
 0x88c   :  { %v1097_v55 = vmul.f32 %v9881_v53, %v1095_v54  ;;  %v11073_v53 = vsel %vm992_vm10, %v11000_v16, %v10997_v37 }
 0x88d   :  { %9044 = vmatpush3.bf16.msra.mxu1 %v10836_v5 }
 0x88e   :  { %9045 = vmatprep.subr.bf16.mxu1 %v10490_v63  ;;  %v11024_v56 = vsel %vm992_vm10, %v1097_v55, %v10949_v47 }
 0x88f   :  { %8020 = vmatmul.mubr.msk.f32.vlgmr.msra.gmra.mrb[6].mxu0 %vm398_vm4, %v11024_v56 }
 0x890   :  { %9088 = vmatpush1.bf16.msra.mxu0 %v10686_v9  ;;  %1635 = vmatprep.mubr.f32.mxu0 %v10487_v0 }
 0x891   :  { %9047 = vmatpush3.bf16.msra.mxu1 %v10844_v11  ;;  %9090 = vmatprep.subr.bf16.mxu0 %v10697_v13 }
 0x892   :  { %9048 = vmatprep.subr.bf16.mxu1 %v10490_v63 }
 0x894   :  { %9092 = vmatpush1.bf16.msra.mxu0 %v10715_v18 }
 0x895   :  { %9050 = vmatpush3.bf16.msra.mxu1 %v10848_v15  ;;  %9094 = vmatprep.subr.bf16.mxu0 %v10718_v19 }
 0x896   :  { %9067 = vmatprep.subr.bf16.mxu1 %v10490_v63 }
 0x898   :  { %8500 = vmatmul.mubr.msk.f32.vlgmr.msra.gmra.mrb[8].mxu1 %vm398_vm4, %v11024_v56  ;;  %9096 = vmatpush1.bf16.msra.mxu0 %v10738_v25 }
 0x899   :  { %9069 = vmatpush3.bf16.msra.mxu1 %v10838_v6  ;;  %8510 = vmatprep.mubr.msk.f32.mxu1 %vm10491_vm3, %v10487_v0 }
 0x89a   :  { %9070 = vmatprep.subr.bf16.mxu1 %v10490_v63  ;;  %9098 = vmatprep.subr.bf16.mxu0 %v10741_v26 }
 0x89c   :  { %9100 = vmatpush1.bf16.msra.mxu0 %v10755_v30 }
 0x89d   :  { %9072 = vmatpush3.bf16.msra.mxu1 %v10853_v20  ;;  %9120 = vmatprep.subr.bf16.mxu0 %v10684_v8 }
 0x89e   :  { %9073 = vmatprep.subr.bf16.mxu1 %v10490_v63 }
 0x95b   :  { %v1171_v47 = vpop.f32.mrb[6].mxu1 }
 0x95c   :  { %v8482_v57 = vpop.f32.mrb[7].mxu1 }
 0x962   :  { %v1349_v58 = vpop.f32.mrb[6].mxu0 }
 0x963   :  { %v1351_v59 = vpop.f32.mrb[7].mxu0  ;;  %v9745_v10 = vadd.f32 %v1349_v58, %v10827_v52 }
 0x964   :  { %v9746_v3 = vadd.f32 %v1351_v59, %v10817_v46 }
 0x965   :  { %v8021_v14 = vmul.f32 -1.442695, %v9745_v10 }
 0x966   :  { %v8022_v37 = vmul.f32 -1.442695, %v9746_v3 }
 0x96b   :  { %v1244_v60 = vpop.f32.mrb[8].mxu1 }
 0x96c   :  { %v1245_v61 = vadd.f32 %v1244_v60, %v1171_v47  ;;  %v8501_v62 = vpop.f32.mrb[9].mxu1 }
 0x96e   :  { %v1248_v2 = vadd.f32 %v10905_v41, %v1245_v61 }
 0x970   :  { %9882 = vtanh.f32 %v1248_v2  ;;  %v8019_v12 = vmul.f32 -1.442695, %v1248_v2 }
 0x971   :  { %9884 = vtanh.f32 %v9746_v3 }
 0x972   :  { %9886 = vpow2.f32 %v8019_v12 }
 0x973   :  { %9888 = vpow2.f32 %v8021_v14 }
 0x97a   :  { %v9883_v4 = vpop.eup %9882 }
 0x97b   :  { %1258 = vrot.lane.b32.xlu1 %v9883_v4, %s10492_s20  ;;  %v9885_v7 = vpop.eup %9884 }
 0x97c   :  { %v9887_v17 = vpop.eup %9886 }
 0x97d   :  { %v1252_v22 = vadd.f32 1.0, %v9887_v17  ;;  %v9889_v24 = vpop.eup %9888 }
 0x97e   :  { %v1362_v28 = vadd.f32 1.0, %v9889_v24 }
 0x97f   :  { %1371 = vrot.lane.b32.xlu1 %v9885_v7, %s10489_s9  ;;  %9890 = vrcp.f32 %v1252_v22 }
 0x980   :  { %9892 = vrcp.f32 %v1362_v28 }
 0x989   :  { %v9891_v33 = vpop.eup %9890 }
 0x98a   :  { %v9893_v42 = vpop.eup %9892  ;;  %v1256_v21 = vmul.f32 %v9891_v33, %v11062_v48 }
 0x98b   :  { %v1369_v38 = vmul.f32 %v9893_v42, %v11073_v53 }
 0x9ed   :  { %v1259_v23 = vpop.permute.xlu1 %1258 }
 0x9ee   :  { %v1261_v36 = vmul.f32 %v9891_v33, %v1259_v23 }
 0x9f0   :  { %1263 = vrot.lane.b32.xlu0 %v1261_v36, %s10492_s20 }
 0x9f1   :  { %v1372_v31 = vpop.permute.xlu1 %1371 }
 0x9f2   :  { %v1374_v43 = vmul.f32 %v9893_v42, %v1372_v31 }
 0x9f4   :  { %1376 = vrot.lane.b32.xlu1 %v1374_v43, %s10489_s9 }
 0x9f8   :  { %1278 = vperm.xlu1 %9828, %v1276_v45  }
 0xa62   :  { %v1264_v27 = vpop.permute.xlu0 %1263 }
 0xa63   :  { %v11065_v49 = vadd.f32 %v1264_v27, %v1256_v21 }
 0xa65   :  { %9894 = vtanh.f32 %v11065_v49 }
 0xa66   :  { %v1377_v54 = vpop.permute.xlu1 %1376 }
 0xa67   :  { %v11076_v29 = vadd.f32 %v1377_v54, %v1369_v38 }
 0xa69   :  { %9896 = vtanh.f32 %v11076_v29 }
 0xa6a   :  { %9898 = vpow2.f32 %v8022_v37 }
 0xa6f   :  { %v9895_v50 = vpop.eup %9894 }
 0xa70   :  { %1269 = vrot.lane.b32.xlu0 %v9895_v50, %s10492_s20 }
 0xa73   :  { %v9897_v57 = vpop.eup %9896 }
 0xa74   :  { %v9899_v16 = vpop.eup %9898 }
 0xa75   :  { %v1363_v58 = vadd.f32 1.0, %v9899_v16 }
 0xa77   :  { %9900 = vrcp.f32 %v1363_v58 }
 0xa81   :  { %v9901_v60 = vpop.eup %9900 }
 0xae2   :  { %v1270_v34 = vpop.permute.xlu0 %1269 }
 0xae3   :  { %v1272_v55 = vmul.f32 %v9891_v33, %v1270_v34 }
 0xae5   :  { %v11082_v47 = vsel %vm992_vm10, %v1272_v55, %v11006_v35  ;;  %v11091_v35 = vpop.permute.xlu1 %1278  ;;  %v1564_v55 = vsel %vm1563_vm13, 1, %v10488_v40 }
 0xae6   :  { %1389 = vrot.lane.b32.xlu0 %v11082_v47, %s10489_s9  ;;  %vm1280_vm12 = vcmp.eq.s32.totalorder %v11091_v35, 1 }
 0xae7   :  { %v11149_v39 = vsel %vm1280_vm12, %v11076_v29, %v11073_v53 }
 0xaea   :  { %1382 = vrot.lane.b32.xlu0 %v9897_v57, %s10489_s9  ;;  %v11138_v57 = vsel %vm992_vm10, %v11065_v49, %v11062_v48 }
 0xb58   :  { %v1390_v59 = vpop.permute.xlu0 %1389 }
 0xb59   :  { %8511 = vmatmul.mubr.msk.f32.vlgmr.msra.gmra.mrb[10].mxu1 %vm519_vm7, %v1390_v59 }
 0xb5a   :  { %9075 = vmatpush3.bf16.msra.mxu1 %v10832_v1  ;;  %8529 = vmatprep.mubr.msk.f32.mxu1 %vm10491_vm3, %v10487_v0 }
 0xb5b   :  { %9076 = vmatprep.subr.bf16.mxu1 %v10490_v63 }
 0xb5c   :  { %v1383_v61 = vpop.permute.xlu0 %1382 }
 0xb5d   :  { %v1385_v62 = vmul.f32 %v9901_v60, %v1383_v61 }
 0xb5e   :  { %9078 = vmatpush3.bf16.msra.mxu1 %v10836_v5 }
 0xb5f   :  { %9079 = vmatprep.subr.bf16.mxu1 %v10490_v63  ;;  %v11100_v2 = vsel %vm1280_vm12, %v1385_v62, %v11024_v56 }
 0xb60   :  { %8026 = vmatmul.mubr.msk.f32.vlgmr.msra.gmra.mrb[8].mxu0 %vm398_vm4, %v11100_v2 }
 0xb61   :  { %9122 = vmatpush1.bf16.msra.mxu0 %v10686_v9  ;;  %1923 = vmatprep.mubr.f32.mxu0 %v10487_v0 }
 0xb62   :  { %9081 = vmatpush3.bf16.msra.mxu1 %v10844_v11  ;;  %9124 = vmatprep.subr.bf16.mxu0 %v10697_v13 }
 0xb63   :  { %9082 = vmatprep.subr.bf16.mxu1 %v10490_v63 }
 0xb65   :  { %9126 = vmatpush1.bf16.msra.mxu0 %v10715_v18 }
 0xb66   :  { %9084 = vmatpush3.bf16.msra.mxu1 %v10848_v15  ;;  %9128 = vmatprep.subr.bf16.mxu0 %v10718_v19 }
 0xb67   :  { %9101 = vmatprep.subr.bf16.mxu1 %v10490_v63 }
 0xb69   :  { %8530 = vmatmul.mubr.msk.f32.vlgmr.msra.gmra.mrb[12].mxu1 %vm398_vm4, %v11100_v2  ;;  %9130 = vmatpush1.bf16.msra.mxu0 %v10738_v25 }
 0xb6a   :  { %9103 = vmatpush3.bf16.msra.mxu1 %v10838_v6  ;;  %8540 = vmatprep.mubr.msk.f32.mxu1 %vm10491_vm3, %v10487_v0 }
 0xb6b   :  { %9104 = vmatprep.subr.bf16.mxu1 %v10490_v63  ;;  %9132 = vmatprep.subr.bf16.mxu0 %v10741_v26 }
 0xb6d   :  { %9134 = vmatpush1.bf16.msra.mxu0 %v10755_v30 }
 0xb6e   :  { %9106 = vmatpush3.bf16.msra.mxu1 %v10853_v20  ;;  %9154 = vmatprep.subr.bf16.mxu0 %v10684_v8 }
 0xb6f   :  { %9107 = vmatprep.subr.bf16.mxu1 %v10490_v63 }
 0xc2c   :  { %v1459_v56 = vpop.f32.mrb[10].mxu1 }
 0xc2d   :  { %v8512_v3 = vpop.f32.mrb[11].mxu1 }
 0xc33   :  { %v1637_v4 = vpop.f32.mrb[8].mxu0 }
 0xc34   :  { %v1639_v7 = vpop.f32.mrb[9].mxu0  ;;  %v9747_v33 = vadd.f32 %v1637_v4, %v10827_v52 }
 0xc35   :  { %v9748_v22 = vadd.f32 %v1639_v7, %v10817_v46 }
 0xc36   :  { %v8027_v36 = vmul.f32 -1.442695, %v9747_v33 }
 0xc37   :  { %v8028_v53 = vmul.f32 -1.442695, %v9748_v22 }
 0xc3c   :  { %v1532_v10 = vpop.f32.mrb[12].mxu1 }
 0xc3d   :  { %v1533_v12 = vadd.f32 %v1532_v10, %v1459_v56  ;;  %v8531_v14 = vpop.f32.mrb[13].mxu1 }
 0xc3f   :  { %v1536_v17 = vadd.f32 %v10905_v41, %v1533_v12 }
 0xc41   :  { %9902 = vtanh.f32 %v1536_v17  ;;  %v8025_v23 = vmul.f32 -1.442695, %v1536_v17 }
 0xc42   :  { %9904 = vtanh.f32 %v9748_v22 }
 0xc43   :  { %9906 = vpow2.f32 %v8025_v23 }
 0xc44   :  { %9908 = vpow2.f32 %v8027_v36 }
 0xc4b   :  { %v9903_v24 = vpop.eup %9902 }
 0xc4c   :  { %1546 = vrot.lane.b32.xlu1 %v9903_v24, %s10492_s20  ;;  %v9905_v28 = vpop.eup %9904 }
 0xc4d   :  { %v9907_v42 = vpop.eup %9906 }
 0xc4e   :  { %v1540_v31 = vadd.f32 1.0, %v9907_v42  ;;  %v9909_v43 = vpop.eup %9908 }
 0xc4f   :  { %v1650_v45 = vadd.f32 1.0, %v9909_v43 }
 0xc50   :  { %1659 = vrot.lane.b32.xlu1 %v9905_v28, %s10489_s9  ;;  %9910 = vrcp.f32 %v1540_v31 }
 0xc51   :  { %9912 = vrcp.f32 %v1650_v45 }
 0xc5a   :  { %v9911_v21 = vpop.eup %9910 }
 0xc5b   :  { %v9913_v54 = vpop.eup %9912  ;;  %v1544_v37 = vmul.f32 %v9911_v21, %v11138_v57 }
 0xc5c   :  { %v1657_v32 = vmul.f32 %v9913_v54, %v11149_v39 }
 0xcbe   :  { %v1547_v27 = vpop.permute.xlu1 %1546 }
 0xcbf   :  { %v1549_v50 = vmul.f32 %v9911_v21, %v1547_v27 }
 0xcc1   :  { %1551 = vrot.lane.b32.xlu0 %v1549_v50, %s10492_s20 }
 0xcc2   :  { %v1660_v38 = vpop.permute.xlu1 %1659 }
 0xcc3   :  { %v1662_v34 = vmul.f32 %v9913_v54, %v1660_v38 }
 0xcc5   :  { %1664 = vrot.lane.b32.xlu1 %v1662_v34, %s10489_s9 }
 0xcc9   :  { %1566 = vperm.xlu1 %9828, %v1564_v55  }
 0xd33   :  { %v1552_v16 = vpop.permute.xlu0 %1551 }
 0xd34   :  { %v11141_v58 = vadd.f32 %v1552_v16, %v1544_v37 }
 0xd36   :  { %9914 = vtanh.f32 %v11141_v58 }
 0xd37   :  { %v1665_v60 = vpop.permute.xlu1 %1664 }
 0xd38   :  { %v11152_v48 = vadd.f32 %v1665_v60, %v1657_v32 }
 0xd3a   :  { %9916 = vtanh.f32 %v11152_v48 }
 0xd3b   :  { %9918 = vpow2.f32 %v8028_v53 }
 0xd40   :  { %v9915_v59 = vpop.eup %9914 }
 0xd41   :  { %1557 = vrot.lane.b32.xlu0 %v9915_v59, %s10492_s20 }
 0xd44   :  { %v9917_v56 = vpop.eup %9916 }
 0xd45   :  { %v9919_v29 = vpop.eup %9918 }
 0xd46   :  { %v1651_v3 = vadd.f32 1.0, %v9919_v29 }
 0xd48   :  { %9920 = vrcp.f32 %v1651_v3 }
 0xd52   :  { %v9921_v7 = vpop.eup %9920 }
 0xdb3   :  { %v1558_v49 = vpop.permute.xlu0 %1557 }
 0xdb4   :  { %v1560_v61 = vmul.f32 %v9911_v21, %v1558_v49  ;;  %v11210_v49 = vld [vmem:[%s12552_s8] sm:$0xff] }
 0xdb5   :  { %vm1851_vm15 = vcmp.gt.s32.totalorder %v11210_v49, 5  ;;  %vm2139_vm2 = vcmp.gt.s32.totalorder %v11210_v49, 6  ;;  %vm2427_vm6 = vcmp.gt.s32.totalorder %v11210_v49, 7  ;;  %vm2715_vm9 = vcmp.gt.s32.totalorder %v11210_v49, 8 }
 0xdb6   :  { %v11158_v62 = vsel %vm1280_vm12, %v1560_v61, %v11082_v47  ;;  %v11167_v47 = vpop.permute.xlu1 %1566  ;;  %v1852_v61 = vsel %vm1851_vm15, 1, %v10488_v40  ;;  %vm3003_vm11 = vcmp.gt.s32.totalorder %v11210_v49, 9  ;;  %vm3291_vm13 = vcmp.gt.s32.totalorder %v11210_v49, 10 }
 0xdb7   :  { %1677 = vrot.lane.b32.xlu0 %v11158_v62, %s10489_s9  ;;  %vm1568_vm14 = vcmp.eq.s32.totalorder %v11167_v47, 1 }
 0xdbb   :  { %1670 = vrot.lane.b32.xlu0 %v9917_v56, %s10489_s9  ;;  %v11219_v56 = vsel %vm1280_vm12, %v11141_v58, %v11138_v57 }
 0xe29   :  { %v1678_v4 = vpop.permute.xlu0 %1677 }
 0xe2a   :  { %8541 = vmatmul.mubr.msk.f32.vlgmr.msra.gmra.mrb[14].mxu1 %vm519_vm7, %v1678_v4 }
 0xe2b   :  { %9109 = vmatpush3.bf16.msra.mxu1 %v10832_v1  ;;  %8559 = vmatprep.mubr.msk.f32.mxu1 %vm10491_vm3, %v10487_v0 }
 0xe2c   :  { %9110 = vmatprep.subr.bf16.mxu1 %v10490_v63 }
 0xe2d   :  { %v1671_v10 = vpop.permute.xlu0 %1670 }
 0xe2e   :  { %v1673_v12 = vmul.f32 %v9921_v7, %v1671_v10  ;;  %v11230_v7 = vsel %vm1568_vm14, %v11152_v48, %v11149_v39 }
 0xe2f   :  { %9112 = vmatpush3.bf16.msra.mxu1 %v10836_v5 }
 0xe30   :  { %9113 = vmatprep.subr.bf16.mxu1 %v10490_v63  ;;  %v11176_v14 = vsel %vm1568_vm14, %v1673_v12, %v11100_v2 }
 0xe31   :  { %8032 = vmatmul.mubr.msk.f32.vlgmr.msra.gmra.mrb[10].mxu0 %vm398_vm4, %v11176_v14 }
 0xe32   :  { %9156 = vmatpush1.bf16.msra.mxu0 %v10686_v9  ;;  %2211 = vmatprep.mubr.f32.mxu0 %v10487_v0 }
 0xe33   :  { %9115 = vmatpush3.bf16.msra.mxu1 %v10844_v11  ;;  %9158 = vmatprep.subr.bf16.mxu0 %v10697_v13 }
 0xe34   :  { %9116 = vmatprep.subr.bf16.mxu1 %v10490_v63 }
 0xe36   :  { %9160 = vmatpush1.bf16.msra.mxu0 %v10715_v18 }
 0xe37   :  { %9118 = vmatpush3.bf16.msra.mxu1 %v10848_v15  ;;  %9162 = vmatprep.subr.bf16.mxu0 %v10718_v19 }
 0xe38   :  { %9135 = vmatprep.subr.bf16.mxu1 %v10490_v63 }
 0xe3a   :  { %8560 = vmatmul.mubr.msk.f32.vlgmr.msra.gmra.mrb[16].mxu1 %vm398_vm4, %v11176_v14  ;;  %9164 = vmatpush1.bf16.msra.mxu0 %v10738_v25 }
 0xe3b   :  { %9137 = vmatpush3.bf16.msra.mxu1 %v10838_v6  ;;  %8570 = vmatprep.mubr.msk.f32.mxu1 %vm10491_vm3, %v10487_v0 }
 0xe3c   :  { %9138 = vmatprep.subr.bf16.mxu1 %v10490_v63  ;;  %9166 = vmatprep.subr.bf16.mxu0 %v10741_v26 }
 0xe3e   :  { %9168 = vmatpush1.bf16.msra.mxu0 %v10755_v30 }
 0xe3f   :  { %9140 = vmatpush3.bf16.msra.mxu1 %v10853_v20  ;;  %9175 = vmatprep.subr.bf16.mxu0 %v10490_v63 }
 0xe40   :  { %9141 = vmatprep.subr.bf16.mxu1 %v10490_v63 }
 0xefd   :  { %v1747_v2 = vpop.f32.mrb[14].mxu1 }
 0xefe   :  { %v8542_v17 = vpop.f32.mrb[15].mxu1 }
 0xf04   :  { %v1925_v22 = vpop.f32.mrb[10].mxu0 }
 0xf05   :  { %v1927_v24 = vpop.f32.mrb[11].mxu0  ;;  %v9749_v45 = vadd.f32 %v1925_v22, %v10827_v52 }
 0xf06   :  { %v9750_v42 = vadd.f32 %v1927_v24, %v10817_v46 }
 0xf07   :  { %v8033_v27 = vmul.f32 -1.442695, %v9749_v45 }
 0xf08   :  { %v8034_v39 = vmul.f32 -1.442695, %v9750_v42 }
 0xf0d   :  { %v1820_v28 = vpop.f32.mrb[16].mxu1 }
 0xf0e   :  { %v1821_v33 = vadd.f32 %v1820_v28, %v1747_v2  ;;  %v8561_v23 = vpop.f32.mrb[17].mxu1 }
 0xf10   :  { %v1824_v36 = vadd.f32 %v10905_v41, %v1821_v33 }
 0xf12   :  { %9922 = vtanh.f32 %v1824_v36  ;;  %v8031_v21 = vmul.f32 -1.442695, %v1824_v36 }
 0xf13   :  { %9924 = vtanh.f32 %v9750_v42 }
 0xf14   :  { %9926 = vpow2.f32 %v8031_v21 }
 0xf15   :  { %9928 = vpow2.f32 %v8033_v27 }
 0xf1c   :  { %v9923_v31 = vpop.eup %9922 }
 0xf1d   :  { %1834 = vrot.lane.b32.xlu1 %v9923_v31, %s10492_s20  ;;  %v9925_v43 = vpop.eup %9924 }
 0xf1e   :  { %v9927_v50 = vpop.eup %9926 }
 0xf1f   :  { %v1828_v54 = vadd.f32 1.0, %v9927_v50  ;;  %v9929_v38 = vpop.eup %9928 }
 0xf20   :  { %v1938_v34 = vadd.f32 1.0, %v9929_v38 }
 0xf21   :  { %1947 = vrot.lane.b32.xlu1 %v9925_v43, %s10489_s9  ;;  %9930 = vrcp.f32 %v1828_v54 }
 0xf22   :  { %9932 = vrcp.f32 %v1938_v34 }
 0xf2b   :  { %v9931_v55 = vpop.eup %9930 }
 0xf2c   :  { %v9933_v59 = vpop.eup %9932  ;;  %v1832_v53 = vmul.f32 %v9931_v55, %v11219_v56 }
 0xf2d   :  { %v1945_v35 = vmul.f32 %v9933_v59, %v11230_v7 }
 0xf8f   :  { %v1835_v37 = vpop.permute.xlu1 %1834 }
 0xf90   :  { %v1837_v16 = vmul.f32 %v9931_v55, %v1835_v37 }
 0xf92   :  { %1839 = vrot.lane.b32.xlu0 %v1837_v16, %s10492_s20 }
 0xf93   :  { %v1948_v60 = vpop.permute.xlu1 %1947 }
 0xf94   :  { %v1950_v32 = vmul.f32 %v9933_v59, %v1948_v60 }
 0xf96   :  { %1952 = vrot.lane.b32.xlu1 %v1950_v32, %s10489_s9 }
 0xf9a   :  { %1854 = vperm.xlu1 %9828, %v1852_v61  }
0x1004   :  { %v1840_v29 = vpop.permute.xlu0 %1839 }
0x1005   :  { %v11222_v3 = vadd.f32 %v1840_v29, %v1832_v53 }
0x1007   :  { %9934 = vtanh.f32 %v11222_v3 }
0x1008   :  { %v1953_v10 = vpop.permute.xlu1 %1952 }
0x1009   :  { %v11233_v57 = vadd.f32 %v1953_v10, %v1945_v35 }
0x100b   :  { %9936 = vtanh.f32 %v11233_v57 }
0x100c   :  { %9938 = vpow2.f32 %v8034_v39 }
0x1011   :  { %v9935_v4 = vpop.eup %9934 }
0x1012   :  { %1845 = vrot.lane.b32.xlu0 %v9935_v4, %s10492_s20  ;;  %v2140_v4 = vsel %vm2139_vm2, 1, %v10488_v40 }
0x1015   :  { %v9937_v17 = vpop.eup %9936 }
0x1016   :  { %v9939_v48 = vpop.eup %9938 }
0x1017   :  { %v1939_v22 = vadd.f32 1.0, %v9939_v48 }
0x1019   :  { %9940 = vrcp.f32 %v1939_v22 }
0x1023   :  { %v9941_v28 = vpop.eup %9940 }
0x1084   :  { %v1846_v58 = vpop.permute.xlu0 %1845 }
0x1085   :  { %v1848_v12 = vmul.f32 %v9931_v55, %v1846_v58 }
0x1087   :  { %v11239_v2 = vsel %vm1568_vm14, %v1848_v12, %v11158_v62  ;;  %v11248_v62 = vpop.permute.xlu1 %1854  ;;  %v11296_v12 = vsel %vm1568_vm14, %v11222_v3, %v11219_v56 }
0x1088   :  { %1965 = vrot.lane.b32.xlu0 %v11239_v2, %s10489_s9  ;;  %vm1856_vm0 = vcmp.eq.s32.totalorder %v11248_v62, 1 }
0x1089   :  { %v11303_v39 = vsel %vm1856_vm0, %v11233_v57, %v11230_v7 }
0x108c   :  { %1958 = vrot.lane.b32.xlu0 %v9937_v17, %s10489_s9 }
0x10fa   :  { %v1966_v24 = vpop.permute.xlu0 %1965 }
0x10fb   :  { %8571 = vmatmul.mubr.msk.f32.vlgmr.msra.gmra.mrb[18].mxu1 %vm519_vm7, %v1966_v24 }
0x10fc   :  { %9143 = vmatpush3.bf16.msra.mxu1 %v10832_v1  ;;  %8589 = vmatprep.mubr.msk.f32.mxu1 %vm10491_vm3, %v10487_v0 }
0x10fd   :  { %9144 = vmatprep.subr.bf16.mxu1 %v10490_v63 }
0x10fe   :  { %v1959_v33 = vpop.permute.xlu0 %1958 }
0x10ff   :  { %v1961_v23 = vmul.f32 %v9941_v28, %v1959_v33 }
0x1100   :  { %9146 = vmatpush3.bf16.msra.mxu1 %v10836_v5 }
0x1101   :  { %9147 = vmatprep.subr.bf16.mxu1 %v10490_v63  ;;  %v11257_v36 = vsel %vm1856_vm0, %v1961_v23, %v11176_v14 }
0x1102   :  { %8038 = vmatmul.mubr.msk.f32.vlgmr.msra.gmra.mrb[12].mxu0 %vm398_vm4, %v11257_v36 }
0x1103   :  { %9177 = vmatpush3.bf16.msra.mxu0 %v10832_v1  ;;  %8619 = vmatprep.mubr.msk.f32.mxu0 %vm10491_vm3, %v10487_v0 }
0x1104   :  { %9149 = vmatpush3.bf16.msra.mxu1 %v10844_v11  ;;  %9178 = vmatprep.subr.bf16.mxu0 %v10490_v63 }
0x1105   :  { %9150 = vmatprep.subr.bf16.mxu1 %v10490_v63 }
0x1107   :  { %9180 = vmatpush3.bf16.msra.mxu0 %v10836_v5 }
0x1108   :  { %9152 = vmatpush3.bf16.msra.mxu1 %v10848_v15  ;;  %9181 = vmatprep.subr.bf16.mxu0 %v10490_v63 }
0x1109   :  { %9169 = vmatprep.subr.bf16.mxu1 %v10490_v63 }
0x110b   :  { %8590 = vmatmul.mubr.msk.f32.vlgmr.msra.gmra.mrb[20].mxu1 %vm398_vm4, %v11257_v36  ;;  %9183 = vmatpush3.bf16.msra.mxu0 %v10844_v11 }
0x110c   :  { %9184 = vmatprep.subr.bf16.mxu0 %v10490_v63  ;;  %9171 = vmatpush3.bf16.msra.mxu1 %v10838_v6 }
0x110d   :  { %9172 = vmatprep.subr.bf16.mxu1 %v10490_v63  ;;  %8600 = vmatprep.mubr.msk.f32.mxu1 %vm10491_vm3, %v10487_v0 }
0x110f   :  { %9186 = vmatpush3.bf16.msra.mxu0 %v10848_v15 }
0x1110   :  { %9188 = vmatprep.subr.bf16.mxu0 %v10684_v8  ;;  %9174 = vmatpush3.bf16.msra.mxu1 %v10853_v20 }
0x1111   :  { %9203 = vmatprep.subr.bf16.mxu1 %v10490_v63 }
0x11ce   :  { %v2035_v14 = vpop.f32.mrb[18].mxu1 }
0x11cf   :  { %v8572_v42 = vpop.f32.mrb[19].mxu1 }
0x11d5   :  { %v2213_v31 = vpop.f32.mrb[12].mxu0 }
0x11d6   :  { %v2215_v43 = vpop.f32.mrb[13].mxu0  ;;  %v9751_v55 = vadd.f32 %v2213_v31, %v10827_v52 }
0x11d7   :  { %v9752_v45 = vadd.f32 %v2215_v43, %v10817_v46 }
0x11d8   :  { %v8039_v37 = vmul.f32 -1.442695, %v9751_v55 }
0x11d9   :  { %9942 = vtanh.f32 %v9752_v45  ;;  %v8040_v3 = vmul.f32 -1.442695, %v9752_v45 }
0x11de   :  { %v2108_v21 = vpop.f32.mrb[20].mxu1 }
0x11df   :  { %v2109_v27 = vadd.f32 %v2108_v21, %v2035_v14  ;;  %v8591_v50 = vpop.f32.mrb[21].mxu1 }
0x11e1   :  { %v2112_v54 = vadd.f32 %v10905_v41, %v2109_v27 }
0x11e3   :  { %v9943_v38 = vpop.eup %9942  ;;  %9944 = vtanh.f32 %v2112_v54  ;;  %v8037_v16 = vmul.f32 -1.442695, %v2112_v54 }
0x11e4   :  { %2235 = vrot.lane.b32.xlu0 %v9943_v38, %s10489_s9  ;;  %9946 = vpow2.f32 %v8039_v37 }
0x11e5   :  { %9948 = vpow2.f32 %v8037_v16  ;;  %v11361_v16 = vld [vmem:[%s12534_s7] ss:$0 sm:$0xff] }
0x11ed   :  { %v9945_v34 = vpop.eup %9944 }
0x11ee   :  { %2122 = vrot.lane.b32.xlu1 %v9945_v34, %s10492_s20  ;;  %v9947_v59 = vpop.eup %9946 }
0x11ef   :  { %v2226_v60 = vadd.f32 1.0, %v9947_v59  ;;  %v9949_v32 = vpop.eup %9948 }
0x11f0   :  { %v2116_v61 = vadd.f32 1.0, %v9949_v32 }
0x11f1   :  { %9950 = vrcp.f32 %v2226_v60 }
0x11f2   :  { %9952 = vrcp.f32 %v2116_v61 }
0x11fb   :  { %v9951_v53 = vpop.eup %9950 }
0x11fc   :  { %v9953_v10 = vpop.eup %9952  ;;  %v2233_v24 = vmul.f32 %v9951_v53, %v11303_v39 }
0x11fd   :  { %v2120_v17 = vmul.f32 %v9953_v10, %v11296_v12 }
0x1256   :  { %v2236_v41 = vpop.permute.xlu0 %2235 }
0x1257   :  { %v2238_v29 = vmul.f32 %v9951_v53, %v2236_v41 }
0x1259   :  { %2240 = vrot.lane.b32.xlu0 %v2238_v29, %s10489_s9 }
0x125d   :  { %2142 = vperm.xlu0 %9829, %v2140_v4  }
0x1260   :  { %v2123_v35 = vpop.permute.xlu1 %2122 }
0x1261   :  { %v2125_v58 = vmul.f32 %v9953_v10, %v2123_v35 }
0x1263   :  { %2127 = vrot.lane.b32.xlu1 %v2125_v58, %s10492_s20 }
0x12cb   :  { %v2241_v48 = vpop.permute.xlu0 %2240 }
0x12cc   :  { %v11308_v33 = vadd.f32 %v2241_v48, %v2233_v24 }
0x12d5   :  { %v2128_v22 = vpop.permute.xlu1 %2127 }
0x12d6   :  { %v11306_v28 = vadd.f32 %v2128_v22, %v2120_v17 }
0x12d8   :  { %9954 = vtanh.f32 %v11306_v28 }
0x12d9   :  { %9956 = vtanh.f32 %v11308_v33 }
0x12da   :  { %9958 = vpow2.f32 %v8040_v3  ;;  %v2428_v3 = vsel %vm2427_vm6, 1, %v10488_v40 }
0x12dc   :  { %v11314_v42 = vpop.permute.xlu0 %2142 }
0x12dd   :  { %vm2144_vm5 = vcmp.eq.s32.totalorder %v11314_v42, 1 }
0x12e2   :  { %v9955_v47 = vpop.eup %9954 }
0x12e3   :  { %2133 = vrot.lane.b32.xlu1 %v9955_v47, %s10492_s20  ;;  %v9957_v56 = vpop.eup %9956 }
0x12e4   :  { %v9959_v7 = vpop.eup %9958 }
0x12e5   :  { %v2227_v57 = vadd.f32 1.0, %v9959_v7  ;;  %v11376_v7 = vsel %vm1856_vm0, %v11306_v28, %v11296_v12 }
0x12e7   :  { %2246 = vrot.lane.b32.xlu1 %v9957_v56, %s10489_s9  ;;  %9960 = vrcp.f32 %v2227_v57 }
0x12f1   :  { %v9961_v43 = vpop.eup %9960 }
0x1355   :  { %v2134_v23 = vpop.permute.xlu1 %2133 }
0x1356   :  { %v2136_v14 = vmul.f32 %v9953_v10, %v2134_v23 }
0x1358   :  { %v11319_v31 = vsel %vm1856_vm0, %v2136_v14, %v11239_v2 }
0x1359   :  { %2253 = vrot.lane.b32.xlu0 %v11319_v31, %s10489_s9  ;;  %v2247_v21 = vpop.permute.xlu1 %2246 }
0x135a   :  { %v2249_v27 = vmul.f32 %v9961_v43, %v2247_v21  ;;  %v11387_v21 = vsel %vm2144_vm5, %v11308_v33, %v11303_v39 }
0x135c   :  { %v11327_v45 = vsel %vm2144_vm5, %v2249_v27, %v11257_v36 }
0x135d   :  { %8620 = vmatmul.mubr.msk.f32.vlgmr.msra.gmra.mrb[26].mxu0 %vm398_vm4, %v11327_v45 }
0x135e   :  { %9190 = vmatpush1.bf16.msra.mxu0 %v10686_v9  ;;  %2499 = vmatprep.mubr.f32.mxu0 %v10487_v0 }
0x135f   :  { %9192 = vmatprep.subr.bf16.mxu0 %v10697_v13 }
0x1362   :  { %9194 = vmatpush1.bf16.msra.mxu0 %v10715_v18 }
0x1363   :  { %9196 = vmatprep.subr.bf16.mxu0 %v10718_v19 }
0x1366   :  { %9198 = vmatpush1.bf16.msra.mxu0 %v10738_v25 }
0x1367   :  { %9200 = vmatprep.subr.bf16.mxu0 %v10741_v26 }
0x136a   :  { %9202 = vmatpush1.bf16.msra.mxu0 %v10755_v30 }
0x136b   :  { %9222 = vmatprep.subr.bf16.mxu0 %v10684_v8 }
0x136d   :  { %8044 = vmatmul.mubr.msk.f32.vlgmr.msra.gmra.mrb[14].mxu0 %vm398_vm4, %v11327_v45 }
0x136e   :  { %9224 = vmatpush1.bf16.msra.mxu0 %v10686_v9  ;;  %2787 = vmatprep.mubr.f32.mxu0 %v10487_v0 }
0x136f   :  { %9226 = vmatprep.subr.bf16.mxu0 %v10697_v13 }
0x1372   :  { %9228 = vmatpush1.bf16.msra.mxu0 %v10715_v18 }
0x1373   :  { %9230 = vmatprep.subr.bf16.mxu0 %v10718_v19 }
0x1376   :  { %9232 = vmatpush1.bf16.msra.mxu0 %v10738_v25 }
0x1377   :  { %9234 = vmatprep.subr.bf16.mxu0 %v10741_v26 }
0x137a   :  { %9236 = vmatpush1.bf16.msra.mxu0 %v10755_v30 }
0x137b   :  { %9256 = vmatprep.subr.bf16.mxu0 %v10684_v8 }
0x13cb   :  { %v2254_v2 = vpop.permute.xlu0 %2253 }
0x13cc   :  { %8601 = vmatmul.mubr.msk.f32.vlgmr.msra.gmra.mrb[22].mxu1 %vm519_vm7, %v2254_v2 }
0x13cd   :  { %9205 = vmatpush3.bf16.msra.mxu1 %v10838_v6  ;;  %8630 = vmatprep.mubr.msk.f32.mxu1 %vm10491_vm3, %v10487_v0 }
0x13ce   :  { %9206 = vmatprep.subr.bf16.mxu1 %v10490_v63 }
0x13d1   :  { %9208 = vmatpush3.bf16.msra.mxu1 %v10853_v20 }
0x13d2   :  { %9209 = vmatprep.subr.bf16.mxu1 %v10490_v63 }
0x1430   :  { %v2396_v36 = vpop.f32.mrb[26].mxu0 }
0x1431   :  { %v8621_v50 = vpop.f32.mrb[27].mxu0 }
0x1440   :  { %v2501_v54 = vpop.f32.mrb[14].mxu0 }
0x1441   :  { %v2503_v38 = vpop.f32.mrb[15].mxu0  ;;  %v9753_v53 = vadd.f32 %v2501_v54, %v10827_v52 }
0x1442   :  { %v9754_v60 = vadd.f32 %v2503_v38, %v10817_v46 }
0x1443   :  { %v8045_v29 = vmul.f32 -1.442695, %v9753_v53 }
0x1444   :  { %v8046_v39 = vmul.f32 -1.442695, %v9754_v60 }
0x149f   :  { %v2323_v34 = vpop.f32.mrb[22].mxu1 }
0x14a0   :  { %v2397_v55 = vadd.f32 %v2396_v36, %v2323_v34  ;;  %v8602_v37 = vpop.f32.mrb[23].mxu1 }
0x14a2   :  { %v2400_v59 = vadd.f32 %v11361_v16, %v2397_v55 }
0x14a4   :  { %9962 = vtanh.f32 %v2400_v59  ;;  %v8043_v41 = vmul.f32 -1.442695, %v2400_v59 }
0x14a5   :  { %9964 = vtanh.f32 %v9754_v60 }
0x14a6   :  { %9966 = vpow2.f32 %v8043_v41 }
0x14a7   :  { %9968 = vpow2.f32 %v8045_v29 }
0x14ae   :  { %v9963_v32 = vpop.eup %9962 }
0x14af   :  { %2410 = vrot.lane.b32.xlu1 %v9963_v32, %s10492_s20  ;;  %v9965_v61 = vpop.eup %9964 }
0x14b0   :  { %v9967_v4 = vpop.eup %9966 }
0x14b1   :  { %v2404_v10 = vadd.f32 1.0, %v9967_v4  ;;  %v9969_v35 = vpop.eup %9968 }
0x14b2   :  { %v2514_v58 = vadd.f32 1.0, %v9969_v35 }
0x14b3   :  { %2523 = vrot.lane.b32.xlu1 %v9965_v61, %s10489_s9  ;;  %9970 = vrcp.f32 %v2404_v10 }
0x14b4   :  { %9972 = vrcp.f32 %v2514_v58 }
0x14bd   :  { %v9971_v17 = vpop.eup %9970 }
0x14be   :  { %v9973_v24 = vpop.eup %9972  ;;  %v2408_v57 = vmul.f32 %v9971_v17, %v11376_v7 }
0x14bf   :  { %v2521_v62 = vmul.f32 %v9973_v24, %v11387_v21 }
0x1521   :  { %v2411_v48 = vpop.permute.xlu1 %2410 }
0x1522   :  { %v2413_v22 = vmul.f32 %v9971_v17, %v2411_v48 }
0x1524   :  { %2415 = vrot.lane.b32.xlu0 %v2413_v22, %s10492_s20 }
0x1525   :  { %v2524_v47 = vpop.permute.xlu1 %2523 }
0x1526   :  { %v2526_v56 = vmul.f32 %v9973_v24, %v2524_v47 }
0x1528   :  { %2528 = vrot.lane.b32.xlu1 %v2526_v56, %s10489_s9 }
0x152c   :  { %2430 = vperm.xlu1 %9828, %v2428_v3  }
0x1596   :  { %v2416_v23 = vpop.permute.xlu0 %2415 }
0x1597   :  { %v11379_v14 = vadd.f32 %v2416_v23, %v2408_v57 }
0x1599   :  { %9974 = vtanh.f32 %v11379_v14 }
0x159a   :  { %v2529_v27 = vpop.permute.xlu1 %2528 }
0x159b   :  { %v11390_v12 = vadd.f32 %v2529_v27, %v2521_v62 }
0x159d   :  { %9976 = vtanh.f32 %v11390_v12 }
0x159e   :  { %9978 = vpow2.f32 %v8046_v39 }
0x15a3   :  { %v9975_v43 = vpop.eup %9974 }
0x15a4   :  { %2421 = vrot.lane.b32.xlu0 %v9975_v43, %s10492_s20 }
0x15a7   :  { %v9977_v50 = vpop.eup %9976 }
0x15a8   :  { %v9979_v33 = vpop.eup %9978 }
0x15a9   :  { %v2515_v54 = vadd.f32 1.0, %v9979_v33 }
0x15ab   :  { %9980 = vrcp.f32 %v2515_v54 }
0x15b5   :  { %v9981_v34 = vpop.eup %9980 }
0x1616   :  { %v2422_v28 = vpop.permute.xlu0 %2421 }
0x1617   :  { %v2424_v2 = vmul.f32 %v9971_v17, %v2422_v28 }
0x1619   :  { %v11396_v36 = vsel %vm2144_vm5, %v2424_v2, %v11319_v31  ;;  %v11405_v31 = vpop.permute.xlu1 %2430  ;;  %v2716_v2 = vsel %vm2715_vm9, 1, %v10488_v40 }
0x161a   :  { %2541 = vrot.lane.b32.xlu0 %v11396_v36, %s10489_s9  ;;  %vm2432_vm8 = vcmp.eq.s32.totalorder %v11405_v31, 1 }
0x161e   :  { %2534 = vrot.lane.b32.xlu0 %v9977_v50, %s10489_s9  ;;  %v11452_v50 = vsel %vm2144_vm5, %v11379_v14, %v11376_v7 }
0x168c   :  { %v2542_v38 = vpop.permute.xlu0 %2541 }
0x168d   :  { %8631 = vmatmul.mubr.msk.f32.vlgmr.msra.gmra.mrb[24].mxu1 %vm519_vm7, %v2542_v38 }
0x168e   :  { %9211 = vmatpush3.bf16.msra.mxu1 %v10832_v1  ;;  %8649 = vmatprep.mubr.msk.f32.mxu1 %vm10491_vm3, %v10487_v0 }
0x168f   :  { %9212 = vmatprep.subr.bf16.mxu1 %v10490_v63 }
0x1690   :  { %v2535_v55 = vpop.permute.xlu0 %2534 }
0x1691   :  { %v2537_v37 = vmul.f32 %v9981_v34, %v2535_v55  ;;  %v11463_v34 = vsel %vm2432_vm8, %v11390_v12, %v11387_v21 }
0x1692   :  { %9214 = vmatpush3.bf16.msra.mxu1 %v10836_v5 }
0x1693   :  { %9215 = vmatprep.subr.bf16.mxu1 %v10490_v63  ;;  %v11414_v59 = vsel %vm2432_vm8, %v2537_v37, %v11327_v45 }
0x1694   :  { %8050 = vmatmul.mubr.msk.f32.vlgmr.msra.gmra.mrb[16].mxu0 %vm398_vm4, %v11414_v59 }
0x1695   :  { %9258 = vmatpush1.bf16.msra.mxu0 %v10686_v9  ;;  %3075 = vmatprep.mubr.f32.mxu0 %v10487_v0 }
0x1696   :  { %9217 = vmatpush3.bf16.msra.mxu1 %v10844_v11  ;;  %9260 = vmatprep.subr.bf16.mxu0 %v10697_v13 }
0x1697   :  { %9218 = vmatprep.subr.bf16.mxu1 %v10490_v63 }
0x1699   :  { %9262 = vmatpush1.bf16.msra.mxu0 %v10715_v18 }
0x169a   :  { %9220 = vmatpush3.bf16.msra.mxu1 %v10848_v15  ;;  %9264 = vmatprep.subr.bf16.mxu0 %v10718_v19 }
0x169b   :  { %9237 = vmatprep.subr.bf16.mxu1 %v10490_v63 }
0x169d   :  { %8650 = vmatmul.mubr.msk.f32.vlgmr.msra.gmra.mrb[26].mxu1 %vm398_vm4, %v11414_v59  ;;  %9266 = vmatpush1.bf16.msra.mxu0 %v10738_v25 }
0x169e   :  { %9239 = vmatpush3.bf16.msra.mxu1 %v10838_v6  ;;  %8660 = vmatprep.mubr.msk.f32.mxu1 %vm10491_vm3, %v10487_v0 }
0x169f   :  { %9240 = vmatprep.subr.bf16.mxu1 %v10490_v63  ;;  %9268 = vmatprep.subr.bf16.mxu0 %v10741_v26 }
0x16a1   :  { %9270 = vmatpush1.bf16.msra.mxu0 %v10755_v30 }
0x16a2   :  { %9242 = vmatpush3.bf16.msra.mxu1 %v10853_v20  ;;  %9290 = vmatprep.subr.bf16.mxu0 %v10684_v8 }
0x16a3   :  { %9243 = vmatprep.subr.bf16.mxu1 %v10490_v63 }
0x1760   :  { %v2611_v45 = vpop.f32.mrb[24].mxu1 }
0x1761   :  { %v8632_v60 = vpop.f32.mrb[25].mxu1 }
0x1767   :  { %v2789_v32 = vpop.f32.mrb[16].mxu0 }
0x1768   :  { %v2791_v61 = vpop.f32.mrb[17].mxu0  ;;  %v9755_v17 = vadd.f32 %v2789_v32, %v10827_v52 }
0x1769   :  { %v9756_v10 = vadd.f32 %v2791_v61, %v10817_v46 }
0x176a   :  { %v8051_v22 = vmul.f32 -1.442695, %v9755_v17 }
0x176b   :  { %v8052_v21 = vmul.f32 -1.442695, %v9756_v10 }
0x1770   :  { %v2684_v53 = vpop.f32.mrb[26].mxu1 }
0x1771   :  { %v2685_v41 = vadd.f32 %v2684_v53, %v2611_v45  ;;  %v8651_v29 = vpop.f32.mrb[27].mxu1 }
0x1773   :  { %v2688_v4 = vadd.f32 %v11361_v16, %v2685_v41 }
0x1775   :  { %9982 = vtanh.f32 %v2688_v4  ;;  %v8049_v48 = vmul.f32 -1.442695, %v2688_v4 }
0x1776   :  { %9984 = vtanh.f32 %v9756_v10 }
0x1777   :  { %9986 = vpow2.f32 %v8049_v48 }
0x1778   :  { %9988 = vpow2.f32 %v8051_v22 }
0x177f   :  { %v9983_v35 = vpop.eup %9982 }
0x1780   :  { %2698 = vrot.lane.b32.xlu1 %v9983_v35, %s10492_s20  ;;  %v9985_v58 = vpop.eup %9984 }
0x1781   :  { %v9987_v24 = vpop.eup %9986 }
0x1782   :  { %v2692_v47 = vadd.f32 1.0, %v9987_v24  ;;  %v9989_v56 = vpop.eup %9988 }
0x1783   :  { %v2802_v3 = vadd.f32 1.0, %v9989_v56 }
0x1784   :  { %2811 = vrot.lane.b32.xlu1 %v9985_v58, %s10489_s9  ;;  %9990 = vrcp.f32 %v2692_v47 }
0x1785   :  { %9992 = vrcp.f32 %v2802_v3 }
0x178e   :  { %v9991_v57 = vpop.eup %9990 }
0x178f   :  { %v9993_v27 = vpop.eup %9992  ;;  %v2696_v39 = vmul.f32 %v9991_v57, %v11452_v50 }
0x1790   :  { %v2809_v42 = vmul.f32 %v9993_v27, %v11463_v34 }
0x17f2   :  { %v2699_v23 = vpop.permute.xlu1 %2698 }
0x17f3   :  { %v2701_v43 = vmul.f32 %v9991_v57, %v2699_v23 }
0x17f5   :  { %2703 = vrot.lane.b32.xlu0 %v2701_v43, %s10492_s20 }
0x17f6   :  { %v2812_v62 = vpop.permute.xlu1 %2811 }
0x17f7   :  { %v2814_v28 = vmul.f32 %v9993_v27, %v2812_v62 }
0x17f9   :  { %2816 = vrot.lane.b32.xlu1 %v2814_v28, %s10489_s9 }
0x17fd   :  { %2718 = vperm.xlu1 %9828, %v2716_v2  }
0x1867   :  { %v2704_v33 = vpop.permute.xlu0 %2703 }
0x1868   :  { %v11455_v54 = vadd.f32 %v2704_v33, %v2696_v39 }
0x186a   :  { %9994 = vtanh.f32 %v11455_v54 }
0x186b   :  { %v2817_v55 = vpop.permute.xlu1 %2816 }
0x186c   :  { %v11466_v7 = vadd.f32 %v2817_v55, %v2809_v42 }
0x186e   :  { %9996 = vtanh.f32 %v11466_v7 }
0x186f   :  { %9998 = vpow2.f32 %v8052_v21 }
0x1874   :  { %v9995_v38 = vpop.eup %9994 }
0x1875   :  { %2709 = vrot.lane.b32.xlu0 %v9995_v38, %s10492_s20 }
0x1878   :  { %v9997_v60 = vpop.eup %9996 }
0x1879   :  { %v9999_v12 = vpop.eup %9998 }
0x187a   :  { %v2803_v32 = vadd.f32 1.0, %v9999_v12 }
0x187c   :  { %10000 = vrcp.f32 %v2803_v32 }
0x1886   :  { %v10001_v53 = vpop.eup %10000 }
0x18e7   :  { %v2710_v14 = vpop.permute.xlu0 %2709 }
0x18e8   :  { %v2712_v37 = vmul.f32 %v9991_v57, %v2710_v14 }
0x18ea   :  { %v11472_v45 = vsel %vm2432_vm8, %v2712_v37, %v11396_v36  ;;  %v11481_v36 = vpop.permute.xlu1 %2718  ;;  %v3004_v37 = vsel %vm3003_vm11, 1, %v10488_v40 }
0x18eb   :  { %2829 = vrot.lane.b32.xlu0 %v11472_v45, %s10489_s9  ;;  %vm2720_vm10 = vcmp.eq.s32.totalorder %v11481_v36, 1 }
0x18ef   :  { %2822 = vrot.lane.b32.xlu0 %v9997_v60, %s10489_s9  ;;  %v11528_v60 = vsel %vm2432_vm8, %v11455_v54, %v11452_v50 }
0x195d   :  { %v2830_v61 = vpop.permute.xlu0 %2829 }
0x195e   :  { %8661 = vmatmul.mubr.msk.f32.vlgmr.msra.gmra.mrb[28].mxu1 %vm519_vm7, %v2830_v61 }
0x195f   :  { %9245 = vmatpush3.bf16.msra.mxu1 %v10832_v1  ;;  %8679 = vmatprep.mubr.msk.f32.mxu1 %vm10491_vm3, %v10487_v0 }
0x1960   :  { %9246 = vmatprep.subr.bf16.mxu1 %v10490_v63 }
0x1961   :  { %v2823_v41 = vpop.permute.xlu0 %2822 }
0x1962   :  { %v2825_v29 = vmul.f32 %v10001_v53, %v2823_v41  ;;  %v11539_v53 = vsel %vm2720_vm10, %v11466_v7, %v11463_v34 }
0x1963   :  { %9248 = vmatpush3.bf16.msra.mxu1 %v10836_v5 }
0x1964   :  { %9249 = vmatprep.subr.bf16.mxu1 %v10490_v63  ;;  %v11490_v4 = vsel %vm2720_vm10, %v2825_v29, %v11414_v59 }
0x1965   :  { %8056 = vmatmul.mubr.msk.f32.vlgmr.msra.gmra.mrb[18].mxu0 %vm398_vm4, %v11490_v4 }
0x1966   :  { %9292 = vmatpush1.bf16.msra.mxu0 %v10686_v9  ;;  %3363 = vmatprep.mubr.f32.mxu0 %v10487_v0 }
0x1967   :  { %9251 = vmatpush3.bf16.msra.mxu1 %v10844_v11  ;;  %9294 = vmatprep.subr.bf16.mxu0 %v10697_v13 }
0x1968   :  { %9252 = vmatprep.subr.bf16.mxu1 %v10490_v63 }
0x196a   :  { %9296 = vmatpush1.bf16.msra.mxu0 %v10715_v18 }
0x196b   :  { %9254 = vmatpush3.bf16.msra.mxu1 %v10848_v15  ;;  %9298 = vmatprep.subr.bf16.mxu0 %v10718_v19 }
0x196c   :  { %9271 = vmatprep.subr.bf16.mxu1 %v10490_v63 }
0x196e   :  { %8680 = vmatmul.mubr.msk.f32.vlgmr.msra.gmra.mrb[30].mxu1 %vm398_vm4, %v11490_v4  ;;  %9300 = vmatpush1.bf16.msra.mxu0 %v10738_v25 }
0x196f   :  { %9273 = vmatpush3.bf16.msra.mxu1 %v10838_v6  ;;  %8690 = vmatprep.mubr.msk.f32.mxu1 %vm10491_vm3, %v10487_v0 }
0x1970   :  { %9274 = vmatprep.subr.bf16.mxu1 %v10490_v63  ;;  %9302 = vmatprep.subr.bf16.mxu0 %v10741_v26 }
0x1972   :  { %9304 = vmatpush1.bf16.msra.mxu0 %v10755_v30 }
0x1973   :  { %9276 = vmatpush3.bf16.msra.mxu1 %v10853_v20  ;;  %9311 = vmatprep.subr.bf16.mxu0 %v10490_v63 }
0x1974   :  { %9277 = vmatprep.subr.bf16.mxu1 %v10490_v63 }
0x1a31   :  { %v2899_v59 = vpop.f32.mrb[28].mxu1 }
0x1a32   :  { %v8662_v10 = vpop.f32.mrb[29].mxu1 }
0x1a38   :  { %v3077_v35 = vpop.f32.mrb[18].mxu0 }
0x1a39   :  { %v3079_v58 = vpop.f32.mrb[19].mxu0  ;;  %v9757_v57 = vadd.f32 %v3077_v35, %v10827_v52 }
0x1a3a   :  { %v9758_v47 = vadd.f32 %v3079_v58, %v10817_v46 }
0x1a3b   :  { %v8057_v43 = vmul.f32 -1.442695, %v9757_v57 }
0x1a3c   :  { %v8058_v34 = vmul.f32 -1.442695, %v9758_v47 }
0x1a41   :  { %v2972_v17 = vpop.f32.mrb[30].mxu1 }
0x1a42   :  { %v2973_v48 = vadd.f32 %v2972_v17, %v2899_v59  ;;  %v8681_v22 = vpop.f32.mrb[31].mxu1 }
0x1a44   :  { %v2976_v24 = vadd.f32 %v11361_v16, %v2973_v48 }
0x1a46   :  { %10002 = vtanh.f32 %v2976_v24  ;;  %v8055_v23 = vmul.f32 -1.442695, %v2976_v24 }
0x1a47   :  { %10004 = vtanh.f32 %v9758_v47 }
0x1a48   :  { %10006 = vpow2.f32 %v8055_v23 }
0x1a49   :  { %10008 = vpow2.f32 %v8057_v43 }
0x1a50   :  { %v10003_v56 = vpop.eup %10002 }
0x1a51   :  { %2986 = vrot.lane.b32.xlu1 %v10003_v56, %s10492_s20  ;;  %v10005_v3 = vpop.eup %10004 }
0x1a52   :  { %v10007_v27 = vpop.eup %10006 }
0x1a53   :  { %v2980_v62 = vadd.f32 1.0, %v10007_v27  ;;  %v10009_v28 = vpop.eup %10008 }
0x1a54   :  { %v3090_v2 = vadd.f32 1.0, %v10009_v28 }
0x1a55   :  { %3099 = vrot.lane.b32.xlu1 %v10005_v3, %s10489_s9  ;;  %10010 = vrcp.f32 %v2980_v62 }
0x1a56   :  { %10012 = vrcp.f32 %v3090_v2 }
0x1a5f   :  { %v10011_v39 = vpop.eup %10010 }
0x1a60   :  { %v10013_v55 = vpop.eup %10012  ;;  %v2984_v21 = vmul.f32 %v10011_v39, %v11528_v60 }
0x1a61   :  { %v3097_v31 = vmul.f32 %v10013_v55, %v11539_v53 }
0x1ac3   :  { %v2987_v33 = vpop.permute.xlu1 %2986 }
0x1ac4   :  { %v2989_v38 = vmul.f32 %v10011_v39, %v2987_v33 }
0x1ac6   :  { %2991 = vrot.lane.b32.xlu0 %v2989_v38, %s10492_s20 }
0x1ac7   :  { %v3100_v42 = vpop.permute.xlu1 %3099 }
0x1ac8   :  { %v3102_v14 = vmul.f32 %v10013_v55, %v3100_v42 }
0x1aca   :  { %3104 = vrot.lane.b32.xlu1 %v3102_v14, %s10489_s9 }
0x1ace   :  { %3006 = vperm.xlu1 %9828, %v3004_v37  }
0x1b38   :  { %v2992_v12 = vpop.permute.xlu0 %2991 }
0x1b39   :  { %v11531_v32 = vadd.f32 %v2992_v12, %v2984_v21 }
0x1b3b   :  { %10014 = vtanh.f32 %v11531_v32 }
0x1b3c   :  { %v3105_v41 = vpop.permute.xlu1 %3104 }
0x1b3d   :  { %v11542_v50 = vadd.f32 %v3105_v41, %v3097_v31 }
0x1b3f   :  { %10016 = vtanh.f32 %v11542_v50 }
0x1b40   :  { %10018 = vpow2.f32 %v8058_v34 }
0x1b45   :  { %v10015_v61 = vpop.eup %10014 }
0x1b46   :  { %2997 = vrot.lane.b32.xlu0 %v10015_v61, %s10492_s20  ;;  %v3292_v61 = vsel %vm3291_vm13, 1, %v10488_v40 }
0x1b49   :  { %v10017_v10 = vpop.eup %10016 }
0x1b4a   :  { %v10019_v7 = vpop.eup %10018 }
0x1b4b   :  { %v3091_v35 = vadd.f32 1.0, %v10019_v7 }
0x1b4d   :  { %10020 = vrcp.f32 %v3091_v35 }
0x1b57   :  { %v10021_v17 = vpop.eup %10020 }
0x1bb8   :  { %v2998_v54 = vpop.permute.xlu0 %2997 }
0x1bb9   :  { %v3000_v29 = vmul.f32 %v10011_v39, %v2998_v54 }
0x1bbb   :  { %v11548_v59 = vsel %vm2720_vm10, %v3000_v29, %v11472_v45  ;;  %v11557_v45 = vpop.permute.xlu1 %3006  ;;  %v11605_v29 = vsel %vm2720_vm10, %v11531_v32, %v11528_v60 }
0x1bbc   :  { %3117 = vrot.lane.b32.xlu0 %v11548_v59, %s10489_s9  ;;  %vm3008_vm12 = vcmp.eq.s32.totalorder %v11557_v45, 1 }
0x1bbd   :  { %v11612_v49 = vsel %vm3008_vm12, %v11542_v50, %v11539_v53 }
0x1bc0   :  { %3110 = vrot.lane.b32.xlu0 %v10017_v10, %s10489_s9 }
0x1c2e   :  { %v3118_v58 = vpop.permute.xlu0 %3117 }
0x1c2f   :  { %8691 = vmatmul.mubr.msk.f32.vlgmr.msra.gmra.mrb[32].mxu1 %vm519_vm7, %v3118_v58 }
0x1c30   :  { %9279 = vmatpush3.bf16.msra.mxu1 %v10832_v1  ;;  %8709 = vmatprep.mubr.msk.f32.mxu1 %vm10491_vm3, %v10487_v0 }
0x1c31   :  { %9280 = vmatprep.subr.bf16.mxu1 %v10490_v63 }
0x1c32   :  { %v3111_v48 = vpop.permute.xlu0 %3110 }
0x1c33   :  { %v3113_v22 = vmul.f32 %v10021_v17, %v3111_v48 }
0x1c34   :  { %9282 = vmatpush3.bf16.msra.mxu1 %v10836_v5 }
0x1c35   :  { %9283 = vmatprep.subr.bf16.mxu1 %v10490_v63  ;;  %v11566_v24 = vsel %vm3008_vm12, %v3113_v22, %v11490_v4 }
0x1c36   :  { %8062 = vmatmul.mubr.msk.f32.vlgmr.msra.gmra.mrb[20].mxu0 %vm398_vm4, %v11566_v24 }
0x1c37   :  { %9313 = vmatpush3.bf16.msra.mxu0 %v10832_v1  ;;  %8739 = vmatprep.mubr.msk.f32.mxu0 %vm10491_vm3, %v10487_v0 }
0x1c38   :  { %9285 = vmatpush3.bf16.msra.mxu1 %v10844_v11  ;;  %9314 = vmatprep.subr.bf16.mxu0 %v10490_v63 }
0x1c39   :  { %9286 = vmatprep.subr.bf16.mxu1 %v10490_v63 }
0x1c3b   :  { %9316 = vmatpush3.bf16.msra.mxu0 %v10836_v5 }
0x1c3c   :  { %9288 = vmatpush3.bf16.msra.mxu1 %v10848_v15  ;;  %9317 = vmatprep.subr.bf16.mxu0 %v10490_v63 }
0x1c3d   :  { %9305 = vmatprep.subr.bf16.mxu1 %v10490_v63 }
0x1c3f   :  { %8710 = vmatmul.mubr.msk.f32.vlgmr.msra.gmra.mrb[34].mxu1 %vm398_vm4, %v11566_v24  ;;  %9319 = vmatpush3.bf16.msra.mxu0 %v10844_v11 }
0x1c40   :  { %9320 = vmatprep.subr.bf16.mxu0 %v10490_v63  ;;  %9307 = vmatpush3.bf16.msra.mxu1 %v10838_v6 }
0x1c41   :  { %9308 = vmatprep.subr.bf16.mxu1 %v10490_v63  ;;  %8720 = vmatprep.mubr.msk.f32.mxu1 %vm10491_vm3, %v10487_v0 }
0x1c43   :  { %9322 = vmatpush3.bf16.msra.mxu0 %v10848_v15 }
0x1c44   :  { %9324 = vmatprep.subr.bf16.mxu0 %v10684_v8  ;;  %9310 = vmatpush3.bf16.msra.mxu1 %v10853_v20 }
0x1c45   :  { %9339 = vmatprep.subr.bf16.mxu1 %v10490_v63 }
0x1d02   :  { %v3187_v4 = vpop.f32.mrb[32].mxu1 }
0x1d03   :  { %v8692_v47 = vpop.f32.mrb[33].mxu1 }
0x1d09   :  { %v3365_v56 = vpop.f32.mrb[20].mxu0 }
0x1d0a   :  { %v3367_v3 = vpop.f32.mrb[21].mxu0  ;;  %v9759_v2 = vadd.f32 %v3365_v56, %v10827_v52 }
0x1d0b   :  { %v9760_v57 = vadd.f32 %v3367_v3, %v10817_v46 }
0x1d0c   :  { %v8063_v39 = vmul.f32 -1.442695, %v9759_v2 }
0x1d0d   :  { %10022 = vtanh.f32 %v9760_v57  ;;  %v8064_v32 = vmul.f32 -1.442695, %v9760_v57 }
0x1d12   :  { %v3260_v23 = vpop.f32.mrb[34].mxu1 }
0x1d13   :  { %v3261_v43 = vadd.f32 %v3260_v23, %v3187_v4  ;;  %v8711_v27 = vpop.f32.mrb[35].mxu1 }
0x1d15   :  { %v3264_v62 = vadd.f32 %v11361_v16, %v3261_v43 }
0x1d17   :  { %v10023_v28 = vpop.eup %10022  ;;  %10024 = vtanh.f32 %v3264_v62  ;;  %v8061_v33 = vmul.f32 -1.442695, %v3264_v62 }
0x1d18   :  { %3387 = vrot.lane.b32.xlu0 %v10023_v28, %s10489_s9  ;;  %10026 = vpow2.f32 %v8063_v39 }
0x1d19   :  { %10028 = vpow2.f32 %v8061_v33 }
0x1d21   :  { %v10025_v8 = vpop.eup %10024 }
0x1d22   :  { %3274 = vrot.lane.b32.xlu1 %v10025_v8, %s10492_s20  ;;  %v10027_v38 = vpop.eup %10026 }
0x1d23   :  { %v3378_v55 = vadd.f32 1.0, %v10027_v38  ;;  %v10029_v42 = vpop.eup %10028 }
0x1d24   :  { %v3268_v14 = vadd.f32 1.0, %v10029_v42 }
0x1d25   :  { %10030 = vrcp.f32 %v3378_v55 }
0x1d26   :  { %10032 = vrcp.f32 %v3268_v14 }
0x1d2f   :  { %v10031_v37 = vpop.eup %10030 }
0x1d30   :  { %v10033_v41 = vpop.eup %10032  ;;  %v3385_v35 = vmul.f32 %v10031_v37, %v11612_v49 }
0x1d31   :  { %v3272_v10 = vmul.f32 %v10033_v41, %v11605_v29 }
0x1d8a   :  { %v3388_v21 = vpop.permute.xlu0 %3387 }
0x1d8b   :  { %v3390_v12 = vmul.f32 %v10031_v37, %v3388_v21 }
0x1d8d   :  { %3392 = vrot.lane.b32.xlu0 %v3390_v12, %s10489_s9 }
0x1d91   :  { %3294 = vperm.xlu0 %9829, %v3292_v61  }
0x1d94   :  { %v3275_v31 = vpop.permute.xlu1 %3274 }
0x1d95   :  { %v3277_v54 = vmul.f32 %v10033_v41, %v3275_v31 }
0x1d97   :  { %3279 = vrot.lane.b32.xlu1 %v3277_v54, %s10492_s20 }
0x1dff   :  { %v3393_v34 = vpop.permute.xlu0 %3392 }
0x1e00   :  { %v11617_v17 = vadd.f32 %v3393_v34, %v3385_v35 }
0x1e09   :  { %v3280_v7 = vpop.permute.xlu1 %3279 }
0x1e0a   :  { %v11615_v58 = vadd.f32 %v3280_v7, %v3272_v10 }
0x1e0c   :  { %10034 = vtanh.f32 %v11615_v58  ;;  %v3289_v12 = vsel %vm3008_vm12, %v11615_v58, %v11605_v29 }
0x1e0d   :  { %10036 = vtanh.f32 %v11617_v17 }
0x1e0e   :  { %10038 = vpow2.f32 %v8064_v32 }
0x1e10   :  { %v11623_v4 = vpop.permute.xlu0 %3294 }
0x1e11   :  { %vm3296_vm14 = vcmp.eq.s32.totalorder %v11623_v4, 1 }
0x1e12   :  { %v3402_v10 = vsel %vm3296_vm14, %v11617_v17, %v11612_v49 }
0x1e16   :  { %v10035_v36 = vpop.eup %10034 }
0x1e17   :  { %3285 = vrot.lane.b32.xlu1 %v10035_v36, %s10492_s20  ;;  %v10037_v60 = vpop.eup %10036 }
0x1e18   :  { %v10039_v53 = vpop.eup %10038 }
0x1e19   :  { %v3379_v50 = vadd.f32 1.0, %v10039_v53 }
0x1e1b   :  { %3398 = vrot.lane.b32.xlu1 %v10037_v60, %s10489_s9  ;;  %10040 = vrcp.f32 %v3379_v50 }
0x1e25   :  { %v10041_v56 = vpop.eup %10040 }
0x1e89   :  { %v3286_v48 = vpop.permute.xlu1 %3285 }
0x1e8a   :  { %v3288_v22 = vmul.f32 %v10033_v41, %v3286_v48 }
0x1e8c   :  { %v11628_v47 = vsel %vm3008_vm12, %v3288_v22, %v11548_v59 }
0x1e8d   :  { %3405 = vrot.lane.b32.xlu0 %v11628_v47, %s10489_s9  ;;  %v3399_v3 = vpop.permute.xlu1 %3398 }
0x1e8e   :  { %v3401_v23 = vmul.f32 %v10041_v56, %v3399_v3 }
0x1e90   :  { %v11636_v57 = vsel %vm3296_vm14, %v3401_v23, %v11566_v24 }
0x1e91   :  { %8740 = vmatmul.mubr.msk.f32.vlgmr.msra.gmra.mrb[28].mxu0 %vm398_vm4, %v11636_v57 }
0x1e92   :  { %9326 = vmatpush1.bf16.msra.mxu0 %v10686_v9  ;;  %3651 = vmatprep.mubr.f32.mxu0 %v10487_v0 }
0x1e93   :  { %9328 = vmatprep.subr.bf16.mxu0 %v10697_v13 }
0x1e96   :  { %9330 = vmatpush1.bf16.msra.mxu0 %v10715_v18 }
0x1e97   :  { %9332 = vmatprep.subr.bf16.mxu0 %v10718_v19 }
0x1e9a   :  { %9334 = vmatpush1.bf16.msra.mxu0 %v10738_v25 }
0x1e9b   :  { %9336 = vmatprep.subr.bf16.mxu0 %v10741_v26 }
0x1e9e   :  { %9338 = vmatpush1.bf16.msra.mxu0 %v10755_v30 }
0x1e9f   :  { %9363 = vmatprep.subr.bf16.mxu0 %v10490_v63 }
0x1ea1   :  { %8068 = vmatmul.mubr.msk.f32.vlgmr.msra.gmra.mrb[22].mxu0 %vm398_vm4, %v11636_v57 }
0x1ea2   :  { %8791 = vmatprep.mubr.msk.f32.mxu0 %vm10491_vm3, %v10487_v0 }
0x1eff   :  { %v3406_v9 = vpop.permute.xlu0 %3405 }
0x1f00   :  { %8721 = vmatmul.mubr.msk.f32.vlgmr.msra.gmra.mrb[36].mxu1 %vm519_vm7, %v3406_v9 }
0x1f01   :  { %9341 = vmatpush3.bf16.msra.mxu1 %v10838_v6  ;;  %8750 = vmatprep.mubr.msk.f32.mxu1 %vm10491_vm3, %v10487_v0 }
0x1f02   :  { %9342 = vmatprep.subr.bf16.mxu1 %v10490_v63 }
0x1f05   :  { %9344 = vmatpush3.bf16.msra.mxu1 %v10853_v20 }
0x1f06   :  { %9345 = vmatprep.subr.bf16.mxu1 %v10490_v63 }
0x1f64   :  { %v3548_v13 = vpop.f32.mrb[28].mxu0 }
0x1f65   :  { %v8741_v18 = vpop.f32.mrb[29].mxu0 }
0x1f74   :  { %v3653_v19 = vpop.f32.mrb[22].mxu0 }
0x1f75   :  { %v3655_v25 = vpop.f32.mrb[23].mxu0  ;;  %v9761_v20 = vadd.f32 %v3653_v19, %v10827_v52  ;;  %v10312_v52 = vld [vmem:[%s12552_s8] sm:$0xff] }
0x1f76   :  { %v9762_v6 = vadd.f32 %v3655_v25, %v10817_v46  ;;  %vm3579_vm15 = vcmp.gt.s32.totalorder %v10312_v52, 11  ;;  %v8074_v52 = vld [vmem:[%s12537_s10] ss:$0 sm:$0xff] }
0x1f77   :  { %v8069_v28 = vmul.f32 -1.442695, %v9761_v20  ;;  %v3580_v21 = vsel %vm3579_vm15, 1, %v10488_v40  ;;  %v3872_v20 = vld [vmem:[#allocation10 + $0x10] sm:$0xff] }
0x1f78   :  { %v8070_v58 = vmul.f32 -1.442695, %v9762_v6 }
0x1fd3   :  { %v3475_v26 = vpop.f32.mrb[36].mxu1 }
0x1fd4   :  { %v3549_v30 = vadd.f32 %v3548_v13, %v3475_v26  ;;  %v8722_v59 = vpop.f32.mrb[37].mxu1 }
0x1fd5   :  { %v3870_v59 = vld [vmem:[#allocation10] sm:$0xff] }
0x1fd6   :  { %v3552_v24 = vadd.f32 %v11361_v16, %v3549_v30 }
0x1fd8   :  { %10042 = vtanh.f32 %v3552_v24  ;;  %v8067_v62 = vmul.f32 -1.442695, %v3552_v24  ;;  %v3871_v24 = vld [vmem:[#allocation10 + $0x8] sm:$0xff] }
0x1fd9   :  { %10044 = vtanh.f32 %v9762_v6  ;;  %v3953_v6 = vld [vmem:[#allocation12] sm:$0xff] }
0x1fda   :  { %10046 = vpow2.f32 %v8067_v62  ;;  %v3873_v62 = vld [vmem:[#allocation10 + $0x18] sm:$0xff] }
0x1fdb   :  { %10048 = vpow2.f32 %v8069_v28 }
0x1fe2   :  { %v10043_v43 = vpop.eup %10042 }
0x1fe3   :  { %3562 = vrot.lane.b32.xlu1 %v10043_v43, %s10492_s20  ;;  %v10045_v27 = vpop.eup %10044  ;;  %v9358_v43 = vpack.c.bf16 %v3871_v24, %v3870_v59 }
0x1fe4   :  { %v10047_v8 = vpop.eup %10046 }
0x1fe5   :  { %v3556_v2 = vadd.f32 1.0, %v10047_v8  ;;  %v10049_v39 = vpop.eup %10048  ;;  %v3955_v8 = vld [vmem:[#allocation12 + $0x10] sm:$0xff] }
0x1fe6   :  { %v3666_v33 = vadd.f32 1.0, %v10049_v39  ;;  %v9361_v39 = vpack.c.bf16 %v3873_v62, %v3872_v20  ;;  %v4059_v20 = vld [vmem:[%s12538_s11 + $0x38] sm:$0xff] }
0x1fe7   :  { %3675 = vrot.lane.b32.xlu1 %v10045_v27, %s10489_s9  ;;  %10050 = vrcp.f32 %v3556_v2  ;;  %v3954_v27 = vld [vmem:[#allocation12 + $0x8] sm:$0xff]  ;;  %v3956_v2 = vld [vmem:[#allocation12 + $0x18] sm:$0xff] }
0x1fe8   :  { %10052 = vrcp.f32 %v3666_v33  ;;  %v11709_v28 = vpack.c.bf16 %v3954_v27, %v3953_v6  ;;  %v11713_v4 = vpack.c.bf16 %v3956_v2, %v3955_v8  ;;  %v4052_v6 = vld [vmem:[%s12538_s11] sm:$0xff]  ;;  %v4057_v27 = vld [vmem:[%s12538_s11 + $0x28] sm:$0xff] }
0x1fe9   :  { %v11795_v8 = vpack.c.bf16 %v4059_v20, %v4057_v27  ;;  %v4056_v2 = vld [vmem:[%s12538_s11 + $0x20] sm:$0xff] }
0x1fea   :  { %9365 = vmatpush3.bf16.msra.mxu0 %v11709_v28 }
0x1feb   :  { %9366 = vmatprep.subr.bf16.mxu0 %v10490_v63 }
0x1fee   :  { %9368 = vmatpush3.bf16.msra.mxu0 %v11713_v4 }
0x1fef   :  { %9393 = vmatprep.subr.bf16.mxu0 %v10490_v63 }
0x1ff1   :  { %v10051_v46 = vpop.eup %10050  ;;  %8792 = vmatmul.mubr.f32.vlgmr.msra.gmra.mrb[30].mxu0 %v10487_v0 }
0x1ff2   :  { %v10053_v42 = vpop.eup %10052  ;;  %v3560_v61 = vmul.f32 %v10051_v46, %v3289_v12  ;;  %9395 = vmatpush3.bf16.msra.mxu0 %v11709_v28  ;;  %8802 = vmatprep.mubr.msk.f32.mxu0 %vm10491_vm3, %v10487_v0 }
0x1ff3   :  { %v3673_v40 = vmul.f32 %v10053_v42, %v3402_v10  ;;  %9396 = vmatprep.subr.bf16.mxu0 %v10490_v63 }
0x1ff6   :  { %9398 = vmatpush3.bf16.msra.mxu0 %v11713_v4 }
0x2055   :  { %v3563_v38 = vpop.permute.xlu1 %3562 }
0x2056   :  { %v3565_v55 = vmul.f32 %v10051_v46, %v3563_v38 }
0x2058   :  { %3567 = vrot.lane.b32.xlu0 %v3565_v55, %s10492_s20 }
0x2059   :  { %v3676_v14 = vpop.permute.xlu1 %3675 }
0x205a   :  { %v3678_v37 = vmul.f32 %v10053_v42, %v3676_v14 }
0x205c   :  { %3680 = vrot.lane.b32.xlu1 %v3678_v37, %s10489_s9 }
0x2060   :  { %3582 = vperm.xlu1 %9828, %v3580_v21  }
0x20c4   :  { %v4023_v14 = vpop.f32.mrb[30].mxu0 }
0x20c5   :  { %v8793_v37 = vpop.f32.mrb[31].mxu0 }
0x20ca   :  { %v3568_v41 = vpop.permute.xlu0 %3567 }
0x20cb   :  { %v3570_v31 = vadd.f32 %v3568_v41, %v3560_v61 }
0x20cd   :  { %10054 = vtanh.f32 %v3570_v31  ;;  %v3577_v25 = vsel %vm3296_vm14, %v3570_v31, %v3289_v12 }
0x20ce   :  { %v3681_v34 = vpop.permute.xlu1 %3680 }
0x20cf   :  { %v3683_v7 = vadd.f32 %v3681_v34, %v3673_v40 }
0x20d1   :  { %10056 = vtanh.f32 %v3683_v7 }
0x20d2   :  { %10058 = vpow2.f32 %v8070_v58  ;;  %v4061_v58 = vld [vmem:[#allocation13 + $0x8] sm:$0xff] }
0x20d7   :  { %v10055_v54 = vpop.eup %10054 }
0x20d8   :  { %3573 = vrot.lane.b32.xlu0 %v10055_v54, %s10492_s20 }
0x20db   :  { %v10057_v29 = vpop.eup %10056 }
0x20dc   :  { %v10059_v49 = vpop.eup %10058 }
0x20dd   :  { %v3667_v17 = vadd.f32 1.0, %v10059_v49  ;;  %v4063_v49 = vld [vmem:[#allocation13 + $0x18] sm:$0xff] }
0x20df   :  { %10060 = vrcp.f32 %v3667_v17  ;;  %v3583_v50 = vpop.permute.xlu1 %3582  ;;  %v4060_v17 = vld [vmem:[#allocation13] sm:$0xff] }
0x20e0   :  { %vm3584_vm0 = vcmp.eq.s32.totalorder %v3583_v50, 1  ;;  %v4067_v50 = vld [vmem:[#allocation13 + $0x38] sm:$0xff] }
0x20e9   :  { %v10061_v53 = vpop.eup %10060 }
0x214a   :  { %v3574_v35 = vpop.permute.xlu0 %3573 }
0x214b   :  { %v3576_v36 = vmul.f32 %v10051_v46, %v3574_v35 }
0x214d   :  { %v11683_v45 = vsel %vm3296_vm14, %v3576_v36, %v11628_v47 }
0x214e   :  { %3692 = vrot.lane.b32.xlu0 %v11683_v45, %s10489_s9 }
0x2152   :  { %3686 = vrot.lane.b32.xlu0 %v10057_v29, %s10489_s9 }
0x21c0   :  { %v3693_v60 = vpop.permute.xlu0 %3692 }
0x21c1   :  { %8751 = vmatmul.mubr.msk.f32.vlgmr.msra.gmra.mrb[38].mxu1 %vm519_vm7, %v3693_v60  ;;  %v11746_v60 = vpack.c.bf16 %v4063_v49, %v4061_v58 }
0x21c2   :  { %9347 = vmatpush3.bf16.msra.mxu1 %v10832_v1  ;;  %8769 = vmatprep.mubr.msk.f32.mxu1 %vm10491_vm3, %v10487_v0 }
0x21c3   :  { %9348 = vmatprep.subr.bf16.mxu1 %v10490_v63  ;;  %9400 = vmatprep.subr.bf16.mxu0 %v11746_v60 }
0x21c4   :  { %v3687_v32 = vpop.permute.xlu0 %3686 }
0x21c5   :  { %v3689_v48 = vmul.f32 %v10061_v53, %v3687_v32  ;;  %v4062_v32 = vld [vmem:[#allocation13 + $0x10] sm:$0xff]  ;;  %v4065_v53 = vld [vmem:[#allocation13 + $0x28] sm:$0xff] }
0x21c6   :  { %9350 = vmatpush3.bf16.msra.mxu1 %v10836_v5 }
0x21c7   :  { %9351 = vmatprep.subr.bf16.mxu1 %v10490_v63  ;;  %v3690_v1 = vsel %vm3584_vm0, %v3689_v48, %v11636_v57  ;;  %v11748_v48 = vpack.c.bf16 %v4062_v32, %v4060_v17 }
0x21ca   :  { %9353 = vmatpush3.bf16.msra.mxu1 %v10844_v11 }
0x21cb   :  { %9354 = vmatprep.subr.bf16.mxu1 %v10490_v63 }
0x21ce   :  { %9356 = vmatpush3.bf16.msra.mxu1 %v10848_v15 }
0x21cf   :  { %9357 = vmatprep.subr.bf16.mxu1 %v10490_v63 }
0x21d1   :  { %8770 = vmatmul.mubr.msk.f32.vlgmr.msra.gmra.mrb[40].mxu1 %vm398_vm4, %v3690_v1  ;;  %v11750_v1 = vpack.c.bf16 %v4067_v50, %v4065_v53 }
0x21d2   :  { %8780 = vmatprep.mubr.msk.f32.mxu1 %vm10491_vm3, %v10487_v0  ;;  %9359 = vmatpush3.bf16.msra.mxu1 %v9358_v43  ;;  %v4054_v43 = vld [vmem:[%s12538_s11 + $0x10] sm:$0xff] }
0x21d3   :  { %9360 = vmatprep.subr.bf16.mxu1 %v10490_v63  ;;  %v11792_v62 = vpack.c.bf16 %v4054_v43, %v4052_v6 }
0x21d6   :  { %9362 = vmatpush3.bf16.msra.mxu1 %v9361_v39  ;;  %v4058_v39 = vld [vmem:[%s12538_s11 + $0x30] sm:$0xff] }
0x21d7   :  { %9370 = vmatprep.subr.bf16.mxu1 %v11746_v60 }
0x2294   :  { %v3762_v5 = vpop.f32.mrb[38].mxu1 }
0x2295   :  { %v8752_v11 = vpop.f32.mrb[39].mxu1 }
0x2296   :  { %v4066_v11 = vld [vmem:[#allocation13 + $0x30] sm:$0xff] }
0x22a4   :  { %v3835_v22 = vpop.f32.mrb[40].mxu1 }
0x22a5   :  { %v3836_v47 = vadd.f32 %v3835_v22, %v3762_v5  ;;  %v8771_v56 = vpop.f32.mrb[41].mxu1  ;;  %v4064_v5 = vld [vmem:[#allocation13 + $0x20] sm:$0xff]  ;;  %v4069_v22 = vld [vmem:[#allocation13 + $0x48] sm:$0xff] }
0x22a6   :  { %v11755_v56 = vpack.c.bf16 %v4066_v11, %v4064_v5 }
0x22a7   :  { %v3839_v3 = vadd.f32 %v11361_v16, %v3836_v47  ;;  %v4071_v47 = vld [vmem:[#allocation13 + $0x58] sm:$0xff] }
0x22a9   :  { %10062 = vtanh.f32 %v3839_v3  ;;  %v8073_v23 = vmul.f32 -1.442695, %v3839_v3  ;;  %v11758_v3 = vpack.c.bf16 %v4071_v47, %v4069_v22 }
0x22ab   :  { %10064 = vpow2.f32 %v8073_v23  ;;  %v4070_v23 = vld [vmem:[#allocation13 + $0x50] sm:$0xff] }
0x22b3   :  { %v10063_v15 = vpop.eup %10062 }
0x22b4   :  { %3849 = vrot.lane.b32.xlu1 %v10063_v15, %s10492_s20  ;;  %v4068_v15 = vld [vmem:[#allocation13 + $0x40] sm:$0xff] }
0x22b5   :  { %v10065_v9 = vpop.eup %10064 }
0x22b6   :  { %v3843_v57 = vadd.f32 1.0, %v10065_v9  ;;  %v4073_v9 = vld [vmem:[#allocation13 + $0x68] sm:$0xff] }
0x22b8   :  { %10066 = vrcp.f32 %v3843_v57  ;;  %v4075_v57 = vld [vmem:[#allocation13 + $0x78] sm:$0xff] }
0x22c2   :  { %v10067_v13 = vpop.eup %10066 }
0x22c3   :  { %v3847_v26 = vmul.f32 %v10067_v13, %v3577_v25  ;;  %v4074_v25 = vld [vmem:[#allocation13 + $0x70] sm:$0xff] }
0x2326   :  { %v3850_v18 = vpop.permute.xlu1 %3849 }
0x2327   :  { %v3852_v19 = vmul.f32 %v10067_v13, %v3850_v18  ;;  %v11764_v18 = vpack.c.bf16 %v4075_v57, %v4073_v9 }
0x2329   :  { %3854 = vrot.lane.b32.xlu0 %v3852_v19, %s10492_s20  ;;  %v4072_v19 = vld [vmem:[#allocation13 + $0x60] sm:$0xff] }
0x232a   :  { %v11774_v59 = vpack.c.bf16 %v4074_v25, %v4072_v19 }
0x239b   :  { %v3855_v30 = vpop.permute.xlu0 %3854 }
0x239c   :  { %v3857_v16 = vadd.f32 %v3855_v30, %v3847_v26  ;;  %v4053_v30 = vld [vmem:[%s12538_s11 + $0x8] sm:$0xff] }
0x239e   :  { %10068 = vtanh.f32 %v3857_v16  ;;  %v4055_v16 = vld [vmem:[%s12538_s11 + $0x18] sm:$0xff] }
0x239f   :  { %v11777_v24 = vpack.c.bf16 %v4055_v16, %v4053_v30 }
0x23a8   :  { %v10069_v33 = vpop.eup %10068 }
0x23a9   :  { %3860 = vrot.lane.b32.xlu1 %v10069_v33, %s10492_s20  ;;  %v11805_v33 = vpack.c.bf16 %v4058_v39, %v4056_v2 }
0x241b   :  { %v3861_v46 = vpop.permute.xlu1 %3860 }
0x241c   :  { %v3863_v38 = vmul.f32 %v10067_v13, %v3861_v46  ;;  %v11761_v13 = vpack.c.bf16 %v4070_v23, %v4068_v15 }
0x241e   :  { %v3864_v55 = vsel %vm3584_vm0, %v3863_v38, %v11683_v45 }
0x241f   :  { %3866 = vrot.lane.b32.xlu0 %v3864_v55, %s10489_s9 }
0x2491   :  { %v3867_v42 = vpop.permute.xlu0 %3866 }
0x2492   :  { %3869 = vst.msk [vmem:[#allocation15] sm:$0xff] %vm519_vm7, %v3867_v42  ;;  %8781 = vmatmul.mubr.msk.f32.vlgmr.msra.gmra.mrb[42].mxu1 %vm519_vm7, %v3867_v42  ;;  %v4223_v42 = vld [vmem:[%s12540_s13] sm:$0x3] }
0x2493   :  { %4140 = vmatprep.mubr.f32.mxu1 %v10487_v0  ;;  %9372 = vmatpush1.bf16.msra.mxu1 %v11748_v48  ;;  %v4232_v32 = vrot.slane %v4223_v42, %v10811_v44 }
0x2494   :  { %9374 = vmatprep.subr.bf16.mxu1 %v11750_v1 }
0x2497   :  { %9376 = vmatpush1.bf16.msra.mxu1 %v11755_v56 }
0x2498   :  { %9378 = vmatprep.subr.bf16.mxu1 %v11758_v3 }
0x249b   :  { %9380 = vmatpush1.bf16.msra.mxu1 %v11761_v13 }
0x249c   :  { %9382 = vmatprep.subr.bf16.mxu1 %v11764_v18 }
0x249f   :  { %9384 = vmatpush1.bf16.msra.mxu1 %v11774_v59 }
0x24a0   :  { %9386 = vmatprep.subr.bf16.mxu1 %v11777_v24 }
0x24a2   :  { %4141 = vmatmul.mubr.f32.vlgmr.msra.gmra.mrb[44].mxu1 %v10487_v0 }
0x24a3   :  { %9388 = vmatpush1.bf16.msra.mxu1 %v11792_v62  ;;  %4216 = vmatprep.mubr.f32.mxu1 %v10487_v0 }
0x24a4   :  { %9390 = vmatprep.subr.bf16.mxu1 %v11795_v8 }
0x24a7   :  { %9392 = vmatpush1.bf16.msra.mxu1 %v11805_v33 }
0x24a8   :  { %9423 = vmatprep.subr.bf16.mxu1 %v10490_v63 }
0x2565   :  { %v3949_v21 = vpop.f32.mrb[42].mxu1 }
0x2566   :  { %v11734_v12 = vadd.f32 %v8074_v52, %v3949_v21  ;;  %v8782_v61 = vpop.f32.mrb[43].mxu1 }
0x2568   :  { %v4027_v41 = vadd.f32 %v4023_v14, %v11734_v12  ;;  %v4228_v14 = vrot.slane %v4223_v42, %v10824_v51 }
0x256a   :  { %10070 = vtanh.f32 %v4027_v41  ;;  %v8076_v54 = vmul.f32 -1.442695, %v4027_v41 }
0x256c   :  { %10072 = vpow2.f32 %v8076_v54 }
0x2574   :  { %v10071_v31 = vpop.eup %10070 }
0x2575   :  { %4037 = vrot.lane.b32.xlu1 %v10071_v31, %s10492_s20 }
0x2576   :  { %v10073_v10 = vpop.eup %10072 }
0x2577   :  { %v4031_v34 = vadd.f32 1.0, %v10073_v10 }
0x2579   :  { %10074 = vrcp.f32 %v4031_v34 }
0x2583   :  { %v11738_v40 = vpop.eup %10074 }
0x2584   :  { %v4035_v36 = vmul.f32 0.0, %v11738_v40 }
0x25e7   :  { %v4038_v7 = vpop.permute.xlu1 %4037 }
0x25e8   :  { %v4040_v35 = vmul.f32 %v11738_v40, %v4038_v7 }
0x25ea   :  { %4042 = vrot.lane.b32.xlu0 %v4040_v35, %s10492_s20 }
0x265c   :  { %v4043_v45 = vpop.permute.xlu0 %4042 }
0x265d   :  { %v11743_v29 = vadd.f32 %v4043_v45, %v4035_v36 }
0x265f   :  { %10076 = vtanh.f32 %v11743_v29 }
0x2669   :  { %v10077_v26 = vpop.eup %10076 }
0x266a   :  { %4048 = vrot.lane.b32.xlu1 %v10077_v26, %s10492_s20 }
0x26dc   :  { %v4049_v46 = vpop.permute.xlu1 %4048 }
0x26dd   :  { %v4051_v38 = vmul.f32 %v11738_v40, %v4049_v46 }
0x26df   :  { %4148 = vrot.lane.b32.xlu0 %v4051_v38, %s10489_s9 }
0x2751   :  { %v4149_v55 = vpop.permute.xlu0 %4148 }
0x2752   :  { %8077 = vmatmul.mubr.msk.f32.vlgmr.msra.gmra.mrb[44].mxu1 %vm519_vm7, %v4149_v55  ;;  %8803 = vmatmul.mubr.msk.f32.vlgmr.msra.gmra.mrb[32].mxu0 %vm519_vm7, %v4149_v55 }
0x2753   :  { %9425 = vmatpush3.bf16.msra.mxu1 %v11709_v28  ;;  %8813 = vmatprep.mubr.msk.f32.mxu1 %vm10491_vm3, %v10487_v0 }
0x2754   :  { %9426 = vmatprep.subr.bf16.mxu1 %v10490_v63  ;;  %9402 = vmatpush1.bf16.msra.mxu0 %v11748_v48 }
0x2755   :  { %9404 = vmatprep.subr.bf16.mxu0 %v11750_v1  ;;  %4458 = vmatprep.mubr.f32.mxu0 %v10487_v0 }
0x2757   :  { %9428 = vmatpush3.bf16.msra.mxu1 %v11713_v4 }
0x2758   :  { %9406 = vmatpush1.bf16.msra.mxu0 %v11755_v56  ;;  %9430 = vmatprep.subr.bf16.mxu1 %v11746_v60 }
0x2759   :  { %9408 = vmatprep.subr.bf16.mxu0 %v11758_v3 }
0x275c   :  { %9410 = vmatpush1.bf16.msra.mxu0 %v11761_v13 }
0x275d   :  { %9412 = vmatprep.subr.bf16.mxu0 %v11764_v18 }
0x2760   :  { %9414 = vmatpush1.bf16.msra.mxu0 %v11774_v59 }
0x2761   :  { %9416 = vmatprep.subr.bf16.mxu0 %v11777_v24 }
0x2825   :  { %v4218_v37 = vpop.f32.mrb[44].mxu1  ;;  %v4338_v52 = vpop.f32.mrb[32].mxu0 }
0x2826   :  { %v4235_v21 = vadd.f32 %v4228_v14, %v4218_v37  ;;  %v4342_v61 = vadd.f32 %v4338_v52, %v11734_v12  ;;  %v4220_v41 = vpop.f32.mrb[45].mxu1  ;;  %v8804_v31 = vpop.f32.mrb[33].mxu0 }
0x2827   :  { %v4236_v53 = vadd.f32 %v4232_v32, %v4220_v41 }
0x2828   :  { %10078 = vtanh.f32 %v4342_v61  ;;  %v8081_v10 = vmul.f32 -1.442695, %v4342_v61 }
0x2829   :  { %v8079_v27 = vmul.f32 -1.442695, %v4236_v53 }
0x282a   :  { %10080 = vpow2.f32 %v8081_v10  ;;  %v4541_v10 = vld [vmem:[%s12540_s13] sm:$0x3] }
0x2832   :  { %v10079_v54 = vpop.eup %10078 }
0x2833   :  { %4352 = vrot.lane.b32.xlu1 %v10079_v54, %s10492_s20 }
0x2834   :  { %v10081_v34 = vpop.eup %10080 }
0x2835   :  { %v4346_v40 = vadd.f32 1.0, %v10081_v34  ;;  %v4546_v34 = vrot.slane %v4541_v10, %v10824_v51 }
0x2837   :  { %10082 = vrcp.f32 %v4346_v40 }
0x2841   :  { %v10083_v7 = vpop.eup %10082 }
0x2842   :  { %v4350_v45 = vmul.f32 %v10083_v7, %v11743_v29  ;;  %v8078_v29 = vmul.f32 -1.442695, %v4235_v21 }
0x28a5   :  { %v4353_v35 = vpop.permute.xlu1 %4352 }
0x28a6   :  { %v4355_v36 = vmul.f32 %v10083_v7, %v4353_v35 }
0x28a8   :  { %4357 = vrot.lane.b32.xlu0 %v4355_v36, %s10492_s20 }
0x291a   :  { %v4358_v58 = vpop.permute.xlu0 %4357 }
0x291b   :  { %v11838_v49 = vadd.f32 %v4358_v58, %v4350_v45  ;;  %v4550_v45 = vrot.slane %v4541_v10, %v10811_v44 }
0x291d   :  { %10084 = vtanh.f32 %v11838_v49 }
0x291e   :  { %10086 = vtanh.f32 %v4236_v53 }
0x291f   :  { %10088 = vpow2.f32 %v8078_v29 }
0x2927   :  { %v10085_v17 = vpop.eup %10084 }
0x2928   :  { %4363 = vrot.lane.b32.xlu1 %v10085_v17, %s10492_s20  ;;  %v10087_v11 = vpop.eup %10086 }
0x2929   :  { %v10089_v22 = vpop.eup %10088 }
0x292a   :  { %v4243_v47 = vadd.f32 1.0, %v10089_v22 }
0x292c   :  { %10090 = vrcp.f32 %v4243_v47 }
0x2936   :  { %v10091_v23 = vpop.eup %10090 }
0x2937   :  { %v4250_v19 = vmul.f32 0.0, %v10091_v23 }
0x299a   :  { %v4364_v50 = vpop.permute.xlu1 %4363 }
0x299b   :  { %v4366_v5 = vmul.f32 %v10083_v7, %v4364_v50 }
0x299d   :  { %4466 = vrot.lane.b32.xlu0 %v4366_v5, %s10489_s9 }
0x29a1   :  { %4252 = vrot.lane.b32.xlu0 %v10087_v11, %s10489_s9 }
0x2a0f   :  { %v4467_v15 = vpop.permute.xlu0 %4466 }
0x2a10   :  { %8814 = vmatmul.mubr.msk.f32.vlgmr.msra.gmra.mrb[46].mxu1 %vm519_vm7, %v4467_v15 }
0x2a11   :  { %9432 = vmatpush1.bf16.msra.mxu1 %v11748_v48  ;;  %4776 = vmatprep.mubr.f32.mxu1 %v10487_v0 }
0x2a12   :  { %9434 = vmatprep.subr.bf16.mxu1 %v11750_v1 }
0x2a13   :  { %v4253_v9 = vpop.permute.xlu0 %4252 }
0x2a14   :  { %v4255_v57 = vmul.f32 %v10091_v23, %v4253_v9 }
0x2a15   :  { %9436 = vmatpush1.bf16.msra.mxu1 %v11755_v56 }
0x2a16   :  { %4257 = vrot.lane.b32.xlu0 %v4255_v57, %s10489_s9  ;;  %9438 = vmatprep.subr.bf16.mxu1 %v11758_v3 }
0x2a19   :  { %9440 = vmatpush1.bf16.msra.mxu1 %v11761_v13 }
0x2a1a   :  { %9442 = vmatprep.subr.bf16.mxu1 %v11764_v18 }
0x2a1d   :  { %9444 = vmatpush1.bf16.msra.mxu1 %v11774_v59 }
0x2a1e   :  { %9446 = vmatprep.subr.bf16.mxu1 %v11777_v24 }
0x2a88   :  { %v4258_v25 = vpop.permute.xlu0 %4257 }
0x2a89   :  { %v11856_v26 = vadd.f32 %v4258_v25, %v4250_v19 }
0x2a8b   :  { %10092 = vtanh.f32 %v11856_v26 }
0x2a95   :  { %v10093_v30 = vpop.eup %10092 }
0x2a96   :  { %4263 = vrot.lane.b32.xlu0 %v10093_v30, %s10489_s9 }
0x2ae3   :  { %v4656_v16 = vpop.f32.mrb[46].mxu1 }
0x2ae4   :  { %v4660_v6 = vadd.f32 %v4656_v16, %v11734_v12  ;;  %v8815_v43 = vpop.f32.mrb[47].mxu1 }
0x2ae6   :  { %10094 = vtanh.f32 %v4660_v6  ;;  %v8087_v42 = vmul.f32 -1.442695, %v4660_v6 }
0x2ae7   :  { %10096 = vpow2.f32 %v8079_v27 }
0x2af0   :  { %v10095_v20 = vpop.eup %10094 }
0x2af1   :  { %4670 = vrot.lane.b32.xlu1 %v10095_v20, %s10492_s20  ;;  %v10097_v2 = vpop.eup %10096 }
0x2af2   :  { %v4244_v39 = vadd.f32 1.0, %v10097_v2 }
0x2af4   :  { %10098 = vrcp.f32 %v4244_v39 }
0x2af5   :  { %10100 = vpow2.f32 %v8087_v42 }
0x2afe   :  { %v10099_v46 = vpop.eup %10098 }
0x2aff   :  { %v10101_v14 = vpop.eup %10100 }
0x2b00   :  { %v4664_v37 = vadd.f32 1.0, %v10101_v14 }
0x2b02   :  { %10102 = vrcp.f32 %v4664_v37 }
0x2b08   :  { %v4264_v38 = vpop.permute.xlu0 %4263 }
0x2b09   :  { %v4266_v55 = vmul.f32 %v10099_v46, %v4264_v38 }
0x2b0b   :  { %4267 = vst.msk [vmem:[#allocation3] sm:$0xff] %vm398_vm4, %v4266_v55  ;;  %8082 = vmatmul.mubr.msk.f32.vlgmr.msra.gmra.mrb[34].mxu0 %vm398_vm4, %v4266_v55 }
0x2b0c   :  { %9418 = vmatpush1.bf16.msra.mxu0 %v11792_v62  ;;  %4534 = vmatprep.mubr.f32.mxu0 %v10487_v0  ;;  %v10103_v52 = vpop.eup %10102 }
0x2b0d   :  { %9420 = vmatprep.subr.bf16.mxu0 %v11795_v8  ;;  %v4668_v41 = vmul.f32 %v10103_v52, %v11838_v49 }
0x2b10   :  { %9422 = vmatpush1.bf16.msra.mxu0 %v11805_v33 }
0x2b11   :  { %9453 = vmatprep.subr.bf16.mxu0 %v10490_v63 }
0x2b13   :  { %8083 = vmatmul.mubr.msk.f32.vlgmr.msra.gmra.mrb[34].mxu0 %vm519_vm7, %v4467_v15 }
0x2b14   :  { %9455 = vmatpush3.bf16.msra.mxu0 %v11709_v28  ;;  %8824 = vmatprep.mubr.msk.f32.mxu0 %vm10491_vm3, %v10487_v0 }
0x2b15   :  { %9456 = vmatprep.subr.bf16.mxu0 %v10490_v63 }
0x2b18   :  { %9458 = vmatpush3.bf16.msra.mxu0 %v11713_v4 }
0x2b19   :  { %9460 = vmatprep.subr.bf16.mxu0 %v11746_v60 }
0x2b63   :  { %v4671_v21 = vpop.permute.xlu1 %4670 }
0x2b64   :  { %v4673_v61 = vmul.f32 %v10103_v52, %v4671_v21 }
0x2b66   :  { %4675 = vrot.lane.b32.xlu1 %v4673_v61, %s10492_s20 }
0x2bd8   :  { %v4676_v31 = vpop.permute.xlu1 %4675 }
0x2bd9   :  { %v11878_v54 = vadd.f32 %v4676_v31, %v4668_v41 }
0x2bdb   :  { %10104 = vtanh.f32 %v11878_v54 }
0x2be5   :  { %v10105_v40 = vpop.eup %10104 }
0x2be6   :  { %4681 = vrot.lane.b32.xlu1 %v10105_v40, %s10492_s20  ;;  %v4536_v7 = vpop.f32.mrb[34].mxu0 }
0x2be7   :  { %v4553_v35 = vadd.f32 %v4546_v34, %v4536_v7  ;;  %v4538_v36 = vpop.f32.mrb[35].mxu0 }
0x2be8   :  { %v4554_v58 = vadd.f32 %v4550_v45, %v4538_v36 }
0x2be9   :  { %v8084_v53 = vmul.f32 -1.442695, %v4553_v35 }
0x2bea   :  { %10106 = vtanh.f32 %v4554_v58  ;;  %v8085_v16 = vmul.f32 -1.442695, %v4554_v58 }
0x2beb   :  { %10108 = vpow2.f32 %v8084_v53 }
0x2bf4   :  { %v10107_v32 = vpop.eup %10106 }
0x2bf5   :  { %v10109_v50 = vpop.eup %10108 }
0x2bf6   :  { %v4561_v5 = vadd.f32 1.0, %v10109_v50 }
0x2bf8   :  { %10110 = vrcp.f32 %v4561_v5 }
0x2c02   :  { %v10111_v29 = vpop.eup %10110 }
0x2c03   :  { %v4568_v15 = vmul.f32 %v10111_v29, %v11856_v26 }
0x2c58   :  { %v4682_v49 = vpop.permute.xlu1 %4681 }
0x2c59   :  { %v4684_v17 = vmul.f32 %v10103_v52, %v4682_v49 }
0x2c5b   :  { %4784 = vrot.lane.b32.xlu1 %v4684_v17, %s10489_s9 }
0x2c5f   :  { %4570 = vrot.lane.b32.xlu1 %v10107_v32, %s10489_s9 }
0x2ccd   :  { %v4785_v11 = vpop.permute.xlu1 %4784 }
0x2cce   :  { %8825 = vmatmul.mubr.msk.f32.vlgmr.msra.gmra.mrb[36].mxu0 %vm519_vm7, %v4785_v11 }
0x2ccf   :  { %9462 = vmatpush1.bf16.msra.mxu0 %v11748_v48  ;;  %5094 = vmatprep.mubr.f32.mxu0 %v10487_v0 }
0x2cd0   :  { %9464 = vmatprep.subr.bf16.mxu0 %v11750_v1 }
0x2cd1   :  { %v4571_v22 = vpop.permute.xlu1 %4570 }
0x2cd2   :  { %v4573_v47 = vmul.f32 %v10111_v29, %v4571_v22 }
0x2cd3   :  { %9466 = vmatpush1.bf16.msra.mxu0 %v11755_v56 }
0x2cd4   :  { %4575 = vrot.lane.b32.xlu1 %v4573_v47, %s10489_s9  ;;  %9468 = vmatprep.subr.bf16.mxu0 %v11758_v3 }
0x2cd7   :  { %9470 = vmatpush1.bf16.msra.mxu0 %v11761_v13 }
0x2cd8   :  { %9472 = vmatprep.subr.bf16.mxu0 %v11764_v18 }
0x2cdb   :  { %9474 = vmatpush1.bf16.msra.mxu0 %v11774_v59 }
0x2cdc   :  { %9476 = vmatprep.subr.bf16.mxu0 %v11777_v24 }
0x2d46   :  { %v4576_v23 = vpop.permute.xlu1 %4575 }
0x2d47   :  { %v11901_v9 = vadd.f32 %v4576_v23, %v4568_v15 }
0x2d49   :  { %10112 = vtanh.f32 %v11901_v9 }
0x2d53   :  { %v10113_v57 = vpop.eup %10112 }
0x2d54   :  { %4581 = vrot.lane.b32.xlu1 %v10113_v57, %s10489_s9 }
0x2da1   :  { %v4974_v19 = vpop.f32.mrb[36].mxu0 }
0x2da2   :  { %v4978_v25 = vadd.f32 %v4974_v19, %v11734_v12  ;;  %v8826_v30 = vpop.f32.mrb[37].mxu0 }
0x2da4   :  { %10114 = vtanh.f32 %v4978_v25  ;;  %v8093_v39 = vmul.f32 -1.442695, %v4978_v25 }
0x2da5   :  { %10116 = vpow2.f32 %v8085_v16 }
0x2dae   :  { %v10115_v6 = vpop.eup %10114 }
0x2daf   :  { %4988 = vrot.lane.b32.xlu0 %v10115_v6, %s10492_s20  ;;  %v10117_v43 = vpop.eup %10116 }
0x2db0   :  { %v4562_v26 = vadd.f32 1.0, %v10117_v43 }
0x2db2   :  { %10118 = vrcp.f32 %v4562_v26 }
0x2db3   :  { %10120 = vpow2.f32 %v8093_v39 }
0x2dbc   :  { %v10119_v27 = vpop.eup %10118 }
0x2dbd   :  { %v10121_v46 = vpop.eup %10120 }
0x2dbe   :  { %v4982_v38 = vadd.f32 1.0, %v10121_v46 }
0x2dc0   :  { %10122 = vrcp.f32 %v4982_v38 }
0x2dc6   :  { %v4582_v20 = vpop.permute.xlu1 %4581 }
0x2dc7   :  { %v4584_v2 = vmul.f32 %v10119_v27, %v4582_v20 }
0x2dc9   :  { %4585 = vst.msk [vmem:[#allocation3 + $0x8] sm:$0xff] %vm398_vm4, %v4584_v2  ;;  %8088 = vmatmul.mubr.msk.f32.vlgmr.msra.gmra.mrb[48].mxu1 %vm398_vm4, %v4584_v2 }
0x2dca   :  { %9448 = vmatpush1.bf16.msra.mxu1 %v11792_v62  ;;  %4852 = vmatprep.mubr.f32.mxu1 %v10487_v0  ;;  %v10123_v55 = vpop.eup %10122 }
0x2dcb   :  { %9450 = vmatprep.subr.bf16.mxu1 %v11795_v8  ;;  %v4986_v37 = vmul.f32 %v10123_v55, %v11878_v54 }
0x2dce   :  { %9452 = vmatpush1.bf16.msra.mxu1 %v11805_v33 }
0x2dcf   :  { %9483 = vmatprep.subr.bf16.mxu1 %v10490_v63 }
0x2dd1   :  { %8089 = vmatmul.mubr.msk.f32.vlgmr.msra.gmra.mrb[48].mxu1 %vm519_vm7, %v4785_v11 }
0x2dd2   :  { %9485 = vmatpush3.bf16.msra.mxu1 %v11709_v28  ;;  %8835 = vmatprep.mubr.msk.f32.mxu1 %vm10491_vm3, %v10487_v0 }
0x2dd3   :  { %9486 = vmatprep.subr.bf16.mxu1 %v10490_v63 }
0x2dd6   :  { %9488 = vmatpush3.bf16.msra.mxu1 %v11713_v4 }
0x2dd7   :  { %9490 = vmatprep.subr.bf16.mxu1 %v11746_v60  ;;  %v4859_v60 = vld [vmem:[%s12540_s13] sm:$0x3] }
0x2dd8   :  { %v4864_v61 = vrot.slane %v4859_v60, %v10824_v51  ;;  %v4868_v41 = vrot.slane %v4859_v60, %v10811_v44 }
0x2e21   :  { %v4989_v42 = vpop.permute.xlu0 %4988 }
0x2e22   :  { %v4991_v14 = vmul.f32 %v10123_v55, %v4989_v42 }
0x2e24   :  { %4993 = vrot.lane.b32.xlu0 %v4991_v14, %s10492_s20 }
0x2e96   :  { %v4994_v52 = vpop.permute.xlu0 %4993 }
0x2e97   :  { %v11923_v21 = vadd.f32 %v4994_v52, %v4986_v37 }
0x2e99   :  { %10124 = vtanh.f32 %v11923_v21 }
0x2ea3   :  { %v10125_v31 = vpop.eup %10124 }
0x2ea4   :  { %4999 = vrot.lane.b32.xlu0 %v10125_v31, %s10492_s20  ;;  %v4854_v10 = vpop.f32.mrb[48].mxu1 }
0x2ea5   :  { %v4871_v34 = vadd.f32 %v4864_v61, %v4854_v10  ;;  %v4856_v40 = vpop.f32.mrb[49].mxu1 }
0x2ea6   :  { %v4872_v54 = vadd.f32 %v4868_v41, %v4856_v40 }
0x2ea7   :  { %v8090_v35 = vmul.f32 -1.442695, %v4871_v34 }
0x2ea8   :  { %10126 = vtanh.f32 %v4872_v54 }
0x2ea9   :  { %10128 = vpow2.f32 %v8090_v35 }
0x2eb2   :  { %v10127_v7 = vpop.eup %10126 }
0x2eb3   :  { %4888 = vrot.lane.b32.xlu1 %v10127_v7, %s10489_s9  ;;  %v10129_v36 = vpop.eup %10128 }
0x2eb4   :  { %v4879_v58 = vadd.f32 1.0, %v10129_v36 }
0x2eb6   :  { %10130 = vrcp.f32 %v4879_v58 }
0x2ec0   :  { %v10131_v17 = vpop.eup %10130 }
0x2ec1   :  { %v4886_v5 = vmul.f32 %v10131_v17, %v11901_v9 }
0x2f16   :  { %v5000_v45 = vpop.permute.xlu0 %4999 }
0x2f17   :  { %v5002_v49 = vmul.f32 %v10123_v55, %v5000_v45 }
0x2f19   :  { %5102 = vrot.lane.b32.xlu0 %v5002_v49, %s10489_s9 }
0x2f25   :  { %v4889_v32 = vpop.permute.xlu1 %4888 }
0x2f26   :  { %v4891_v53 = vmul.f32 %v10131_v17, %v4889_v32 }
0x2f28   :  { %4893 = vrot.lane.b32.xlu1 %v4891_v53, %s10489_s9 }
0x2f8b   :  { %v5103_v50 = vpop.permute.xlu0 %5102 }
0x2f8c   :  { %8836 = vmatmul.mubr.msk.f32.vlgmr.msra.gmra.mrb[50].mxu1 %vm519_vm7, %v5103_v50 }
0x2f8d   :  { %9492 = vmatpush1.bf16.msra.mxu1 %v11748_v48  ;;  %5412 = vmatprep.mubr.f32.mxu1 %v10487_v0 }
0x2f8e   :  { %9494 = vmatprep.subr.bf16.mxu1 %v11750_v1 }
0x2f91   :  { %9496 = vmatpush1.bf16.msra.mxu1 %v11755_v56  ;;  %v8091_v56 = vmul.f32 -1.442695, %v4872_v54 }
0x2f92   :  { %9498 = vmatprep.subr.bf16.mxu1 %v11758_v3 }
0x2f95   :  { %9500 = vmatpush1.bf16.msra.mxu1 %v11761_v13 }
0x2f96   :  { %9502 = vmatprep.subr.bf16.mxu1 %v11764_v18 }
0x2f99   :  { %9504 = vmatpush1.bf16.msra.mxu1 %v11774_v59 }
0x2f9a   :  { %v4894_v11 = vpop.permute.xlu1 %4893  ;;  %9506 = vmatprep.subr.bf16.mxu1 %v11777_v24 }
0x2f9b   :  { %v11946_v48 = vadd.f32 %v4894_v11, %v4886_v5 }
0x2f9d   :  { %10132 = vtanh.f32 %v11946_v48 }
0x2f9e   :  { %10134 = vpow2.f32 %v8091_v56 }
0x2fa7   :  { %v10133_v1 = vpop.eup %10132 }
0x2fa8   :  { %4899 = vrot.lane.b32.xlu1 %v10133_v1, %s10489_s9  ;;  %v10135_v3 = vpop.eup %10134 }
0x2fa9   :  { %v4880_v13 = vadd.f32 1.0, %v10135_v3 }
0x2fab   :  { %10136 = vrcp.f32 %v4880_v13 }
0x2fb5   :  { %v10137_v18 = vpop.eup %10136 }
0x301a   :  { %v4900_v29 = vpop.permute.xlu1 %4899 }
0x301b   :  { %v4902_v22 = vmul.f32 %v10137_v18, %v4900_v29 }
0x301d   :  { %4903 = vst.msk [vmem:[#allocation3 + $0x10] sm:$0xff] %vm398_vm4, %v4902_v22  ;;  %8094 = vmatmul.mubr.msk.f32.vlgmr.msra.gmra.mrb[38].mxu0 %vm398_vm4, %v4902_v22 }
0x301e   :  { %9478 = vmatpush1.bf16.msra.mxu0 %v11792_v62  ;;  %5170 = vmatprep.mubr.f32.mxu0 %v10487_v0 }
0x301f   :  { %9480 = vmatprep.subr.bf16.mxu0 %v11795_v8 }
0x3022   :  { %9482 = vmatpush1.bf16.msra.mxu0 %v11805_v33 }
0x3023   :  { %9513 = vmatprep.subr.bf16.mxu0 %v10490_v63 }
0x3025   :  { %8095 = vmatmul.mubr.msk.f32.vlgmr.msra.gmra.mrb[38].mxu0 %vm519_vm7, %v5103_v50 }
0x3026   :  { %9515 = vmatpush3.bf16.msra.mxu0 %v11709_v28  ;;  %8846 = vmatprep.mubr.msk.f32.mxu0 %vm10491_vm3, %v10487_v0 }
0x3027   :  { %9516 = vmatprep.subr.bf16.mxu0 %v10490_v63 }
0x302a   :  { %9518 = vmatpush3.bf16.msra.mxu0 %v11713_v4  ;;  %v5177_v4 = vld [vmem:[%s12540_s13] sm:$0x3] }
0x302b   :  { %v5182_v30 = vrot.slane %v5177_v4, %v10824_v51  ;;  %v5186_v26 = vrot.slane %v5177_v4, %v10811_v44 }
0x305f   :  { %v5292_v59 = vpop.f32.mrb[50].mxu1 }
0x3060   :  { %v5296_v24 = vadd.f32 %v5292_v59, %v11734_v12  ;;  %v8837_v47 = vpop.f32.mrb[51].mxu1 }
0x3061   :  { %v5858_v47 = vld [vmem:[#allocation12] sm:$0xff] }
0x3062   :  { %10138 = vtanh.f32 %v5296_v24  ;;  %v8099_v23 = vmul.f32 -1.442695, %v5296_v24 }
0x3064   :  { %10140 = vpow2.f32 %v8099_v23  ;;  %v5860_v23 = vld [vmem:[#allocation12 + $0x10] sm:$0xff] }
0x306c   :  { %v10139_v15 = vpop.eup %10138 }
0x306d   :  { %5306 = vrot.lane.b32.xlu0 %v10139_v15, %s10492_s20  ;;  %v5859_v15 = vld [vmem:[#allocation12 + $0x8] sm:$0xff] }
0x306e   :  { %v10141_v9 = vpop.eup %10140 }
0x306f   :  { %v5300_v57 = vadd.f32 1.0, %v10141_v9  ;;  %v12011_v9 = vpack.c.bf16 %v5859_v15, %v5858_v47 }
0x3071   :  { %10142 = vrcp.f32 %v5300_v57  ;;  %v5861_v57 = vld [vmem:[#allocation12 + $0x18] sm:$0xff] }
0x307b   :  { %v10143_v28 = vpop.eup %10142 }
0x307c   :  { %v5304_v27 = vmul.f32 %v10143_v28, %v11923_v21 }
0x30df   :  { %v5307_v19 = vpop.permute.xlu0 %5306 }
0x30e0   :  { %v5309_v25 = vmul.f32 %v10143_v28, %v5307_v19 }
0x30e2   :  { %5311 = vrot.lane.b32.xlu0 %v5309_v25, %s10492_s20 }
0x30f8   :  { %v5172_v16 = vpop.f32.mrb[38].mxu0 }
0x30f9   :  { %v5189_v6 = vadd.f32 %v5182_v30, %v5172_v16  ;;  %v5174_v43 = vpop.f32.mrb[39].mxu0 }
0x30fa   :  { %v5190_v39 = vadd.f32 %v5186_v26, %v5174_v43 }
0x30fb   :  { %v8096_v55 = vmul.f32 -1.442695, %v5189_v6 }
0x30fc   :  { %v8097_v54 = vmul.f32 -1.442695, %v5190_v39 }
0x3154   :  { %v5312_v20 = vpop.permute.xlu0 %5311 }
0x3155   :  { %v11972_v2 = vadd.f32 %v5312_v20, %v5304_v27 }
0x3157   :  { %10144 = vtanh.f32 %v11972_v2 }
0x3158   :  { %10146 = vtanh.f32 %v5190_v39  ;;  %v5650_v39 = vld [vmem:[#allocation13 + $0x18] sm:$0xff] }
0x3159   :  { %10148 = vpow2.f32 %v8096_v55  ;;  %v5649_v55 = vld [vmem:[#allocation13 + $0x10] sm:$0xff] }
0x3161   :  { %v10145_v46 = vpop.eup %10144 }
0x3162   :  { %5317 = vrot.lane.b32.xlu0 %v10145_v46, %s10492_s20  ;;  %v10147_v38 = vpop.eup %10146  ;;  %v5647_v46 = vld [vmem:[#allocation13] sm:$0xff] }
0x3163   :  { %v10149_v42 = vpop.eup %10148 }
0x3164   :  { %v5197_v14 = vadd.f32 1.0, %v10149_v42  ;;  %v5652_v42 = vld [vmem:[#allocation13 + $0x28] sm:$0xff] }
0x3166   :  { %5206 = vrot.lane.b32.xlu0 %v10147_v38, %s10489_s9  ;;  %10150 = vrcp.f32 %v5197_v14  ;;  %v5654_v14 = vld [vmem:[#allocation13 + $0x38] sm:$0xff] }
0x3170   :  { %v10151_v21 = vpop.eup %10150 }
0x3171   :  { %v5204_v31 = vmul.f32 %v10151_v21, %v11946_v48  ;;  %v5495_v48 = vld [vmem:[%s12540_s13] sm:$0x3] }
0x3172   :  { %v5500_v1 = vrot.slane %v5495_v48, %v10824_v51  ;;  %v5504_v18 = vrot.slane %v5495_v48, %v10811_v44 }
0x31d4   :  { %v5318_v37 = vpop.permute.xlu0 %5317 }
0x31d5   :  { %v5320_v52 = vmul.f32 %v10143_v28, %v5318_v37  ;;  %v12014_v28 = vpack.c.bf16 %v5861_v57, %v5860_v23  ;;  %v12024_v37 = vpack.c.bf16 %v5649_v55, %v5647_v46  ;;  %v5643_v23 = vld [vmem:[%s12538_s11 + $0x20] sm:$0xff]  ;;  %v5645_v57 = vld [vmem:[%s12538_s11 + $0x30] sm:$0xff] }
0x31d7   :  { %5420 = vrot.lane.b32.xlu1 %v5320_v52, %s10489_s9  ;;  %v12026_v52 = vpack.c.bf16 %v5654_v14, %v5652_v42 }
0x31d8   :  { %v5207_v60 = vpop.permute.xlu0 %5206 }
0x31d9   :  { %v5209_v61 = vmul.f32 %v10151_v21, %v5207_v60  ;;  %v5651_v21 = vld [vmem:[#allocation13 + $0x20] sm:$0xff]  ;;  %v5653_v60 = vld [vmem:[#allocation13 + $0x30] sm:$0xff] }
0x31db   :  { %5211 = vrot.lane.b32.xlu1 %v5209_v61, %s10489_s9  ;;  %v5656_v61 = vld [vmem:[#allocation13 + $0x48] sm:$0xff] }
0x3249   :  { %v5421_v41 = vpop.permute.xlu1 %5420 }
0x324a   :  { %8847 = vmatmul.mubr.msk.f32.vlgmr.msra.gmra.mrb[40].mxu0 %vm519_vm7, %v5421_v41 }
0x324b   :  { %5730 = vmatprep.mubr.f32.mxu0 %v10487_v0 }
0x324d   :  { %v5212_v10 = vpop.permute.xlu1 %5211 }
0x324e   :  { %v11982_v34 = vadd.f32 %v5212_v10, %v5204_v31  ;;  %v12031_v31 = vpack.c.bf16 %v5653_v60, %v5651_v21 }
0x3250   :  { %10152 = vtanh.f32 %v11982_v34 }
0x3251   :  { %10154 = vpow2.f32 %v8097_v54  ;;  %v5657_v54 = vld [vmem:[#allocation13 + $0x50] sm:$0xff] }
0x325a   :  { %v10153_v40 = vpop.eup %10152 }
0x325b   :  { %5217 = vrot.lane.b32.xlu1 %v10153_v40, %s10489_s9  ;;  %v10155_v7 = vpop.eup %10154  ;;  %v5655_v40 = vld [vmem:[#allocation13 + $0x40] sm:$0xff] }
0x325c   :  { %v5198_v35 = vadd.f32 1.0, %v10155_v7  ;;  %v5660_v7 = vld [vmem:[#allocation13 + $0x68] sm:$0xff] }
0x325e   :  { %10156 = vrcp.f32 %v5198_v35  ;;  %v5662_v35 = vld [vmem:[#allocation13 + $0x78] sm:$0xff] }
0x3268   :  { %v10157_v36 = vpop.eup %10156 }
0x32cd   :  { %v5218_v45 = vpop.permute.xlu1 %5217 }
0x32ce   :  { %v5220_v58 = vmul.f32 %v10157_v36, %v5218_v45  ;;  %v12037_v36 = vpack.c.bf16 %v5657_v54, %v5655_v40  ;;  %v12040_v45 = vpack.c.bf16 %v5662_v35, %v5660_v7 }
0x32d0   :  { %5221 = vst.msk [vmem:[#allocation3 + $0x18] sm:$0xff] %vm398_vm4, %v5220_v58  ;;  %8100 = vmatmul.mubr.msk.f32.vlgmr.msra.gmra.mrb[52].mxu1 %vm398_vm4, %v5220_v58  ;;  %v5659_v58 = vld [vmem:[#allocation13 + $0x60] sm:$0xff] }
0x32d1   :  { %9508 = vmatpush1.bf16.msra.mxu1 %v11792_v62  ;;  %5488 = vmatprep.mubr.f32.mxu1 %v10487_v0 }
0x32d2   :  { %9510 = vmatprep.subr.bf16.mxu1 %v11795_v8 }
0x32d5   :  { %9512 = vmatpush1.bf16.msra.mxu1 %v11805_v33 }
0x32d6   :  { %9543 = vmatprep.subr.bf16.mxu1 %v10490_v63 }
0x32d8   :  { %8101 = vmatmul.mubr.msk.f32.vlgmr.msra.gmra.mrb[52].mxu1 %vm519_vm7, %v5421_v41  ;;  %v5658_v41 = vld [vmem:[#allocation13 + $0x58] sm:$0xff] }
0x32d9   :  { %8857 = vmatprep.mubr.msk.f32.mxu1 %vm10491_vm3, %v10487_v0  ;;  %9545 = vmatpush3.bf16.msra.mxu1 %v12011_v9  ;;  %v12034_v10 = vpack.c.bf16 %v5658_v41, %v5656_v61 }
0x32da   :  { %9546 = vmatprep.subr.bf16.mxu1 %v10490_v63 }
0x32dd   :  { %9548 = vmatpush3.bf16.msra.mxu1 %v12014_v28 }
0x331d   :  { %v5610_v49 = vpop.f32.mrb[40].mxu0 }
0x331e   :  { %v5614_v17 = vadd.f32 %v5610_v49, %v11734_v12  ;;  %v8848_v32 = vpop.f32.mrb[41].mxu0  ;;  %v5661_v49 = vld [vmem:[#allocation13 + $0x70] sm:$0xff] }
0x3320   :  { %10158 = vtanh.f32 %v5614_v17  ;;  %v8105_v62 = vmul.f32 -1.442695, %v5614_v17  ;;  %v12043_v17 = vpack.c.bf16 %v5661_v49, %v5659_v58 }
0x3322   :  { %10160 = vpow2.f32 %v8105_v62 }
0x332a   :  { %v10159_v53 = vpop.eup %10158 }
0x332b   :  { %5624 = vrot.lane.b32.xlu0 %v10159_v53, %s10492_s20 }
0x332c   :  { %v10161_v8 = vpop.eup %10160 }
0x332d   :  { %v5618_v50 = vadd.f32 1.0, %v10161_v8 }
0x332f   :  { %10162 = vrcp.f32 %v5618_v50  ;;  %v5640_v50 = vld [vmem:[%s12538_s11 + $0x8] sm:$0xff] }
0x3339   :  { %v10163_v33 = vpop.eup %10162 }
0x333a   :  { %v5622_v29 = vmul.f32 %v10163_v33, %v11972_v2  ;;  %v5648_v2 = vld [vmem:[#allocation13 + $0x8] sm:$0xff] }
0x333b   :  { %v12022_v38 = vpack.c.bf16 %v5650_v39, %v5648_v2  ;;  %v5813_v39 = vld [vmem:[%s12540_s13] sm:$0x3] }
0x333c   :  { %v5818_v46 = vrot.slane %v5813_v39, %v10824_v51  ;;  %v5822_v21 = vrot.slane %v5813_v39, %v10811_v44 }
0x333d   :  { %9520 = vmatprep.subr.bf16.mxu0 %v12022_v38  ;;  %9550 = vmatprep.subr.bf16.mxu1 %v12022_v38 }
0x333e   :  { %9522 = vmatpush1.bf16.msra.mxu0 %v12024_v37 }
0x333f   :  { %9524 = vmatprep.subr.bf16.mxu0 %v12026_v52 }
0x3342   :  { %9526 = vmatpush1.bf16.msra.mxu0 %v12031_v31 }
0x3343   :  { %9528 = vmatprep.subr.bf16.mxu0 %v12034_v10 }
0x3346   :  { %9530 = vmatpush1.bf16.msra.mxu0 %v12037_v36 }
0x3347   :  { %9532 = vmatprep.subr.bf16.mxu0 %v12040_v45 }
0x334a   :  { %9534 = vmatpush1.bf16.msra.mxu0 %v12043_v17 }
0x339d   :  { %v5625_v5 = vpop.permute.xlu0 %5624 }
0x339e   :  { %v5627_v11 = vmul.f32 %v10163_v33, %v5625_v5 }
0x33a0   :  { %5629 = vrot.lane.b32.xlu0 %v5627_v11, %s10492_s20 }
0x33ab   :  { %v5490_v56 = vpop.f32.mrb[52].mxu1 }
0x33ac   :  { %v5507_v3 = vadd.f32 %v5500_v1, %v5490_v56  ;;  %v5492_v13 = vpop.f32.mrb[53].mxu1  ;;  %v5639_v56 = vld [vmem:[%s12538_s11] sm:$0xff] }
0x33ad   :  { %v12007_v24 = vadd.f32 %v5504_v18, %v5492_v13  ;;  %v5644_v13 = vld [vmem:[%s12538_s11 + $0x28] sm:$0xff]  ;;  %v5646_v18 = vld [vmem:[%s12538_s11 + $0x38] sm:$0xff] }
0x33ae   :  { %v8102_v4 = vmul.f32 -1.442695, %v5507_v3  ;;  %v5641_v3 = vld [vmem:[%s12538_s11 + $0x10] sm:$0xff]  ;;  %v12086_v15 = vpack.c.bf16 %v5646_v18, %v5644_v13 }
0x33af   :  { %v8103_v11 = vmul.f32 -1.442695, %v12007_v24 }
0x3412   :  { %v5630_v22 = vpop.permute.xlu0 %5629 }
0x3413   :  { %v12005_v59 = vadd.f32 %v5630_v22, %v5622_v29 }
0x3415   :  { %10164 = vtanh.f32 %v12005_v59 }
0x3416   :  { %10166 = vtanh.f32 %v12007_v24  ;;  %v12084_v24 = vpack.c.bf16 %v5641_v3, %v5639_v56 }
0x3417   :  { %10168 = vpow2.f32 %v8102_v4 }
0x341f   :  { %v10165_v19 = vpop.eup %10164 }
0x3420   :  { %5635 = vrot.lane.b32.xlu1 %v10165_v19, %s10492_s20  ;;  %v10167_v25 = vpop.eup %10166  ;;  %v12097_v19 = vpack.c.bf16 %v5645_v57, %v5643_v23 }
0x3421   :  { %v10169_v30 = vpop.eup %10168 }
0x3422   :  { %v5515_v16 = vadd.f32 1.0, %v10169_v30 }
0x3424   :  { %5524 = vrot.lane.b32.xlu1 %v10167_v25, %s10489_s9  ;;  %10170 = vrcp.f32 %v5515_v16 }
0x342e   :  { %v10171_v26 = vpop.eup %10170 }
0x342f   :  { %v5522_v53 = vmul.f32 %v10171_v26, %v11982_v34 }
0x3492   :  { %v5636_v6 = vpop.permute.xlu1 %5635 }
0x3493   :  { %v5638_v43 = vmul.f32 %v10163_v33, %v5636_v6  ;;  %v5642_v33 = vld [vmem:[%s12538_s11 + $0x18] sm:$0xff] }
0x3494   :  { %v12060_v5 = vpack.c.bf16 %v5642_v33, %v5640_v50 }
0x3495   :  { %5738 = vrot.lane.b32.xlu0 %v5638_v43, %s10489_s9 }
0x3496   :  { %v5525_v27 = vpop.permute.xlu1 %5524  ;;  %9536 = vmatprep.subr.bf16.mxu0 %v12060_v5 }
0x3497   :  { %v5527_v20 = vmul.f32 %v10171_v26, %v5525_v27 }
0x3499   :  { %5529 = vrot.lane.b32.xlu0 %v5527_v20, %s10489_s9 }
0x3507   :  { %v5739_v32 = vpop.permute.xlu0 %5738 }
0x3508   :  { %8858 = vmatmul.mubr.msk.f32.vlgmr.msra.gmra.mrb[54].mxu1 %vm519_vm7, %v5739_v32 }
0x3509   :  { %9552 = vmatpush1.bf16.msra.mxu1 %v12024_v37  ;;  %6048 = vmatprep.mubr.f32.mxu1 %v10487_v0 }
0x350a   :  { %9554 = vmatprep.subr.bf16.mxu1 %v12026_v52 }
0x350b   :  { %v5530_v62 = vpop.permute.xlu0 %5529 }
0x350c   :  { %v12052_v8 = vadd.f32 %v5530_v62, %v5522_v53 }
0x350d   :  { %9556 = vmatpush1.bf16.msra.mxu1 %v12031_v31 }
0x350e   :  { %10172 = vtanh.f32 %v12052_v8  ;;  %9558 = vmatprep.subr.bf16.mxu1 %v12034_v10 }
0x350f   :  { %10174 = vpow2.f32 %v8103_v11 }
0x3511   :  { %9560 = vmatpush1.bf16.msra.mxu1 %v12037_v36 }
0x3512   :  { %9562 = vmatprep.subr.bf16.mxu1 %v12040_v45 }
0x3515   :  { %9564 = vmatpush1.bf16.msra.mxu1 %v12043_v17 }
0x3516   :  { %9566 = vmatprep.subr.bf16.mxu1 %v12060_v5 }
0x3518   :  { %v10173_v34 = vpop.eup %10172 }
0x3519   :  { %5535 = vrot.lane.b32.xlu0 %v10173_v34, %s10489_s9  ;;  %v10175_v48 = vpop.eup %10174 }
0x351a   :  { %v5516_v1 = vadd.f32 1.0, %v10175_v48 }
0x351c   :  { %10176 = vrcp.f32 %v5516_v1 }
0x3526   :  { %v10177_v29 = vpop.eup %10176 }
0x358b   :  { %v5536_v22 = vpop.permute.xlu0 %5535 }
0x358c   :  { %v5538_v47 = vmul.f32 %v10177_v29, %v5536_v22 }
0x358e   :  { %5539 = vst.msk [vmem:[#allocation3 + $0x20] sm:$0xff] %vm398_vm4, %v5538_v47  ;;  %8106 = vmatmul.mubr.msk.f32.vlgmr.msra.gmra.mrb[42].mxu0 %vm398_vm4, %v5538_v47 }
0x358f   :  { %9538 = vmatpush1.bf16.msra.mxu0 %v12084_v24  ;;  %5806 = vmatprep.mubr.f32.mxu0 %v10487_v0 }
0x3590   :  { %9540 = vmatprep.subr.bf16.mxu0 %v12086_v15 }
0x3593   :  { %9542 = vmatpush1.bf16.msra.mxu0 %v12097_v19 }
0x3594   :  { %9573 = vmatprep.subr.bf16.mxu0 %v10490_v63 }
0x3596   :  { %8107 = vmatmul.mubr.msk.f32.vlgmr.msra.gmra.mrb[42].mxu0 %vm519_vm7, %v5739_v32 }
0x3597   :  { %9575 = vmatpush3.bf16.msra.mxu0 %v12011_v9  ;;  %8868 = vmatprep.mubr.msk.f32.mxu0 %vm10491_vm3, %v10487_v0 }
0x3598   :  { %9576 = vmatprep.subr.bf16.mxu0 %v10490_v63 }
0x359b   :  { %9578 = vmatpush3.bf16.msra.mxu0 %v12014_v28 }
0x359c   :  { %9580 = vmatprep.subr.bf16.mxu0 %v12022_v38 }
0x35db   :  { %v5928_v25 = vpop.f32.mrb[54].mxu1 }
0x35dc   :  { %v5932_v4 = vadd.f32 %v5928_v25, %v11734_v12  ;;  %v8859_v30 = vpop.f32.mrb[55].mxu1 }
0x35de   :  { %10178 = vtanh.f32 %v5932_v4  ;;  %v8111_v6 = vmul.f32 -1.442695, %v5932_v4 }
0x35e0   :  { %10180 = vpow2.f32 %v8111_v6 }
0x35e8   :  { %v10179_v16 = vpop.eup %10178 }
0x35e9   :  { %5942 = vrot.lane.b32.xlu1 %v10179_v16, %s10492_s20 }
0x35ea   :  { %v10181_v43 = vpop.eup %10180 }
0x35eb   :  { %v5936_v26 = vadd.f32 1.0, %v10181_v43 }
0x35ed   :  { %10182 = vrcp.f32 %v5936_v26  ;;  %v6131_v26 = vld [vmem:[%s12540_s13] sm:$0x3] }
0x35f7   :  { %v10183_v27 = vpop.eup %10182 }
0x35f8   :  { %v5940_v60 = vmul.f32 %v10183_v27, %v12005_v59 }
0x365b   :  { %v5943_v20 = vpop.permute.xlu1 %5942 }
0x365c   :  { %v5945_v2 = vmul.f32 %v10183_v27, %v5943_v20 }
0x365e   :  { %5947 = vrot.lane.b32.xlu1 %v5945_v2, %s10492_s20 }
0x3669   :  { %v5808_v55 = vpop.f32.mrb[42].mxu0 }
0x366a   :  { %v5825_v42 = vadd.f32 %v5818_v46, %v5808_v55  ;;  %v5810_v14 = vpop.f32.mrb[43].mxu0  ;;  %v6140_v46 = vrot.slane %v6131_v26, %v10811_v44 }
0x366b   :  { %v5826_v40 = vadd.f32 %v5822_v21, %v5810_v14 }
0x366c   :  { %v8108_v35 = vmul.f32 -1.442695, %v5825_v42 }
0x366d   :  { %v8109_v1 = vmul.f32 -1.442695, %v5826_v40 }
0x36d0   :  { %v5948_v61 = vpop.permute.xlu1 %5947 }
0x36d1   :  { %v12119_v41 = vadd.f32 %v5948_v61, %v5940_v60 }
0x36d3   :  { %10184 = vtanh.f32 %v12119_v41 }
0x36d4   :  { %10186 = vtanh.f32 %v5826_v40 }
0x36d5   :  { %10188 = vpow2.f32 %v8108_v35 }
0x36dd   :  { %v10185_v54 = vpop.eup %10184 }
0x36de   :  { %5953 = vrot.lane.b32.xlu0 %v10185_v54, %s10492_s20  ;;  %v10187_v7 = vpop.eup %10186 }
0x36df   :  { %v10189_v58 = vpop.eup %10188 }
0x36e0   :  { %v5833_v49 = vadd.f32 1.0, %v10189_v58 }
0x36e2   :  { %5842 = vrot.lane.b32.xlu0 %v10187_v7, %s10489_s9  ;;  %10190 = vrcp.f32 %v5833_v49 }
0x36ec   :  { %v10191_v53 = vpop.eup %10190 }
0x36ed   :  { %v5840_v34 = vmul.f32 %v10191_v53, %v12052_v8 }
0x3750   :  { %v5954_v32 = vpop.permute.xlu0 %5953 }
0x3751   :  { %v5956_v59 = vmul.f32 %v10183_v27, %v5954_v32  ;;  %v6136_v27 = vrot.slane %v6131_v26, %v10824_v51 }
0x3753   :  { %6056 = vrot.lane.b32.xlu1 %v5956_v59, %s10489_s9 }
0x3754   :  { %v5843_v62 = vpop.permute.xlu0 %5842 }
0x3755   :  { %v5845_v50 = vmul.f32 %v10191_v53, %v5843_v62 }
0x3757   :  { %5847 = vrot.lane.b32.xlu1 %v5845_v50, %s10489_s9 }
0x37c5   :  { %v6057_v33 = vpop.permute.xlu1 %6056 }
0x37c6   :  { %8869 = vmatmul.mubr.msk.f32.vlgmr.msra.gmra.mrb[44].mxu0 %vm519_vm7, %v6057_v33 }
0x37c7   :  { %9582 = vmatpush1.bf16.msra.mxu0 %v12024_v37  ;;  %6366 = vmatprep.mubr.f32.mxu0 %v10487_v0 }
0x37c8   :  { %9584 = vmatprep.subr.bf16.mxu0 %v12026_v52 }
0x37c9   :  { %v5848_v11 = vpop.permute.xlu1 %5847 }
0x37ca   :  { %v12131_v48 = vadd.f32 %v5848_v11, %v5840_v34 }
0x37cb   :  { %9586 = vmatpush1.bf16.msra.mxu0 %v12031_v31 }
0x37cc   :  { %10192 = vtanh.f32 %v12131_v48  ;;  %9588 = vmatprep.subr.bf16.mxu0 %v12034_v10 }
0x37cd   :  { %10194 = vpow2.f32 %v8109_v1 }
0x37cf   :  { %9590 = vmatpush1.bf16.msra.mxu0 %v12037_v36 }
0x37d0   :  { %9592 = vmatprep.subr.bf16.mxu0 %v12040_v45 }
0x37d3   :  { %9594 = vmatpush1.bf16.msra.mxu0 %v12043_v17 }
0x37d4   :  { %9596 = vmatprep.subr.bf16.mxu0 %v12060_v5 }
0x37d6   :  { %v10193_v8 = vpop.eup %10192 }
0x37d7   :  { %5853 = vrot.lane.b32.xlu0 %v10193_v8, %s10489_s9  ;;  %v10195_v56 = vpop.eup %10194 }
0x37d8   :  { %v5834_v3 = vadd.f32 1.0, %v10195_v56 }
0x37da   :  { %10196 = vrcp.f32 %v5834_v3 }
0x37e4   :  { %v10197_v13 = vpop.eup %10196 }
0x3849   :  { %v5854_v18 = vpop.permute.xlu0 %5853 }
0x384a   :  { %v5856_v29 = vmul.f32 %v10197_v13, %v5854_v18 }
0x384c   :  { %5857 = vst.msk [vmem:[#allocation3 + $0x28] sm:$0xff] %vm398_vm4, %v5856_v29  ;;  %8112 = vmatmul.mubr.msk.f32.vlgmr.msra.gmra.mrb[56].mxu1 %vm398_vm4, %v5856_v29 }
0x384d   :  { %9568 = vmatpush1.bf16.msra.mxu1 %v12084_v24  ;;  %6124 = vmatprep.mubr.f32.mxu1 %v10487_v0 }
0x384e   :  { %9570 = vmatprep.subr.bf16.mxu1 %v12086_v15 }
0x3851   :  { %9572 = vmatpush1.bf16.msra.mxu1 %v12097_v19 }
0x3852   :  { %9603 = vmatprep.subr.bf16.mxu1 %v10490_v63 }
0x3854   :  { %8113 = vmatmul.mubr.msk.f32.vlgmr.msra.gmra.mrb[56].mxu1 %vm519_vm7, %v6057_v33 }
0x3855   :  { %9605 = vmatpush3.bf16.msra.mxu1 %v12011_v9  ;;  %8879 = vmatprep.mubr.msk.f32.mxu1 %vm10491_vm3, %v10487_v0 }
0x3856   :  { %9606 = vmatprep.subr.bf16.mxu1 %v10490_v63 }
0x3859   :  { %9608 = vmatpush3.bf16.msra.mxu1 %v12014_v28 }
0x385a   :  { %9610 = vmatprep.subr.bf16.mxu1 %v12022_v38 }
0x3899   :  { %v6246_v22 = vpop.f32.mrb[44].mxu0 }
0x389a   :  { %v6250_v47 = vadd.f32 %v6246_v22, %v11734_v12  ;;  %v8870_v23 = vpop.f32.mrb[45].mxu0 }
0x389c   :  { %10198 = vtanh.f32 %v6250_v47  ;;  %v8117_v25 = vmul.f32 -1.442695, %v6250_v47 }
0x389e   :  { %10200 = vpow2.f32 %v8117_v25 }
0x38a6   :  { %v10199_v57 = vpop.eup %10198 }
0x38a7   :  { %6260 = vrot.lane.b32.xlu1 %v10199_v57, %s10492_s20 }
0x38a8   :  { %v10201_v4 = vpop.eup %10200 }
0x38a9   :  { %v6254_v30 = vadd.f32 1.0, %v10201_v4 }
0x38ab   :  { %10202 = vrcp.f32 %v6254_v30 }
0x38b5   :  { %v10203_v16 = vpop.eup %10202 }
0x38b6   :  { %v6258_v55 = vmul.f32 %v10203_v16, %v12119_v41 }
0x3919   :  { %v6261_v6 = vpop.permute.xlu1 %6260 }
0x391a   :  { %v6263_v43 = vmul.f32 %v10203_v16, %v6261_v6 }
0x391c   :  { %6265 = vrot.lane.b32.xlu0 %v6263_v43, %s10492_s20 }
0x3927   :  { %v6126_v20 = vpop.f32.mrb[56].mxu1 }
0x3928   :  { %v6143_v2 = vadd.f32 %v6136_v27, %v6126_v20  ;;  %v6128_v39 = vpop.f32.mrb[57].mxu1 }
0x3929   :  { %v6144_v21 = vadd.f32 %v6140_v46, %v6128_v39 }
0x392a   :  { %v8114_v40 = vmul.f32 -1.442695, %v6143_v2 }
0x392b   :  { %v8115_v34 = vmul.f32 -1.442695, %v6144_v21 }
0x398e   :  { %v6266_v42 = vpop.permute.xlu0 %6265 }
0x398f   :  { %v12164_v14 = vadd.f32 %v6266_v42, %v6258_v55 }
0x3991   :  { %10204 = vtanh.f32 %v12164_v14 }
0x3992   :  { %10206 = vtanh.f32 %v6144_v21 }
0x3993   :  { %10208 = vpow2.f32 %v8114_v40 }
0x399b   :  { %v10205_v60 = vpop.eup %10204 }
0x399c   :  { %6271 = vrot.lane.b32.xlu1 %v10205_v60, %s10492_s20  ;;  %v10207_v61 = vpop.eup %10206 }
0x399d   :  { %v10209_v54 = vpop.eup %10208 }
0x399e   :  { %v6151_v7 = vadd.f32 1.0, %v10209_v54 }
0x39a0   :  { %6160 = vrot.lane.b32.xlu1 %v10207_v61, %s10489_s9  ;;  %10210 = vrcp.f32 %v6151_v7 }
0x39aa   :  { %v10211_v58 = vpop.eup %10210 }
0x39ab   :  { %v6158_v53 = vmul.f32 %v10211_v58, %v12131_v48 }
0x3a0e   :  { %v6272_v35 = vpop.permute.xlu1 %6271 }
0x3a0f   :  { %v6274_v41 = vmul.f32 %v10203_v16, %v6272_v35 }
0x3a11   :  { %6374 = vrot.lane.b32.xlu0 %v6274_v41, %s10489_s9 }
0x3a12   :  { %v6161_v49 = vpop.permute.xlu1 %6160 }
0x3a13   :  { %v6163_v32 = vmul.f32 %v10211_v58, %v6161_v49 }
0x3a15   :  { %6165 = vrot.lane.b32.xlu0 %v6163_v32, %s10489_s9 }
0x3a83   :  { %v6375_v59 = vpop.permute.xlu0 %6374 }
0x3a84   :  { %8880 = vmatmul.mubr.msk.f32.vlgmr.msra.gmra.mrb[58].mxu1 %vm519_vm7, %v6375_v59 }
0x3a85   :  { %9612 = vmatpush1.bf16.msra.mxu1 %v12024_v37  ;;  %6684 = vmatprep.mubr.f32.mxu1 %v10487_v0 }
0x3a86   :  { %9614 = vmatprep.subr.bf16.mxu1 %v12026_v52 }
0x3a87   :  { %v6166_v62 = vpop.permute.xlu0 %6165 }
0x3a88   :  { %v12176_v50 = vadd.f32 %v6166_v62, %v6158_v53 }
0x3a89   :  { %9616 = vmatpush1.bf16.msra.mxu1 %v12031_v31 }
0x3a8a   :  { %10212 = vtanh.f32 %v12176_v50  ;;  %9618 = vmatprep.subr.bf16.mxu1 %v12034_v10 }
0x3a8b   :  { %10214 = vpow2.f32 %v8115_v34 }
0x3a8d   :  { %9620 = vmatpush1.bf16.msra.mxu1 %v12037_v36 }
0x3a8e   :  { %9622 = vmatprep.subr.bf16.mxu1 %v12040_v45 }
0x3a91   :  { %9624 = vmatpush1.bf16.msra.mxu1 %v12043_v17 }
0x3a92   :  { %9626 = vmatprep.subr.bf16.mxu1 %v12060_v5 }
0x3a94   :  { %v10213_v33 = vpop.eup %10212 }
0x3a95   :  { %6171 = vrot.lane.b32.xlu1 %v10213_v33, %s10489_s9  ;;  %v10215_v11 = vpop.eup %10214 }
0x3a96   :  { %v6152_v48 = vadd.f32 1.0, %v10215_v11 }
0x3a98   :  { %10216 = vrcp.f32 %v6152_v48 }
0x3aa2   :  { %v10217_v8 = vpop.eup %10216 }
0x3b07   :  { %v6172_v1 = vpop.permute.xlu1 %6171 }
0x3b08   :  { %v6174_v56 = vmul.f32 %v10217_v8, %v6172_v1 }
0x3b0a   :  { %6175 = vst.msk [vmem:[#allocation3 + $0x30] sm:$0xff] %vm398_vm4, %v6174_v56  ;;  %8118 = vmatmul.mubr.msk.f32.vlgmr.msra.gmra.mrb[46].mxu0 %vm398_vm4, %v6174_v56 }
0x3b0b   :  { %9598 = vmatpush1.bf16.msra.mxu0 %v12084_v24  ;;  %6442 = vmatprep.mubr.f32.mxu0 %v10487_v0 }
0x3b0c   :  { %9600 = vmatprep.subr.bf16.mxu0 %v12086_v15 }
0x3b0f   :  { %9602 = vmatpush1.bf16.msra.mxu0 %v12097_v19 }
0x3b10   :  { %9633 = vmatprep.subr.bf16.mxu0 %v10490_v63 }
0x3b12   :  { %8119 = vmatmul.mubr.msk.f32.vlgmr.msra.gmra.mrb[46].mxu0 %vm519_vm7, %v6375_v59 }
0x3b13   :  { %9635 = vmatpush3.bf16.msra.mxu0 %v12011_v9  ;;  %8890 = vmatprep.mubr.msk.f32.mxu0 %vm10491_vm3, %v10487_v0 }
0x3b14   :  { %9636 = vmatprep.subr.bf16.mxu0 %v10490_v63 }
0x3b17   :  { %9638 = vmatpush3.bf16.msra.mxu0 %v12014_v28 }
0x3b18   :  { %9640 = vmatprep.subr.bf16.mxu0 %v12022_v38  ;;  %v6449_v38 = vld [vmem:[%s12540_s13] sm:$0x3] }
0x3b19   :  { %v6454_v30 = vrot.slane %v6449_v38, %v10824_v51  ;;  %v6458_v26 = vrot.slane %v6449_v38, %v10811_v44 }
0x3b57   :  { %v6564_v3 = vpop.f32.mrb[58].mxu1 }
0x3b58   :  { %v6568_v13 = vadd.f32 %v6564_v3, %v11734_v12  ;;  %v8881_v18 = vpop.f32.mrb[59].mxu1 }
0x3b5a   :  { %10218 = vtanh.f32 %v6568_v13  ;;  %v8123_v22 = vmul.f32 -1.442695, %v6568_v13 }
0x3b5c   :  { %10220 = vpow2.f32 %v8123_v22 }
0x3b64   :  { %v10219_v29 = vpop.eup %10218 }
0x3b65   :  { %6578 = vrot.lane.b32.xlu0 %v10219_v29, %s10492_s20 }
0x3b66   :  { %v10221_v47 = vpop.eup %10220 }
0x3b67   :  { %v6572_v23 = vadd.f32 1.0, %v10221_v47 }
0x3b69   :  { %10222 = vrcp.f32 %v6572_v23 }
0x3b73   :  { %v10223_v57 = vpop.eup %10222 }
0x3b74   :  { %v6576_v27 = vmul.f32 %v10223_v57, %v12164_v14 }
0x3bd7   :  { %v6579_v25 = vpop.permute.xlu0 %6578 }
0x3bd8   :  { %v6581_v4 = vmul.f32 %v10223_v57, %v6579_v25 }
0x3bda   :  { %6583 = vrot.lane.b32.xlu1 %v6581_v4, %s10492_s20 }
0x3be5   :  { %v6444_v16 = vpop.f32.mrb[46].mxu0 }
0x3be6   :  { %v6461_v6 = vadd.f32 %v6454_v30, %v6444_v16  ;;  %v6446_v43 = vpop.f32.mrb[47].mxu0 }
0x3be7   :  { %v6462_v39 = vadd.f32 %v6458_v26, %v6446_v43 }
0x3be8   :  { %v8120_v42 = vmul.f32 -1.442695, %v6461_v6 }
0x3c4c   :  { %v6584_v20 = vpop.permute.xlu1 %6583 }
0x3c4d   :  { %v12209_v2 = vadd.f32 %v6584_v20, %v6576_v27 }
0x3c4f   :  { %10224 = vtanh.f32 %v12209_v2 }
0x3c50   :  { %10226 = vtanh.f32 %v6462_v39 }
0x3c51   :  { %10228 = vpow2.f32 %v8120_v42 }
0x3c59   :  { %v10225_v46 = vpop.eup %10224 }
0x3c5a   :  { %6589 = vrot.lane.b32.xlu0 %v10225_v46, %s10492_s20  ;;  %v10227_v55 = vpop.eup %10226 }
0x3c5b   :  { %v10229_v21 = vpop.eup %10228 }
0x3c5c   :  { %v6469_v60 = vadd.f32 1.0, %v10229_v21 }
0x3c5e   :  { %6478 = vrot.lane.b32.xlu0 %v10227_v55, %s10489_s9  ;;  %10230 = vrcp.f32 %v6469_v60 }
0x3c68   :  { %v10231_v40 = vpop.eup %10230 }
0x3c69   :  { %v6476_v41 = vmul.f32 %v10231_v40, %v12176_v50 }
0x3ccc   :  { %v6590_v61 = vpop.permute.xlu0 %6589 }
0x3ccd   :  { %v6592_v14 = vmul.f32 %v10223_v57, %v6590_v61 }
0x3ccf   :  { %6692 = vrot.lane.b32.xlu1 %v6592_v14, %s10489_s9 }
0x3cd0   :  { %v6479_v54 = vpop.permute.xlu0 %6478 }
0x3cd1   :  { %v6481_v7 = vmul.f32 %v10231_v40, %v6479_v54 }
0x3cd3   :  { %6483 = vrot.lane.b32.xlu1 %v6481_v7, %s10489_s9 }
0x3d41   :  { %v6693_v35 = vpop.permute.xlu1 %6692 }
0x3d42   :  { %8891 = vmatmul.mubr.msk.f32.vlgmr.msra.gmra.mrb[48].mxu0 %vm519_vm7, %v6693_v35 }
0x3d43   :  { %9642 = vmatpush1.bf16.msra.mxu0 %v12024_v37  ;;  %7002 = vmatprep.mubr.f32.mxu0 %v10487_v0 }
0x3d44   :  { %9644 = vmatprep.subr.bf16.mxu0 %v12026_v52  ;;  %v8121_v52 = vmul.f32 -1.442695, %v6462_v39 }
0x3d45   :  { %v6484_v58 = vpop.permute.xlu1 %6483 }
0x3d46   :  { %v12221_v49 = vadd.f32 %v6484_v58, %v6476_v41 }
0x3d47   :  { %9646 = vmatpush1.bf16.msra.mxu0 %v12031_v31 }
0x3d48   :  { %10232 = vtanh.f32 %v12221_v49  ;;  %9648 = vmatprep.subr.bf16.mxu0 %v12034_v10 }
0x3d49   :  { %10234 = vpow2.f32 %v8121_v52 }
0x3d4b   :  { %9650 = vmatpush1.bf16.msra.mxu0 %v12037_v36 }
0x3d4c   :  { %9652 = vmatprep.subr.bf16.mxu0 %v12040_v45 }
0x3d4f   :  { %9654 = vmatpush1.bf16.msra.mxu0 %v12043_v17 }
0x3d50   :  { %9656 = vmatprep.subr.bf16.mxu0 %v12060_v5 }
0x3d52   :  { %v10233_v37 = vpop.eup %10232 }
0x3d53   :  { %6489 = vrot.lane.b32.xlu0 %v10233_v37, %s10489_s9  ;;  %v10235_v32 = vpop.eup %10234 }
0x3d54   :  { %v6470_v59 = vadd.f32 1.0, %v10235_v32 }
0x3d56   :  { %10236 = vrcp.f32 %v6470_v59 }
0x3d60   :  { %v10237_v31 = vpop.eup %10236 }
0x3dc5   :  { %v6490_v53 = vpop.permute.xlu0 %6489 }
0x3dc6   :  { %v6492_v62 = vmul.f32 %v10237_v31, %v6490_v53 }
0x3dc8   :  { %6493 = vst.msk [vmem:[#allocation3 + $0x38] sm:$0xff] %vm398_vm4, %v6492_v62  ;;  %8124 = vmatmul.mubr.msk.f32.vlgmr.msra.gmra.mrb[60].mxu1 %vm398_vm4, %v6492_v62 }
0x3dc9   :  { %9628 = vmatpush1.bf16.msra.mxu1 %v12084_v24  ;;  %6760 = vmatprep.mubr.f32.mxu1 %v10487_v0 }
0x3dca   :  { %9630 = vmatprep.subr.bf16.mxu1 %v12086_v15 }
0x3dcd   :  { %9632 = vmatpush1.bf16.msra.mxu1 %v12097_v19 }
0x3dce   :  { %9663 = vmatprep.subr.bf16.mxu1 %v10490_v63 }
0x3dd0   :  { %8125 = vmatmul.mubr.msk.f32.vlgmr.msra.gmra.mrb[60].mxu1 %vm519_vm7, %v6693_v35 }
0x3dd1   :  { %9665 = vmatpush3.bf16.msra.mxu1 %v12011_v9  ;;  %8901 = vmatprep.mubr.msk.f32.mxu1 %vm10491_vm3, %v10487_v0 }
0x3dd2   :  { %9666 = vmatprep.subr.bf16.mxu1 %v10490_v63 }
0x3dd5   :  { %9668 = vmatpush3.bf16.msra.mxu1 %v12014_v28  ;;  %v6767_v28 = vld [vmem:[%s12540_s13] sm:$0x3] }
0x3dd6   :  { %v6772_v48 = vrot.slane %v6767_v28, %v10824_v51  ;;  %v6776_v8 = vrot.slane %v6767_v28, %v10811_v44  ;;  %v7240_v28 = vld [vmem:[#allocation13 + $0x18] sm:$0xff] }
0x3e15   :  { %v6882_v10 = vpop.f32.mrb[48].mxu0 }
0x3e16   :  { %v6886_v36 = vadd.f32 %v6882_v10, %v11734_v12  ;;  %v8892_v45 = vpop.f32.mrb[49].mxu0 }
0x3e18   :  { %10238 = vtanh.f32 %v6886_v36  ;;  %v8129_v5 = vmul.f32 -1.442695, %v6886_v36 }
0x3e1a   :  { %10240 = vpow2.f32 %v8129_v5 }
0x3e22   :  { %v10239_v17 = vpop.eup %10238 }
0x3e23   :  { %6896 = vrot.lane.b32.xlu1 %v10239_v17, %s10492_s20 }
0x3e24   :  { %v10241_v50 = vpop.eup %10240 }
0x3e25   :  { %v6890_v33 = vadd.f32 1.0, %v10241_v50 }
0x3e27   :  { %10242 = vrcp.f32 %v6890_v33 }
0x3e31   :  { %v10243_v9 = vpop.eup %10242 }
0x3e32   :  { %v6894_v22 = vmul.f32 %v10243_v9, %v12209_v2 }
0x3e95   :  { %v6897_v34 = vpop.permute.xlu1 %6896 }
0x3e96   :  { %v6899_v11 = vmul.f32 %v10243_v9, %v6897_v34 }
0x3e98   :  { %6901 = vrot.lane.b32.xlu0 %v6899_v11, %s10492_s20  ;;  %v7238_v11 = vld [vmem:[#allocation13 + $0x8] sm:$0xff] }
0x3ea3   :  { %v6762_v1 = vpop.f32.mrb[60].mxu1 }
0x3ea4   :  { %v6779_v56 = vadd.f32 %v6772_v48, %v6762_v1  ;;  %v6764_v3 = vpop.f32.mrb[61].mxu1  ;;  %v7237_v48 = vld [vmem:[#allocation13] sm:$0xff]  ;;  %v7239_v1 = vld [vmem:[#allocation13 + $0x10] sm:$0xff] }
0x3ea5   :  { %v6780_v13 = vadd.f32 %v6776_v8, %v6764_v3  ;;  %v9669_v8 = vpack.c.bf16 %v7240_v28, %v7238_v11  ;;  %v7244_v3 = vld [vmem:[#allocation13 + $0x38] sm:$0xff] }
0x3ea6   :  { %v8126_v29 = vmul.f32 -1.442695, %v6779_v56  ;;  %v7242_v56 = vld [vmem:[#allocation13 + $0x28] sm:$0xff]  ;;  %v7781_v11 = vld [vmem:[%s12541_s14 + $0x18] sm:$0xff] }
0x3ea7   :  { %10244 = vtanh.f32 %v6780_v13  ;;  %v8127_v39 = vmul.f32 -1.442695, %v6780_v13  ;;  %v12298_v13 = vpack.c.bf16 %v7239_v1, %v7237_v48  ;;  %9670 = vmatprep.subr.bf16.mxu1 %v9669_v8  ;;  %v7783_v1 = vld [vmem:[%s12541_s14 + $0x28] sm:$0xff] }
0x3ea8   :  { %10246 = vpow2.f32 %v8126_v29  ;;  %v7241_v29 = vld [vmem:[#allocation13 + $0x20] sm:$0xff] }
0x3eb1   :  { %v10245_v18 = vpop.eup %10244 }
0x3eb2   :  { %6796 = vrot.lane.b32.xlu0 %v10245_v18, %s10489_s9  ;;  %v10247_v57 = vpop.eup %10246  ;;  %v12300_v18 = vpack.c.bf16 %v7244_v3, %v7242_v56  ;;  %v7766_v56 = vld [vmem:[#allocation3] sm:$0xff] }
0x3eb3   :  { %v6787_v25 = vadd.f32 1.0, %v10247_v57 }
0x3f0a   :  { %v6902_v47 = vpop.permute.xlu0 %6901 }
0x3f0b   :  { %v12254_v23 = vadd.f32 %v6902_v47, %v6894_v22  ;;  %v7243_v22 = vld [vmem:[#allocation13 + $0x30] sm:$0xff]  ;;  %v7246_v47 = vld [vmem:[#allocation13 + $0x48] sm:$0xff] }
0x3f0c   :  { %v12303_v57 = vpack.c.bf16 %v7243_v22, %v7241_v29  ;;  %v7784_v29 = vld [vmem:[%s12541_s14 + $0x30] sm:$0xff]  ;;  %v7785_v22 = vld [vmem:[%s12541_s14 + $0x38] sm:$0xff] }
0x3f0d   :  { %10248 = vtanh.f32 %v12254_v23 }
0x3f0e   :  { %10250 = vrcp.f32 %v6787_v25 }
0x3f17   :  { %v10249_v4 = vpop.eup %10248 }
0x3f18   :  { %6907 = vrot.lane.b32.xlu1 %v10249_v4, %s10492_s20  ;;  %v10251_v38 = vpop.eup %10250  ;;  %v7245_v4 = vld [vmem:[#allocation13 + $0x40] sm:$0xff] }
0x3f19   :  { %v6794_v26 = vmul.f32 %v10251_v38, %v12221_v49 }
0x3f24   :  { %v6797_v30 = vpop.permute.xlu0 %6796 }
0x3f25   :  { %v6799_v16 = vmul.f32 %v10251_v38, %v6797_v30  ;;  %v7247_v38 = vld [vmem:[#allocation13 + $0x50] sm:$0xff]  ;;  %v7250_v30 = vld [vmem:[#allocation13 + $0x68] sm:$0xff] }
0x3f27   :  { %6801 = vrot.lane.b32.xlu0 %v6799_v16, %s10489_s9  ;;  %v7252_v16 = vld [vmem:[#allocation13 + $0x78] sm:$0xff] }
0x3f8a   :  { %v6908_v6 = vpop.permute.xlu1 %6907 }
0x3f8b   :  { %v6910_v43 = vmul.f32 %v10243_v9, %v6908_v6  ;;  %v12309_v6 = vpack.c.bf16 %v7247_v38, %v7245_v4  ;;  %v7772_v4 = vld [vmem:[#allocation3 + $0x30] sm:$0xff]  ;;  %v7773_v38 = vld [vmem:[#allocation3 + $0x38] sm:$0xff] }
0x3f8d   :  { %7010 = vrot.lane.b32.xlu1 %v6910_v43, %s10489_s9  ;;  %v12312_v43 = vpack.c.bf16 %v7252_v16, %v7250_v30 }
0x3f99   :  { %v6802_v27 = vpop.permute.xlu0 %6801 }
0x3f9a   :  { %v12261_v20 = vadd.f32 %v6802_v27, %v6794_v26  ;;  %v7249_v26 = vld [vmem:[#allocation13 + $0x60] sm:$0xff]  ;;  %v7251_v27 = vld [vmem:[#allocation13 + $0x70] sm:$0xff] }
0x3f9c   :  { %10252 = vtanh.f32 %v12261_v20 }
0x3f9d   :  { %10254 = vpow2.f32 %v8127_v39  ;;  %v12316_v39 = vpack.c.bf16 %v7251_v27, %v7249_v26 }
0x3fa6   :  { %v10253_v2 = vpop.eup %10252 }
0x3fa7   :  { %6807 = vrot.lane.b32.xlu1 %v10253_v2, %s10489_s9  ;;  %v10255_v55 = vpop.eup %10254 }
0x3fa8   :  { %v6788_v42 = vadd.f32 1.0, %v10255_v55 }
0x3faa   :  { %10256 = vrcp.f32 %v6788_v42 }
0x3fb4   :  { %v10257_v21 = vpop.eup %10256 }
0x3fff   :  { %v7011_v46 = vpop.permute.xlu1 %7010 }
0x4000   :  { %8902 = vmatmul.mubr.msk.f32.vlgmr.msra.gmra.mrb[62].mxu1 %vm519_vm7, %v7011_v46 }
0x4001   :  { %7320 = vmatprep.mubr.f32.mxu1 %v10487_v0  ;;  %9672 = vmatpush1.bf16.msra.mxu1 %v12298_v13 }
0x4002   :  { %9674 = vmatprep.subr.bf16.mxu1 %v12300_v18 }
0x4005   :  { %9676 = vmatpush1.bf16.msra.mxu1 %v12303_v57 }
0x4019   :  { %v6808_v60 = vpop.permute.xlu1 %6807 }
0x401a   :  { %v6810_v61 = vmul.f32 %v10257_v21, %v6808_v60  ;;  %v7230_v21 = vld [vmem:[%s12538_s11 + $0x8] sm:$0xff]  ;;  %v7232_v60 = vld [vmem:[%s12538_s11 + $0x18] sm:$0xff] }
0x401c   :  { %6811 = vst.msk [vmem:[#allocation3 + $0x40] sm:$0xff] %vm398_vm4, %v6810_v61  ;;  %8130 = vmatmul.mubr.msk.f32.vlgmr.msra.gmra.mrb[50].mxu0 %vm398_vm4, %v6810_v61  ;;  %v12330_v61 = vpack.c.bf16 %v7232_v60, %v7230_v21 }
0x401d   :  { %9658 = vmatpush1.bf16.msra.mxu0 %v12084_v24  ;;  %7078 = vmatprep.mubr.f32.mxu0 %v10487_v0  ;;  %v7085_v24 = vld [vmem:[%s12540_s13] sm:$0x3] }
0x401e   :  { %9660 = vmatprep.subr.bf16.mxu0 %v12086_v15  ;;  %v7090_v15 = vrot.slane %v7085_v24, %v10824_v51 }
0x4021   :  { %9662 = vmatpush1.bf16.msra.mxu0 %v12097_v19  ;;  %v7094_v19 = vrot.slane %v7085_v24, %v10811_v44 }
0x4022   :  { %9693 = vmatprep.subr.bf16.mxu0 %v10490_v63 }
0x4023   :  { %v7774_v30 = vld [vmem:[#allocation3 + $0x40] sm:$0xff] }
0x4024   :  { %8131 = vmatmul.mubr.msk.f32.vlgmr.msra.gmra.mrb[50].mxu0 %vm519_vm7, %v7011_v46 }
0x4025   :  { %8912 = vmatprep.mubr.msk.f32.mxu0 %vm10491_vm3, %v10487_v0 }
0x40d3   :  { %v7200_v14 = vpop.f32.mrb[62].mxu1 }
0x40d4   :  { %v7204_v40 = vadd.f32 %v7200_v14, %v11734_v12  ;;  %v8903_v54 = vpop.f32.mrb[63].mxu1  ;;  %v7448_v14 = vld [vmem:[#allocation12] sm:$0xff] }
0x40d6   :  { %10258 = vtanh.f32 %v7204_v40  ;;  %v8135_v52 = vmul.f32 -1.442695, %v7204_v40  ;;  %v7449_v40 = vld [vmem:[#allocation12 + $0x8] sm:$0xff] }
0x40d7   :  { %v9694_v54 = vpack.c.bf16 %v7449_v40, %v7448_v14  ;;  %v12426_v40 = vld [vmem:[%s12542_s15] ss:$0 sm:$0xff] }
0x40d9   :  { %9695 = vmatpush3.bf16.msra.mxu0 %v9694_v54 }
0x40da   :  { %9696 = vmatprep.subr.bf16.mxu0 %v10490_v63  ;;  %v7229_v63 = vld [vmem:[%s12538_s11] sm:$0xff] }
0x40e0   :  { %v10259_v7 = vpop.eup %10258 }
0x40e1   :  { %7214 = vrot.lane.b32.xlu0 %v10259_v7, %s10492_s20  ;;  %v7451_v7 = vld [vmem:[#allocation12 + $0x18] sm:$0xff] }
0x40f7   :  { %v7080_v35 = vpop.f32.mrb[50].mxu0 }
0x40f8   :  { %v7097_v41 = vadd.f32 %v7090_v15, %v7080_v35  ;;  %v7082_v58 = vpop.f32.mrb[51].mxu0 }
0x40f9   :  { %v12284_v49 = vadd.f32 %v7094_v19, %v7082_v58 }
0x40fa   :  { %v8132_v10 = vmul.f32 -1.442695, %v7097_v41 }
0x40fb   :  { %10260 = vtanh.f32 %v12284_v49  ;;  %v8133_v41 = vmul.f32 -1.442695, %v12284_v49  ;;  %v7236_v49 = vld [vmem:[%s12538_s11 + $0x38] sm:$0xff] }
0x40fc   :  { %10262 = vpow2.f32 %v8135_v52  ;;  %v7231_v52 = vld [vmem:[%s12538_s11 + $0x10] sm:$0xff] }
0x4105   :  { %v10261_v37 = vpop.eup %10260 }
0x4106   :  { %7114 = vrot.lane.b32.xlu0 %v10261_v37, %s10489_s9  ;;  %v10263_v32 = vpop.eup %10262 }
0x4107   :  { %v7208_v59 = vadd.f32 1.0, %v10263_v32  ;;  %v7234_v32 = vld [vmem:[%s12538_s11 + $0x28] sm:$0xff] }
0x4109   :  { %10264 = vrcp.f32 %v7208_v59 }
0x410a   :  { %10266 = vpow2.f32 %v8132_v10  ;;  %v12352_v10 = vpack.c.bf16 %v7236_v49, %v7234_v32 }
0x4113   :  { %v12288_v31 = vpop.eup %10264 }
0x4114   :  { %v10267_v36 = vpop.eup %10266  ;;  %v7212_v33 = vmul.f32 %v12288_v31, %v12254_v23  ;;  %v7248_v23 = vld [vmem:[#allocation13 + $0x58] sm:$0xff] }
0x4115   :  { %v7105_v45 = vadd.f32 1.0, %v10267_v36  ;;  %v12306_v25 = vpack.c.bf16 %v7248_v23, %v7246_v47  ;;  %v7233_v36 = vld [vmem:[%s12538_s11 + $0x20] sm:$0xff]  ;;  %v9735_v47 = vpack.c.bf16 %v7785_v22, %v7784_v29  ;;  %v7769_v23 = vld [vmem:[#allocation3 + $0x18] sm:$0xff] }
0x4117   :  { %10268 = vrcp.f32 %v7105_v45  ;;  %9678 = vmatprep.subr.bf16.mxu1 %v12306_v25  ;;  %v7235_v45 = vld [vmem:[%s12538_s11 + $0x30] sm:$0xff] }
0x4118   :  { %9680 = vmatpush1.bf16.msra.mxu1 %v12309_v6 }
0x4119   :  { %9682 = vmatprep.subr.bf16.mxu1 %v12312_v43 }
0x411c   :  { %9684 = vmatpush1.bf16.msra.mxu1 %v12316_v39 }
0x411d   :  { %9686 = vmatprep.subr.bf16.mxu1 %v12330_v61 }
0x4121   :  { %v10269_v17 = vpop.eup %10268 }
0x4122   :  { %v7112_v46 = vmul.f32 %v10269_v17, %v12261_v20  ;;  %v7450_v20 = vld [vmem:[#allocation12 + $0x10] sm:$0xff] }
0x4123   :  { %v9697_v24 = vpack.c.bf16 %v7451_v7, %v7450_v20 }
0x4125   :  { %9698 = vmatpush3.bf16.msra.mxu0 %v9697_v24 }
0x4126   :  { %9700 = vmatprep.subr.bf16.mxu0 %v9669_v8  ;;  %v7782_v8 = vld [vmem:[%s12541_s14 + $0x20] sm:$0xff] }
0x4127   :  { %v9731_v3 = vpack.c.bf16 %v7783_v1, %v7782_v8 }
0x4153   :  { %v7215_v53 = vpop.permute.xlu0 %7214 }
0x4154   :  { %v7217_v62 = vmul.f32 %v12288_v31, %v7215_v53  ;;  %v12350_v53 = vpack.c.bf16 %v7231_v52, %v7229_v63 }
0x4156   :  { %7219 = vrot.lane.b32.xlu1 %v7217_v62, %s10492_s20 }
0x4178   :  { %v7115_v5 = vpop.permute.xlu0 %7114 }
0x4179   :  { %v7117_v50 = vmul.f32 %v10269_v17, %v7115_v5  ;;  %v7778_v17 = vld [vmem:[%s12541_s14] sm:$0xff]  ;;  %v7779_v5 = vld [vmem:[%s12541_s14 + $0x8] sm:$0xff] }
0x417b   :  { %7119 = vrot.lane.b32.xlu0 %v7117_v50, %s10489_s9  ;;  %v12369_v50 = vpack.c.bf16 %v7235_v45, %v7233_v36 }
0x41c8   :  { %v7220_v9 = vpop.permute.xlu1 %7219 }
0x41c9   :  { %v12295_v34 = vadd.f32 %v7220_v9, %v7212_v33  ;;  %v9723_v33 = vpack.c.bf16 %v7779_v5, %v7778_v17  ;;  %v7780_v9 = vld [vmem:[%s12541_s14 + $0x10] sm:$0xff] }
0x41ca   :  { %v9727_v28 = vpack.c.bf16 %v7781_v11, %v7780_v9 }
0x41cb   :  { %10270 = vtanh.f32 %v12295_v34 }
0x41d5   :  { %v10271_v2 = vpop.eup %10270 }
0x41d6   :  { %7225 = vrot.lane.b32.xlu1 %v10271_v2, %s10492_s20 }
0x41ed   :  { %v7120_v55 = vpop.permute.xlu0 %7119 }
0x41ee   :  { %v12321_v42 = vadd.f32 %v7120_v55, %v7112_v46 }
0x41f0   :  { %10272 = vtanh.f32 %v12321_v42 }
0x41f1   :  { %10274 = vpow2.f32 %v8133_v41 }
0x41fa   :  { %v10273_v15 = vpop.eup %10272 }
0x41fb   :  { %7125 = vrot.lane.b32.xlu0 %v10273_v15, %s10489_s9  ;;  %v10275_v58 = vpop.eup %10274 }
0x41fc   :  { %v7106_v37 = vadd.f32 1.0, %v10275_v58 }
0x41fe   :  { %10276 = vrcp.f32 %v7106_v37 }
0x4208   :  { %v10277_v59 = vpop.eup %10276 }
0x4248   :  { %v7226_v19 = vpop.permute.xlu1 %7225 }
0x4249   :  { %v7228_v35 = vmul.f32 %v12288_v31, %v7226_v19 }
0x424b   :  { %7328 = vrot.lane.b32.xlu1 %v7228_v35, %s10489_s9 }
0x426d   :  { %v7126_v31 = vpop.permute.xlu0 %7125 }
0x426e   :  { %v7128_v62 = vmul.f32 %v10277_v59, %v7126_v31 }
0x4270   :  { %7129 = vst.msk [vmem:[#allocation3 + $0x48] sm:$0xff] %vm398_vm4, %v7128_v62  ;;  %8136 = vmatmul.mubr.msk.f32.vlgmr.msra.gmra.mrb[64].mxu1 %vm398_vm4, %v7128_v62 }
0x4271   :  { %9688 = vmatpush1.bf16.msra.mxu1 %v12350_v53  ;;  %7396 = vmatprep.mubr.f32.mxu1 %v10487_v0 }
0x4272   :  { %9690 = vmatprep.subr.bf16.mxu1 %v12352_v10 }
0x4275   :  { %9692 = vmatpush1.bf16.msra.mxu1 %v12369_v50 }
0x4276   :  { %9724 = vmatprep.subr.bf16.mxu1 %v9723_v33 }
0x4277   :  { %v7775_v16 = vld [vmem:[#allocation3 + $0x48] sm:$0xff] }
0x42bd   :  { %v7329_v48 = vpop.permute.xlu1 %7328 }
0x42be   :  { %8137 = vmatmul.mubr.msk.f32.vlgmr.msra.gmra.mrb[64].mxu1 %vm519_vm7, %v7329_v48  ;;  %8913 = vmatmul.mubr.msk.f32.vlgmr.msra.gmra.mrb[52].mxu0 %vm519_vm7, %v7329_v48 }
0x42bf   :  { %9726 = vmatpush3.bf16.msra.mxu1 %v9723_v33  ;;  %8931 = vmatprep.mubr.msk.f32.mxu1 %vm398_vm4, %v7766_v56 }
0x42c0   :  { %9728 = vmatprep.subr.bf16.mxu1 %v9727_v28  ;;  %9702 = vmatpush1.bf16.msra.mxu0 %v12298_v13  ;;  %v7767_v13 = vld [vmem:[#allocation3 + $0x8] sm:$0xff] }
0x42c1   :  { %9704 = vmatprep.subr.bf16.mxu0 %v12300_v18  ;;  %7638 = vmatprep.mubr.f32.mxu0 %v10487_v0  ;;  %v7768_v18 = vld [vmem:[#allocation3 + $0x10] sm:$0xff] }
0x42c3   :  { %9730 = vmatpush3.bf16.msra.mxu1 %v9727_v28 }
0x42c4   :  { %9732 = vmatprep.subr.bf16.mxu1 %v9731_v3  ;;  %9706 = vmatpush1.bf16.msra.mxu0 %v12303_v57  ;;  %v7770_v57 = vld [vmem:[#allocation3 + $0x20] sm:$0xff] }
0x42c5   :  { %9708 = vmatprep.subr.bf16.mxu0 %v12306_v25  ;;  %v7771_v25 = vld [vmem:[#allocation3 + $0x28] sm:$0xff] }
0x42c7   :  { %9734 = vmatpush3.bf16.msra.mxu1 %v9731_v3 }
0x42c8   :  { %9736 = vmatprep.subr.bf16.mxu1 %v9735_v47  ;;  %9710 = vmatpush1.bf16.msra.mxu0 %v12309_v6  ;;  %v7403_v6 = vld [vmem:[%s12540_s13] sm:$0x3] }
0x42c9   :  { %9712 = vmatprep.subr.bf16.mxu0 %v12312_v43  ;;  %v7408_v43 = vrot.slane %v7403_v6, %v10824_v51  ;;  %v7412_v26 = vrot.slane %v7403_v6, %v10811_v44 }
0x42cb   :  { %9738 = vmatpush3.bf16.msra.mxu1 %v9735_v47 }
0x42cc   :  { %9714 = vmatpush1.bf16.msra.mxu0 %v12316_v39 }
0x42cd   :  { %9716 = vmatprep.subr.bf16.mxu0 %v12330_v61 }
0x42ce   :  { %8932 = vmatmul.mubr.msk.f32.vlgmr.msra.gmra.mrb[66].mxu1 %vm398_vm4, %v7767_v13 }
0x42cf   :  { %8934 = vmatprep.mubr.msk.f32.mxu1 %vm398_vm4, %v7768_v18 }
0x42d2   :  { %8935 = vmatmul.mubr.msk.f32.gmra.mrb[68].mxu1 %vm398_vm4, %v7769_v23 }
0x42d3   :  { %8937 = vmatprep.mubr.msk.f32.mxu1 %vm398_vm4, %v7770_v57 }
0x42d6   :  { %8938 = vmatmul.mubr.msk.f32.gmra.mrb[70].mxu1 %vm398_vm4, %v7771_v25 }
0x42d7   :  { %8940 = vmatprep.mubr.msk.f32.mxu1 %vm398_vm4, %v7772_v4 }
0x42da   :  { %8941 = vmatmul.mubr.msk.f32.gmra.mrb[72].mxu1 %vm398_vm4, %v7773_v38 }
0x42db   :  { %8943 = vmatprep.mubr.msk.f32.mxu1 %vm398_vm4, %v7774_v30 }
0x42de   :  { %8944 = vmatmul.mubr.msk.f32.gmra.mrb[74].mxu1 %vm398_vm4, %v7775_v16 }
0x4391   :  { %v7398_v27 = vpop.f32.mrb[64].mxu1  ;;  %v7518_v2 = vpop.f32.mrb[52].mxu0 }
0x4392   :  { %v7415_v39 = vadd.f32 %v7408_v43, %v7398_v27  ;;  %v7522_v46 = vadd.f32 %v7518_v2, %v11734_v12  ;;  %v7400_v55 = vpop.f32.mrb[65].mxu1  ;;  %v8914_v21 = vpop.f32.mrb[53].mxu0 }
0x4393   :  { %v12419_v60 = vadd.f32 %v7412_v26, %v7400_v55 }
0x4394   :  { %10278 = vtanh.f32 %v7522_v46  ;;  %v8141_v17 = vmul.f32 -1.442695, %v7522_v46  ;;  %v8138_v5 = vmul.f32 -1.442695, %v7415_v39  ;;  %v7721_v39 = vld [vmem:[%s12540_s13] sm:$0x3] }
0x4395   :  { %10280 = vtanh.f32 %v12419_v60  ;;  %v8139_v38 = vmul.f32 -1.442695, %v12419_v60  ;;  %v7726_v46 = vrot.slane %v7721_v39, %v10824_v51  ;;  %s10493_s13 = smov [#allocation15]  }
0x4396   :  { %10282 = vpow2.f32 %v8141_v17  ;;  %s7972_s0 = sshll.u32 %s10493_s13, 4  ;;  %s7973_s0 = int_to_ptr.vmem [resolvable:$true] %s7972_s0 }
0x4397   :  { %10284 = vpow2.f32 %v8138_v5  ;;  %s10445_s30 = scalar_lea.vmem %s7973_s0, 128  ;;  %p10450_p7 = scmp.lt.s32.totalorder %s7973_s0, %s7973_s0 }
0x4398   :  { %p10446_p6 = scmp.ne.s32.totalorder %s7973_s0, %s10445_s30  ;;  %p10451_p8 = scmp.lt.s32.totalorder %s10445_s30, %s10445_s30 }
0x439a   :  { %p10452_p9 = por %p10451_p8, %p10450_p7 }
0x439c   :  { %p10453_p10 = pnand %p10452_p9, %p10446_p6 }
0x439e   :  { %v10279_v61 = vpop.eup %10278 }
0x439f   :  { %v10281_v14 = vpop.eup %10280  ;;  %7532 = vrot.lane.b32.xlu1 %v10279_v61, %s10492_s20 }
0x43a0   :  { %7432 = vrot.lane.b32.xlu0 %v10281_v14, %s10489_s9  ;;  %v10283_v33 = vpop.eup %10282 }
0x43a1   :  { %v8933_v54 = vpop.f32.mrb[66].mxu1  ;;  %v10285_v9 = vpop.eup %10284  ;;  %v7526_v11 = vadd.f32 1.0, %v10283_v33 }
0x43a2   :  { %v7901_v12 = vadd.f32 %v8933_v54, %v12426_v40  ;;  %v7895_v20 = vpop.f32.mrb[67].mxu1  ;;  %v7423_v28 = vadd.f32 1.0, %v10285_v9 }
0x43a3   :  { %v7896_v7 = vadd.f32 %v12426_v40, %v7895_v20  ;;  %10286 = vrcp.f32 %v7526_v11 }
0x43a4   :  { %7955 = vst.msk [vmem:[%s12544_s17 + $0x8] sm:$0xff] %vm171_vm1, %v7901_v12  ;;  %10288 = vrcp.f32 %v7423_v28 }
0x43a5   :  { %7954 = vst.msk [vmem:[%s12544_s17] sm:$0xff] %vm171_vm1, %v7896_v7  ;;  %v8936_v24 = vpop.f32.mrb[68].mxu1 }
0x43a6   :  { %v7911_v15 = vadd.f32 %v8936_v24, %v12426_v40  ;;  %v7905_v19 = vpop.f32.mrb[69].mxu1 }
0x43a7   :  { %v7906_v35 = vadd.f32 %v12426_v40, %v7905_v19 }
0x43a8   :  { %7957 = vst.msk [vmem:[%s12544_s17 + $0x18] sm:$0xff] %vm171_vm1, %v7911_v15 }
0x43a9   :  { %7956 = vst.msk [vmem:[%s12544_s17 + $0x10] sm:$0xff] %vm171_vm1, %v7906_v35  ;;  %v8939_v41 = vpop.f32.mrb[70].mxu1 }
0x43aa   :  { %v7921_v58 = vadd.f32 %v8939_v41, %v12426_v40  ;;  %v7915_v37 = vpop.f32.mrb[71].mxu1 }
0x43ab   :  { %v7916_v63 = vadd.f32 %v12426_v40, %v7915_v37 }
0x43ac   :  { %7959 = vst.msk [vmem:[%s12544_s17 + $0x28] sm:$0xff] %vm171_vm1, %v7921_v58 }
0x43ad   :  { %7958 = vst.msk [vmem:[%s12544_s17 + $0x20] sm:$0xff] %vm171_vm1, %v7916_v63  ;;  %v8942_v52 = vpop.f32.mrb[72].mxu1  ;;  %v10287_v48 = vpop.eup %10286 }
0x43ae   :  { %v7931_v32 = vadd.f32 %v8942_v52, %v12426_v40  ;;  %v7925_v49 = vpop.f32.mrb[73].mxu1  ;;  %v10289_v1 = vpop.eup %10288  ;;  %v7530_v22 = vmul.f32 %v10287_v48, %v12295_v34 }
0x43af   :  { %v7926_v59 = vadd.f32 %v12426_v40, %v7925_v49  ;;  %v7430_v13 = vmul.f32 %v10289_v1, %v12321_v42 }
0x43b0   :  { %7961 = vst.msk [vmem:[%s12544_s17 + $0x38] sm:$0xff] %vm171_vm1, %v7931_v32 }
0x43b1   :  { %7960 = vst.msk [vmem:[%s12544_s17 + $0x30] sm:$0xff] %vm171_vm1, %v7926_v59  ;;  %v8945_v31 = vpop.f32.mrb[74].mxu1 }
0x43b2   :  { %v7941_v62 = vadd.f32 %v8945_v31, %v12426_v40  ;;  %v7935_v36 = vpop.f32.mrb[75].mxu1 }
0x43b3   :  { %v7936_v45 = vadd.f32 %v12426_v40, %v7935_v36 }
0x43b4   :  { %7963 = vst.msk [vmem:[%s12544_s17 + $0x48] sm:$0xff] %vm171_vm1, %v7941_v62 }
0x43b5   :  { %7962 = vst.msk [vmem:[%s12544_s17 + $0x40] sm:$0xff] %vm171_vm1, %v7936_v45 }
0x4411   :  { %v7533_v8 = vpop.permute.xlu1 %7532 }
0x4412   :  { %v7535_v56 = vmul.f32 %v10287_v48, %v7533_v8  ;;  %v7433_v3 = vpop.permute.xlu0 %7432 }
0x4413   :  { %v7435_v29 = vmul.f32 %v10289_v1, %v7433_v3 }
0x4414   :  { %7537 = vrot.lane.b32.xlu1 %v7535_v56, %s10492_s20 }
0x4415   :  { %7437 = vrot.lane.b32.xlu0 %v7435_v29, %s10489_s9 }
0x4486   :  { %v7538_v47 = vpop.permute.xlu1 %7537 }
0x4487   :  { %v7540_v18 = vadd.f32 %v7538_v47, %v7530_v22  ;;  %v7438_v23 = vpop.permute.xlu0 %7437 }
0x4488   :  { %v7440_v57 = vadd.f32 %v7438_v23, %v7430_v13 }
0x4489   :  { %10290 = vtanh.f32 %v7540_v18 }
0x448a   :  { %10292 = vtanh.f32 %v7440_v57 }
0x448b   :  { %10294 = vpow2.f32 %v8139_v38 }
0x4493   :  { %v10291_v25 = vpop.eup %10290 }
0x4494   :  { %v10293_v4 = vpop.eup %10292  ;;  %7543 = vrot.lane.b32.xlu1 %v10291_v25, %s10492_s20 }
0x4495   :  { %7443 = vrot.lane.b32.xlu0 %v10293_v4, %s10489_s9  ;;  %v10295_v30 = vpop.eup %10294 }
0x4496   :  { %v7424_v16 = vadd.f32 1.0, %v10295_v30 }
0x4498   :  { %10296 = vrcp.f32 %v7424_v16 }
0x44a2   :  { %v10297_v6 = vpop.eup %10296 }
0x4506   :  { %v7544_v34 = vpop.permute.xlu1 %7543 }
0x4507   :  { %v7546_v42 = vmul.f32 %v10287_v48, %v7544_v34  ;;  %v7444_v43 = vpop.permute.xlu0 %7443 }
0x4508   :  { %v7446_v26 = vmul.f32 %v10297_v6, %v7444_v43 }
0x4509   :  { %7646 = vrot.lane.b32.xlu1 %v7546_v42, %s10489_s9 }
0x450a   :  { %7447 = vst.msk [vmem:[#allocation3 + $0x50] sm:$0xff] %vm398_vm4, %v7446_v26  ;;  %8142 = vmatmul.mubr.msk.f32.vlgmr.msra.gmra.mrb[54].mxu0 %vm398_vm4, %v7446_v26 }
0x450b   :  { %9718 = vmatpush1.bf16.msra.mxu0 %v12350_v53  ;;  %7714 = vmatprep.mubr.f32.mxu0 %v10487_v0  ;;  %v7730_v53 = vrot.slane %v7721_v39, %v10811_v44 }
0x450c   :  { %9720 = vmatprep.subr.bf16.mxu0 %v12352_v10 }
0x450f   :  { %9722 = vmatpush1.bf16.msra.mxu0 %v12369_v50 }
0x4511   :  { %v7776_v27 = vld [vmem:[#allocation3 + $0x50] sm:$0xff] }
0x4512   :  { %8946 = vmatprep.mubr.msk.f32.mxu1 %vm398_vm4, %v7776_v27 }
0x457b   :  { %v7647_v2 = vpop.permute.xlu1 %7646 }
0x457c   :  { %8143 = vmatmul.mubr.msk.f32.vlgmr.msra.gmra.mrb[54].mxu0 %vm519_vm7, %v7647_v2 }
0x464f   :  { %v7716_v55 = vpop.f32.mrb[54].mxu0 }
0x4650   :  { %v7733_v0 = vadd.f32 %v7726_v46, %v7716_v55  ;;  %v7718_v21 = vpop.f32.mrb[55].mxu0 }
0x4651   :  { %v7734_v10 = vadd.f32 %v7730_v53, %v7718_v21 }
0x4652   :  { %v8144_v60 = vmul.f32 -1.442695, %v7733_v0 }
0x4653   :  { %10298 = vtanh.f32 %v7734_v10  ;;  %v8145_v15 = vmul.f32 -1.442695, %v7734_v10 }
0x4654   :  { %10300 = vpow2.f32 %v8144_v60 }
0x465d   :  { %v10299_v50 = vpop.eup %10298 }
0x465e   :  { %7750 = vrot.lane.b32.xlu0 %v10299_v50, %s10489_s9  ;;  %v10301_v61 = vpop.eup %10300 }
0x465f   :  { %v7741_v14 = vadd.f32 1.0, %v10301_v61 }
0x4661   :  { %10302 = vrcp.f32 %v7741_v14 }
0x466b   :  { %v10303_v54 = vpop.eup %10302 }
0x466c   :  { %v7748_v51 = vmul.f32 %v10303_v54, %v7440_v57 }
0x46d0   :  { %v7751_v12 = vpop.permute.xlu0 %7750 }
0x46d1   :  { %v7753_v20 = vmul.f32 %v10303_v54, %v7751_v12 }
0x46d3   :  { %7755 = vrot.lane.b32.xlu1 %v7753_v20, %s10489_s9 }
0x4745   :  { %v7756_v44 = vpop.permute.xlu1 %7755 }
0x4746   :  { %v7758_v7 = vadd.f32 %v7756_v44, %v7748_v51 }
0x4748   :  { %10304 = vtanh.f32 %v7758_v7 }
0x4749   :  { %10306 = vpow2.f32 %v8145_v15 }
0x4752   :  { %v10305_v24 = vpop.eup %10304 }
0x4753   :  { %7761 = vrot.lane.b32.xlu0 %v10305_v24, %s10489_s9  ;;  %v10307_v19 = vpop.eup %10306 }
0x4754   :  { %v7742_v35 = vadd.f32 1.0, %v10307_v19 }
0x4756   :  { %10308 = vrcp.f32 %v7742_v35 }
0x4760   :  { %v10309_v41 = vpop.eup %10308 }
0x47c5   :  { %v7762_v58 = vpop.permute.xlu0 %7761 }
0x47c6   :  { %v7764_v37 = vmul.f32 %v10309_v41, %v7762_v58 }
0x47c8   :  { %7765 = vst.msk [vmem:[#allocation3 + $0x58] sm:$0xff] %vm398_vm4, %v7764_v37 }
0x47cf   :  { %v7777_v63 = vld [vmem:[#allocation3 + $0x58] sm:$0xff] }
0x47d0   :  { %8947 = vmatmul.mubr.msk.f32.gmra.mrb[76].mxu1 %vm398_vm4, %v7777_v63 }
0x47d1   :  { %10456 = shalt.err (!%p10453_p10)
}
0x47d2   :  { %s12553_s8 = sld [smem:[#allocation23_spill]] }
0x47d8   :  { %s10457_s28 = scalar_lea.hbm %s12553_s8, 128 }
0x47d9   :  { %p10458_p11 = scmp.ne.s32.totalorder %s12553_s8, %s10457_s28  ;;  %p10461_p12 = scmp.lt.u32.totalorder %s10457_s28, %s12553_s8 }
0x47db   :  { %p10463_p13 = pnand %p10461_p12, %p10458_p11 }
0x47dd   :  { %10466 = shalt.err (!%p10463_p13)
}
0x47de   :  { %7975 = dma.vmem_to_hbm [thread:$0]  %s7973_s0, 128, %s12553_s8, [#allocation6]  }
0x48a3   :  { %v8948_v52 = vpop.f32.mrb[76].mxu1 }
0x48a4   :  { %v7951_v32 = vadd.f32 %v8948_v52, %v12426_v40  ;;  %v7945_v49 = vpop.f32.mrb[77].mxu1 }
0x48a5   :  { %v7946_v59 = vadd.f32 %v12426_v40, %v7945_v49 }
0x48a6   :  { %7965 = vst.msk [vmem:[%s12544_s17 + $0x58] sm:$0xff] %vm171_vm1, %v7951_v32 }
0x48a7   :  { %7964 = vst.msk [vmem:[%s12544_s17 + $0x50] sm:$0xff] %vm171_vm1, %v7946_v59 }
0x48a8   :  { %10475 = dma.done.wait [#allocation6], 128  }
0x48a9   :  { %10476 = vsyncadd [#allocation6], 4294967168 }
0x48aa   :  { %7983 = vsyncpa [#allocation5], 1 }
0x48ab   :  { %7984 = vsyncpa [#allocation8], 1 }
0x48ac   :  { %7985 = vsyncpa [#allocation11], 1 }
0x48ad   :  { %7986 = vsyncpa [#allocation14], 1 }
0x48ae   :  { %7987 = vsyncpa [#allocation6], 1 }

</bundles_post_ra>
